<compile_context>
chip_gen: v7x
topology: tpu7x:2x2x1
jax: 0.10.0
libtpu: 0.0.40
codegen_flags: <defaults>
</compile_context>

<pallas_src>
import functools

import jax
import jax.numpy as jnp
from jax.experimental import pallas as pl
from jax.experimental.pallas import tpu as pltpu


# ---------------------------------------------------------------------------
# Static layer geometry (lane-padded).  fc3/fc4/fc5 stay at 128 on purpose:
# they are <2.5% of total FLOPs, padding them to 256 buys nothing.
# ---------------------------------------------------------------------------
D_IN = 3072                               # 3 * 32 * 32
H1, H2, H3, H4 = 1280, 512, 128, 128      # 1176, 400, 120, 84 zero-padded
C_PAD = 128                               # num_classes zero-padded (<= 128)
TB_MAX = 512                              # max batch tile


def _round_up(n, m):
    return ((n + m - 1) // m) * m


def _fcnet_kernel(x_ref,
                  w1_ref, b1_ref,
                  w2_ref, b2_ref,
                  w3_ref, b3_ref,
                  w4_ref, b4_ref,
                  w5_ref, b5_ref,
                  out_ref):
    """Fused FCNet forward for one batch tile.  Grid = (batch tiles,).

    All weights/biases use constant index maps -> DMA'd once, VMEM-resident
    across batch tiles.  bf16 MXU inputs, f32 accumulation/epilogue.
    """

    def dense(h, w_ref, b_ref, relu):
        y = jnp.dot(h.astype(jnp.bfloat16), w_ref[...],
                    preferred_element_type=jnp.float32)
        y = y + b_ref[...]                    # f32 bias add
        if relu:
            y = jnp.maximum(y, 0.0)           # f32 ReLU (v5e-safe)
        return y

    h = dense(x_ref[...], w1_ref, b1_ref, relu=True)    # (tb, H1)
    h = dense(h, w2_ref, b2_ref, relu=True)             # (tb, H2)
    h = dense(h, w3_ref, b3_ref, relu=True)             # (tb, H3)
    h = dense(h, w4_ref, b4_ref, relu=True)             # (tb, H4)
    h = dense(h, w5_ref, b5_ref, relu=False)            # (tb, C_PAD)
    out_ref[...] = h.astype(out_ref.dtype)


@functools.partial(jax.jit, static_argnames=("num_classes",))
def fcnet_forward(x, params, num_classes=10):
    """x: (B, 3, 32, 32) float32 NCHW.  Returns (B, num_classes) float32."""
    assert num_classes <= C_PAD, "FCNet Pallas kernel supports num_classes <= 128"
    B = x.shape[0]
    # torch.flatten(start_dim=1) on contiguous NCHW == row-major reshape.
    x_flat = x.reshape(B, -1).astype(jnp.float32)

    # Batch tiling:
    #   * tiny batch (<= 8 rows): one 8-row tile.
    #   * mid batch (<= 2*TB_MAX): exactly 2 tiles, adaptively sized, so
    #     v7x's two TensorCores both get work and padding stays small.
    #   * large batch: TB_MAX-row tiles.
    b8 = max(8, _round_up(B, 8))
    if b8 <= 8:
        tb = b8
    elif b8 <= 2 * TB_MAX:
        tb = _round_up((b8 + 1) // 2, 8)
    else:
        tb = TB_MAX
    b_pad = _round_up(b8, tb)

    if b_pad != B:
        # A pad copy is materialized anyway -> fold the bf16 cast into it
        # (halves the x HBM stream).  Without a pad we keep f32 and let the
        # kernel cast (a standalone wrapper cast would add HBM traffic).
        x_flat = jnp.pad(x_flat, ((0, b_pad - B), (0, 0))).astype(jnp.bfloat16)

    (w1, b1), (w2, b2), (w3, b3), (w4, b4), (w5, b5) = params

    nb = b_pad // tb
    const = lambda i: (0, 0)    # weights/biases: VMEM-resident, DMA'd once

    out = pl.pallas_call(
        _fcnet_kernel,
        out_shape=jax.ShapeDtypeStruct((b_pad, C_PAD), jnp.float32),
        grid=(nb,),
        in_specs=[
            pl.BlockSpec((tb, D_IN), lambda i: (i, 0)),      # x (batch-tiled)
            pl.BlockSpec((D_IN, H1), const),                 # w1 (resident)
            pl.BlockSpec((1, H1), const),                    # b1
            pl.BlockSpec((H1, H2), const),                   # w2
            pl.BlockSpec((1, H2), const),                    # b2
            pl.BlockSpec((H2, H3), const),                   # w3
            pl.BlockSpec((1, H3), const),                    # b3
            pl.BlockSpec((H3, H4), const),                   # w4
            pl.BlockSpec((1, H4), const),                    # b4
            pl.BlockSpec((H4, C_PAD), const),                # w5
            pl.BlockSpec((1, C_PAD), const),                 # b5
        ],
        out_specs=pl.BlockSpec((tb, C_PAD), lambda i: (i, 0)),
        compiler_params=pltpu.CompilerParams(
            dimension_semantics=("parallel",),               # megacore split on v7x
            vmem_limit_bytes=48 * 1024 * 1024,               # ~35 MiB used; <64 MiB v7x
        ),
    )(x_flat, w1, b1, w2, b2, w3, b3, w4, b4, w5, b5)

    return out[:B, :num_classes]


def init_fcnet_params(key, num_classes=10):
    """nn.Linear-default init (U[-1/sqrt(fan_in), +1/sqrt(fan_in)]), stored as
    (in, out) weights zero-padded to lane multiples; weights bf16, biases f32."""
    assert num_classes <= C_PAD, "FCNet Pallas kernel supports num_classes <= 128"
    layer_dims = [(3072, 1176), (1176, 400), (400, 120), (120, 84),
                  (84, num_classes)]
    pad_in = [D_IN, H1, H2, H3, H4]
    pad_out = [H1, H2, H3, H4, C_PAD]
    params = []
    for (fan_in, fan_out), pi, po in zip(layer_dims, pad_in, pad_out):
        key, kw, kb = jax.random.split(key, 3)
        bound = 1.0 / float(fan_in) ** 0.5
        w = jax.random.uniform(kw, (fan_in, fan_out), jnp.float32,
                               minval=-bound, maxval=bound)
        b = jax.random.uniform(kb, (1, fan_out), jnp.float32,
                               minval=-bound, maxval=bound)
        w_p = jnp.zeros((pi, po), jnp.float32).at[:fan_in, :fan_out].set(w)
        b_p = jnp.zeros((1, po), jnp.float32).at[:, :fan_out].set(b)
        params.append((w_p.astype(jnp.bfloat16), b_p))
    return tuple(params)


def fcnet_reference(x, params, num_classes=10):
    """Pure-JAX reference (same bf16-quantized weights, f32 activations)."""
    h = x.reshape(x.shape[0], -1).astype(jnp.float32)
    for i, (w, b) in enumerate(params):
        h = h @ w.astype(jnp.float32) + b
        if i < len(params) - 1:
            h = jnp.maximum(h, 0.0)
    return h[:, :num_classes]


if __name__ == "__main__":
    key = jax.random.PRNGKey(0)
    k_params, k_x = jax.random.split(key)

    num_classes = 10
    params = init_fcnet_params(k_params, num_classes=num_classes)

    # FCNet's fc1 requires 3*32*32 = 3072 features -> (B, 3, 32, 32) input.
    x = jax.random.normal(k_x, (2, 3, 32, 32), dtype=jnp.float32)

    out = fcnet_forward(x, params, num_classes=num_classes)
    out = jax.block_until_ready(out)

    ref = fcnet_reference(x, params, num_classes=num_classes)
    assert out.shape == (2, num_classes), out.shape
    max_err = float(jnp.max(jnp.abs(out - ref)))
    # bf16 weights + bf16 activations into the MXU (f32 accumulate) vs. an
    # f32-activation reference -> intentionally loosened tolerance.
    assert jnp.allclose(out, ref, atol=2e-2, rtol=2e-2), max_err

    print("KERNEL_OK")
</pallas_src>

<mosaic_0001>
module attributes {stable_mosaic.version = 11 : i64} {
  func.func @_fcnet_kernel(%arg0: i32, %arg1: memref<8x3072xbf16, #tpu.memory_space<vmem>>, %arg2: memref<3072x1280xbf16, #tpu.memory_space<vmem>>, %arg3: memref<1x1280xf32, #tpu.memory_space<vmem>>, %arg4: memref<1280x512xbf16, #tpu.memory_space<vmem>>, %arg5: memref<1x512xf32, #tpu.memory_space<vmem>>, %arg6: memref<512x128xbf16, #tpu.memory_space<vmem>>, %arg7: memref<1x128xf32, #tpu.memory_space<vmem>>, %arg8: memref<128x128xbf16, #tpu.memory_space<vmem>>, %arg9: memref<1x128xf32, #tpu.memory_space<vmem>>, %arg10: memref<128x128xbf16, #tpu.memory_space<vmem>>, %arg11: memref<1x128xf32, #tpu.memory_space<vmem>>, %arg12: memref<8x128xf32, #tpu.memory_space<vmem>>) attributes {dimension_semantics = [#tpu.dimension_semantics<parallel>], iteration_bounds = array<i64: 1>, scalar_prefetch = 0 : i64, scratch_operands = 0 : i64, tpu.core_type = #tpu.core_type<tc>, window_params = [{transform_indices = @transform_0, window_bounds = array<i64: 8, 3072>}, {pipeline_mode = #tpu.pipeline_mode<synchronous>, transform_indices = @transform_1, window_bounds = array<i64: 3072, 1280>}, {pipeline_mode = #tpu.pipeline_mode<synchronous>, transform_indices = @transform_2, window_bounds = array<i64: 1, 1280>}, {pipeline_mode = #tpu.pipeline_mode<synchronous>, transform_indices = @transform_3, window_bounds = array<i64: 1280, 512>}, {pipeline_mode = #tpu.pipeline_mode<synchronous>, transform_indices = @transform_4, window_bounds = array<i64: 1, 512>}, {pipeline_mode = #tpu.pipeline_mode<synchronous>, transform_indices = @transform_5, window_bounds = array<i64: 512, 128>}, {pipeline_mode = #tpu.pipeline_mode<synchronous>, transform_indices = @transform_6, window_bounds = array<i64: 1, 128>}, {pipeline_mode = #tpu.pipeline_mode<synchronous>, transform_indices = @transform_7, window_bounds = array<i64: 128, 128>}, {pipeline_mode = #tpu.pipeline_mode<synchronous>, transform_indices = @transform_8, window_bounds = array<i64: 1, 128>}, {pipeline_mode = #tpu.pipeline_mode<synchronous>, transform_indices = @transform_9, window_bounds = array<i64: 128, 128>}, {pipeline_mode = #tpu.pipeline_mode<synchronous>, transform_indices = @transform_10, window_bounds = array<i64: 1, 128>}, {transform_indices = @transform_11, window_bounds = array<i64: 8, 128>}]} {
    %c0 = arith.constant 0 : index
    %c0_0 = arith.constant 0 : index
    %0 = vector.load %arg1[%c0, %c0_0] : memref<8x3072xbf16, #tpu.memory_space<vmem>>, vector<8x3072xbf16>
    %c0_1 = arith.constant 0 : index
    %c0_2 = arith.constant 0 : index
    %1 = vector.load %arg2[%c0_1, %c0_2] : memref<3072x1280xbf16, #tpu.memory_space<vmem>>, vector<3072x1280xbf16>
    %cst = arith.constant dense<0.000000e+00> : vector<8x1280xf32>
    %2 = tpu.matmul %0, %1, %cst {dimension_numbers = #tpu.dot_dimension_numbers<[1], [0], [0], [1], [0, 0, 1, 1], [], []>} : vector<8x3072xbf16>, vector<3072x1280xbf16>, vector<8x1280xf32> -> vector<8x1280xf32>
    %c0_3 = arith.constant 0 : index
    %c0_4 = arith.constant 0 : index
    %3 = vector.load %arg3[%c0_3, %c0_4] : memref<1x1280xf32, #tpu.memory_space<vmem>>, vector<1x1280xf32>
    %4 = vector.broadcast %3 : vector<1x1280xf32> to vector<8x1280xf32>
    %5 = arith.addf %2, %4 : vector<8x1280xf32>
    %cst_5 = arith.constant 0.000000e+00 : f32
    %6 = vector.broadcast %cst_5 : f32 to vector<8x1280xf32>
    %7 = arith.maximumf %5, %6 : vector<8x1280xf32>
    %8 = arith.truncf %7 : vector<8x1280xf32> to vector<8x1280xbf16>
    %c0_6 = arith.constant 0 : index
    %c0_7 = arith.constant 0 : index
    %9 = vector.load %arg4[%c0_6, %c0_7] : memref<1280x512xbf16, #tpu.memory_space<vmem>>, vector<1280x512xbf16>
    %cst_8 = arith.constant dense<0.000000e+00> : vector<8x512xf32>
    %10 = tpu.matmul %8, %9, %cst_8 {dimension_numbers = #tpu.dot_dimension_numbers<[1], [0], [0], [1], [0, 0, 1, 1], [], []>} : vector<8x1280xbf16>, vector<1280x512xbf16>, vector<8x512xf32> -> vector<8x512xf32>
    %c0_9 = arith.constant 0 : index
    %c0_10 = arith.constant 0 : index
    %11 = vector.load %arg5[%c0_9, %c0_10] : memref<1x512xf32, #tpu.memory_space<vmem>>, vector<1x512xf32>
    %12 = vector.broadcast %11 : vector<1x512xf32> to vector<8x512xf32>
    %13 = arith.addf %10, %12 : vector<8x512xf32>
    %cst_11 = arith.constant 0.000000e+00 : f32
    %14 = vector.broadcast %cst_11 : f32 to vector<8x512xf32>
    %15 = arith.maximumf %13, %14 : vector<8x512xf32>
    %16 = arith.truncf %15 : vector<8x512xf32> to vector<8x512xbf16>
    %c0_12 = arith.constant 0 : index
    %c0_13 = arith.constant 0 : index
    %17 = vector.load %arg6[%c0_12, %c0_13] : memref<512x128xbf16, #tpu.memory_space<vmem>>, vector<512x128xbf16>
    %cst_14 = arith.constant dense<0.000000e+00> : vector<8x128xf32>
    %18 = tpu.matmul %16, %17, %cst_14 {dimension_numbers = #tpu.dot_dimension_numbers<[1], [0], [0], [1], [0, 0, 1, 1], [], []>} : vector<8x512xbf16>, vector<512x128xbf16>, vector<8x128xf32> -> vector<8x128xf32>
    %c0_15 = arith.constant 0 : index
    %c0_16 = arith.constant 0 : index
    %19 = vector.load %arg7[%c0_15, %c0_16] : memref<1x128xf32, #tpu.memory_space<vmem>>, vector<1x128xf32>
    %20 = vector.broadcast %19 : vector<1x128xf32> to vector<8x128xf32>
    %21 = arith.addf %18, %20 : vector<8x128xf32>
    %cst_17 = arith.constant 0.000000e+00 : f32
    %22 = vector.broadcast %cst_17 : f32 to vector<8x128xf32>
    %23 = arith.maximumf %21, %22 : vector<8x128xf32>
    %24 = arith.truncf %23 : vector<8x128xf32> to vector<8x128xbf16>
    %c0_18 = arith.constant 0 : index
    %c0_19 = arith.constant 0 : index
    %25 = vector.load %arg8[%c0_18, %c0_19] : memref<128x128xbf16, #tpu.memory_space<vmem>>, vector<128x128xbf16>
    %cst_20 = arith.constant dense<0.000000e+00> : vector<8x128xf32>
    %26 = tpu.matmul %24, %25, %cst_20 {dimension_numbers = #tpu.dot_dimension_numbers<[1], [0], [0], [1], [0, 0, 1, 1], [], []>} : vector<8x128xbf16>, vector<128x128xbf16>, vector<8x128xf32> -> vector<8x128xf32>
    %c0_21 = arith.constant 0 : index
    %c0_22 = arith.constant 0 : index
    %27 = vector.load %arg9[%c0_21, %c0_22] : memref<1x128xf32, #tpu.memory_space<vmem>>, vector<1x128xf32>
    %28 = vector.broadcast %27 : vector<1x128xf32> to vector<8x128xf32>
    %29 = arith.addf %26, %28 : vector<8x128xf32>
    %cst_23 = arith.constant 0.000000e+00 : f32
    %30 = vector.broadcast %cst_23 : f32 to vector<8x128xf32>
    %31 = arith.maximumf %29, %30 : vector<8x128xf32>
    %32 = arith.truncf %31 : vector<8x128xf32> to vector<8x128xbf16>
    %c0_24 = arith.constant 0 : index
    %c0_25 = arith.constant 0 : index
    %33 = vector.load %arg10[%c0_24, %c0_25] : memref<128x128xbf16, #tpu.memory_space<vmem>>, vector<128x128xbf16>
    %cst_26 = arith.constant dense<0.000000e+00> : vector<8x128xf32>
    %34 = tpu.matmul %32, %33, %cst_26 {dimension_numbers = #tpu.dot_dimension_numbers<[1], [0], [0], [1], [0, 0, 1, 1], [], []>} : vector<8x128xbf16>, vector<128x128xbf16>, vector<8x128xf32> -> vector<8x128xf32>
    %c0_27 = arith.constant 0 : index
    %c0_28 = arith.constant 0 : index
    %35 = vector.load %arg11[%c0_27, %c0_28] : memref<1x128xf32, #tpu.memory_space<vmem>>, vector<1x128xf32>
    %36 = vector.broadcast %35 : vector<1x128xf32> to vector<8x128xf32>
    %37 = arith.addf %34, %36 : vector<8x128xf32>
    %c0_29 = arith.constant 0 : index
    %c0_30 = arith.constant 0 : index
    %38 = vector.load %arg12[%c0_29, %c0_30] : memref<8x128xf32, #tpu.memory_space<vmem>>, vector<8x128xf32>
    tpu.vector_store %arg12[%c0_29, %c0_30], %37 {strides = array<i32>} : memref<8x128xf32, #tpu.memory_space<vmem>>, vector<8x128xf32>,
    return
  }
  func.func @transform_0(%arg0: i32) -> (i32, i32) {
    %c0_i32 = arith.constant 0 : i32
    %c0_i32_0 = arith.constant 0 : i32
    return %arg0, %c0_i32 : i32, i32
  }
  func.func @transform_1(%arg0: i32) -> (i32, i32) {
    %c0_i32 = arith.constant 0 : i32
    %c0_i32_0 = arith.constant 0 : i32
    %c0_i32_1 = arith.constant 0 : i32
    return %c0_i32, %c0_i32_0 : i32, i32
  }
  func.func @transform_2(%arg0: i32) -> (i32, i32) {
    %c0_i32 = arith.constant 0 : i32
    %c0_i32_0 = arith.constant 0 : i32
    %c0_i32_1 = arith.constant 0 : i32
    return %c0_i32, %c0_i32_0 : i32, i32
  }
  func.func @transform_3(%arg0: i32) -> (i32, i32) {
    %c0_i32 = arith.constant 0 : i32
    %c0_i32_0 = arith.constant 0 : i32
    %c0_i32_1 = arith.constant 0 : i32
    return %c0_i32, %c0_i32_0 : i32, i32
  }
  func.func @transform_4(%arg0: i32) -> (i32, i32) {
    %c0_i32 = arith.constant 0 : i32
    %c0_i32_0 = arith.constant 0 : i32
    %c0_i32_1 = arith.constant 0 : i32
    return %c0_i32, %c0_i32_0 : i32, i32
  }
  func.func @transform_5(%arg0: i32) -> (i32, i32) {
    %c0_i32 = arith.constant 0 : i32
    %c0_i32_0 = arith.constant 0 : i32
    %c0_i32_1 = arith.constant 0 : i32
    return %c0_i32, %c0_i32_0 : i32, i32
  }
  func.func @transform_6(%arg0: i32) -> (i32, i32) {
    %c0_i32 = arith.constant 0 : i32
    %c0_i32_0 = arith.constant 0 : i32
    %c0_i32_1 = arith.constant 0 : i32
    return %c0_i32, %c0_i32_0 : i32, i32
  }
  func.func @transform_7(%arg0: i32) -> (i32, i32) {
    %c0_i32 = arith.constant 0 : i32
    %c0_i32_0 = arith.constant 0 : i32
    %c0_i32_1 = arith.constant 0 : i32
    return %c0_i32, %c0_i32_0 : i32, i32
  }
  func.func @transform_8(%arg0: i32) -> (i32, i32) {
    %c0_i32 = arith.constant 0 : i32
    %c0_i32_0 = arith.constant 0 : i32
    %c0_i32_1 = arith.constant 0 : i32
    return %c0_i32, %c0_i32_0 : i32, i32
  }
  func.func @transform_9(%arg0: i32) -> (i32, i32) {
    %c0_i32 = arith.constant 0 : i32
    %c0_i32_0 = arith.constant 0 : i32
    %c0_i32_1 = arith.constant 0 : i32
    return %c0_i32, %c0_i32_0 : i32, i32
  }
  func.func @transform_10(%arg0: i32) -> (i32, i32) {
    %c0_i32 = arith.constant 0 : i32
    %c0_i32_0 = arith.constant 0 : i32
    %c0_i32_1 = arith.constant 0 : i32
    return %c0_i32, %c0_i32_0 : i32, i32
  }
  func.func @transform_11(%arg0: i32) -> (i32, i32) {
    %c0_i32 = arith.constant 0 : i32
    %c0_i32_0 = arith.constant 0 : i32
    return %arg0, %c0_i32 : i32, i32
  }
}

</mosaic_0001>

<bundles_post_ra>
// kernel: fcnet_forward.1
= control target key start
LH: loop header
LB: loop body
LE: loop exit
PB: predicated region body
PF: predicated region fallthrough
CT: control target
= control target key end

     0   :  { %16 = vsyncpa [#allocation3], 0  ;;  %s24225_s0 = inlined_call_operand.vmem [shape: bf16[8,3072], index: 0, kind: input, shape index: {}]   ;;  %s24226_s1 = inlined_call_operand.hbm [shape: bf16[3072,1280], index: 1, kind: input, shape index: {}]   ;;  %s24227_s2 = inlined_call_operand.hbm [shape: f32[1,1280], index: 2, kind: input, shape index: {}]   ;;  %s24228_s3 = inlined_call_operand.hbm [shape: bf16[1280,512], index: 3, kind: input, shape index: {}]   ;;  %s24229_s4 = inlined_call_operand.hbm [shape: f32[1,512], index: 4, kind: input, shape index: {}]   ;;  %s24230_s5 = inlined_call_operand.hbm [shape: bf16[512,128], index: 5, kind: input, shape index: {}]   ;;  %s24231_s6 = inlined_call_operand.hbm [shape: f32[1,128], index: 6, kind: input, shape index: {}]   ;;  %s24232_s7 = inlined_call_operand.hbm [shape: bf16[128,128], index: 7, kind: input, shape index: {}]   ;;  %s24233_s8 = inlined_call_operand.hbm [shape: f32[1,128], index: 8, kind: input, shape index: {}]   ;;  %s24234_s9 = inlined_call_operand.hbm [shape: bf16[128,128], index: 9, kind: input, shape index: {}]   ;;  %s24235_s10 = inlined_call_operand.hbm [shape: f32[1,128], index: 10, kind: input, shape index: {}]   ;;  %s24236_s11 = inlined_call_operand.vmem [shape: f32[8,128], index: 11, kind: output, shape index: {}]  }
   0x1   :  { %17 = vsyncpa [#allocation5], 0 }
   0x2   :  { %18 = vsyncpa [#allocation8], 0 }
   0x3   :  { %19 = vsyncpa [#allocation11], 0 }
   0x4   :  { %20 = vsyncpa [#allocation14], 0 }
   0x5   :  { %21 = vsyncpa [#allocation17], 0  ;;  %s23621_s17 = smov [#allocation4]   ;;  %s23622_s19 = smov [#allocation7]  }
   0x6   :  { %s42_s18 = sshll.u32 %s23621_s17, 4  ;;  %s64_s20 = sshll.u32 %s23622_s19, 4  ;;  %s43_s18 = int_to_ptr.vmem [resolvable:$true] %s42_s18  ;;  %s65_s20 = int_to_ptr.vmem [resolvable:$true] %s64_s20 }
   0x7   :  { %s23389_s23 = scalar_lea.hbm %s24227_s2, 160 }
   0x8   :  { %p23390_p0 = scmp.ne.s32.totalorder %s24227_s2, %s23389_s23  ;;  %p23393_p1 = scmp.lt.u32.totalorder %s23389_s23, %s24227_s2 }
   0xa   :  { %p23395_p2 = pnand %p23393_p1, %p23390_p0 }
   0xc   :  { %23398 = shalt.err (!%p23395_p2)
}
   0xd   :  { %s23399_s28 = scalar_lea.vmem %s43_s18, 160  ;;  %p23404_p4 = scmp.lt.s32.totalorder %s43_s18, %s43_s18 }
   0xe   :  { %p23400_p3 = scmp.ne.s32.totalorder %s43_s18, %s23399_s28  ;;  %p23405_p5 = scmp.lt.s32.totalorder %s23399_s28, %s23399_s28 }
  0x10   :  { %p23406_p6 = por %p23405_p5, %p23404_p4 }
  0x12   :  { %p23407_p7 = pnand %p23406_p6, %p23400_p3 }
  0x14   :  { %23410 = shalt.err (!%p23407_p7)
}
  0x15   :  { %45 = dma.hbm_to_vmem [thread:$0]  %s24227_s2, 160, %s43_s18, [#allocation5]  }
  0x16   :  { %s23411_s14 = scalar_lea.hbm %s24229_s4, 64 }
  0x17   :  { %p23412_p8 = scmp.ne.s32.totalorder %s24229_s4, %s23411_s14  ;;  %p23415_p9 = scmp.lt.u32.totalorder %s23411_s14, %s24229_s4 }
  0x19   :  { %p23417_p10 = pnand %p23415_p9, %p23412_p8 }
  0x1b   :  { %23420 = shalt.err (!%p23417_p10)
}
  0x1c   :  { %s23421_s21 = scalar_lea.vmem %s65_s20, 64  ;;  %p23426_p12 = scmp.lt.s32.totalorder %s65_s20, %s65_s20 }
  0x1d   :  { %p23422_p11 = scmp.ne.s32.totalorder %s65_s20, %s23421_s21  ;;  %p23427_p13 = scmp.lt.s32.totalorder %s23421_s21, %s23421_s21 }
  0x1f   :  { %p23428_p0 = por %p23427_p13, %p23426_p12 }
  0x21   :  { %p23429_p1 = pnand %p23428_p0, %p23422_p11 }
  0x23   :  { %23432 = shalt.err (!%p23429_p1)
}
  0x24   :  { %67 = dma.hbm_to_vmem [thread:$0]  %s24229_s4, 64, %s65_s20, [#allocation8]  }
  0x25   :  { %s23623_s22 = smov [#allocation10]   ;;  %s23624_s24 = smov [#allocation13]  }
  0x26   :  { %s86_s23 = sshll.u32 %s23623_s22, 4  ;;  %s108_s25 = sshll.u32 %s23624_s24, 4  ;;  %s87_s23 = int_to_ptr.vmem [resolvable:$true] %s86_s23  ;;  %s109_s25 = int_to_ptr.vmem [resolvable:$true] %s108_s25 }
  0x27   :  { %s23433_s28 = scalar_lea.hbm %s24231_s6, 16 }
  0x28   :  { %p23434_p2 = scmp.ne.s32.totalorder %s24231_s6, %s23433_s28  ;;  %p23437_p3 = scmp.lt.u32.totalorder %s23433_s28, %s24231_s6 }
  0x2a   :  { %p23439_p4 = pnand %p23437_p3, %p23434_p2 }
  0x2c   :  { %23442 = shalt.err (!%p23439_p4)
}
  0x2d   :  { %s23443_s4 = scalar_lea.vmem %s87_s23, 16  ;;  %s23447_s20 = scalar_lea.vmem %s87_s23, 32 }
  0x2e   :  { %p23444_p5 = scmp.ne.s32.totalorder %s87_s23, %s23443_s4  ;;  %p23448_p6 = scmp.lt.s32.totalorder %s87_s23, %s87_s23 }
  0x2f   :  { %p23449_p7 = scmp.lt.s32.totalorder %s23447_s20, %s23443_s4 }
  0x31   :  { %p23450_p8 = por %p23449_p7, %p23448_p6 }
  0x33   :  { %p23451_p9 = pnand %p23450_p8, %p23444_p5 }
  0x35   :  { %23454 = shalt.err (!%p23451_p9)
}
  0x36   :  { %89 = dma.hbm_to_vmem [thread:$0]  %s24231_s6, 16, %s87_s23, [#allocation11]  }
  0x37   :  { %s23455_s19 = scalar_lea.hbm %s24233_s8, 16 }
  0x38   :  { %p23456_p10 = scmp.ne.s32.totalorder %s24233_s8, %s23455_s19  ;;  %p23459_p11 = scmp.lt.u32.totalorder %s23455_s19, %s24233_s8 }
  0x3a   :  { %p23461_p12 = pnand %p23459_p11, %p23456_p10 }
  0x3c   :  { %23464 = shalt.err (!%p23461_p12)
}
  0x3d   :  { %s23465_s24 = scalar_lea.vmem %s109_s25, 16  ;;  %s23469_s26 = scalar_lea.vmem %s109_s25, 32 }
  0x3e   :  { %p23466_p13 = scmp.ne.s32.totalorder %s109_s25, %s23465_s24  ;;  %p23470_p0 = scmp.lt.s32.totalorder %s109_s25, %s109_s25 }
  0x3f   :  { %p23471_p1 = scmp.lt.s32.totalorder %s23469_s26, %s23465_s24 }
  0x41   :  { %p23472_p2 = por %p23471_p1, %p23470_p0 }
  0x43   :  { %p23473_p3 = pnand %p23472_p2, %p23466_p13 }
  0x45   :  { %23476 = shalt.err (!%p23473_p3)
}
  0x46   :  { %111 = dma.hbm_to_vmem [thread:$0]  %s24233_s8, 16, %s109_s25, [#allocation14]  }
  0x47   :  { %s23625_s27 = smov [#allocation2]   ;;  %s23477_s12 = scalar_lea.hbm %s24226_s1, 245760 }
  0x48   :  { %s29_s28 = sshll.u32 %s23625_s27, 4  ;;  %p23478_p4 = scmp.ne.s32.totalorder %s24226_s1, %s23477_s12  ;;  %s30_s28 = int_to_ptr.vmem [resolvable:$true] %s29_s28 }
  0x49   :  { %p23481_p5 = scmp.lt.u32.totalorder %s23477_s12, %s24226_s1 }
  0x4b   :  { %p23483_p6 = pnand %p23481_p5, %p23478_p4 }
  0x4d   :  { %23486 = shalt.err (!%p23483_p6)
}
  0x4e   :  { %s23487_s15 = scalar_lea.vmem %s30_s28, 245760  ;;  %p23492_p8 = scmp.lt.s32.totalorder %s30_s28, %s30_s28 }
  0x4f   :  { %p23488_p7 = scmp.ne.s32.totalorder %s30_s28, %s23487_s15  ;;  %p23493_p9 = scmp.lt.s32.totalorder %s23487_s15, %s23487_s15 }
  0x51   :  { %p23494_p10 = por %p23493_p9, %p23492_p8 }
  0x53   :  { %p23495_p11 = pnand %p23494_p10, %p23488_p7 }
  0x55   :  { %23498 = shalt.err (!%p23495_p11)
}
  0x56   :  { %s23626_s8 = smov 640   ;;  %s23627_s25 = smov 40  }
  0x57   :  { %35 = dma.hbm_to_vmem [thread:$0]  %s24226_s1, 245760, %s30_s28, [#allocation3], %s23626_s8, %s23626_s8, %s23627_s25  }
  0x58   :  { %s23628_s19 = smov [#allocation6]   ;;  %s23499_s22 = scalar_lea.hbm %s24228_s3, 40960 }
  0x59   :  { %s51_s21 = sshll.u32 %s23628_s19, 4  ;;  %p23500_p12 = scmp.ne.s32.totalorder %s24228_s3, %s23499_s22  ;;  %s52_s21 = int_to_ptr.vmem [resolvable:$true] %s51_s21 }
  0x5a   :  { %p23503_p13 = scmp.lt.u32.totalorder %s23499_s22, %s24228_s3 }
  0x5c   :  { %p23505_p0 = pnand %p23503_p13, %p23500_p12 }
  0x5e   :  { %23508 = shalt.err (!%p23505_p0)
}
  0x5f   :  { %s23509_s27 = scalar_lea.vmem %s52_s21, 40960  ;;  %p23514_p2 = scmp.lt.s32.totalorder %s52_s21, %s52_s21 }
  0x60   :  { %p23510_p1 = scmp.ne.s32.totalorder %s52_s21, %s23509_s27  ;;  %p23515_p3 = scmp.lt.s32.totalorder %s23509_s27, %s23509_s27 }
  0x62   :  { %p23516_p4 = por %p23515_p3, %p23514_p2 }
  0x64   :  { %p23517_p5 = pnand %p23516_p4, %p23510_p1 }
  0x66   :  { %23520 = shalt.err (!%p23517_p5)
}
  0x67   :  { %s23629_s1 = smov 256   ;;  %s23630_s28 = smov 16  }
  0x68   :  { %57 = dma.hbm_to_vmem [thread:$0]  %s24228_s3, 40960, %s52_s21, [#allocation5], %s23629_s1, %s23629_s1, %s23630_s28  }
  0x69   :  { %s23631_s12 = smov [#allocation9]   ;;  %s23521_s14 = scalar_lea.hbm %s24230_s5, 4096 }
  0x6a   :  { %s73_s13 = sshll.u32 %s23631_s12, 4  ;;  %p23522_p6 = scmp.ne.s32.totalorder %s24230_s5, %s23521_s14  ;;  %s74_s13 = int_to_ptr.vmem [resolvable:$true] %s73_s13 }
  0x6b   :  { %p23525_p7 = scmp.lt.u32.totalorder %s23521_s14, %s24230_s5 }
  0x6d   :  { %p23527_p8 = pnand %p23525_p7, %p23522_p6 }
  0x6f   :  { %23530 = shalt.err (!%p23527_p8)
}
  0x70   :  { %s23531_s17 = scalar_lea.vmem %s74_s13, 4096  ;;  %p23536_p10 = scmp.lt.s32.totalorder %s74_s13, %s74_s13 }
  0x71   :  { %p23532_p9 = scmp.ne.s32.totalorder %s74_s13, %s23531_s17  ;;  %p23537_p11 = scmp.lt.s32.totalorder %s23531_s17, %s23531_s17 }
  0x73   :  { %p23538_p12 = por %p23537_p11, %p23536_p10 }
  0x75   :  { %p23539_p13 = pnand %p23538_p12, %p23532_p9 }
  0x77   :  { %23542 = shalt.err (!%p23539_p13)
}
  0x78   :  { %s23632_s3 = smov 64   ;;  %s23633_s19 = smov 4  }
  0x79   :  { %79 = dma.hbm_to_vmem [thread:$0]  %s24230_s5, 4096, %s74_s13, [#allocation8], %s23632_s3, %s23632_s3, %s23633_s19  }
  0x7a   :  { %s23634_s18 = smov [#allocation12]   ;;  %s23635_s24 = smov [#allocation15]  }
  0x7b   :  { %s95_s22 = sshll.u32 %s23634_s18, 4  ;;  %s117_s26 = sshll.u32 %s23635_s24, 4  ;;  %s96_s22 = int_to_ptr.vmem [resolvable:$true] %s95_s22  ;;  %s118_s26 = int_to_ptr.vmem [resolvable:$true] %s117_s26 }
  0x7c   :  { %s23543_s27 = scalar_lea.hbm %s24232_s7, 1024 }
  0x7d   :  { %p23544_p0 = scmp.ne.s32.totalorder %s24232_s7, %s23543_s27  ;;  %p23547_p1 = scmp.lt.u32.totalorder %s23543_s27, %s24232_s7 }
  0x7f   :  { %p23549_p2 = pnand %p23547_p1, %p23544_p0 }
  0x81   :  { %23552 = shalt.err (!%p23549_p2)
}
  0x82   :  { %s23553_s5 = scalar_lea.vmem %s96_s22, 1024  ;;  %p23558_p4 = scmp.lt.s32.totalorder %s96_s22, %s96_s22 }
  0x83   :  { %p23554_p3 = scmp.ne.s32.totalorder %s96_s22, %s23553_s5  ;;  %p23559_p5 = scmp.lt.s32.totalorder %s23553_s5, %s23553_s5 }
  0x85   :  { %p23560_p6 = por %p23559_p5, %p23558_p4 }
  0x87   :  { %p23561_p7 = pnand %p23560_p6, %p23554_p3 }
  0x89   :  { %23564 = shalt.err (!%p23561_p7)
}
  0x8a   :  { %101 = dma.hbm_to_vmem [thread:$0]  %s24232_s7, 1024, %s96_s22, [#allocation11], %s23632_s3, %s23632_s3, %s23633_s19  }
  0x8b   :  { %s23565_s14 = scalar_lea.hbm %s24234_s9, 1024 }
  0x8c   :  { %p23566_p8 = scmp.ne.s32.totalorder %s24234_s9, %s23565_s14  ;;  %p23569_p9 = scmp.lt.u32.totalorder %s23565_s14, %s24234_s9 }
  0x8e   :  { %p23571_p10 = pnand %p23569_p9, %p23566_p8 }
  0x90   :  { %23574 = shalt.err (!%p23571_p10)
}
  0x91   :  { %s23575_s17 = scalar_lea.vmem %s118_s26, 1024  ;;  %p23580_p12 = scmp.lt.s32.totalorder %s118_s26, %s118_s26 }
  0x92   :  { %p23576_p11 = scmp.ne.s32.totalorder %s118_s26, %s23575_s17  ;;  %p23581_p13 = scmp.lt.s32.totalorder %s23575_s17, %s23575_s17 }
  0x94   :  { %p23582_p0 = por %p23581_p13, %p23580_p12 }
  0x96   :  { %p23583_p1 = pnand %p23582_p0, %p23576_p11 }
  0x98   :  { %23586 = shalt.err (!%p23583_p1)
}
  0x99   :  { %123 = dma.hbm_to_vmem [thread:$0]  %s24234_s9, 1024, %s118_s26, [#allocation14], %s23632_s3, %s23632_s3, %s23633_s19  }
  0x9a   :  { %s23636_s2 = smov [#allocation16]   ;;  %s23587_s6 = scalar_lea.hbm %s24235_s10, 16 }
  0x9b   :  { %s130_s18 = sshll.u32 %s23636_s2, 4  ;;  %p23588_p2 = scmp.ne.s32.totalorder %s24235_s10, %s23587_s6  ;;  %s131_s18 = int_to_ptr.vmem [resolvable:$true] %s130_s18 }
  0x9c   :  { %p23591_p3 = scmp.lt.u32.totalorder %s23587_s6, %s24235_s10 }
  0x9e   :  { %p23593_p4 = pnand %p23591_p3, %p23588_p2 }
  0xa0   :  { %23596 = shalt.err (!%p23593_p4)
}
  0xa1   :  { %s23597_s29 = scalar_lea.vmem %s131_s18, 16  ;;  %s23601_s9 = scalar_lea.vmem %s131_s18, 32 }
  0xa2   :  { %p23598_p5 = scmp.ne.s32.totalorder %s131_s18, %s23597_s29  ;;  %p23602_p6 = scmp.lt.s32.totalorder %s131_s18, %s131_s18 }
  0xa3   :  { %p23603_p7 = scmp.lt.s32.totalorder %s23601_s9, %s23597_s29 }
  0xa5   :  { %p23604_p8 = por %p23603_p7, %p23602_p6 }
  0xa7   :  { %p23605_p9 = pnand %p23604_p8, %p23598_p5 }
  0xa9   :  { %23608 = shalt.err (!%p23605_p9)
}
  0xaa   :  { %133 = dma.hbm_to_vmem [thread:$0]  %s24235_s10, 16, %s131_s18, [#allocation17]  }
  0xab   :  { %23609 = dma.done.wait [#allocation3], 245760  }
  0xac   :  { %23610 = vsyncadd [#allocation3], 4294721536 }
  0xad   :  { %23611 = dma.done.wait [#allocation5], 41120  }
  0xae   :  { %23612 = vsyncadd [#allocation5], 4294926176 }
  0xaf   :  { %23613 = dma.done.wait [#allocation8], 4160  }
  0xb0   :  { %23614 = vsyncadd [#allocation8], 4294963136 }
  0xb1   :  { %23615 = dma.done.wait [#allocation11], 1040  }
  0xb2   :  { %23616 = vsyncadd [#allocation11], 4294966256 }
  0xb3   :  { %23617 = dma.done.wait [#allocation14], 1040  }
  0xb4   :  { %23618 = vsyncadd [#allocation14], 4294966256 }
  0xb5   :  { %23619 = dma.done.wait [#allocation17], 16  }
  0xb6   :  { %23620 = vsyncadd [#allocation17], 4294967280  ;;  %v19956_v0 = vld [vmem:[#allocation2 + $0x4] ss:$40 sps:$4 sm:$0xff]   ;;  %v19960_v2 = vld [vmem:[#allocation2] ss:$40 sps:$4 sm:$0xff]  }
  0xb7   :  { %v19958_v1 = vld [vmem:[#allocation2 + $0xc] ss:$40 sps:$4 sm:$0xff]   ;;  %11835 = vmatprep.subr.bf16.mxu0 %v19956_v0  ;;  %v19961_v3 = vld [vmem:[#allocation2 + $0x8] ss:$40 sps:$4 sm:$0xff]   ;;  %v19964_v5 = vld [vmem:[#allocation2 + $0x5c] ss:$40 sps:$4 sm:$0xff]  }
  0xb8   :  { %12327 = vmatprep.subr.bf16.mxu1 %v19958_v1  ;;  %v19962_v4 = vld [vmem:[#allocation2 + $0x54] ss:$40 sps:$4 sm:$0xff]   ;;  %11836 = vmatpush1.bf16.msra.mxu0 %v19960_v2  ;;  %v19966_v6 = vld [vmem:[#allocation2 + $0x50] ss:$40 sps:$4 sm:$0xff]   ;;  %v19968_v8 = vld [vmem:[#allocation2 + $0xa4] ss:$40 sps:$4 sm:$0xff]  }
  0xb9   :  { %12328 = vmatpush1.bf16.msra.mxu1 %v19961_v3  ;;  %11837 = vmatprep.subr.bf16.mxu0 %v19962_v4  ;;  %v19967_v7 = vld [vmem:[#allocation2 + $0x58] ss:$40 sps:$4 sm:$0xff]   ;;  %v19970_v9 = vld [vmem:[#allocation2 + $0xac] ss:$40 sps:$4 sm:$0xff]   ;;  %v19973_v11 = vld [vmem:[#allocation2 + $0xa8] ss:$40 sps:$4 sm:$0xff]  }
  0xba   :  { %12329 = vmatprep.subr.bf16.mxu1 %v19964_v5  ;;  %v19972_v10 = vld [vmem:[#allocation2 + $0xa0] ss:$40 sps:$4 sm:$0xff]   ;;  %v19974_v12 = vld [vmem:[#allocation2 + $0xf4] ss:$40 sps:$4 sm:$0xff]   ;;  %v19978_v14 = vld [vmem:[#allocation2 + $0xf0] ss:$40 sps:$4 sm:$0xff]  }
  0xbb   :  { %v19976_v13 = vld [vmem:[#allocation2 + $0xfc] ss:$40 sps:$4 sm:$0xff]   ;;  %v19979_v15 = vld [vmem:[#allocation2 + $0xf8] ss:$40 sps:$4 sm:$0xff]   ;;  %v19982_v17 = vld [vmem:[#allocation2 + $0x14c] ss:$40 sps:$4 sm:$0xff]  }
  0xbc   :  { %11838 = vmatpush1.bf16.msra.mxu0 %v19966_v6  ;;  %v19980_v16 = vld [vmem:[#allocation2 + $0x144] ss:$40 sps:$4 sm:$0xff]   ;;  %v19984_v18 = vld [vmem:[#allocation2 + $0x140] ss:$40 sps:$4 sm:$0xff]   ;;  %v19986_v20 = vld [vmem:[#allocation2 + $0x194] ss:$40 sps:$4 sm:$0xff]  }
  0xbd   :  { %12330 = vmatpush1.bf16.msra.mxu1 %v19967_v7  ;;  %11839 = vmatprep.subr.bf16.mxu0 %v19968_v8  ;;  %v19985_v19 = vld [vmem:[#allocation2 + $0x148] ss:$40 sps:$4 sm:$0xff]   ;;  %v19988_v21 = vld [vmem:[#allocation2 + $0x19c] ss:$40 sps:$4 sm:$0xff]   ;;  %v19991_v23 = vld [vmem:[#allocation2 + $0x198] ss:$40 sps:$4 sm:$0xff]  }
  0xbe   :  { %12331 = vmatprep.subr.bf16.mxu1 %v19970_v9  ;;  %v19990_v22 = vld [vmem:[#allocation2 + $0x190] ss:$40 sps:$4 sm:$0xff]   ;;  %v19992_v24 = vld [vmem:[#allocation2 + $0x1e4] ss:$40 sps:$4 sm:$0xff]   ;;  %v19996_v26 = vld [vmem:[#allocation2 + $0x1e0] ss:$40 sps:$4 sm:$0xff]  }
  0xbf   :  { %v19994_v25 = vld [vmem:[#allocation2 + $0x1ec] ss:$40 sps:$4 sm:$0xff]   ;;  %v19997_v27 = vld [vmem:[#allocation2 + $0x1e8] ss:$40 sps:$4 sm:$0xff]   ;;  %v20000_v29 = vld [vmem:[#allocation2 + $0x23c] ss:$40 sps:$4 sm:$0xff]  }
  0xc0   :  { %11840 = vmatpush1.bf16.msra.mxu0 %v19972_v10  ;;  %v19998_v28 = vld [vmem:[#allocation2 + $0x234] ss:$40 sps:$4 sm:$0xff]   ;;  %v20002_v30 = vld [vmem:[#allocation2 + $0x230] ss:$40 sps:$4 sm:$0xff]   ;;  %v20004_v32 = vld [vmem:[#allocation2 + $0x284] ss:$40 sps:$4 sm:$0xff]  }
  0xc1   :  { %12332 = vmatpush1.bf16.msra.mxu1 %v19973_v11  ;;  %11841 = vmatprep.subr.bf16.mxu0 %v19974_v12  ;;  %v20003_v31 = vld [vmem:[#allocation2 + $0x238] ss:$40 sps:$4 sm:$0xff]   ;;  %v20006_v33 = vld [vmem:[#allocation2 + $0x28c] ss:$40 sps:$4 sm:$0xff]   ;;  %v20009_v35 = vld [vmem:[#allocation2 + $0x288] ss:$40 sps:$4 sm:$0xff]  }
  0xc2   :  { %12333 = vmatprep.subr.bf16.mxu1 %v19976_v13  ;;  %v20008_v34 = vld [vmem:[#allocation2 + $0x280] ss:$40 sps:$4 sm:$0xff]   ;;  %v20010_v36 = vld [vmem:[#allocation2 + $0x2d4] ss:$40 sps:$4 sm:$0xff]   ;;  %v20014_v38 = vld [vmem:[#allocation2 + $0x2d0] ss:$40 sps:$4 sm:$0xff]  }
  0xc3   :  { %v20012_v37 = vld [vmem:[#allocation2 + $0x2dc] ss:$40 sps:$4 sm:$0xff]   ;;  %v20015_v39 = vld [vmem:[#allocation2 + $0x2d8] ss:$40 sps:$4 sm:$0xff]   ;;  %v20018_v41 = vld [vmem:[#allocation2 + $0x32c] ss:$40 sps:$4 sm:$0xff]  }
  0xc4   :  { %11842 = vmatpush1.bf16.msra.mxu0 %v19978_v14  ;;  %v20016_v40 = vld [vmem:[#allocation2 + $0x324] ss:$40 sps:$4 sm:$0xff]   ;;  %v20020_v42 = vld [vmem:[#allocation2 + $0x320] ss:$40 sps:$4 sm:$0xff]   ;;  %v20022_v44 = vld [vmem:[#allocation2 + $0x374] ss:$40 sps:$4 sm:$0xff]  }
  0xc5   :  { %12334 = vmatpush1.bf16.msra.mxu1 %v19979_v15  ;;  %11843 = vmatprep.subr.bf16.mxu0 %v19980_v16  ;;  %v20021_v43 = vld [vmem:[#allocation2 + $0x328] ss:$40 sps:$4 sm:$0xff]   ;;  %v20024_v45 = vld [vmem:[#allocation2 + $0x37c] ss:$40 sps:$4 sm:$0xff]   ;;  %v20027_v49 = vld [vmem:[#allocation2 + $0x378] ss:$40 sps:$4 sm:$0xff]  }
  0xc6   :  { %12335 = vmatprep.subr.bf16.mxu1 %v19982_v17  ;;  %v165_v46 = vld [vmem:[%s24225_s0] sm:$0xff]  ;;  %v20026_v47 = vld [vmem:[#allocation2 + $0x370] ss:$40 sps:$4 sm:$0xff]   ;;  %v20030_v51 = vld [vmem:[#allocation2 + $0x3cc] ss:$40 sps:$4 sm:$0xff]   ;;  %vm23638_vm0 = vmmov 0  }
  0xc7   :  { %v23831_v48 = vcombine.high %v165_v46, %v165_v46  ;;  %v20028_v50 = vld [vmem:[#allocation2 + $0x3c4] ss:$40 sps:$4 sm:$0xff]   ;;  %v20032_v52 = vld [vmem:[#allocation2 + $0x3c0] ss:$40 sps:$4 sm:$0xff]   ;;  %v20034_v54 = vld [vmem:[#allocation2 + $0x414] ss:$40 sps:$4 sm:$0xff]   ;;  %v23835_v5 = vcombine.low %v165_v46, %v165_v46 }
  0xc8   :  { %11844 = vmatpush1.bf16.msra.mxu0 %v19984_v18  ;;  %v20033_v53 = vld [vmem:[#allocation2 + $0x3c8] ss:$40 sps:$4 sm:$0xff]   ;;  %v20036_v55 = vld [vmem:[#allocation2 + $0x41c] ss:$40 sps:$4 sm:$0xff]   ;;  %v20039_v57 = vld [vmem:[#allocation2 + $0x418] ss:$40 sps:$4 sm:$0xff]  }
  0xc9   :  { %12336 = vmatpush1.bf16.msra.mxu1 %v19985_v19  ;;  %11845 = vmatprep.subr.bf16.mxu0 %v19986_v20  ;;  %v20038_v56 = vld [vmem:[#allocation2 + $0x410] ss:$40 sps:$4 sm:$0xff]   ;;  %v20040_v58 = vld [vmem:[#allocation2 + $0x464] ss:$40 sps:$4 sm:$0xff]   ;;  %v20044_v60 = vld [vmem:[#allocation2 + $0x460] ss:$40 sps:$4 sm:$0xff]  }
  0xca   :  { %12337 = vmatprep.subr.bf16.mxu1 %v19988_v21  ;;  %11867 = vmatprep.mubr.bf16.mxu0 %v23831_v48  ;;  %v20042_v59 = vld [vmem:[#allocation2 + $0x46c] ss:$40 sps:$4 sm:$0xff]   ;;  %v20045_v61 = vld [vmem:[#allocation2 + $0x468] ss:$40 sps:$4 sm:$0xff]   ;;  %v20048_v63 = vld [vmem:[#allocation2 + $0x4bc] ss:$40 sps:$4 sm:$0xff]  }
  0xcb   :  { %12359 = vmatprep.mubr.bf16.mxu1 %v23831_v48  ;;  %v20046_v62 = vld [vmem:[#allocation2 + $0x4b4] ss:$40 sps:$4 sm:$0xff]   ;;  %v20050_v0 = vld [vmem:[#allocation2 + $0x4b0] ss:$40 sps:$4 sm:$0xff]   ;;  %v20055_v2 = vld [vmem:[#allocation2 + $0x504] ss:$40 sps:$4 sm:$0xff]  }
  0xcc   :  { %11846 = vmatpush1.bf16.msra.mxu0 %v19990_v22  ;;  %v20051_v1 = vld [vmem:[#allocation2 + $0x4b8] ss:$40 sps:$4 sm:$0xff]   ;;  %v20058_v3 = vld [vmem:[#allocation2 + $0x50c] ss:$40 sps:$4 sm:$0xff]   ;;  %v20056_v6 = vld [vmem:[#allocation2 + $0x508] ss:$40 sps:$4 sm:$0xff]  }
  0xcd   :  { %12338 = vmatpush1.bf16.msra.mxu1 %v19991_v23  ;;  %11847 = vmatprep.subr.bf16.mxu0 %v19992_v24  ;;  %v20053_v4 = vld [vmem:[#allocation2 + $0x500] ss:$40 sps:$4 sm:$0xff]   ;;  %v20062_v7 = vld [vmem:[#allocation2 + $0x554] ss:$40 sps:$4 sm:$0xff]   ;;  %v20060_v9 = vld [vmem:[#allocation2 + $0x550] ss:$40 sps:$4 sm:$0xff]  }
  0xce   :  { %12339 = vmatprep.subr.bf16.mxu1 %v19994_v25  ;;  %v20065_v8 = vld [vmem:[#allocation2 + $0x55c] ss:$40 sps:$4 sm:$0xff]   ;;  %v20063_v10 = vld [vmem:[#allocation2 + $0x558] ss:$40 sps:$4 sm:$0xff]   ;;  %v20071_v12 = vld [vmem:[#allocation2 + $0x5ac] ss:$40 sps:$4 sm:$0xff]  }
  0xcf   :  { %v20068_v11 = vld [vmem:[#allocation2 + $0x5a4] ss:$40 sps:$4 sm:$0xff]   ;;  %v20066_v13 = vld [vmem:[#allocation2 + $0x5a0] ss:$40 sps:$4 sm:$0xff]   ;;  %v20074_v15 = vld [vmem:[#allocation2 + $0x5f4] ss:$40 sps:$4 sm:$0xff]  }
  0xd0   :  { %11848 = vmatpush1.bf16.msra.mxu0 %v19996_v26  ;;  %v20069_v14 = vld [vmem:[#allocation2 + $0x5a8] ss:$40 sps:$4 sm:$0xff]   ;;  %v20077_v16 = vld [vmem:[#allocation2 + $0x5fc] ss:$40 sps:$4 sm:$0xff]   ;;  %v20075_v18 = vld [vmem:[#allocation2 + $0x5f8] ss:$40 sps:$4 sm:$0xff]  }
  0xd1   :  { %12340 = vmatpush1.bf16.msra.mxu1 %v19997_v27  ;;  %11849 = vmatprep.subr.bf16.mxu0 %v19998_v28  ;;  %v20072_v17 = vld [vmem:[#allocation2 + $0x5f0] ss:$40 sps:$4 sm:$0xff]   ;;  %v20080_v19 = vld [vmem:[#allocation2 + $0x644] ss:$40 sps:$4 sm:$0xff]   ;;  %v20078_v21 = vld [vmem:[#allocation2 + $0x640] ss:$40 sps:$4 sm:$0xff]  }
  0xd2   :  { %12341 = vmatprep.subr.bf16.mxu1 %v20000_v29  ;;  %v20083_v20 = vld [vmem:[#allocation2 + $0x64c] ss:$40 sps:$4 sm:$0xff]   ;;  %v20081_v22 = vld [vmem:[#allocation2 + $0x648] ss:$40 sps:$4 sm:$0xff]   ;;  %v20089_v24 = vld [vmem:[#allocation2 + $0x69c] ss:$40 sps:$4 sm:$0xff]  }
  0xd3   :  { %v20086_v23 = vld [vmem:[#allocation2 + $0x694] ss:$40 sps:$4 sm:$0xff]   ;;  %v20084_v25 = vld [vmem:[#allocation2 + $0x690] ss:$40 sps:$4 sm:$0xff]   ;;  %v20092_v27 = vld [vmem:[#allocation2 + $0x6e4] ss:$40 sps:$4 sm:$0xff]  }
  0xd4   :  { %11850 = vmatpush1.bf16.msra.mxu0 %v20002_v30  ;;  %v20087_v26 = vld [vmem:[#allocation2 + $0x698] ss:$40 sps:$4 sm:$0xff]   ;;  %v20095_v28 = vld [vmem:[#allocation2 + $0x6ec] ss:$40 sps:$4 sm:$0xff]  }
  0xd5   :  { %12342 = vmatpush1.bf16.msra.mxu1 %v20003_v31  ;;  %11851 = vmatprep.subr.bf16.mxu0 %v20004_v32  ;;  %v23842_v29 = vld [vmem:[%s24225_s0 + $0x8] sm:$0xff] }
  0xd6   :  { %12343 = vmatprep.subr.bf16.mxu1 %v20006_v33  ;;  %v23846_v30 = vcombine.high %v23842_v29, %v23842_v29  ;;  %v20090_v31 = vld [vmem:[#allocation2 + $0x6e0] ss:$40 sps:$4 sm:$0xff]   ;;  %v20098_v33 = vld [vmem:[#allocation2 + $0x734] ss:$40 sps:$4 sm:$0xff]  }
  0xd7   :  { %v20093_v32 = vld [vmem:[#allocation2 + $0x6e8] ss:$40 sps:$4 sm:$0xff]   ;;  %v20119_v46 = vld [vmem:[#allocation2 + $0x82c] ss:$40 sps:$4 sm:$0xff]  }
  0xd8   :  { %11852 = vmatpush1.bf16.msra.mxu0 %v20008_v34  ;;  %v20101_v34 = vld [vmem:[#allocation2 + $0x73c] ss:$40 sps:$4 sm:$0xff]  }
  0xd9   :  { %12344 = vmatpush1.bf16.msra.mxu1 %v20009_v35  ;;  %11853 = vmatprep.subr.bf16.mxu0 %v20010_v36  ;;  %v20096_v35 = vld [vmem:[#allocation2 + $0x730] ss:$40 sps:$4 sm:$0xff]  }
  0xda   :  { %12345 = vmatprep.subr.bf16.mxu1 %v20012_v37  ;;  %v20099_v36 = vld [vmem:[#allocation2 + $0x738] ss:$40 sps:$4 sm:$0xff]   ;;  %v20104_v37 = vld [vmem:[#allocation2 + $0x784] ss:$40 sps:$4 sm:$0xff]  }
  0xdc   :  { %11854 = vmatpush1.bf16.msra.mxu0 %v20014_v38  ;;  %v20107_v38 = vld [vmem:[#allocation2 + $0x78c] ss:$40 sps:$4 sm:$0xff]  }
  0xdd   :  { %12346 = vmatpush1.bf16.msra.mxu1 %v20015_v39  ;;  %11855 = vmatprep.subr.bf16.mxu0 %v20016_v40  ;;  %v20102_v39 = vld [vmem:[#allocation2 + $0x780] ss:$40 sps:$4 sm:$0xff]  }
  0xde   :  { %12347 = vmatprep.subr.bf16.mxu1 %v20018_v41  ;;  %v20105_v40 = vld [vmem:[#allocation2 + $0x788] ss:$40 sps:$4 sm:$0xff]   ;;  %v20110_v41 = vld [vmem:[#allocation2 + $0x7d4] ss:$40 sps:$4 sm:$0xff]  }
  0xe0   :  { %11856 = vmatpush1.bf16.msra.mxu0 %v20020_v42  ;;  %v20113_v42 = vld [vmem:[#allocation2 + $0x7dc] ss:$40 sps:$4 sm:$0xff]  }
  0xe1   :  { %12348 = vmatpush1.bf16.msra.mxu1 %v20021_v43  ;;  %11857 = vmatprep.subr.bf16.mxu0 %v20022_v44  ;;  %v20108_v43 = vld [vmem:[#allocation2 + $0x7d0] ss:$40 sps:$4 sm:$0xff]  }
  0xe2   :  { %12349 = vmatprep.subr.bf16.mxu1 %v20024_v45  ;;  %v20111_v44 = vld [vmem:[#allocation2 + $0x7d8] ss:$40 sps:$4 sm:$0xff]   ;;  %v20116_v45 = vld [vmem:[#allocation2 + $0x824] ss:$40 sps:$4 sm:$0xff]  }
  0xe4   :  { %11858 = vmatpush1.bf16.msra.mxu0 %v20026_v47  ;;  %v20114_v47 = vld [vmem:[#allocation2 + $0x820] ss:$40 sps:$4 sm:$0xff]  }
  0xe5   :  { %12350 = vmatpush1.bf16.msra.mxu1 %v20027_v49  ;;  %11859 = vmatprep.subr.bf16.mxu0 %v20028_v50  ;;  %v20117_v49 = vld [vmem:[#allocation2 + $0x828] ss:$40 sps:$4 sm:$0xff]   ;;  %v20122_v50 = vld [vmem:[#allocation2 + $0x874] ss:$40 sps:$4 sm:$0xff]  }
  0xe6   :  { %12351 = vmatprep.subr.bf16.mxu1 %v20030_v51  ;;  %v20125_v51 = vld [vmem:[#allocation2 + $0x87c] ss:$40 sps:$4 sm:$0xff]  }
  0xe8   :  { %11860 = vmatpush1.bf16.msra.mxu0 %v20032_v52  ;;  %v20120_v52 = vld [vmem:[#allocation2 + $0x870] ss:$40 sps:$4 sm:$0xff]  }
  0xe9   :  { %12352 = vmatpush1.bf16.msra.mxu1 %v20033_v53  ;;  %11861 = vmatprep.subr.bf16.mxu0 %v20034_v54  ;;  %v20123_v53 = vld [vmem:[#allocation2 + $0x878] ss:$40 sps:$4 sm:$0xff]   ;;  %v20128_v54 = vld [vmem:[#allocation2 + $0x8c4] ss:$40 sps:$4 sm:$0xff]  }
  0xea   :  { %12353 = vmatprep.subr.bf16.mxu1 %v20036_v55  ;;  %v20131_v55 = vld [vmem:[#allocation2 + $0x8cc] ss:$40 sps:$4 sm:$0xff]  }
  0xec   :  { %11862 = vmatpush1.bf16.msra.mxu0 %v20038_v56  ;;  %v20126_v56 = vld [vmem:[#allocation2 + $0x8c0] ss:$40 sps:$4 sm:$0xff]  }
  0xed   :  { %12354 = vmatpush1.bf16.msra.mxu1 %v20039_v57  ;;  %11863 = vmatprep.subr.bf16.mxu0 %v20040_v58  ;;  %v20129_v57 = vld [vmem:[#allocation2 + $0x8c8] ss:$40 sps:$4 sm:$0xff]   ;;  %v20134_v58 = vld [vmem:[#allocation2 + $0x914] ss:$40 sps:$4 sm:$0xff]  }
  0xee   :  { %12355 = vmatprep.subr.bf16.mxu1 %v20042_v59  ;;  %v20137_v59 = vld [vmem:[#allocation2 + $0x91c] ss:$40 sps:$4 sm:$0xff]  }
  0xf0   :  { %11864 = vmatpush1.bf16.msra.mxu0 %v20044_v60  ;;  %v20132_v60 = vld [vmem:[#allocation2 + $0x910] ss:$40 sps:$4 sm:$0xff]  }
  0xf1   :  { %12356 = vmatpush1.bf16.msra.mxu1 %v20045_v61  ;;  %11865 = vmatprep.subr.bf16.mxu0 %v20046_v62  ;;  %v20135_v61 = vld [vmem:[#allocation2 + $0x918] ss:$40 sps:$4 sm:$0xff]   ;;  %v20140_v62 = vld [vmem:[#allocation2 + $0x964] ss:$40 sps:$4 sm:$0xff]  }
  0xf2   :  { %12357 = vmatprep.subr.bf16.mxu1 %v20048_v63  ;;  %v20143_v63 = vld [vmem:[#allocation2 + $0x96c] ss:$40 sps:$4 sm:$0xff]  }
  0xf4   :  { %11866 = vmatpush1.bf16.msra.mxu0 %v20050_v0  ;;  %v20138_v0 = vld [vmem:[#allocation2 + $0x960] ss:$40 sps:$4 sm:$0xff]  }
  0xf5   :  { %12358 = vmatpush1.bf16.msra.mxu1 %v20051_v1  ;;  %11876 = vmatprep.subr.bf16.mxu0 %v20055_v2  ;;  %v20141_v1 = vld [vmem:[#allocation2 + $0x968] ss:$40 sps:$4 sm:$0xff]   ;;  %v20146_v2 = vld [vmem:[#allocation2 + $0x9b4] ss:$40 sps:$4 sm:$0xff]  }
  0xf6   :  { %12368 = vmatprep.subr.bf16.mxu1 %v20058_v3  ;;  %v20149_v3 = vld [vmem:[#allocation2 + $0x9bc] ss:$40 sps:$4 sm:$0xff]  }
  0xf7   :  { %11868 = vmatmul.mubr.bf16.vlgmr.msra.gmra.mrb[0].mxu0 %v23835_v5 }
  0xf8   :  { %12360 = vmatmul.mubr.bf16.vlgmr.msra.gmra.mrb[0].mxu1 %v23835_v5  ;;  %11877 = vmatpush1.bf16.msra.mxu0 %v20053_v4  ;;  %v20144_v4 = vld [vmem:[#allocation2 + $0x9b0] ss:$40 sps:$4 sm:$0xff]  }
  0xf9   :  { %12369 = vmatpush1.bf16.msra.mxu1 %v20056_v6  ;;  %11878 = vmatprep.subr.bf16.mxu0 %v20062_v7  ;;  %v20147_v6 = vld [vmem:[#allocation2 + $0x9b8] ss:$40 sps:$4 sm:$0xff]   ;;  %v20153_v7 = vld [vmem:[#allocation2 + $0xa04] ss:$40 sps:$4 sm:$0xff]  }
  0xfa   :  { %12370 = vmatprep.subr.bf16.mxu1 %v20065_v8  ;;  %11908 = vmatprep.mubr.bf16.mxu0 %v23846_v30  ;;  %v20156_v8 = vld [vmem:[#allocation2 + $0xa0c] ss:$40 sps:$4 sm:$0xff]  }
  0xfb   :  { %12400 = vmatprep.mubr.bf16.mxu1 %v23846_v30 }
  0xfc   :  { %11879 = vmatpush1.bf16.msra.mxu0 %v20060_v9  ;;  %v20151_v9 = vld [vmem:[#allocation2 + $0xa00] ss:$40 sps:$4 sm:$0xff]  }
  0xfd   :  { %12371 = vmatpush1.bf16.msra.mxu1 %v20063_v10  ;;  %11880 = vmatprep.subr.bf16.mxu0 %v20068_v11  ;;  %v23852_v10 = vcombine.low %v23842_v29, %v23842_v29  ;;  %v20154_v11 = vld [vmem:[#allocation2 + $0xa08] ss:$40 sps:$4 sm:$0xff]  }
  0xfe   :  { %12372 = vmatprep.subr.bf16.mxu1 %v20071_v12  ;;  %v20160_v12 = vld [vmem:[#allocation2 + $0xa54] ss:$40 sps:$4 sm:$0xff]   ;;  %v20179_v29 = vld [vmem:[#allocation2 + $0xb48] ss:$40 sps:$4 sm:$0xff]  }
 0x100   :  { %11881 = vmatpush1.bf16.msra.mxu0 %v20066_v13  ;;  %v23857_v13 = vld [vmem:[%s24225_s0 + $0x10] sm:$0xff] }
 0x101   :  { %12373 = vmatpush1.bf16.msra.mxu1 %v20069_v14  ;;  %11882 = vmatprep.subr.bf16.mxu0 %v20074_v15  ;;  %v20163_v14 = vld [vmem:[#allocation2 + $0xa5c] ss:$40 sps:$4 sm:$0xff]   ;;  %v23861_v15 = vcombine.high %v23857_v13, %v23857_v13 }
 0x102   :  { %12374 = vmatprep.subr.bf16.mxu1 %v20077_v16  ;;  %v20158_v16 = vld [vmem:[#allocation2 + $0xa50] ss:$40 sps:$4 sm:$0xff]  }
 0x104   :  { %11883 = vmatpush1.bf16.msra.mxu0 %v20072_v17  ;;  %v20161_v17 = vld [vmem:[#allocation2 + $0xa58] ss:$40 sps:$4 sm:$0xff]  }
 0x105   :  { %12375 = vmatpush1.bf16.msra.mxu1 %v20075_v18  ;;  %11884 = vmatprep.subr.bf16.mxu0 %v20080_v19  ;;  %v20166_v18 = vld [vmem:[#allocation2 + $0xaa4] ss:$40 sps:$4 sm:$0xff]  }
 0x106   :  { %12376 = vmatprep.subr.bf16.mxu1 %v20083_v20  ;;  %v20169_v19 = vld [vmem:[#allocation2 + $0xaac] ss:$40 sps:$4 sm:$0xff]   ;;  %v20164_v20 = vld [vmem:[#allocation2 + $0xaa0] ss:$40 sps:$4 sm:$0xff]  }
 0x108   :  { %11885 = vmatpush1.bf16.msra.mxu0 %v20078_v21  ;;  %v20167_v21 = vld [vmem:[#allocation2 + $0xaa8] ss:$40 sps:$4 sm:$0xff]  }
 0x109   :  { %12377 = vmatpush1.bf16.msra.mxu1 %v20081_v22  ;;  %11886 = vmatprep.subr.bf16.mxu0 %v20086_v23  ;;  %v20172_v22 = vld [vmem:[#allocation2 + $0xaf4] ss:$40 sps:$4 sm:$0xff]  }
 0x10a   :  { %12378 = vmatprep.subr.bf16.mxu1 %v20089_v24  ;;  %v20175_v23 = vld [vmem:[#allocation2 + $0xafc] ss:$40 sps:$4 sm:$0xff]   ;;  %v20170_v24 = vld [vmem:[#allocation2 + $0xaf0] ss:$40 sps:$4 sm:$0xff]  }
 0x10c   :  { %11887 = vmatpush1.bf16.msra.mxu0 %v20084_v25  ;;  %v20173_v25 = vld [vmem:[#allocation2 + $0xaf8] ss:$40 sps:$4 sm:$0xff]  }
 0x10d   :  { %12379 = vmatpush1.bf16.msra.mxu1 %v20087_v26  ;;  %11888 = vmatprep.subr.bf16.mxu0 %v20092_v27  ;;  %v20178_v26 = vld [vmem:[#allocation2 + $0xb44] ss:$40 sps:$4 sm:$0xff]  }
 0x10e   :  { %12380 = vmatprep.subr.bf16.mxu1 %v20095_v28  ;;  %v20181_v27 = vld [vmem:[#allocation2 + $0xb4c] ss:$40 sps:$4 sm:$0xff]   ;;  %v20176_v28 = vld [vmem:[#allocation2 + $0xb40] ss:$40 sps:$4 sm:$0xff]  }
 0x110   :  { %11889 = vmatpush1.bf16.msra.mxu0 %v20090_v31  ;;  %v20184_v31 = vld [vmem:[#allocation2 + $0xb94] ss:$40 sps:$4 sm:$0xff]  }
 0x111   :  { %12381 = vmatpush1.bf16.msra.mxu1 %v20093_v32  ;;  %11890 = vmatprep.subr.bf16.mxu0 %v20098_v33  ;;  %v20187_v32 = vld [vmem:[#allocation2 + $0xb9c] ss:$40 sps:$4 sm:$0xff]   ;;  %v20182_v33 = vld [vmem:[#allocation2 + $0xb90] ss:$40 sps:$4 sm:$0xff]  }
 0x112   :  { %12382 = vmatprep.subr.bf16.mxu1 %v20101_v34  ;;  %v20185_v34 = vld [vmem:[#allocation2 + $0xb98] ss:$40 sps:$4 sm:$0xff]  }
 0x114   :  { %11891 = vmatpush1.bf16.msra.mxu0 %v20096_v35  ;;  %v20190_v35 = vld [vmem:[#allocation2 + $0xbe4] ss:$40 sps:$4 sm:$0xff]  }
 0x115   :  { %12383 = vmatpush1.bf16.msra.mxu1 %v20099_v36  ;;  %11892 = vmatprep.subr.bf16.mxu0 %v20104_v37  ;;  %v20193_v36 = vld [vmem:[#allocation2 + $0xbec] ss:$40 sps:$4 sm:$0xff]   ;;  %v20188_v37 = vld [vmem:[#allocation2 + $0xbe0] ss:$40 sps:$4 sm:$0xff]  }
 0x116   :  { %12384 = vmatprep.subr.bf16.mxu1 %v20107_v38  ;;  %v20191_v38 = vld [vmem:[#allocation2 + $0xbe8] ss:$40 sps:$4 sm:$0xff]  }
 0x118   :  { %11893 = vmatpush1.bf16.msra.mxu0 %v20102_v39  ;;  %v20196_v39 = vld [vmem:[#allocation2 + $0xc34] ss:$40 sps:$4 sm:$0xff]  }
 0x119   :  { %12385 = vmatpush1.bf16.msra.mxu1 %v20105_v40  ;;  %11894 = vmatprep.subr.bf16.mxu0 %v20110_v41  ;;  %v20199_v40 = vld [vmem:[#allocation2 + $0xc3c] ss:$40 sps:$4 sm:$0xff]   ;;  %v20194_v41 = vld [vmem:[#allocation2 + $0xc30] ss:$40 sps:$4 sm:$0xff]  }
 0x11a   :  { %12386 = vmatprep.subr.bf16.mxu1 %v20113_v42  ;;  %v20197_v42 = vld [vmem:[#allocation2 + $0xc38] ss:$40 sps:$4 sm:$0xff]  }
 0x11c   :  { %11895 = vmatpush1.bf16.msra.mxu0 %v20108_v43  ;;  %v20202_v43 = vld [vmem:[#allocation2 + $0xc84] ss:$40 sps:$4 sm:$0xff]  }
 0x11d   :  { %12387 = vmatpush1.bf16.msra.mxu1 %v20111_v44  ;;  %11896 = vmatprep.subr.bf16.mxu0 %v20116_v45  ;;  %v20205_v44 = vld [vmem:[#allocation2 + $0xc8c] ss:$40 sps:$4 sm:$0xff]   ;;  %v20200_v45 = vld [vmem:[#allocation2 + $0xc80] ss:$40 sps:$4 sm:$0xff]  }
 0x11e   :  { %12388 = vmatprep.subr.bf16.mxu1 %v20119_v46  ;;  %v20203_v46 = vld [vmem:[#allocation2 + $0xc88] ss:$40 sps:$4 sm:$0xff]  }
 0x120   :  { %11897 = vmatpush1.bf16.msra.mxu0 %v20114_v47  ;;  %v20208_v47 = vld [vmem:[#allocation2 + $0xcd4] ss:$40 sps:$4 sm:$0xff]  }
 0x121   :  { %12389 = vmatpush1.bf16.msra.mxu1 %v20117_v49  ;;  %11898 = vmatprep.subr.bf16.mxu0 %v20122_v50  ;;  %v20211_v49 = vld [vmem:[#allocation2 + $0xcdc] ss:$40 sps:$4 sm:$0xff]   ;;  %v20206_v50 = vld [vmem:[#allocation2 + $0xcd0] ss:$40 sps:$4 sm:$0xff]  }
 0x122   :  { %12390 = vmatprep.subr.bf16.mxu1 %v20125_v51  ;;  %v20209_v51 = vld [vmem:[#allocation2 + $0xcd8] ss:$40 sps:$4 sm:$0xff]  }
 0x124   :  { %11899 = vmatpush1.bf16.msra.mxu0 %v20120_v52  ;;  %v20214_v52 = vld [vmem:[#allocation2 + $0xd24] ss:$40 sps:$4 sm:$0xff]  }
 0x125   :  { %12391 = vmatpush1.bf16.msra.mxu1 %v20123_v53  ;;  %11900 = vmatprep.subr.bf16.mxu0 %v20128_v54  ;;  %v20217_v53 = vld [vmem:[#allocation2 + $0xd2c] ss:$40 sps:$4 sm:$0xff]   ;;  %v20212_v54 = vld [vmem:[#allocation2 + $0xd20] ss:$40 sps:$4 sm:$0xff]  }
 0x126   :  { %12392 = vmatprep.subr.bf16.mxu1 %v20131_v55  ;;  %v20215_v55 = vld [vmem:[#allocation2 + $0xd28] ss:$40 sps:$4 sm:$0xff]  }
 0x128   :  { %11901 = vmatpush1.bf16.msra.mxu0 %v20126_v56  ;;  %v20220_v56 = vld [vmem:[#allocation2 + $0xd74] ss:$40 sps:$4 sm:$0xff]  }
 0x129   :  { %12393 = vmatpush1.bf16.msra.mxu1 %v20129_v57  ;;  %11902 = vmatprep.subr.bf16.mxu0 %v20134_v58  ;;  %v20223_v57 = vld [vmem:[#allocation2 + $0xd7c] ss:$40 sps:$4 sm:$0xff]   ;;  %v20218_v58 = vld [vmem:[#allocation2 + $0xd70] ss:$40 sps:$4 sm:$0xff]  }
 0x12a   :  { %12394 = vmatprep.subr.bf16.mxu1 %v20137_v59  ;;  %v20221_v59 = vld [vmem:[#allocation2 + $0xd78] ss:$40 sps:$4 sm:$0xff]  }
 0x12c   :  { %11903 = vmatpush1.bf16.msra.mxu0 %v20132_v60  ;;  %v20226_v60 = vld [vmem:[#allocation2 + $0xdc4] ss:$40 sps:$4 sm:$0xff]  }
 0x12d   :  { %12395 = vmatpush1.bf16.msra.mxu1 %v20135_v61  ;;  %11904 = vmatprep.subr.bf16.mxu0 %v20140_v62  ;;  %v20229_v61 = vld [vmem:[#allocation2 + $0xdcc] ss:$40 sps:$4 sm:$0xff]   ;;  %v20224_v62 = vld [vmem:[#allocation2 + $0xdc0] ss:$40 sps:$4 sm:$0xff]  }
 0x12e   :  { %12396 = vmatprep.subr.bf16.mxu1 %v20143_v63  ;;  %v20227_v63 = vld [vmem:[#allocation2 + $0xdc8] ss:$40 sps:$4 sm:$0xff]  }
 0x130   :  { %11905 = vmatpush1.bf16.msra.mxu0 %v20138_v0  ;;  %v20232_v0 = vld [vmem:[#allocation2 + $0xe14] ss:$40 sps:$4 sm:$0xff]  }
 0x131   :  { %12397 = vmatpush1.bf16.msra.mxu1 %v20141_v1  ;;  %11906 = vmatprep.subr.bf16.mxu0 %v20146_v2  ;;  %v20235_v1 = vld [vmem:[#allocation2 + $0xe1c] ss:$40 sps:$4 sm:$0xff]   ;;  %v20230_v2 = vld [vmem:[#allocation2 + $0xe10] ss:$40 sps:$4 sm:$0xff]  }
 0x132   :  { %12398 = vmatprep.subr.bf16.mxu1 %v20149_v3  ;;  %v20233_v3 = vld [vmem:[#allocation2 + $0xe18] ss:$40 sps:$4 sm:$0xff]  }
 0x134   :  { %11907 = vmatpush1.bf16.msra.mxu0 %v20144_v4  ;;  %v20238_v4 = vld [vmem:[#allocation2 + $0xe64] ss:$40 sps:$4 sm:$0xff]  }
 0x135   :  { %12399 = vmatpush1.bf16.msra.mxu1 %v20147_v6  ;;  %11917 = vmatprep.subr.bf16.mxu0 %v20153_v7  ;;  %v20241_v6 = vld [vmem:[#allocation2 + $0xe6c] ss:$40 sps:$4 sm:$0xff]   ;;  %v20236_v7 = vld [vmem:[#allocation2 + $0xe60] ss:$40 sps:$4 sm:$0xff]  }
 0x136   :  { %12409 = vmatprep.subr.bf16.mxu1 %v20156_v8  ;;  %v20239_v8 = vld [vmem:[#allocation2 + $0xe68] ss:$40 sps:$4 sm:$0xff]  }
 0x137   :  { %11909 = vmatmul.mubr.bf16.vlgmr.msra.gmra.mrb[0].mxu0 %v23852_v10 }
 0x138   :  { %12401 = vmatmul.mubr.bf16.vlgmr.msra.gmra.mrb[0].mxu1 %v23852_v10  ;;  %11918 = vmatpush1.bf16.msra.mxu0 %v20151_v9  ;;  %v20244_v9 = vld [vmem:[#allocation2 + $0xeb4] ss:$40 sps:$4 sm:$0xff]  }
 0x139   :  { %12410 = vmatpush1.bf16.msra.mxu1 %v20154_v11  ;;  %11919 = vmatprep.subr.bf16.mxu0 %v20160_v12  ;;  %v20247_v11 = vld [vmem:[#allocation2 + $0xebc] ss:$40 sps:$4 sm:$0xff]   ;;  %v20242_v12 = vld [vmem:[#allocation2 + $0xeb0] ss:$40 sps:$4 sm:$0xff]  }
 0x13a   :  { %12411 = vmatprep.subr.bf16.mxu1 %v20163_v14  ;;  %11949 = vmatprep.mubr.bf16.mxu0 %v23861_v15  ;;  %v20245_v14 = vld [vmem:[#allocation2 + $0xeb8] ss:$40 sps:$4 sm:$0xff]  }
 0x13b   :  { %12441 = vmatprep.mubr.bf16.mxu1 %v23861_v15 }
 0x13c   :  { %11920 = vmatpush1.bf16.msra.mxu0 %v20158_v16  ;;  %v20251_v16 = vld [vmem:[#allocation2 + $0xf04] ss:$40 sps:$4 sm:$0xff]  }
 0x13d   :  { %12412 = vmatpush1.bf16.msra.mxu1 %v20161_v17  ;;  %11921 = vmatprep.subr.bf16.mxu0 %v20166_v18  ;;  %v20254_v17 = vld [vmem:[#allocation2 + $0xf0c] ss:$40 sps:$4 sm:$0xff]   ;;  %v20249_v18 = vld [vmem:[#allocation2 + $0xf00] ss:$40 sps:$4 sm:$0xff]  }
 0x13e   :  { %12413 = vmatprep.subr.bf16.mxu1 %v20169_v19  ;;  %v20252_v19 = vld [vmem:[#allocation2 + $0xf08] ss:$40 sps:$4 sm:$0xff]  }
 0x140   :  { %11922 = vmatpush1.bf16.msra.mxu0 %v20164_v20  ;;  %v23869_v20 = vcombine.low %v23857_v13, %v23857_v13  ;;  %v20256_v13 = vld [vmem:[#allocation2 + $0xf50] ss:$40 sps:$4 sm:$0xff]  }
 0x141   :  { %12414 = vmatpush1.bf16.msra.mxu1 %v20167_v21  ;;  %11923 = vmatprep.subr.bf16.mxu0 %v20172_v22  ;;  %v23874_v21 = vld [vmem:[%s24225_s0 + $0x18] sm:$0xff] }
 0x142   :  { %12415 = vmatprep.subr.bf16.mxu1 %v20175_v23  ;;  %v20258_v22 = vld [vmem:[#allocation2 + $0xf54] ss:$40 sps:$4 sm:$0xff]  }
 0x143   :  { %v20261_v23 = vld [vmem:[#allocation2 + $0xf5c] ss:$40 sps:$4 sm:$0xff]  }
 0x144   :  { %11924 = vmatpush1.bf16.msra.mxu0 %v20170_v24  ;;  %v23878_v24 = vcombine.high %v23874_v21, %v23874_v21 }
 0x145   :  { %12416 = vmatpush1.bf16.msra.mxu1 %v20173_v25  ;;  %11925 = vmatprep.subr.bf16.mxu0 %v20178_v26  ;;  %v20259_v25 = vld [vmem:[#allocation2 + $0xf58] ss:$40 sps:$4 sm:$0xff]   ;;  %v20264_v26 = vld [vmem:[#allocation2 + $0xfa4] ss:$40 sps:$4 sm:$0xff]  }
 0x146   :  { %12417 = vmatprep.subr.bf16.mxu1 %v20181_v27  ;;  %v20267_v27 = vld [vmem:[#allocation2 + $0xfac] ss:$40 sps:$4 sm:$0xff]  }
 0x148   :  { %11926 = vmatpush1.bf16.msra.mxu0 %v20176_v28  ;;  %v20262_v28 = vld [vmem:[#allocation2 + $0xfa0] ss:$40 sps:$4 sm:$0xff]  }
 0x149   :  { %12418 = vmatpush1.bf16.msra.mxu1 %v20179_v29  ;;  %11927 = vmatprep.subr.bf16.mxu0 %v20184_v31  ;;  %v20265_v29 = vld [vmem:[#allocation2 + $0xfa8] ss:$40 sps:$4 sm:$0xff]   ;;  %v20270_v31 = vld [vmem:[#allocation2 + $0xff4] ss:$40 sps:$4 sm:$0xff]  }
 0x14a   :  { %12419 = vmatprep.subr.bf16.mxu1 %v20187_v32  ;;  %v20273_v32 = vld [vmem:[#allocation2 + $0xffc] ss:$40 sps:$4 sm:$0xff]  }
 0x14c   :  { %11928 = vmatpush1.bf16.msra.mxu0 %v20182_v33  ;;  %v20268_v33 = vld [vmem:[#allocation2 + $0xff0] ss:$40 sps:$4 sm:$0xff]  }
 0x14d   :  { %12420 = vmatpush1.bf16.msra.mxu1 %v20185_v34  ;;  %11929 = vmatprep.subr.bf16.mxu0 %v20190_v35  ;;  %v20271_v34 = vld [vmem:[#allocation2 + $0xff8] ss:$40 sps:$4 sm:$0xff]   ;;  %v20276_v35 = vld [vmem:[#allocation2 + $0x1044] ss:$40 sps:$4 sm:$0xff]  }
 0x14e   :  { %12421 = vmatprep.subr.bf16.mxu1 %v20193_v36  ;;  %v20279_v36 = vld [vmem:[#allocation2 + $0x104c] ss:$40 sps:$4 sm:$0xff]  }
 0x150   :  { %11930 = vmatpush1.bf16.msra.mxu0 %v20188_v37  ;;  %v20274_v37 = vld [vmem:[#allocation2 + $0x1040] ss:$40 sps:$4 sm:$0xff]  }
 0x151   :  { %12422 = vmatpush1.bf16.msra.mxu1 %v20191_v38  ;;  %11931 = vmatprep.subr.bf16.mxu0 %v20196_v39  ;;  %v20277_v38 = vld [vmem:[#allocation2 + $0x1048] ss:$40 sps:$4 sm:$0xff]   ;;  %v20282_v39 = vld [vmem:[#allocation2 + $0x1094] ss:$40 sps:$4 sm:$0xff]  }
 0x152   :  { %12423 = vmatprep.subr.bf16.mxu1 %v20199_v40  ;;  %v20285_v40 = vld [vmem:[#allocation2 + $0x109c] ss:$40 sps:$4 sm:$0xff]  }
 0x154   :  { %11932 = vmatpush1.bf16.msra.mxu0 %v20194_v41  ;;  %v20280_v41 = vld [vmem:[#allocation2 + $0x1090] ss:$40 sps:$4 sm:$0xff]  }
 0x155   :  { %12424 = vmatpush1.bf16.msra.mxu1 %v20197_v42  ;;  %11933 = vmatprep.subr.bf16.mxu0 %v20202_v43  ;;  %v20283_v42 = vld [vmem:[#allocation2 + $0x1098] ss:$40 sps:$4 sm:$0xff]   ;;  %v20288_v43 = vld [vmem:[#allocation2 + $0x10e4] ss:$40 sps:$4 sm:$0xff]  }
 0x156   :  { %12425 = vmatprep.subr.bf16.mxu1 %v20205_v44  ;;  %v20291_v44 = vld [vmem:[#allocation2 + $0x10ec] ss:$40 sps:$4 sm:$0xff]  }
 0x158   :  { %11934 = vmatpush1.bf16.msra.mxu0 %v20200_v45  ;;  %v20286_v45 = vld [vmem:[#allocation2 + $0x10e0] ss:$40 sps:$4 sm:$0xff]  }
 0x159   :  { %12426 = vmatpush1.bf16.msra.mxu1 %v20203_v46  ;;  %11935 = vmatprep.subr.bf16.mxu0 %v20208_v47  ;;  %v20289_v46 = vld [vmem:[#allocation2 + $0x10e8] ss:$40 sps:$4 sm:$0xff]   ;;  %v20294_v47 = vld [vmem:[#allocation2 + $0x1134] ss:$40 sps:$4 sm:$0xff]  }
 0x15a   :  { %12427 = vmatprep.subr.bf16.mxu1 %v20211_v49  ;;  %v20297_v49 = vld [vmem:[#allocation2 + $0x113c] ss:$40 sps:$4 sm:$0xff]  }
 0x15c   :  { %11936 = vmatpush1.bf16.msra.mxu0 %v20206_v50  ;;  %v20292_v50 = vld [vmem:[#allocation2 + $0x1130] ss:$40 sps:$4 sm:$0xff]  }
 0x15d   :  { %12428 = vmatpush1.bf16.msra.mxu1 %v20209_v51  ;;  %11937 = vmatprep.subr.bf16.mxu0 %v20214_v52  ;;  %v20295_v51 = vld [vmem:[#allocation2 + $0x1138] ss:$40 sps:$4 sm:$0xff]   ;;  %v20300_v52 = vld [vmem:[#allocation2 + $0x1184] ss:$40 sps:$4 sm:$0xff]  }
 0x15e   :  { %12429 = vmatprep.subr.bf16.mxu1 %v20217_v53  ;;  %v20303_v53 = vld [vmem:[#allocation2 + $0x118c] ss:$40 sps:$4 sm:$0xff]  }
 0x160   :  { %11938 = vmatpush1.bf16.msra.mxu0 %v20212_v54  ;;  %v20298_v54 = vld [vmem:[#allocation2 + $0x1180] ss:$40 sps:$4 sm:$0xff]  }
 0x161   :  { %12430 = vmatpush1.bf16.msra.mxu1 %v20215_v55  ;;  %11939 = vmatprep.subr.bf16.mxu0 %v20220_v56  ;;  %v20301_v55 = vld [vmem:[#allocation2 + $0x1188] ss:$40 sps:$4 sm:$0xff]   ;;  %v20306_v56 = vld [vmem:[#allocation2 + $0x11d4] ss:$40 sps:$4 sm:$0xff]  }
 0x162   :  { %12431 = vmatprep.subr.bf16.mxu1 %v20223_v57  ;;  %v20309_v57 = vld [vmem:[#allocation2 + $0x11dc] ss:$40 sps:$4 sm:$0xff]  }
 0x164   :  { %11940 = vmatpush1.bf16.msra.mxu0 %v20218_v58  ;;  %v20304_v58 = vld [vmem:[#allocation2 + $0x11d0] ss:$40 sps:$4 sm:$0xff]  }
 0x165   :  { %12432 = vmatpush1.bf16.msra.mxu1 %v20221_v59  ;;  %11941 = vmatprep.subr.bf16.mxu0 %v20226_v60  ;;  %v20307_v59 = vld [vmem:[#allocation2 + $0x11d8] ss:$40 sps:$4 sm:$0xff]   ;;  %v20312_v60 = vld [vmem:[#allocation2 + $0x1224] ss:$40 sps:$4 sm:$0xff]  }
 0x166   :  { %12433 = vmatprep.subr.bf16.mxu1 %v20229_v61  ;;  %v20315_v61 = vld [vmem:[#allocation2 + $0x122c] ss:$40 sps:$4 sm:$0xff]  }
 0x168   :  { %11942 = vmatpush1.bf16.msra.mxu0 %v20224_v62  ;;  %v20310_v62 = vld [vmem:[#allocation2 + $0x1220] ss:$40 sps:$4 sm:$0xff]  }
 0x169   :  { %12434 = vmatpush1.bf16.msra.mxu1 %v20227_v63  ;;  %11943 = vmatprep.subr.bf16.mxu0 %v20232_v0  ;;  %v20313_v63 = vld [vmem:[#allocation2 + $0x1228] ss:$40 sps:$4 sm:$0xff]   ;;  %v20318_v0 = vld [vmem:[#allocation2 + $0x1274] ss:$40 sps:$4 sm:$0xff]  }
 0x16a   :  { %12435 = vmatprep.subr.bf16.mxu1 %v20235_v1  ;;  %v20321_v1 = vld [vmem:[#allocation2 + $0x127c] ss:$40 sps:$4 sm:$0xff]  }
 0x16c   :  { %11944 = vmatpush1.bf16.msra.mxu0 %v20230_v2  ;;  %v20316_v2 = vld [vmem:[#allocation2 + $0x1270] ss:$40 sps:$4 sm:$0xff]  }
 0x16d   :  { %12436 = vmatpush1.bf16.msra.mxu1 %v20233_v3  ;;  %11945 = vmatprep.subr.bf16.mxu0 %v20238_v4  ;;  %v20319_v3 = vld [vmem:[#allocation2 + $0x1278] ss:$40 sps:$4 sm:$0xff]   ;;  %v20324_v4 = vld [vmem:[#allocation2 + $0x12c4] ss:$40 sps:$4 sm:$0xff]  }
 0x16e   :  { %12437 = vmatprep.subr.bf16.mxu1 %v20241_v6  ;;  %v20327_v6 = vld [vmem:[#allocation2 + $0x12cc] ss:$40 sps:$4 sm:$0xff]  }
 0x170   :  { %11946 = vmatpush1.bf16.msra.mxu0 %v20236_v7  ;;  %v20322_v7 = vld [vmem:[#allocation2 + $0x12c0] ss:$40 sps:$4 sm:$0xff]  }
 0x171   :  { %12438 = vmatpush1.bf16.msra.mxu1 %v20239_v8  ;;  %11947 = vmatprep.subr.bf16.mxu0 %v20244_v9  ;;  %v20325_v8 = vld [vmem:[#allocation2 + $0x12c8] ss:$40 sps:$4 sm:$0xff]   ;;  %v20330_v9 = vld [vmem:[#allocation2 + $0x1314] ss:$40 sps:$4 sm:$0xff]  }
 0x172   :  { %12439 = vmatprep.subr.bf16.mxu1 %v20247_v11  ;;  %v20333_v11 = vld [vmem:[#allocation2 + $0x131c] ss:$40 sps:$4 sm:$0xff]  }
 0x174   :  { %11948 = vmatpush1.bf16.msra.mxu0 %v20242_v12  ;;  %v20328_v12 = vld [vmem:[#allocation2 + $0x1310] ss:$40 sps:$4 sm:$0xff]  }
 0x175   :  { %12440 = vmatpush1.bf16.msra.mxu1 %v20245_v14  ;;  %11958 = vmatprep.subr.bf16.mxu0 %v20251_v16  ;;  %v20331_v14 = vld [vmem:[#allocation2 + $0x1318] ss:$40 sps:$4 sm:$0xff]   ;;  %v20336_v16 = vld [vmem:[#allocation2 + $0x1364] ss:$40 sps:$4 sm:$0xff]  }
 0x176   :  { %12450 = vmatprep.subr.bf16.mxu1 %v20254_v17  ;;  %v20339_v17 = vld [vmem:[#allocation2 + $0x136c] ss:$40 sps:$4 sm:$0xff]  }
 0x177   :  { %11950 = vmatmul.mubr.bf16.vlgmr.msra.gmra.mrb[0].mxu0 %v23869_v20 }
 0x178   :  { %12442 = vmatmul.mubr.bf16.vlgmr.msra.gmra.mrb[0].mxu1 %v23869_v20  ;;  %11959 = vmatpush1.bf16.msra.mxu0 %v20249_v18  ;;  %v20334_v18 = vld [vmem:[#allocation2 + $0x1360] ss:$40 sps:$4 sm:$0xff]  }
 0x179   :  { %12451 = vmatpush1.bf16.msra.mxu1 %v20252_v19  ;;  %11960 = vmatprep.subr.bf16.mxu0 %v20258_v22  ;;  %v20337_v19 = vld [vmem:[#allocation2 + $0x1368] ss:$40 sps:$4 sm:$0xff]   ;;  %v20342_v22 = vld [vmem:[#allocation2 + $0x13b4] ss:$40 sps:$4 sm:$0xff]  }
 0x17a   :  { %12452 = vmatprep.subr.bf16.mxu1 %v20261_v23  ;;  %11990 = vmatprep.mubr.bf16.mxu0 %v23878_v24  ;;  %v20345_v23 = vld [vmem:[#allocation2 + $0x13bc] ss:$40 sps:$4 sm:$0xff]  }
 0x17b   :  { %12482 = vmatprep.mubr.bf16.mxu1 %v23878_v24 }
 0x17c   :  { %11961 = vmatpush1.bf16.msra.mxu0 %v20256_v13  ;;  %v20340_v13 = vld [vmem:[#allocation2 + $0x13b0] ss:$40 sps:$4 sm:$0xff]  }
 0x17d   :  { %12453 = vmatpush1.bf16.msra.mxu1 %v20259_v25  ;;  %11962 = vmatprep.subr.bf16.mxu0 %v20264_v26  ;;  %v20343_v25 = vld [vmem:[#allocation2 + $0x13b8] ss:$40 sps:$4 sm:$0xff]   ;;  %v20349_v26 = vld [vmem:[#allocation2 + $0x1404] ss:$40 sps:$4 sm:$0xff]  }
 0x17e   :  { %12454 = vmatprep.subr.bf16.mxu1 %v20267_v27  ;;  %v20352_v27 = vld [vmem:[#allocation2 + $0x140c] ss:$40 sps:$4 sm:$0xff]  }
 0x180   :  { %11963 = vmatpush1.bf16.msra.mxu0 %v20262_v28  ;;  %v20347_v28 = vld [vmem:[#allocation2 + $0x1400] ss:$40 sps:$4 sm:$0xff]  }
 0x181   :  { %12455 = vmatpush1.bf16.msra.mxu1 %v20265_v29  ;;  %11964 = vmatprep.subr.bf16.mxu0 %v20270_v31  ;;  %v23886_v29 = vcombine.low %v23874_v21, %v23874_v21  ;;  %v23891_v31 = vld [vmem:[%s24225_s0 + $0x20] sm:$0xff]  ;;  %v20354_v21 = vld [vmem:[#allocation2 + $0x1450] ss:$40 sps:$4 sm:$0xff]  }
 0x182   :  { %12456 = vmatprep.subr.bf16.mxu1 %v20273_v32  ;;  %v20350_v32 = vld [vmem:[#allocation2 + $0x1408] ss:$40 sps:$4 sm:$0xff]  }
 0x184   :  { %11965 = vmatpush1.bf16.msra.mxu0 %v20268_v33  ;;  %v20356_v33 = vld [vmem:[#allocation2 + $0x1454] ss:$40 sps:$4 sm:$0xff]  }
 0x185   :  { %12457 = vmatpush1.bf16.msra.mxu1 %v20271_v34  ;;  %11966 = vmatprep.subr.bf16.mxu0 %v20276_v35  ;;  %v20359_v34 = vld [vmem:[#allocation2 + $0x145c] ss:$40 sps:$4 sm:$0xff]   ;;  %v23895_v35 = vcombine.high %v23891_v31, %v23891_v31 }
 0x186   :  { %12458 = vmatprep.subr.bf16.mxu1 %v20279_v36  ;;  %v20357_v36 = vld [vmem:[#allocation2 + $0x1458] ss:$40 sps:$4 sm:$0xff]  }
 0x188   :  { %11967 = vmatpush1.bf16.msra.mxu0 %v20274_v37  ;;  %v20362_v37 = vld [vmem:[#allocation2 + $0x14a4] ss:$40 sps:$4 sm:$0xff]  }
 0x189   :  { %12459 = vmatpush1.bf16.msra.mxu1 %v20277_v38  ;;  %11968 = vmatprep.subr.bf16.mxu0 %v20282_v39  ;;  %v20365_v38 = vld [vmem:[#allocation2 + $0x14ac] ss:$40 sps:$4 sm:$0xff]   ;;  %v20360_v39 = vld [vmem:[#allocation2 + $0x14a0] ss:$40 sps:$4 sm:$0xff]  }
 0x18a   :  { %12460 = vmatprep.subr.bf16.mxu1 %v20285_v40  ;;  %v20363_v40 = vld [vmem:[#allocation2 + $0x14a8] ss:$40 sps:$4 sm:$0xff]  }
 0x18c   :  { %11969 = vmatpush1.bf16.msra.mxu0 %v20280_v41  ;;  %v20368_v41 = vld [vmem:[#allocation2 + $0x14f4] ss:$40 sps:$4 sm:$0xff]  }
 0x18d   :  { %12461 = vmatpush1.bf16.msra.mxu1 %v20283_v42  ;;  %11970 = vmatprep.subr.bf16.mxu0 %v20288_v43  ;;  %v20371_v42 = vld [vmem:[#allocation2 + $0x14fc] ss:$40 sps:$4 sm:$0xff]   ;;  %v20366_v43 = vld [vmem:[#allocation2 + $0x14f0] ss:$40 sps:$4 sm:$0xff]  }
 0x18e   :  { %12462 = vmatprep.subr.bf16.mxu1 %v20291_v44  ;;  %v20369_v44 = vld [vmem:[#allocation2 + $0x14f8] ss:$40 sps:$4 sm:$0xff]  }
 0x190   :  { %11971 = vmatpush1.bf16.msra.mxu0 %v20286_v45  ;;  %v20374_v45 = vld [vmem:[#allocation2 + $0x1544] ss:$40 sps:$4 sm:$0xff]  }
 0x191   :  { %12463 = vmatpush1.bf16.msra.mxu1 %v20289_v46  ;;  %11972 = vmatprep.subr.bf16.mxu0 %v20294_v47  ;;  %v20377_v46 = vld [vmem:[#allocation2 + $0x154c] ss:$40 sps:$4 sm:$0xff]   ;;  %v20372_v47 = vld [vmem:[#allocation2 + $0x1540] ss:$40 sps:$4 sm:$0xff]  }
 0x192   :  { %12464 = vmatprep.subr.bf16.mxu1 %v20297_v49  ;;  %v20375_v49 = vld [vmem:[#allocation2 + $0x1548] ss:$40 sps:$4 sm:$0xff]  }
 0x194   :  { %11973 = vmatpush1.bf16.msra.mxu0 %v20292_v50  ;;  %v20380_v50 = vld [vmem:[#allocation2 + $0x1594] ss:$40 sps:$4 sm:$0xff]  }
 0x195   :  { %12465 = vmatpush1.bf16.msra.mxu1 %v20295_v51  ;;  %11974 = vmatprep.subr.bf16.mxu0 %v20300_v52  ;;  %v20383_v51 = vld [vmem:[#allocation2 + $0x159c] ss:$40 sps:$4 sm:$0xff]   ;;  %v20378_v52 = vld [vmem:[#allocation2 + $0x1590] ss:$40 sps:$4 sm:$0xff]  }
 0x196   :  { %12466 = vmatprep.subr.bf16.mxu1 %v20303_v53  ;;  %v20381_v53 = vld [vmem:[#allocation2 + $0x1598] ss:$40 sps:$4 sm:$0xff]  }
 0x198   :  { %11975 = vmatpush1.bf16.msra.mxu0 %v20298_v54  ;;  %v20386_v54 = vld [vmem:[#allocation2 + $0x15e4] ss:$40 sps:$4 sm:$0xff]  }
 0x199   :  { %12467 = vmatpush1.bf16.msra.mxu1 %v20301_v55  ;;  %11976 = vmatprep.subr.bf16.mxu0 %v20306_v56  ;;  %v20389_v55 = vld [vmem:[#allocation2 + $0x15ec] ss:$40 sps:$4 sm:$0xff]   ;;  %v20384_v56 = vld [vmem:[#allocation2 + $0x15e0] ss:$40 sps:$4 sm:$0xff]  }
 0x19a   :  { %12468 = vmatprep.subr.bf16.mxu1 %v20309_v57  ;;  %v20387_v57 = vld [vmem:[#allocation2 + $0x15e8] ss:$40 sps:$4 sm:$0xff]  }
 0x19c   :  { %11977 = vmatpush1.bf16.msra.mxu0 %v20304_v58  ;;  %v20392_v58 = vld [vmem:[#allocation2 + $0x1634] ss:$40 sps:$4 sm:$0xff]  }
 0x19d   :  { %12469 = vmatpush1.bf16.msra.mxu1 %v20307_v59  ;;  %11978 = vmatprep.subr.bf16.mxu0 %v20312_v60  ;;  %v20395_v59 = vld [vmem:[#allocation2 + $0x163c] ss:$40 sps:$4 sm:$0xff]   ;;  %v20390_v60 = vld [vmem:[#allocation2 + $0x1630] ss:$40 sps:$4 sm:$0xff]  }
 0x19e   :  { %12470 = vmatprep.subr.bf16.mxu1 %v20315_v61  ;;  %v20393_v61 = vld [vmem:[#allocation2 + $0x1638] ss:$40 sps:$4 sm:$0xff]  }
 0x1a0   :  { %11979 = vmatpush1.bf16.msra.mxu0 %v20310_v62  ;;  %v20398_v62 = vld [vmem:[#allocation2 + $0x1684] ss:$40 sps:$4 sm:$0xff]  }
 0x1a1   :  { %12471 = vmatpush1.bf16.msra.mxu1 %v20313_v63  ;;  %11980 = vmatprep.subr.bf16.mxu0 %v20318_v0  ;;  %v20401_v63 = vld [vmem:[#allocation2 + $0x168c] ss:$40 sps:$4 sm:$0xff]   ;;  %v20396_v0 = vld [vmem:[#allocation2 + $0x1680] ss:$40 sps:$4 sm:$0xff]  }
 0x1a2   :  { %12472 = vmatprep.subr.bf16.mxu1 %v20321_v1  ;;  %v20399_v1 = vld [vmem:[#allocation2 + $0x1688] ss:$40 sps:$4 sm:$0xff]  }
 0x1a4   :  { %11981 = vmatpush1.bf16.msra.mxu0 %v20316_v2  ;;  %v20404_v2 = vld [vmem:[#allocation2 + $0x16d4] ss:$40 sps:$4 sm:$0xff]  }
 0x1a5   :  { %12473 = vmatpush1.bf16.msra.mxu1 %v20319_v3  ;;  %11982 = vmatprep.subr.bf16.mxu0 %v20324_v4  ;;  %v20407_v3 = vld [vmem:[#allocation2 + $0x16dc] ss:$40 sps:$4 sm:$0xff]   ;;  %v20402_v4 = vld [vmem:[#allocation2 + $0x16d0] ss:$40 sps:$4 sm:$0xff]  }
 0x1a6   :  { %12474 = vmatprep.subr.bf16.mxu1 %v20327_v6  ;;  %v20405_v6 = vld [vmem:[#allocation2 + $0x16d8] ss:$40 sps:$4 sm:$0xff]  }
 0x1a8   :  { %11983 = vmatpush1.bf16.msra.mxu0 %v20322_v7  ;;  %v20410_v7 = vld [vmem:[#allocation2 + $0x1724] ss:$40 sps:$4 sm:$0xff]  }
 0x1a9   :  { %12475 = vmatpush1.bf16.msra.mxu1 %v20325_v8  ;;  %11984 = vmatprep.subr.bf16.mxu0 %v20330_v9  ;;  %v20413_v8 = vld [vmem:[#allocation2 + $0x172c] ss:$40 sps:$4 sm:$0xff]   ;;  %v20408_v9 = vld [vmem:[#allocation2 + $0x1720] ss:$40 sps:$4 sm:$0xff]  }
 0x1aa   :  { %12476 = vmatprep.subr.bf16.mxu1 %v20333_v11  ;;  %v20411_v11 = vld [vmem:[#allocation2 + $0x1728] ss:$40 sps:$4 sm:$0xff]  }
 0x1ac   :  { %11985 = vmatpush1.bf16.msra.mxu0 %v20328_v12  ;;  %v20416_v12 = vld [vmem:[#allocation2 + $0x1774] ss:$40 sps:$4 sm:$0xff]  }
 0x1ad   :  { %12477 = vmatpush1.bf16.msra.mxu1 %v20331_v14  ;;  %11986 = vmatprep.subr.bf16.mxu0 %v20336_v16  ;;  %v20419_v14 = vld [vmem:[#allocation2 + $0x177c] ss:$40 sps:$4 sm:$0xff]   ;;  %v20414_v16 = vld [vmem:[#allocation2 + $0x1770] ss:$40 sps:$4 sm:$0xff]  }
 0x1ae   :  { %12478 = vmatprep.subr.bf16.mxu1 %v20339_v17  ;;  %v20417_v17 = vld [vmem:[#allocation2 + $0x1778] ss:$40 sps:$4 sm:$0xff]  }
 0x1b0   :  { %11987 = vmatpush1.bf16.msra.mxu0 %v20334_v18  ;;  %v20422_v18 = vld [vmem:[#allocation2 + $0x17c4] ss:$40 sps:$4 sm:$0xff]  }
 0x1b1   :  { %12479 = vmatpush1.bf16.msra.mxu1 %v20337_v19  ;;  %11988 = vmatprep.subr.bf16.mxu0 %v20342_v22  ;;  %v20425_v19 = vld [vmem:[#allocation2 + $0x17cc] ss:$40 sps:$4 sm:$0xff]   ;;  %v20420_v22 = vld [vmem:[#allocation2 + $0x17c0] ss:$40 sps:$4 sm:$0xff]  }
 0x1b2   :  { %12480 = vmatprep.subr.bf16.mxu1 %v20345_v23  ;;  %v20423_v23 = vld [vmem:[#allocation2 + $0x17c8] ss:$40 sps:$4 sm:$0xff]  }
 0x1b4   :  { %11989 = vmatpush1.bf16.msra.mxu0 %v20340_v13  ;;  %v20428_v13 = vld [vmem:[#allocation2 + $0x1814] ss:$40 sps:$4 sm:$0xff]  }
 0x1b5   :  { %12481 = vmatpush1.bf16.msra.mxu1 %v20343_v25  ;;  %11999 = vmatprep.subr.bf16.mxu0 %v20349_v26  ;;  %v20431_v25 = vld [vmem:[#allocation2 + $0x181c] ss:$40 sps:$4 sm:$0xff]   ;;  %v20426_v26 = vld [vmem:[#allocation2 + $0x1810] ss:$40 sps:$4 sm:$0xff]  }
 0x1b6   :  { %12491 = vmatprep.subr.bf16.mxu1 %v20352_v27  ;;  %v20429_v27 = vld [vmem:[#allocation2 + $0x1818] ss:$40 sps:$4 sm:$0xff]  }
 0x1b7   :  { %11991 = vmatmul.mubr.bf16.vlgmr.msra.gmra.mrb[0].mxu0 %v23886_v29 }
 0x1b8   :  { %12483 = vmatmul.mubr.bf16.vlgmr.msra.gmra.mrb[0].mxu1 %v23886_v29  ;;  %12000 = vmatpush1.bf16.msra.mxu0 %v20347_v28  ;;  %v20434_v28 = vld [vmem:[#allocation2 + $0x1864] ss:$40 sps:$4 sm:$0xff]  }
 0x1b9   :  { %12492 = vmatpush1.bf16.msra.mxu1 %v20350_v32  ;;  %12001 = vmatprep.subr.bf16.mxu0 %v20356_v33  ;;  %v20437_v32 = vld [vmem:[#allocation2 + $0x186c] ss:$40 sps:$4 sm:$0xff]   ;;  %v20432_v33 = vld [vmem:[#allocation2 + $0x1860] ss:$40 sps:$4 sm:$0xff]  }
 0x1ba   :  { %12493 = vmatprep.subr.bf16.mxu1 %v20359_v34  ;;  %12031 = vmatprep.mubr.bf16.mxu0 %v23895_v35  ;;  %v20435_v34 = vld [vmem:[#allocation2 + $0x1868] ss:$40 sps:$4 sm:$0xff]  }
 0x1bb   :  { %12523 = vmatprep.mubr.bf16.mxu1 %v23895_v35 }
 0x1bc   :  { %12002 = vmatpush1.bf16.msra.mxu0 %v20354_v21  ;;  %v20440_v21 = vld [vmem:[#allocation2 + $0x18b4] ss:$40 sps:$4 sm:$0xff]  }
 0x1bd   :  { %12494 = vmatpush1.bf16.msra.mxu1 %v20357_v36  ;;  %12003 = vmatprep.subr.bf16.mxu0 %v20362_v37  ;;  %v20443_v36 = vld [vmem:[#allocation2 + $0x18bc] ss:$40 sps:$4 sm:$0xff]   ;;  %v20438_v37 = vld [vmem:[#allocation2 + $0x18b0] ss:$40 sps:$4 sm:$0xff]  }
 0x1be   :  { %12495 = vmatprep.subr.bf16.mxu1 %v20365_v38  ;;  %v20441_v38 = vld [vmem:[#allocation2 + $0x18b8] ss:$40 sps:$4 sm:$0xff]  }
 0x1c0   :  { %12004 = vmatpush1.bf16.msra.mxu0 %v20360_v39  ;;  %v20447_v39 = vld [vmem:[#allocation2 + $0x1904] ss:$40 sps:$4 sm:$0xff]  }
 0x1c1   :  { %12496 = vmatpush1.bf16.msra.mxu1 %v20363_v40  ;;  %12005 = vmatprep.subr.bf16.mxu0 %v20368_v41  ;;  %v20450_v40 = vld [vmem:[#allocation2 + $0x190c] ss:$40 sps:$4 sm:$0xff]  }
 0x1c2   :  { %12497 = vmatprep.subr.bf16.mxu1 %v20371_v42  ;;  %v23904_v41 = vld [vmem:[%s24225_s0 + $0x28] sm:$0xff]  ;;  %v23908_v42 = vcombine.low %v23891_v31, %v23891_v31  ;;  %v20452_v31 = vld [vmem:[#allocation2 + $0x1950] ss:$40 sps:$4 sm:$0xff]  }
 0x1c4   :  { %12006 = vmatpush1.bf16.msra.mxu0 %v20366_v43  ;;  %v20445_v43 = vld [vmem:[#allocation2 + $0x1900] ss:$40 sps:$4 sm:$0xff]  }
 0x1c5   :  { %12498 = vmatpush1.bf16.msra.mxu1 %v20369_v44  ;;  %12007 = vmatprep.subr.bf16.mxu0 %v20374_v45  ;;  %v20448_v44 = vld [vmem:[#allocation2 + $0x1908] ss:$40 sps:$4 sm:$0xff]   ;;  %v20454_v45 = vld [vmem:[#allocation2 + $0x1954] ss:$40 sps:$4 sm:$0xff]  }
 0x1c6   :  { %12499 = vmatprep.subr.bf16.mxu1 %v20377_v46  ;;  %v20457_v46 = vld [vmem:[#allocation2 + $0x195c] ss:$40 sps:$4 sm:$0xff]  }
 0x1c8   :  { %12008 = vmatpush1.bf16.msra.mxu0 %v20372_v47  ;;  %v23912_v47 = vcombine.high %v23904_v41, %v23904_v41 }
 0x1c9   :  { %12500 = vmatpush1.bf16.msra.mxu1 %v20375_v49  ;;  %12009 = vmatprep.subr.bf16.mxu0 %v20380_v50  ;;  %v20455_v49 = vld [vmem:[#allocation2 + $0x1958] ss:$40 sps:$4 sm:$0xff]   ;;  %v20460_v50 = vld [vmem:[#allocation2 + $0x19a4] ss:$40 sps:$4 sm:$0xff]  }
 0x1ca   :  { %12501 = vmatprep.subr.bf16.mxu1 %v20383_v51  ;;  %v20463_v51 = vld [vmem:[#allocation2 + $0x19ac] ss:$40 sps:$4 sm:$0xff]  }
 0x1cc   :  { %12010 = vmatpush1.bf16.msra.mxu0 %v20378_v52  ;;  %v20458_v52 = vld [vmem:[#allocation2 + $0x19a0] ss:$40 sps:$4 sm:$0xff]  }
 0x1cd   :  { %12502 = vmatpush1.bf16.msra.mxu1 %v20381_v53  ;;  %12011 = vmatprep.subr.bf16.mxu0 %v20386_v54  ;;  %v20461_v53 = vld [vmem:[#allocation2 + $0x19a8] ss:$40 sps:$4 sm:$0xff]   ;;  %v20466_v54 = vld [vmem:[#allocation2 + $0x19f4] ss:$40 sps:$4 sm:$0xff]  }
 0x1ce   :  { %12503 = vmatprep.subr.bf16.mxu1 %v20389_v55  ;;  %v20469_v55 = vld [vmem:[#allocation2 + $0x19fc] ss:$40 sps:$4 sm:$0xff]  }
 0x1d0   :  { %12012 = vmatpush1.bf16.msra.mxu0 %v20384_v56  ;;  %v20464_v56 = vld [vmem:[#allocation2 + $0x19f0] ss:$40 sps:$4 sm:$0xff]  }
 0x1d1   :  { %12504 = vmatpush1.bf16.msra.mxu1 %v20387_v57  ;;  %12013 = vmatprep.subr.bf16.mxu0 %v20392_v58  ;;  %v20467_v57 = vld [vmem:[#allocation2 + $0x19f8] ss:$40 sps:$4 sm:$0xff]   ;;  %v20472_v58 = vld [vmem:[#allocation2 + $0x1a44] ss:$40 sps:$4 sm:$0xff]  }
 0x1d2   :  { %12505 = vmatprep.subr.bf16.mxu1 %v20395_v59  ;;  %v20475_v59 = vld [vmem:[#allocation2 + $0x1a4c] ss:$40 sps:$4 sm:$0xff]  }
 0x1d4   :  { %12014 = vmatpush1.bf16.msra.mxu0 %v20390_v60  ;;  %v20470_v60 = vld [vmem:[#allocation2 + $0x1a40] ss:$40 sps:$4 sm:$0xff]  }
 0x1d5   :  { %12506 = vmatpush1.bf16.msra.mxu1 %v20393_v61  ;;  %12015 = vmatprep.subr.bf16.mxu0 %v20398_v62  ;;  %v20473_v61 = vld [vmem:[#allocation2 + $0x1a48] ss:$40 sps:$4 sm:$0xff]   ;;  %v20478_v62 = vld [vmem:[#allocation2 + $0x1a94] ss:$40 sps:$4 sm:$0xff]  }
 0x1d6   :  { %12507 = vmatprep.subr.bf16.mxu1 %v20401_v63  ;;  %v20481_v63 = vld [vmem:[#allocation2 + $0x1a9c] ss:$40 sps:$4 sm:$0xff]  }
 0x1d8   :  { %12016 = vmatpush1.bf16.msra.mxu0 %v20396_v0  ;;  %v20476_v0 = vld [vmem:[#allocation2 + $0x1a90] ss:$40 sps:$4 sm:$0xff]  }
 0x1d9   :  { %12508 = vmatpush1.bf16.msra.mxu1 %v20399_v1  ;;  %12017 = vmatprep.subr.bf16.mxu0 %v20404_v2  ;;  %v20479_v1 = vld [vmem:[#allocation2 + $0x1a98] ss:$40 sps:$4 sm:$0xff]   ;;  %v20484_v2 = vld [vmem:[#allocation2 + $0x1ae4] ss:$40 sps:$4 sm:$0xff]  }
 0x1da   :  { %12509 = vmatprep.subr.bf16.mxu1 %v20407_v3  ;;  %v20487_v3 = vld [vmem:[#allocation2 + $0x1aec] ss:$40 sps:$4 sm:$0xff]  }
 0x1dc   :  { %12018 = vmatpush1.bf16.msra.mxu0 %v20402_v4  ;;  %v20482_v4 = vld [vmem:[#allocation2 + $0x1ae0] ss:$40 sps:$4 sm:$0xff]  }
 0x1dd   :  { %12510 = vmatpush1.bf16.msra.mxu1 %v20405_v6  ;;  %12019 = vmatprep.subr.bf16.mxu0 %v20410_v7  ;;  %v20485_v6 = vld [vmem:[#allocation2 + $0x1ae8] ss:$40 sps:$4 sm:$0xff]   ;;  %v20490_v7 = vld [vmem:[#allocation2 + $0x1b34] ss:$40 sps:$4 sm:$0xff]  }
 0x1de   :  { %12511 = vmatprep.subr.bf16.mxu1 %v20413_v8  ;;  %v20493_v8 = vld [vmem:[#allocation2 + $0x1b3c] ss:$40 sps:$4 sm:$0xff]  }
 0x1e0   :  { %12020 = vmatpush1.bf16.msra.mxu0 %v20408_v9  ;;  %v20488_v9 = vld [vmem:[#allocation2 + $0x1b30] ss:$40 sps:$4 sm:$0xff]  }
 0x1e1   :  { %12512 = vmatpush1.bf16.msra.mxu1 %v20411_v11  ;;  %12021 = vmatprep.subr.bf16.mxu0 %v20416_v12  ;;  %v20491_v11 = vld [vmem:[#allocation2 + $0x1b38] ss:$40 sps:$4 sm:$0xff]   ;;  %v20496_v12 = vld [vmem:[#allocation2 + $0x1b84] ss:$40 sps:$4 sm:$0xff]  }
 0x1e2   :  { %12513 = vmatprep.subr.bf16.mxu1 %v20419_v14  ;;  %v20499_v14 = vld [vmem:[#allocation2 + $0x1b8c] ss:$40 sps:$4 sm:$0xff]  }
 0x1e4   :  { %12022 = vmatpush1.bf16.msra.mxu0 %v20414_v16  ;;  %v20494_v16 = vld [vmem:[#allocation2 + $0x1b80] ss:$40 sps:$4 sm:$0xff]  }
 0x1e5   :  { %12514 = vmatpush1.bf16.msra.mxu1 %v20417_v17  ;;  %12023 = vmatprep.subr.bf16.mxu0 %v20422_v18  ;;  %v20497_v17 = vld [vmem:[#allocation2 + $0x1b88] ss:$40 sps:$4 sm:$0xff]   ;;  %v20502_v18 = vld [vmem:[#allocation2 + $0x1bd4] ss:$40 sps:$4 sm:$0xff]  }
 0x1e6   :  { %12515 = vmatprep.subr.bf16.mxu1 %v20425_v19  ;;  %v20505_v19 = vld [vmem:[#allocation2 + $0x1bdc] ss:$40 sps:$4 sm:$0xff]  }
 0x1e8   :  { %12024 = vmatpush1.bf16.msra.mxu0 %v20420_v22  ;;  %v20500_v22 = vld [vmem:[#allocation2 + $0x1bd0] ss:$40 sps:$4 sm:$0xff]  }
 0x1e9   :  { %12516 = vmatpush1.bf16.msra.mxu1 %v20423_v23  ;;  %12025 = vmatprep.subr.bf16.mxu0 %v20428_v13  ;;  %v20503_v23 = vld [vmem:[#allocation2 + $0x1bd8] ss:$40 sps:$4 sm:$0xff]   ;;  %v20508_v13 = vld [vmem:[#allocation2 + $0x1c24] ss:$40 sps:$4 sm:$0xff]  }
 0x1ea   :  { %12517 = vmatprep.subr.bf16.mxu1 %v20431_v25  ;;  %v20511_v25 = vld [vmem:[#allocation2 + $0x1c2c] ss:$40 sps:$4 sm:$0xff]  }
 0x1ec   :  { %12026 = vmatpush1.bf16.msra.mxu0 %v20426_v26  ;;  %v20506_v26 = vld [vmem:[#allocation2 + $0x1c20] ss:$40 sps:$4 sm:$0xff]  }
 0x1ed   :  { %12518 = vmatpush1.bf16.msra.mxu1 %v20429_v27  ;;  %12027 = vmatprep.subr.bf16.mxu0 %v20434_v28  ;;  %v20509_v27 = vld [vmem:[#allocation2 + $0x1c28] ss:$40 sps:$4 sm:$0xff]   ;;  %v20514_v28 = vld [vmem:[#allocation2 + $0x1c74] ss:$40 sps:$4 sm:$0xff]  }
 0x1ee   :  { %12519 = vmatprep.subr.bf16.mxu1 %v20437_v32  ;;  %v20517_v32 = vld [vmem:[#allocation2 + $0x1c7c] ss:$40 sps:$4 sm:$0xff]  }
 0x1f0   :  { %12028 = vmatpush1.bf16.msra.mxu0 %v20432_v33  ;;  %v20512_v33 = vld [vmem:[#allocation2 + $0x1c70] ss:$40 sps:$4 sm:$0xff]  }
 0x1f1   :  { %12520 = vmatpush1.bf16.msra.mxu1 %v20435_v34  ;;  %12029 = vmatprep.subr.bf16.mxu0 %v20440_v21  ;;  %v20515_v34 = vld [vmem:[#allocation2 + $0x1c78] ss:$40 sps:$4 sm:$0xff]   ;;  %v20520_v21 = vld [vmem:[#allocation2 + $0x1cc4] ss:$40 sps:$4 sm:$0xff]  }
 0x1f2   :  { %12521 = vmatprep.subr.bf16.mxu1 %v20443_v36  ;;  %v20523_v36 = vld [vmem:[#allocation2 + $0x1ccc] ss:$40 sps:$4 sm:$0xff]  }
 0x1f4   :  { %12030 = vmatpush1.bf16.msra.mxu0 %v20438_v37  ;;  %v20518_v37 = vld [vmem:[#allocation2 + $0x1cc0] ss:$40 sps:$4 sm:$0xff]  }
 0x1f5   :  { %12522 = vmatpush1.bf16.msra.mxu1 %v20441_v38  ;;  %12040 = vmatprep.subr.bf16.mxu0 %v20447_v39  ;;  %v20521_v38 = vld [vmem:[#allocation2 + $0x1cc8] ss:$40 sps:$4 sm:$0xff]   ;;  %v20526_v39 = vld [vmem:[#allocation2 + $0x1d14] ss:$40 sps:$4 sm:$0xff]  }
 0x1f6   :  { %12532 = vmatprep.subr.bf16.mxu1 %v20450_v40  ;;  %v20529_v40 = vld [vmem:[#allocation2 + $0x1d1c] ss:$40 sps:$4 sm:$0xff]  }
 0x1f7   :  { %12032 = vmatmul.mubr.bf16.vlgmr.msra.gmra.mrb[0].mxu0 %v23908_v42 }
 0x1f8   :  { %12524 = vmatmul.mubr.bf16.vlgmr.msra.gmra.mrb[0].mxu1 %v23908_v42  ;;  %12041 = vmatpush1.bf16.msra.mxu0 %v20445_v43  ;;  %v20524_v43 = vld [vmem:[#allocation2 + $0x1d10] ss:$40 sps:$4 sm:$0xff]  }
 0x1f9   :  { %12533 = vmatpush1.bf16.msra.mxu1 %v20448_v44  ;;  %12042 = vmatprep.subr.bf16.mxu0 %v20454_v45  ;;  %v20527_v44 = vld [vmem:[#allocation2 + $0x1d18] ss:$40 sps:$4 sm:$0xff]   ;;  %v20532_v45 = vld [vmem:[#allocation2 + $0x1d64] ss:$40 sps:$4 sm:$0xff]  }
 0x1fa   :  { %12534 = vmatprep.subr.bf16.mxu1 %v20457_v46  ;;  %12072 = vmatprep.mubr.bf16.mxu0 %v23912_v47  ;;  %v20535_v46 = vld [vmem:[#allocation2 + $0x1d6c] ss:$40 sps:$4 sm:$0xff]  }
 0x1fb   :  { %12564 = vmatprep.mubr.bf16.mxu1 %v23912_v47 }
 0x1fc   :  { %12043 = vmatpush1.bf16.msra.mxu0 %v20452_v31  ;;  %v20530_v31 = vld [vmem:[#allocation2 + $0x1d60] ss:$40 sps:$4 sm:$0xff]  }
 0x1fd   :  { %12535 = vmatpush1.bf16.msra.mxu1 %v20455_v49  ;;  %12044 = vmatprep.subr.bf16.mxu0 %v20460_v50  ;;  %v20533_v49 = vld [vmem:[#allocation2 + $0x1d68] ss:$40 sps:$4 sm:$0xff]   ;;  %v20538_v50 = vld [vmem:[#allocation2 + $0x1db4] ss:$40 sps:$4 sm:$0xff]  }
 0x1fe   :  { %12536 = vmatprep.subr.bf16.mxu1 %v20463_v51  ;;  %v20541_v51 = vld [vmem:[#allocation2 + $0x1dbc] ss:$40 sps:$4 sm:$0xff]  }
 0x200   :  { %12045 = vmatpush1.bf16.msra.mxu0 %v20458_v52  ;;  %v20536_v52 = vld [vmem:[#allocation2 + $0x1db0] ss:$40 sps:$4 sm:$0xff]  }
 0x201   :  { %12537 = vmatpush1.bf16.msra.mxu1 %v20461_v53  ;;  %12046 = vmatprep.subr.bf16.mxu0 %v20466_v54  ;;  %v20539_v53 = vld [vmem:[#allocation2 + $0x1db8] ss:$40 sps:$4 sm:$0xff]   ;;  %v20545_v54 = vld [vmem:[#allocation2 + $0x1e04] ss:$40 sps:$4 sm:$0xff]  }
 0x202   :  { %12538 = vmatprep.subr.bf16.mxu1 %v20469_v55  ;;  %v20548_v55 = vld [vmem:[#allocation2 + $0x1e0c] ss:$40 sps:$4 sm:$0xff]  }
 0x204   :  { %12047 = vmatpush1.bf16.msra.mxu0 %v20464_v56  ;;  %v23921_v56 = vld [vmem:[%s24225_s0 + $0x30] sm:$0xff] }
 0x205   :  { %12539 = vmatpush1.bf16.msra.mxu1 %v20467_v57  ;;  %12048 = vmatprep.subr.bf16.mxu0 %v20472_v58  ;;  %v23925_v57 = vcombine.low %v23904_v41, %v23904_v41  ;;  %v20543_v58 = vld [vmem:[#allocation2 + $0x1e00] ss:$40 sps:$4 sm:$0xff]   ;;  %v20550_v41 = vld [vmem:[#allocation2 + $0x1e50] ss:$40 sps:$4 sm:$0xff]  }
 0x206   :  { %12540 = vmatprep.subr.bf16.mxu1 %v20475_v59  ;;  %v20546_v59 = vld [vmem:[#allocation2 + $0x1e08] ss:$40 sps:$4 sm:$0xff]  }
 0x208   :  { %12049 = vmatpush1.bf16.msra.mxu0 %v20470_v60  ;;  %v20552_v60 = vld [vmem:[#allocation2 + $0x1e54] ss:$40 sps:$4 sm:$0xff]  }
 0x209   :  { %12541 = vmatpush1.bf16.msra.mxu1 %v20473_v61  ;;  %12050 = vmatprep.subr.bf16.mxu0 %v20478_v62  ;;  %v20555_v61 = vld [vmem:[#allocation2 + $0x1e5c] ss:$40 sps:$4 sm:$0xff]   ;;  %v23929_v62 = vcombine.high %v23921_v56, %v23921_v56 }
 0x20a   :  { %12542 = vmatprep.subr.bf16.mxu1 %v20481_v63  ;;  %v20553_v63 = vld [vmem:[#allocation2 + $0x1e58] ss:$40 sps:$4 sm:$0xff]  }
 0x20c   :  { %12051 = vmatpush1.bf16.msra.mxu0 %v20476_v0  ;;  %v20558_v0 = vld [vmem:[#allocation2 + $0x1ea4] ss:$40 sps:$4 sm:$0xff]  }
 0x20d   :  { %12543 = vmatpush1.bf16.msra.mxu1 %v20479_v1  ;;  %12052 = vmatprep.subr.bf16.mxu0 %v20484_v2  ;;  %v20561_v1 = vld [vmem:[#allocation2 + $0x1eac] ss:$40 sps:$4 sm:$0xff]   ;;  %v20556_v2 = vld [vmem:[#allocation2 + $0x1ea0] ss:$40 sps:$4 sm:$0xff]  }
 0x20e   :  { %12544 = vmatprep.subr.bf16.mxu1 %v20487_v3  ;;  %v20559_v3 = vld [vmem:[#allocation2 + $0x1ea8] ss:$40 sps:$4 sm:$0xff]  }
 0x210   :  { %12053 = vmatpush1.bf16.msra.mxu0 %v20482_v4  ;;  %v20564_v4 = vld [vmem:[#allocation2 + $0x1ef4] ss:$40 sps:$4 sm:$0xff]  }
 0x211   :  { %12545 = vmatpush1.bf16.msra.mxu1 %v20485_v6  ;;  %12054 = vmatprep.subr.bf16.mxu0 %v20490_v7  ;;  %v20567_v6 = vld [vmem:[#allocation2 + $0x1efc] ss:$40 sps:$4 sm:$0xff]   ;;  %v20562_v7 = vld [vmem:[#allocation2 + $0x1ef0] ss:$40 sps:$4 sm:$0xff]  }
 0x212   :  { %12546 = vmatprep.subr.bf16.mxu1 %v20493_v8  ;;  %v20565_v8 = vld [vmem:[#allocation2 + $0x1ef8] ss:$40 sps:$4 sm:$0xff]  }
 0x214   :  { %12055 = vmatpush1.bf16.msra.mxu0 %v20488_v9  ;;  %v20570_v9 = vld [vmem:[#allocation2 + $0x1f44] ss:$40 sps:$4 sm:$0xff]  }
 0x215   :  { %12547 = vmatpush1.bf16.msra.mxu1 %v20491_v11  ;;  %12056 = vmatprep.subr.bf16.mxu0 %v20496_v12  ;;  %v20573_v11 = vld [vmem:[#allocation2 + $0x1f4c] ss:$40 sps:$4 sm:$0xff]   ;;  %v20568_v12 = vld [vmem:[#allocation2 + $0x1f40] ss:$40 sps:$4 sm:$0xff]  }
 0x216   :  { %12548 = vmatprep.subr.bf16.mxu1 %v20499_v14  ;;  %v20571_v14 = vld [vmem:[#allocation2 + $0x1f48] ss:$40 sps:$4 sm:$0xff]  }
 0x218   :  { %12057 = vmatpush1.bf16.msra.mxu0 %v20494_v16  ;;  %v20576_v16 = vld [vmem:[#allocation2 + $0x1f94] ss:$40 sps:$4 sm:$0xff]  }
 0x219   :  { %12549 = vmatpush1.bf16.msra.mxu1 %v20497_v17  ;;  %12058 = vmatprep.subr.bf16.mxu0 %v20502_v18  ;;  %v20579_v17 = vld [vmem:[#allocation2 + $0x1f9c] ss:$40 sps:$4 sm:$0xff]   ;;  %v20574_v18 = vld [vmem:[#allocation2 + $0x1f90] ss:$40 sps:$4 sm:$0xff]  }
 0x21a   :  { %12550 = vmatprep.subr.bf16.mxu1 %v20505_v19  ;;  %v20577_v19 = vld [vmem:[#allocation2 + $0x1f98] ss:$40 sps:$4 sm:$0xff]  }
 0x21c   :  { %12059 = vmatpush1.bf16.msra.mxu0 %v20500_v22  ;;  %v20582_v22 = vld [vmem:[#allocation2 + $0x1fe4] ss:$40 sps:$4 sm:$0xff]  }
 0x21d   :  { %12551 = vmatpush1.bf16.msra.mxu1 %v20503_v23  ;;  %12060 = vmatprep.subr.bf16.mxu0 %v20508_v13  ;;  %v20585_v23 = vld [vmem:[#allocation2 + $0x1fec] ss:$40 sps:$4 sm:$0xff]   ;;  %v20580_v13 = vld [vmem:[#allocation2 + $0x1fe0] ss:$40 sps:$4 sm:$0xff]  }
 0x21e   :  { %12552 = vmatprep.subr.bf16.mxu1 %v20511_v25  ;;  %v20583_v25 = vld [vmem:[#allocation2 + $0x1fe8] ss:$40 sps:$4 sm:$0xff]  }
 0x220   :  { %12061 = vmatpush1.bf16.msra.mxu0 %v20506_v26  ;;  %v20588_v26 = vld [vmem:[#allocation2 + $0x2034] ss:$40 sps:$4 sm:$0xff]  }
 0x221   :  { %12553 = vmatpush1.bf16.msra.mxu1 %v20509_v27  ;;  %12062 = vmatprep.subr.bf16.mxu0 %v20514_v28  ;;  %v20591_v27 = vld [vmem:[#allocation2 + $0x203c] ss:$40 sps:$4 sm:$0xff]   ;;  %v20586_v28 = vld [vmem:[#allocation2 + $0x2030] ss:$40 sps:$4 sm:$0xff]  }
 0x222   :  { %12554 = vmatprep.subr.bf16.mxu1 %v20517_v32  ;;  %v20589_v32 = vld [vmem:[#allocation2 + $0x2038] ss:$40 sps:$4 sm:$0xff]  }
 0x224   :  { %12063 = vmatpush1.bf16.msra.mxu0 %v20512_v33  ;;  %v20594_v33 = vld [vmem:[#allocation2 + $0x2084] ss:$40 sps:$4 sm:$0xff]  }
 0x225   :  { %12555 = vmatpush1.bf16.msra.mxu1 %v20515_v34  ;;  %12064 = vmatprep.subr.bf16.mxu0 %v20520_v21  ;;  %v20597_v34 = vld [vmem:[#allocation2 + $0x208c] ss:$40 sps:$4 sm:$0xff]   ;;  %v20592_v21 = vld [vmem:[#allocation2 + $0x2080] ss:$40 sps:$4 sm:$0xff]  }
 0x226   :  { %12556 = vmatprep.subr.bf16.mxu1 %v20523_v36  ;;  %v20595_v36 = vld [vmem:[#allocation2 + $0x2088] ss:$40 sps:$4 sm:$0xff]  }
 0x228   :  { %12065 = vmatpush1.bf16.msra.mxu0 %v20518_v37  ;;  %v20600_v37 = vld [vmem:[#allocation2 + $0x20d4] ss:$40 sps:$4 sm:$0xff]  }
 0x229   :  { %12557 = vmatpush1.bf16.msra.mxu1 %v20521_v38  ;;  %12066 = vmatprep.subr.bf16.mxu0 %v20526_v39  ;;  %v20603_v38 = vld [vmem:[#allocation2 + $0x20dc] ss:$40 sps:$4 sm:$0xff]   ;;  %v20598_v39 = vld [vmem:[#allocation2 + $0x20d0] ss:$40 sps:$4 sm:$0xff]  }
 0x22a   :  { %12558 = vmatprep.subr.bf16.mxu1 %v20529_v40  ;;  %v20601_v40 = vld [vmem:[#allocation2 + $0x20d8] ss:$40 sps:$4 sm:$0xff]  }
 0x22c   :  { %12067 = vmatpush1.bf16.msra.mxu0 %v20524_v43  ;;  %v20606_v43 = vld [vmem:[#allocation2 + $0x2124] ss:$40 sps:$4 sm:$0xff]  }
 0x22d   :  { %12559 = vmatpush1.bf16.msra.mxu1 %v20527_v44  ;;  %12068 = vmatprep.subr.bf16.mxu0 %v20532_v45  ;;  %v20609_v44 = vld [vmem:[#allocation2 + $0x212c] ss:$40 sps:$4 sm:$0xff]   ;;  %v20604_v45 = vld [vmem:[#allocation2 + $0x2120] ss:$40 sps:$4 sm:$0xff]  }
 0x22e   :  { %12560 = vmatprep.subr.bf16.mxu1 %v20535_v46  ;;  %v20607_v46 = vld [vmem:[#allocation2 + $0x2128] ss:$40 sps:$4 sm:$0xff]  }
 0x230   :  { %12069 = vmatpush1.bf16.msra.mxu0 %v20530_v31  ;;  %v20612_v31 = vld [vmem:[#allocation2 + $0x2174] ss:$40 sps:$4 sm:$0xff]  }
 0x231   :  { %12561 = vmatpush1.bf16.msra.mxu1 %v20533_v49  ;;  %12070 = vmatprep.subr.bf16.mxu0 %v20538_v50  ;;  %v20615_v49 = vld [vmem:[#allocation2 + $0x217c] ss:$40 sps:$4 sm:$0xff]   ;;  %v20610_v50 = vld [vmem:[#allocation2 + $0x2170] ss:$40 sps:$4 sm:$0xff]  }
 0x232   :  { %12562 = vmatprep.subr.bf16.mxu1 %v20541_v51  ;;  %v20613_v51 = vld [vmem:[#allocation2 + $0x2178] ss:$40 sps:$4 sm:$0xff]  }
 0x234   :  { %12071 = vmatpush1.bf16.msra.mxu0 %v20536_v52  ;;  %v20618_v52 = vld [vmem:[#allocation2 + $0x21c4] ss:$40 sps:$4 sm:$0xff]  }
 0x235   :  { %12563 = vmatpush1.bf16.msra.mxu1 %v20539_v53  ;;  %12081 = vmatprep.subr.bf16.mxu0 %v20545_v54  ;;  %v20621_v53 = vld [vmem:[#allocation2 + $0x21cc] ss:$40 sps:$4 sm:$0xff]   ;;  %v20616_v54 = vld [vmem:[#allocation2 + $0x21c0] ss:$40 sps:$4 sm:$0xff]  }
 0x236   :  { %12573 = vmatprep.subr.bf16.mxu1 %v20548_v55  ;;  %v20619_v55 = vld [vmem:[#allocation2 + $0x21c8] ss:$40 sps:$4 sm:$0xff]  }
 0x237   :  { %12073 = vmatmul.mubr.bf16.vlgmr.msra.gmra.mrb[0].mxu0 %v23925_v57 }
 0x238   :  { %12565 = vmatmul.mubr.bf16.vlgmr.msra.gmra.mrb[0].mxu1 %v23925_v57  ;;  %12082 = vmatpush1.bf16.msra.mxu0 %v20543_v58  ;;  %v20624_v58 = vld [vmem:[#allocation2 + $0x2214] ss:$40 sps:$4 sm:$0xff]  }
 0x239   :  { %12574 = vmatpush1.bf16.msra.mxu1 %v20546_v59  ;;  %12083 = vmatprep.subr.bf16.mxu0 %v20552_v60  ;;  %v20627_v59 = vld [vmem:[#allocation2 + $0x221c] ss:$40 sps:$4 sm:$0xff]   ;;  %v20622_v60 = vld [vmem:[#allocation2 + $0x2210] ss:$40 sps:$4 sm:$0xff]  }
 0x23a   :  { %12575 = vmatprep.subr.bf16.mxu1 %v20555_v61  ;;  %12113 = vmatprep.mubr.bf16.mxu0 %v23929_v62  ;;  %v20625_v61 = vld [vmem:[#allocation2 + $0x2218] ss:$40 sps:$4 sm:$0xff]  }
 0x23b   :  { %12605 = vmatprep.mubr.bf16.mxu1 %v23929_v62 }
 0x23c   :  { %12084 = vmatpush1.bf16.msra.mxu0 %v20550_v41  ;;  %v20630_v41 = vld [vmem:[#allocation2 + $0x2264] ss:$40 sps:$4 sm:$0xff]  }
 0x23d   :  { %12576 = vmatpush1.bf16.msra.mxu1 %v20553_v63  ;;  %12085 = vmatprep.subr.bf16.mxu0 %v20558_v0  ;;  %v20633_v63 = vld [vmem:[#allocation2 + $0x226c] ss:$40 sps:$4 sm:$0xff]   ;;  %v20628_v0 = vld [vmem:[#allocation2 + $0x2260] ss:$40 sps:$4 sm:$0xff]  }
 0x23e   :  { %12577 = vmatprep.subr.bf16.mxu1 %v20561_v1  ;;  %v20631_v1 = vld [vmem:[#allocation2 + $0x2268] ss:$40 sps:$4 sm:$0xff]  }
 0x240   :  { %12086 = vmatpush1.bf16.msra.mxu0 %v20556_v2  ;;  %v20636_v2 = vld [vmem:[#allocation2 + $0x22b4] ss:$40 sps:$4 sm:$0xff]  }
 0x241   :  { %12578 = vmatpush1.bf16.msra.mxu1 %v20559_v3  ;;  %12087 = vmatprep.subr.bf16.mxu0 %v20564_v4  ;;  %v20639_v3 = vld [vmem:[#allocation2 + $0x22bc] ss:$40 sps:$4 sm:$0xff]   ;;  %v20634_v4 = vld [vmem:[#allocation2 + $0x22b0] ss:$40 sps:$4 sm:$0xff]  }
 0x242   :  { %12579 = vmatprep.subr.bf16.mxu1 %v20567_v6  ;;  %v20637_v6 = vld [vmem:[#allocation2 + $0x22b8] ss:$40 sps:$4 sm:$0xff]  }
 0x244   :  { %12088 = vmatpush1.bf16.msra.mxu0 %v20562_v7  ;;  %v20643_v7 = vld [vmem:[#allocation2 + $0x2304] ss:$40 sps:$4 sm:$0xff]  }
 0x245   :  { %12580 = vmatpush1.bf16.msra.mxu1 %v20565_v8  ;;  %12089 = vmatprep.subr.bf16.mxu0 %v20570_v9  ;;  %v20646_v8 = vld [vmem:[#allocation2 + $0x230c] ss:$40 sps:$4 sm:$0xff]   ;;  %v23938_v9 = vld [vmem:[%s24225_s0 + $0x38] sm:$0xff] }
 0x246   :  { %12581 = vmatprep.subr.bf16.mxu1 %v20573_v11  ;;  %v23942_v11 = vcombine.low %v23921_v56, %v23921_v56  ;;  %v20648_v56 = vld [vmem:[#allocation2 + $0x2350] ss:$40 sps:$4 sm:$0xff]  }
 0x248   :  { %12090 = vmatpush1.bf16.msra.mxu0 %v20568_v12  ;;  %v20641_v12 = vld [vmem:[#allocation2 + $0x2300] ss:$40 sps:$4 sm:$0xff]  }
 0x249   :  { %12582 = vmatpush1.bf16.msra.mxu1 %v20571_v14  ;;  %12091 = vmatprep.subr.bf16.mxu0 %v20576_v16  ;;  %v20644_v14 = vld [vmem:[#allocation2 + $0x2308] ss:$40 sps:$4 sm:$0xff]   ;;  %v20650_v16 = vld [vmem:[#allocation2 + $0x2354] ss:$40 sps:$4 sm:$0xff]  }
 0x24a   :  { %12583 = vmatprep.subr.bf16.mxu1 %v20579_v17  ;;  %v20653_v17 = vld [vmem:[#allocation2 + $0x235c] ss:$40 sps:$4 sm:$0xff]  }
 0x24c   :  { %12092 = vmatpush1.bf16.msra.mxu0 %v20574_v18  ;;  %v23946_v18 = vcombine.high %v23938_v9, %v23938_v9 }
 0x24d   :  { %12584 = vmatpush1.bf16.msra.mxu1 %v20577_v19  ;;  %12093 = vmatprep.subr.bf16.mxu0 %v20582_v22  ;;  %v20651_v19 = vld [vmem:[#allocation2 + $0x2358] ss:$40 sps:$4 sm:$0xff]   ;;  %v20656_v22 = vld [vmem:[#allocation2 + $0x23a4] ss:$40 sps:$4 sm:$0xff]  }
 0x24e   :  { %12585 = vmatprep.subr.bf16.mxu1 %v20585_v23  ;;  %v20659_v23 = vld [vmem:[#allocation2 + $0x23ac] ss:$40 sps:$4 sm:$0xff]  }
 0x250   :  { %12094 = vmatpush1.bf16.msra.mxu0 %v20580_v13  ;;  %v20654_v13 = vld [vmem:[#allocation2 + $0x23a0] ss:$40 sps:$4 sm:$0xff]  }
 0x251   :  { %12586 = vmatpush1.bf16.msra.mxu1 %v20583_v25  ;;  %12095 = vmatprep.subr.bf16.mxu0 %v20588_v26  ;;  %v20657_v25 = vld [vmem:[#allocation2 + $0x23a8] ss:$40 sps:$4 sm:$0xff]   ;;  %v20662_v26 = vld [vmem:[#allocation2 + $0x23f4] ss:$40 sps:$4 sm:$0xff]  }
 0x252   :  { %12587 = vmatprep.subr.bf16.mxu1 %v20591_v27  ;;  %v20665_v27 = vld [vmem:[#allocation2 + $0x23fc] ss:$40 sps:$4 sm:$0xff]  }
 0x254   :  { %12096 = vmatpush1.bf16.msra.mxu0 %v20586_v28  ;;  %v20660_v28 = vld [vmem:[#allocation2 + $0x23f0] ss:$40 sps:$4 sm:$0xff]  }
 0x255   :  { %12588 = vmatpush1.bf16.msra.mxu1 %v20589_v32  ;;  %12097 = vmatprep.subr.bf16.mxu0 %v20594_v33  ;;  %v20663_v32 = vld [vmem:[#allocation2 + $0x23f8] ss:$40 sps:$4 sm:$0xff]   ;;  %v20668_v33 = vld [vmem:[#allocation2 + $0x2444] ss:$40 sps:$4 sm:$0xff]  }
 0x256   :  { %12589 = vmatprep.subr.bf16.mxu1 %v20597_v34  ;;  %v20671_v34 = vld [vmem:[#allocation2 + $0x244c] ss:$40 sps:$4 sm:$0xff]  }
 0x258   :  { %12098 = vmatpush1.bf16.msra.mxu0 %v20592_v21  ;;  %v20666_v21 = vld [vmem:[#allocation2 + $0x2440] ss:$40 sps:$4 sm:$0xff]  }
 0x259   :  { %12590 = vmatpush1.bf16.msra.mxu1 %v20595_v36  ;;  %12099 = vmatprep.subr.bf16.mxu0 %v20600_v37  ;;  %v20669_v36 = vld [vmem:[#allocation2 + $0x2448] ss:$40 sps:$4 sm:$0xff]   ;;  %v20674_v37 = vld [vmem:[#allocation2 + $0x2494] ss:$40 sps:$4 sm:$0xff]  }
 0x25a   :  { %12591 = vmatprep.subr.bf16.mxu1 %v20603_v38  ;;  %v20677_v38 = vld [vmem:[#allocation2 + $0x249c] ss:$40 sps:$4 sm:$0xff]  }
 0x25c   :  { %12100 = vmatpush1.bf16.msra.mxu0 %v20598_v39  ;;  %v20672_v39 = vld [vmem:[#allocation2 + $0x2490] ss:$40 sps:$4 sm:$0xff]  }
 0x25d   :  { %12592 = vmatpush1.bf16.msra.mxu1 %v20601_v40  ;;  %12101 = vmatprep.subr.bf16.mxu0 %v20606_v43  ;;  %v20675_v40 = vld [vmem:[#allocation2 + $0x2498] ss:$40 sps:$4 sm:$0xff]   ;;  %v20680_v43 = vld [vmem:[#allocation2 + $0x24e4] ss:$40 sps:$4 sm:$0xff]  }
 0x25e   :  { %12593 = vmatprep.subr.bf16.mxu1 %v20609_v44  ;;  %v20683_v44 = vld [vmem:[#allocation2 + $0x24ec] ss:$40 sps:$4 sm:$0xff]  }
 0x260   :  { %12102 = vmatpush1.bf16.msra.mxu0 %v20604_v45  ;;  %v20678_v45 = vld [vmem:[#allocation2 + $0x24e0] ss:$40 sps:$4 sm:$0xff]  }
 0x261   :  { %12594 = vmatpush1.bf16.msra.mxu1 %v20607_v46  ;;  %12103 = vmatprep.subr.bf16.mxu0 %v20612_v31  ;;  %v20681_v46 = vld [vmem:[#allocation2 + $0x24e8] ss:$40 sps:$4 sm:$0xff]   ;;  %v20686_v31 = vld [vmem:[#allocation2 + $0x2534] ss:$40 sps:$4 sm:$0xff]  }
 0x262   :  { %12595 = vmatprep.subr.bf16.mxu1 %v20615_v49  ;;  %v20689_v49 = vld [vmem:[#allocation2 + $0x253c] ss:$40 sps:$4 sm:$0xff]  }
 0x264   :  { %12104 = vmatpush1.bf16.msra.mxu0 %v20610_v50  ;;  %v20684_v50 = vld [vmem:[#allocation2 + $0x2530] ss:$40 sps:$4 sm:$0xff]  }
 0x265   :  { %12596 = vmatpush1.bf16.msra.mxu1 %v20613_v51  ;;  %12105 = vmatprep.subr.bf16.mxu0 %v20618_v52  ;;  %v20687_v51 = vld [vmem:[#allocation2 + $0x2538] ss:$40 sps:$4 sm:$0xff]   ;;  %v20692_v52 = vld [vmem:[#allocation2 + $0x2584] ss:$40 sps:$4 sm:$0xff]  }
 0x266   :  { %12597 = vmatprep.subr.bf16.mxu1 %v20621_v53  ;;  %v20695_v53 = vld [vmem:[#allocation2 + $0x258c] ss:$40 sps:$4 sm:$0xff]  }
 0x268   :  { %12106 = vmatpush1.bf16.msra.mxu0 %v20616_v54  ;;  %v20690_v54 = vld [vmem:[#allocation2 + $0x2580] ss:$40 sps:$4 sm:$0xff]  }
 0x269   :  { %12598 = vmatpush1.bf16.msra.mxu1 %v20619_v55  ;;  %12107 = vmatprep.subr.bf16.mxu0 %v20624_v58  ;;  %v20693_v55 = vld [vmem:[#allocation2 + $0x2588] ss:$40 sps:$4 sm:$0xff]   ;;  %v20698_v58 = vld [vmem:[#allocation2 + $0x25d4] ss:$40 sps:$4 sm:$0xff]  }
 0x26a   :  { %12599 = vmatprep.subr.bf16.mxu1 %v20627_v59  ;;  %v20701_v59 = vld [vmem:[#allocation2 + $0x25dc] ss:$40 sps:$4 sm:$0xff]  }
 0x26c   :  { %12108 = vmatpush1.bf16.msra.mxu0 %v20622_v60  ;;  %v20696_v60 = vld [vmem:[#allocation2 + $0x25d0] ss:$40 sps:$4 sm:$0xff]  }
 0x26d   :  { %12600 = vmatpush1.bf16.msra.mxu1 %v20625_v61  ;;  %12109 = vmatprep.subr.bf16.mxu0 %v20630_v41  ;;  %v20699_v61 = vld [vmem:[#allocation2 + $0x25d8] ss:$40 sps:$4 sm:$0xff]   ;;  %v20704_v41 = vld [vmem:[#allocation2 + $0x2624] ss:$40 sps:$4 sm:$0xff]  }
 0x26e   :  { %12601 = vmatprep.subr.bf16.mxu1 %v20633_v63  ;;  %v20707_v63 = vld [vmem:[#allocation2 + $0x262c] ss:$40 sps:$4 sm:$0xff]  }
 0x270   :  { %12110 = vmatpush1.bf16.msra.mxu0 %v20628_v0  ;;  %v20702_v0 = vld [vmem:[#allocation2 + $0x2620] ss:$40 sps:$4 sm:$0xff]  }
 0x271   :  { %12602 = vmatpush1.bf16.msra.mxu1 %v20631_v1  ;;  %12111 = vmatprep.subr.bf16.mxu0 %v20636_v2  ;;  %v20705_v1 = vld [vmem:[#allocation2 + $0x2628] ss:$40 sps:$4 sm:$0xff]   ;;  %v20710_v2 = vld [vmem:[#allocation2 + $0x2674] ss:$40 sps:$4 sm:$0xff]  }
 0x272   :  { %12603 = vmatprep.subr.bf16.mxu1 %v20639_v3  ;;  %v20713_v3 = vld [vmem:[#allocation2 + $0x267c] ss:$40 sps:$4 sm:$0xff]  }
 0x274   :  { %12112 = vmatpush1.bf16.msra.mxu0 %v20634_v4  ;;  %v20708_v4 = vld [vmem:[#allocation2 + $0x2670] ss:$40 sps:$4 sm:$0xff]  }
 0x275   :  { %12604 = vmatpush1.bf16.msra.mxu1 %v20637_v6  ;;  %12122 = vmatprep.subr.bf16.mxu0 %v20643_v7  ;;  %v20711_v6 = vld [vmem:[#allocation2 + $0x2678] ss:$40 sps:$4 sm:$0xff]   ;;  %v20716_v7 = vld [vmem:[#allocation2 + $0x26c4] ss:$40 sps:$4 sm:$0xff]  }
 0x276   :  { %12614 = vmatprep.subr.bf16.mxu1 %v20646_v8  ;;  %v20719_v8 = vld [vmem:[#allocation2 + $0x26cc] ss:$40 sps:$4 sm:$0xff]  }
 0x277   :  { %12114 = vmatmul.mubr.bf16.vlgmr.msra.gmra.mrb[0].mxu0 %v23942_v11 }
 0x278   :  { %12606 = vmatmul.mubr.bf16.vlgmr.msra.gmra.mrb[0].mxu1 %v23942_v11  ;;  %12123 = vmatpush1.bf16.msra.mxu0 %v20641_v12  ;;  %v20714_v12 = vld [vmem:[#allocation2 + $0x26c0] ss:$40 sps:$4 sm:$0xff]  }
 0x279   :  { %12615 = vmatpush1.bf16.msra.mxu1 %v20644_v14  ;;  %12124 = vmatprep.subr.bf16.mxu0 %v20650_v16  ;;  %v20717_v14 = vld [vmem:[#allocation2 + $0x26c8] ss:$40 sps:$4 sm:$0xff]   ;;  %v20722_v16 = vld [vmem:[#allocation2 + $0x2714] ss:$40 sps:$4 sm:$0xff]  }
 0x27a   :  { %12616 = vmatprep.subr.bf16.mxu1 %v20653_v17  ;;  %12154 = vmatprep.mubr.bf16.mxu0 %v23946_v18  ;;  %v20725_v17 = vld [vmem:[#allocation2 + $0x271c] ss:$40 sps:$4 sm:$0xff]  }
 0x27b   :  { %12646 = vmatprep.mubr.bf16.mxu1 %v23946_v18 }
 0x27c   :  { %12125 = vmatpush1.bf16.msra.mxu0 %v20648_v56  ;;  %v20720_v56 = vld [vmem:[#allocation2 + $0x2710] ss:$40 sps:$4 sm:$0xff]  }
 0x27d   :  { %12617 = vmatpush1.bf16.msra.mxu1 %v20651_v19  ;;  %12126 = vmatprep.subr.bf16.mxu0 %v20656_v22  ;;  %v20723_v19 = vld [vmem:[#allocation2 + $0x2718] ss:$40 sps:$4 sm:$0xff]   ;;  %v20728_v22 = vld [vmem:[#allocation2 + $0x2764] ss:$40 sps:$4 sm:$0xff]  }
 0x27e   :  { %12618 = vmatprep.subr.bf16.mxu1 %v20659_v23  ;;  %v20731_v23 = vld [vmem:[#allocation2 + $0x276c] ss:$40 sps:$4 sm:$0xff]  }
 0x280   :  { %12127 = vmatpush1.bf16.msra.mxu0 %v20654_v13  ;;  %v20726_v13 = vld [vmem:[#allocation2 + $0x2760] ss:$40 sps:$4 sm:$0xff]  }
 0x281   :  { %12619 = vmatpush1.bf16.msra.mxu1 %v20657_v25  ;;  %12128 = vmatprep.subr.bf16.mxu0 %v20662_v26  ;;  %v20729_v25 = vld [vmem:[#allocation2 + $0x2768] ss:$40 sps:$4 sm:$0xff]   ;;  %v20734_v26 = vld [vmem:[#allocation2 + $0x27b4] ss:$40 sps:$4 sm:$0xff]  }
 0x282   :  { %12620 = vmatprep.subr.bf16.mxu1 %v20665_v27  ;;  %v20737_v27 = vld [vmem:[#allocation2 + $0x27bc] ss:$40 sps:$4 sm:$0xff]  }
 0x284   :  { %12129 = vmatpush1.bf16.msra.mxu0 %v20660_v28  ;;  %v20732_v28 = vld [vmem:[#allocation2 + $0x27b0] ss:$40 sps:$4 sm:$0xff]  }
 0x285   :  { %12621 = vmatpush1.bf16.msra.mxu1 %v20663_v32  ;;  %12130 = vmatprep.subr.bf16.mxu0 %v20668_v33  ;;  %v20735_v32 = vld [vmem:[#allocation2 + $0x27b8] ss:$40 sps:$4 sm:$0xff]   ;;  %v20741_v33 = vld [vmem:[#allocation2 + $0x2804] ss:$40 sps:$4 sm:$0xff]  }
 0x286   :  { %12622 = vmatprep.subr.bf16.mxu1 %v20671_v34  ;;  %v20744_v34 = vld [vmem:[#allocation2 + $0x280c] ss:$40 sps:$4 sm:$0xff]  }
 0x288   :  { %12131 = vmatpush1.bf16.msra.mxu0 %v20666_v21  ;;  %v23955_v21 = vld [vmem:[%s24225_s0 + $0x40] sm:$0xff] }
 0x289   :  { %12623 = vmatpush1.bf16.msra.mxu1 %v20669_v36  ;;  %12132 = vmatprep.subr.bf16.mxu0 %v20674_v37  ;;  %v23959_v36 = vcombine.low %v23938_v9, %v23938_v9  ;;  %v20739_v37 = vld [vmem:[#allocation2 + $0x2800] ss:$40 sps:$4 sm:$0xff]   ;;  %v20746_v9 = vld [vmem:[#allocation2 + $0x2850] ss:$40 sps:$4 sm:$0xff]  }
 0x28a   :  { %12624 = vmatprep.subr.bf16.mxu1 %v20677_v38  ;;  %v20742_v38 = vld [vmem:[#allocation2 + $0x2808] ss:$40 sps:$4 sm:$0xff]  }
 0x28c   :  { %12133 = vmatpush1.bf16.msra.mxu0 %v20672_v39  ;;  %v20748_v39 = vld [vmem:[#allocation2 + $0x2854] ss:$40 sps:$4 sm:$0xff]  }
 0x28d   :  { %12625 = vmatpush1.bf16.msra.mxu1 %v20675_v40  ;;  %12134 = vmatprep.subr.bf16.mxu0 %v20680_v43  ;;  %v20751_v40 = vld [vmem:[#allocation2 + $0x285c] ss:$40 sps:$4 sm:$0xff]   ;;  %v23963_v43 = vcombine.high %v23955_v21, %v23955_v21 }
 0x28e   :  { %12626 = vmatprep.subr.bf16.mxu1 %v20683_v44  ;;  %v20749_v44 = vld [vmem:[#allocation2 + $0x2858] ss:$40 sps:$4 sm:$0xff]  }
 0x290   :  { %12135 = vmatpush1.bf16.msra.mxu0 %v20678_v45  ;;  %v20754_v45 = vld [vmem:[#allocation2 + $0x28a4] ss:$40 sps:$4 sm:$0xff]  }
 0x291   :  { %12627 = vmatpush1.bf16.msra.mxu1 %v20681_v46  ;;  %12136 = vmatprep.subr.bf16.mxu0 %v20686_v31  ;;  %v20757_v46 = vld [vmem:[#allocation2 + $0x28ac] ss:$40 sps:$4 sm:$0xff]   ;;  %v20752_v31 = vld [vmem:[#allocation2 + $0x28a0] ss:$40 sps:$4 sm:$0xff]  }
 0x292   :  { %12628 = vmatprep.subr.bf16.mxu1 %v20689_v49  ;;  %v20755_v49 = vld [vmem:[#allocation2 + $0x28a8] ss:$40 sps:$4 sm:$0xff]  }
 0x294   :  { %12137 = vmatpush1.bf16.msra.mxu0 %v20684_v50  ;;  %v20760_v50 = vld [vmem:[#allocation2 + $0x28f4] ss:$40 sps:$4 sm:$0xff]  }
 0x295   :  { %12629 = vmatpush1.bf16.msra.mxu1 %v20687_v51  ;;  %12138 = vmatprep.subr.bf16.mxu0 %v20692_v52  ;;  %v20763_v51 = vld [vmem:[#allocation2 + $0x28fc] ss:$40 sps:$4 sm:$0xff]   ;;  %v20758_v52 = vld [vmem:[#allocation2 + $0x28f0] ss:$40 sps:$4 sm:$0xff]  }
 0x296   :  { %12630 = vmatprep.subr.bf16.mxu1 %v20695_v53  ;;  %v20761_v53 = vld [vmem:[#allocation2 + $0x28f8] ss:$40 sps:$4 sm:$0xff]  }
 0x298   :  { %12139 = vmatpush1.bf16.msra.mxu0 %v20690_v54  ;;  %v20766_v54 = vld [vmem:[#allocation2 + $0x2944] ss:$40 sps:$4 sm:$0xff]  }
 0x299   :  { %12631 = vmatpush1.bf16.msra.mxu1 %v20693_v55  ;;  %12140 = vmatprep.subr.bf16.mxu0 %v20698_v58  ;;  %v20769_v55 = vld [vmem:[#allocation2 + $0x294c] ss:$40 sps:$4 sm:$0xff]   ;;  %v20764_v58 = vld [vmem:[#allocation2 + $0x2940] ss:$40 sps:$4 sm:$0xff]  }
 0x29a   :  { %12632 = vmatprep.subr.bf16.mxu1 %v20701_v59  ;;  %v20767_v59 = vld [vmem:[#allocation2 + $0x2948] ss:$40 sps:$4 sm:$0xff]  }
 0x29c   :  { %12141 = vmatpush1.bf16.msra.mxu0 %v20696_v60  ;;  %v20772_v60 = vld [vmem:[#allocation2 + $0x2994] ss:$40 sps:$4 sm:$0xff]  }
 0x29d   :  { %12633 = vmatpush1.bf16.msra.mxu1 %v20699_v61  ;;  %12142 = vmatprep.subr.bf16.mxu0 %v20704_v41  ;;  %v20775_v61 = vld [vmem:[#allocation2 + $0x299c] ss:$40 sps:$4 sm:$0xff]   ;;  %v20770_v41 = vld [vmem:[#allocation2 + $0x2990] ss:$40 sps:$4 sm:$0xff]  }
 0x29e   :  { %12634 = vmatprep.subr.bf16.mxu1 %v20707_v63  ;;  %v20773_v63 = vld [vmem:[#allocation2 + $0x2998] ss:$40 sps:$4 sm:$0xff]  }
 0x2a0   :  { %12143 = vmatpush1.bf16.msra.mxu0 %v20702_v0  ;;  %v20778_v0 = vld [vmem:[#allocation2 + $0x29e4] ss:$40 sps:$4 sm:$0xff]  }
 0x2a1   :  { %12635 = vmatpush1.bf16.msra.mxu1 %v20705_v1  ;;  %12144 = vmatprep.subr.bf16.mxu0 %v20710_v2  ;;  %v20781_v1 = vld [vmem:[#allocation2 + $0x29ec] ss:$40 sps:$4 sm:$0xff]   ;;  %v20776_v2 = vld [vmem:[#allocation2 + $0x29e0] ss:$40 sps:$4 sm:$0xff]  }
 0x2a2   :  { %12636 = vmatprep.subr.bf16.mxu1 %v20713_v3  ;;  %v20779_v3 = vld [vmem:[#allocation2 + $0x29e8] ss:$40 sps:$4 sm:$0xff]  }
 0x2a4   :  { %12145 = vmatpush1.bf16.msra.mxu0 %v20708_v4  ;;  %v20784_v4 = vld [vmem:[#allocation2 + $0x2a34] ss:$40 sps:$4 sm:$0xff]  }
 0x2a5   :  { %12637 = vmatpush1.bf16.msra.mxu1 %v20711_v6  ;;  %12146 = vmatprep.subr.bf16.mxu0 %v20716_v7  ;;  %v20787_v6 = vld [vmem:[#allocation2 + $0x2a3c] ss:$40 sps:$4 sm:$0xff]   ;;  %v20782_v7 = vld [vmem:[#allocation2 + $0x2a30] ss:$40 sps:$4 sm:$0xff]  }
 0x2a6   :  { %12638 = vmatprep.subr.bf16.mxu1 %v20719_v8  ;;  %v20785_v8 = vld [vmem:[#allocation2 + $0x2a38] ss:$40 sps:$4 sm:$0xff]  }
 0x2a8   :  { %12147 = vmatpush1.bf16.msra.mxu0 %v20714_v12  ;;  %v20790_v12 = vld [vmem:[#allocation2 + $0x2a84] ss:$40 sps:$4 sm:$0xff]  }
 0x2a9   :  { %12639 = vmatpush1.bf16.msra.mxu1 %v20717_v14  ;;  %12148 = vmatprep.subr.bf16.mxu0 %v20722_v16  ;;  %v20793_v14 = vld [vmem:[#allocation2 + $0x2a8c] ss:$40 sps:$4 sm:$0xff]   ;;  %v20788_v16 = vld [vmem:[#allocation2 + $0x2a80] ss:$40 sps:$4 sm:$0xff]  }
 0x2aa   :  { %12640 = vmatprep.subr.bf16.mxu1 %v20725_v17  ;;  %v20791_v17 = vld [vmem:[#allocation2 + $0x2a88] ss:$40 sps:$4 sm:$0xff]  }
 0x2ac   :  { %12149 = vmatpush1.bf16.msra.mxu0 %v20720_v56  ;;  %v20796_v56 = vld [vmem:[#allocation2 + $0x2ad4] ss:$40 sps:$4 sm:$0xff]  }
 0x2ad   :  { %12641 = vmatpush1.bf16.msra.mxu1 %v20723_v19  ;;  %12150 = vmatprep.subr.bf16.mxu0 %v20728_v22  ;;  %v20799_v19 = vld [vmem:[#allocation2 + $0x2adc] ss:$40 sps:$4 sm:$0xff]   ;;  %v20794_v22 = vld [vmem:[#allocation2 + $0x2ad0] ss:$40 sps:$4 sm:$0xff]  }
 0x2ae   :  { %12642 = vmatprep.subr.bf16.mxu1 %v20731_v23  ;;  %v20797_v23 = vld [vmem:[#allocation2 + $0x2ad8] ss:$40 sps:$4 sm:$0xff]  }
 0x2b0   :  { %12151 = vmatpush1.bf16.msra.mxu0 %v20726_v13  ;;  %v20802_v13 = vld [vmem:[#allocation2 + $0x2b24] ss:$40 sps:$4 sm:$0xff]  }
 0x2b1   :  { %12643 = vmatpush1.bf16.msra.mxu1 %v20729_v25  ;;  %12152 = vmatprep.subr.bf16.mxu0 %v20734_v26  ;;  %v20805_v25 = vld [vmem:[#allocation2 + $0x2b2c] ss:$40 sps:$4 sm:$0xff]   ;;  %v20800_v26 = vld [vmem:[#allocation2 + $0x2b20] ss:$40 sps:$4 sm:$0xff]  }
 0x2b2   :  { %12644 = vmatprep.subr.bf16.mxu1 %v20737_v27  ;;  %v20803_v27 = vld [vmem:[#allocation2 + $0x2b28] ss:$40 sps:$4 sm:$0xff]  }
 0x2b4   :  { %12153 = vmatpush1.bf16.msra.mxu0 %v20732_v28  ;;  %v20808_v28 = vld [vmem:[#allocation2 + $0x2b74] ss:$40 sps:$4 sm:$0xff]  }
 0x2b5   :  { %12645 = vmatpush1.bf16.msra.mxu1 %v20735_v32  ;;  %12163 = vmatprep.subr.bf16.mxu0 %v20741_v33  ;;  %v20811_v32 = vld [vmem:[#allocation2 + $0x2b7c] ss:$40 sps:$4 sm:$0xff]   ;;  %v20806_v33 = vld [vmem:[#allocation2 + $0x2b70] ss:$40 sps:$4 sm:$0xff]  }
 0x2b6   :  { %12655 = vmatprep.subr.bf16.mxu1 %v20744_v34  ;;  %v20809_v34 = vld [vmem:[#allocation2 + $0x2b78] ss:$40 sps:$4 sm:$0xff]  }
 0x2b7   :  { %12155 = vmatmul.mubr.bf16.vlgmr.msra.gmra.mrb[0].mxu0 %v23959_v36 }
 0x2b8   :  { %12647 = vmatmul.mubr.bf16.vlgmr.msra.gmra.mrb[0].mxu1 %v23959_v36  ;;  %12164 = vmatpush1.bf16.msra.mxu0 %v20739_v37  ;;  %v20814_v37 = vld [vmem:[#allocation2 + $0x2bc4] ss:$40 sps:$4 sm:$0xff]  }
 0x2b9   :  { %12656 = vmatpush1.bf16.msra.mxu1 %v20742_v38  ;;  %12165 = vmatprep.subr.bf16.mxu0 %v20748_v39  ;;  %v20817_v38 = vld [vmem:[#allocation2 + $0x2bcc] ss:$40 sps:$4 sm:$0xff]   ;;  %v20812_v39 = vld [vmem:[#allocation2 + $0x2bc0] ss:$40 sps:$4 sm:$0xff]  }
 0x2ba   :  { %12657 = vmatprep.subr.bf16.mxu1 %v20751_v40  ;;  %12195 = vmatprep.mubr.bf16.mxu0 %v23963_v43  ;;  %v20815_v40 = vld [vmem:[#allocation2 + $0x2bc8] ss:$40 sps:$4 sm:$0xff]  }
 0x2bb   :  { %12687 = vmatprep.mubr.bf16.mxu1 %v23963_v43 }
 0x2bc   :  { %12166 = vmatpush1.bf16.msra.mxu0 %v20746_v9  ;;  %v20820_v9 = vld [vmem:[#allocation2 + $0x2c14] ss:$40 sps:$4 sm:$0xff]  }
 0x2bd   :  { %12658 = vmatpush1.bf16.msra.mxu1 %v20749_v44  ;;  %12167 = vmatprep.subr.bf16.mxu0 %v20754_v45  ;;  %v20823_v44 = vld [vmem:[#allocation2 + $0x2c1c] ss:$40 sps:$4 sm:$0xff]   ;;  %v20818_v45 = vld [vmem:[#allocation2 + $0x2c10] ss:$40 sps:$4 sm:$0xff]  }
 0x2be   :  { %12659 = vmatprep.subr.bf16.mxu1 %v20757_v46  ;;  %v20821_v46 = vld [vmem:[#allocation2 + $0x2c18] ss:$40 sps:$4 sm:$0xff]  }
 0x2c0   :  { %12168 = vmatpush1.bf16.msra.mxu0 %v20752_v31  ;;  %v20826_v31 = vld [vmem:[#allocation2 + $0x2c64] ss:$40 sps:$4 sm:$0xff]  }
 0x2c1   :  { %12660 = vmatpush1.bf16.msra.mxu1 %v20755_v49  ;;  %12169 = vmatprep.subr.bf16.mxu0 %v20760_v50  ;;  %v20829_v49 = vld [vmem:[#allocation2 + $0x2c6c] ss:$40 sps:$4 sm:$0xff]   ;;  %v20824_v50 = vld [vmem:[#allocation2 + $0x2c60] ss:$40 sps:$4 sm:$0xff]  }
 0x2c2   :  { %12661 = vmatprep.subr.bf16.mxu1 %v20763_v51  ;;  %v20827_v51 = vld [vmem:[#allocation2 + $0x2c68] ss:$40 sps:$4 sm:$0xff]  }
 0x2c4   :  { %12170 = vmatpush1.bf16.msra.mxu0 %v20758_v52  ;;  %v20832_v52 = vld [vmem:[#allocation2 + $0x2cb4] ss:$40 sps:$4 sm:$0xff]  }
 0x2c5   :  { %12662 = vmatpush1.bf16.msra.mxu1 %v20761_v53  ;;  %12171 = vmatprep.subr.bf16.mxu0 %v20766_v54  ;;  %v20835_v53 = vld [vmem:[#allocation2 + $0x2cbc] ss:$40 sps:$4 sm:$0xff]   ;;  %v20830_v54 = vld [vmem:[#allocation2 + $0x2cb0] ss:$40 sps:$4 sm:$0xff]  }
 0x2c6   :  { %12663 = vmatprep.subr.bf16.mxu1 %v20769_v55  ;;  %v20833_v55 = vld [vmem:[#allocation2 + $0x2cb8] ss:$40 sps:$4 sm:$0xff]  }
 0x2c8   :  { %12172 = vmatpush1.bf16.msra.mxu0 %v20764_v58  ;;  %v20839_v58 = vld [vmem:[#allocation2 + $0x2d04] ss:$40 sps:$4 sm:$0xff]  }
 0x2c9   :  { %12664 = vmatpush1.bf16.msra.mxu1 %v20767_v59  ;;  %12173 = vmatprep.subr.bf16.mxu0 %v20772_v60  ;;  %v20842_v59 = vld [vmem:[#allocation2 + $0x2d0c] ss:$40 sps:$4 sm:$0xff]  }
 0x2ca   :  { %12665 = vmatprep.subr.bf16.mxu1 %v20775_v61  ;;  %v23972_v60 = vld [vmem:[%s24225_s0 + $0x48] sm:$0xff]  ;;  %v23976_v61 = vcombine.low %v23955_v21, %v23955_v21  ;;  %v20844_v21 = vld [vmem:[#allocation2 + $0x2d50] ss:$40 sps:$4 sm:$0xff]  }
 0x2cc   :  { %12174 = vmatpush1.bf16.msra.mxu0 %v20770_v41  ;;  %v20837_v41 = vld [vmem:[#allocation2 + $0x2d00] ss:$40 sps:$4 sm:$0xff]  }
 0x2cd   :  { %12666 = vmatpush1.bf16.msra.mxu1 %v20773_v63  ;;  %12175 = vmatprep.subr.bf16.mxu0 %v20778_v0  ;;  %v20840_v63 = vld [vmem:[#allocation2 + $0x2d08] ss:$40 sps:$4 sm:$0xff]   ;;  %v20846_v0 = vld [vmem:[#allocation2 + $0x2d54] ss:$40 sps:$4 sm:$0xff]  }
 0x2ce   :  { %12667 = vmatprep.subr.bf16.mxu1 %v20781_v1  ;;  %v20849_v1 = vld [vmem:[#allocation2 + $0x2d5c] ss:$40 sps:$4 sm:$0xff]  }
 0x2d0   :  { %12176 = vmatpush1.bf16.msra.mxu0 %v20776_v2  ;;  %v23980_v2 = vcombine.high %v23972_v60, %v23972_v60 }
 0x2d1   :  { %12668 = vmatpush1.bf16.msra.mxu1 %v20779_v3  ;;  %12177 = vmatprep.subr.bf16.mxu0 %v20784_v4  ;;  %v20847_v3 = vld [vmem:[#allocation2 + $0x2d58] ss:$40 sps:$4 sm:$0xff]   ;;  %v20852_v4 = vld [vmem:[#allocation2 + $0x2da4] ss:$40 sps:$4 sm:$0xff]  }
 0x2d2   :  { %12669 = vmatprep.subr.bf16.mxu1 %v20787_v6  ;;  %v20855_v6 = vld [vmem:[#allocation2 + $0x2dac] ss:$40 sps:$4 sm:$0xff]  }
 0x2d4   :  { %12178 = vmatpush1.bf16.msra.mxu0 %v20782_v7  ;;  %v20850_v7 = vld [vmem:[#allocation2 + $0x2da0] ss:$40 sps:$4 sm:$0xff]  }
 0x2d5   :  { %12670 = vmatpush1.bf16.msra.mxu1 %v20785_v8  ;;  %12179 = vmatprep.subr.bf16.mxu0 %v20790_v12  ;;  %v20853_v8 = vld [vmem:[#allocation2 + $0x2da8] ss:$40 sps:$4 sm:$0xff]   ;;  %v20858_v12 = vld [vmem:[#allocation2 + $0x2df4] ss:$40 sps:$4 sm:$0xff]  }
 0x2d6   :  { %12671 = vmatprep.subr.bf16.mxu1 %v20793_v14  ;;  %v20861_v14 = vld [vmem:[#allocation2 + $0x2dfc] ss:$40 sps:$4 sm:$0xff]  }
 0x2d8   :  { %12180 = vmatpush1.bf16.msra.mxu0 %v20788_v16  ;;  %v20856_v16 = vld [vmem:[#allocation2 + $0x2df0] ss:$40 sps:$4 sm:$0xff]  }
 0x2d9   :  { %12672 = vmatpush1.bf16.msra.mxu1 %v20791_v17  ;;  %12181 = vmatprep.subr.bf16.mxu0 %v20796_v56  ;;  %v20859_v17 = vld [vmem:[#allocation2 + $0x2df8] ss:$40 sps:$4 sm:$0xff]   ;;  %v20864_v56 = vld [vmem:[#allocation2 + $0x2e44] ss:$40 sps:$4 sm:$0xff]  }
 0x2da   :  { %12673 = vmatprep.subr.bf16.mxu1 %v20799_v19  ;;  %v20867_v19 = vld [vmem:[#allocation2 + $0x2e4c] ss:$40 sps:$4 sm:$0xff]  }
 0x2dc   :  { %12182 = vmatpush1.bf16.msra.mxu0 %v20794_v22  ;;  %v20862_v22 = vld [vmem:[#allocation2 + $0x2e40] ss:$40 sps:$4 sm:$0xff]  }
 0x2dd   :  { %12674 = vmatpush1.bf16.msra.mxu1 %v20797_v23  ;;  %12183 = vmatprep.subr.bf16.mxu0 %v20802_v13  ;;  %v20865_v23 = vld [vmem:[#allocation2 + $0x2e48] ss:$40 sps:$4 sm:$0xff]   ;;  %v20870_v13 = vld [vmem:[#allocation2 + $0x2e94] ss:$40 sps:$4 sm:$0xff]  }
 0x2de   :  { %12675 = vmatprep.subr.bf16.mxu1 %v20805_v25  ;;  %v20873_v25 = vld [vmem:[#allocation2 + $0x2e9c] ss:$40 sps:$4 sm:$0xff]  }
 0x2e0   :  { %12184 = vmatpush1.bf16.msra.mxu0 %v20800_v26  ;;  %v20868_v26 = vld [vmem:[#allocation2 + $0x2e90] ss:$40 sps:$4 sm:$0xff]  }
 0x2e1   :  { %12676 = vmatpush1.bf16.msra.mxu1 %v20803_v27  ;;  %12185 = vmatprep.subr.bf16.mxu0 %v20808_v28  ;;  %v20871_v27 = vld [vmem:[#allocation2 + $0x2e98] ss:$40 sps:$4 sm:$0xff]   ;;  %v20876_v28 = vld [vmem:[#allocation2 + $0x2ee4] ss:$40 sps:$4 sm:$0xff]  }
 0x2e2   :  { %12677 = vmatprep.subr.bf16.mxu1 %v20811_v32  ;;  %v20879_v32 = vld [vmem:[#allocation2 + $0x2eec] ss:$40 sps:$4 sm:$0xff]  }
 0x2e4   :  { %12186 = vmatpush1.bf16.msra.mxu0 %v20806_v33  ;;  %v20874_v33 = vld [vmem:[#allocation2 + $0x2ee0] ss:$40 sps:$4 sm:$0xff]  }
 0x2e5   :  { %12678 = vmatpush1.bf16.msra.mxu1 %v20809_v34  ;;  %12187 = vmatprep.subr.bf16.mxu0 %v20814_v37  ;;  %v20877_v34 = vld [vmem:[#allocation2 + $0x2ee8] ss:$40 sps:$4 sm:$0xff]   ;;  %v20882_v37 = vld [vmem:[#allocation2 + $0x2f34] ss:$40 sps:$4 sm:$0xff]  }
 0x2e6   :  { %12679 = vmatprep.subr.bf16.mxu1 %v20817_v38  ;;  %v20885_v38 = vld [vmem:[#allocation2 + $0x2f3c] ss:$40 sps:$4 sm:$0xff]  }
 0x2e8   :  { %12188 = vmatpush1.bf16.msra.mxu0 %v20812_v39  ;;  %v20880_v39 = vld [vmem:[#allocation2 + $0x2f30] ss:$40 sps:$4 sm:$0xff]  }
 0x2e9   :  { %12680 = vmatpush1.bf16.msra.mxu1 %v20815_v40  ;;  %12189 = vmatprep.subr.bf16.mxu0 %v20820_v9  ;;  %v20883_v40 = vld [vmem:[#allocation2 + $0x2f38] ss:$40 sps:$4 sm:$0xff]   ;;  %v20888_v9 = vld [vmem:[#allocation2 + $0x2f84] ss:$40 sps:$4 sm:$0xff]  }
 0x2ea   :  { %12681 = vmatprep.subr.bf16.mxu1 %v20823_v44  ;;  %v20891_v44 = vld [vmem:[#allocation2 + $0x2f8c] ss:$40 sps:$4 sm:$0xff]  }
 0x2ec   :  { %12190 = vmatpush1.bf16.msra.mxu0 %v20818_v45  ;;  %v20886_v45 = vld [vmem:[#allocation2 + $0x2f80] ss:$40 sps:$4 sm:$0xff]  }
 0x2ed   :  { %12682 = vmatpush1.bf16.msra.mxu1 %v20821_v46  ;;  %12191 = vmatprep.subr.bf16.mxu0 %v20826_v31  ;;  %v20889_v46 = vld [vmem:[#allocation2 + $0x2f88] ss:$40 sps:$4 sm:$0xff]   ;;  %v20894_v31 = vld [vmem:[#allocation2 + $0x2fd4] ss:$40 sps:$4 sm:$0xff]  }
 0x2ee   :  { %12683 = vmatprep.subr.bf16.mxu1 %v20829_v49  ;;  %v20897_v49 = vld [vmem:[#allocation2 + $0x2fdc] ss:$40 sps:$4 sm:$0xff]  }
 0x2f0   :  { %12192 = vmatpush1.bf16.msra.mxu0 %v20824_v50  ;;  %v20892_v50 = vld [vmem:[#allocation2 + $0x2fd0] ss:$40 sps:$4 sm:$0xff]  }
 0x2f1   :  { %12684 = vmatpush1.bf16.msra.mxu1 %v20827_v51  ;;  %12193 = vmatprep.subr.bf16.mxu0 %v20832_v52  ;;  %v20895_v51 = vld [vmem:[#allocation2 + $0x2fd8] ss:$40 sps:$4 sm:$0xff]   ;;  %v20900_v52 = vld [vmem:[#allocation2 + $0x3024] ss:$40 sps:$4 sm:$0xff]  }
 0x2f2   :  { %12685 = vmatprep.subr.bf16.mxu1 %v20835_v53  ;;  %v20903_v53 = vld [vmem:[#allocation2 + $0x302c] ss:$40 sps:$4 sm:$0xff]  }
 0x2f4   :  { %12194 = vmatpush1.bf16.msra.mxu0 %v20830_v54  ;;  %v20898_v54 = vld [vmem:[#allocation2 + $0x3020] ss:$40 sps:$4 sm:$0xff]  }
 0x2f5   :  { %12686 = vmatpush1.bf16.msra.mxu1 %v20833_v55  ;;  %12204 = vmatprep.subr.bf16.mxu0 %v20839_v58  ;;  %v20901_v55 = vld [vmem:[#allocation2 + $0x3028] ss:$40 sps:$4 sm:$0xff]   ;;  %v20906_v58 = vld [vmem:[#allocation2 + $0x3074] ss:$40 sps:$4 sm:$0xff]  }
 0x2f6   :  { %12696 = vmatprep.subr.bf16.mxu1 %v20842_v59  ;;  %v20909_v59 = vld [vmem:[#allocation2 + $0x307c] ss:$40 sps:$4 sm:$0xff]  }
 0x2f7   :  { %12196 = vmatmul.mubr.bf16.vlgmr.msra.gmra.mrb[0].mxu0 %v23976_v61 }
 0x2f8   :  { %12688 = vmatmul.mubr.bf16.vlgmr.msra.gmra.mrb[0].mxu1 %v23976_v61  ;;  %12205 = vmatpush1.bf16.msra.mxu0 %v20837_v41  ;;  %v20904_v41 = vld [vmem:[#allocation2 + $0x3070] ss:$40 sps:$4 sm:$0xff]  }
 0x2f9   :  { %12697 = vmatpush1.bf16.msra.mxu1 %v20840_v63  ;;  %12206 = vmatprep.subr.bf16.mxu0 %v20846_v0  ;;  %v20907_v63 = vld [vmem:[#allocation2 + $0x3078] ss:$40 sps:$4 sm:$0xff]   ;;  %v20912_v0 = vld [vmem:[#allocation2 + $0x30c4] ss:$40 sps:$4 sm:$0xff]  }
 0x2fa   :  { %12698 = vmatprep.subr.bf16.mxu1 %v20849_v1  ;;  %12236 = vmatprep.mubr.bf16.mxu0 %v23980_v2  ;;  %v20915_v1 = vld [vmem:[#allocation2 + $0x30cc] ss:$40 sps:$4 sm:$0xff]  }
 0x2fb   :  { %12728 = vmatprep.mubr.bf16.mxu1 %v23980_v2 }
 0x2fc   :  { %12207 = vmatpush1.bf16.msra.mxu0 %v20844_v21  ;;  %v20910_v21 = vld [vmem:[#allocation2 + $0x30c0] ss:$40 sps:$4 sm:$0xff]  }
 0x2fd   :  { %12699 = vmatpush1.bf16.msra.mxu1 %v20847_v3  ;;  %12208 = vmatprep.subr.bf16.mxu0 %v20852_v4  ;;  %v20913_v3 = vld [vmem:[#allocation2 + $0x30c8] ss:$40 sps:$4 sm:$0xff]   ;;  %v20918_v4 = vld [vmem:[#allocation2 + $0x3114] ss:$40 sps:$4 sm:$0xff]  }
 0x2fe   :  { %12700 = vmatprep.subr.bf16.mxu1 %v20855_v6  ;;  %v20921_v6 = vld [vmem:[#allocation2 + $0x311c] ss:$40 sps:$4 sm:$0xff]  }
 0x300   :  { %12209 = vmatpush1.bf16.msra.mxu0 %v20850_v7  ;;  %v20916_v7 = vld [vmem:[#allocation2 + $0x3110] ss:$40 sps:$4 sm:$0xff]  }
 0x301   :  { %12701 = vmatpush1.bf16.msra.mxu1 %v20853_v8  ;;  %12210 = vmatprep.subr.bf16.mxu0 %v20858_v12  ;;  %v20919_v8 = vld [vmem:[#allocation2 + $0x3118] ss:$40 sps:$4 sm:$0xff]   ;;  %v20924_v12 = vld [vmem:[#allocation2 + $0x3164] ss:$40 sps:$4 sm:$0xff]  }
 0x302   :  { %12702 = vmatprep.subr.bf16.mxu1 %v20861_v14  ;;  %v20927_v14 = vld [vmem:[#allocation2 + $0x316c] ss:$40 sps:$4 sm:$0xff]  }
 0x304   :  { %12211 = vmatpush1.bf16.msra.mxu0 %v20856_v16  ;;  %v20922_v16 = vld [vmem:[#allocation2 + $0x3160] ss:$40 sps:$4 sm:$0xff]  }
 0x305   :  { %12703 = vmatpush1.bf16.msra.mxu1 %v20859_v17  ;;  %12212 = vmatprep.subr.bf16.mxu0 %v20864_v56  ;;  %v20925_v17 = vld [vmem:[#allocation2 + $0x3168] ss:$40 sps:$4 sm:$0xff]   ;;  %v20930_v56 = vld [vmem:[#allocation2 + $0x31b4] ss:$40 sps:$4 sm:$0xff]  }
 0x306   :  { %12704 = vmatprep.subr.bf16.mxu1 %v20867_v19  ;;  %v20933_v19 = vld [vmem:[#allocation2 + $0x31bc] ss:$40 sps:$4 sm:$0xff]  }
 0x308   :  { %12213 = vmatpush1.bf16.msra.mxu0 %v20862_v22  ;;  %v20928_v22 = vld [vmem:[#allocation2 + $0x31b0] ss:$40 sps:$4 sm:$0xff]  }
 0x309   :  { %12705 = vmatpush1.bf16.msra.mxu1 %v20865_v23  ;;  %12214 = vmatprep.subr.bf16.mxu0 %v20870_v13  ;;  %v20931_v23 = vld [vmem:[#allocation2 + $0x31b8] ss:$40 sps:$4 sm:$0xff]   ;;  %v20937_v13 = vld [vmem:[#allocation2 + $0x3204] ss:$40 sps:$4 sm:$0xff]  }
 0x30a   :  { %12706 = vmatprep.subr.bf16.mxu1 %v20873_v25  ;;  %v20940_v25 = vld [vmem:[#allocation2 + $0x320c] ss:$40 sps:$4 sm:$0xff]  }
 0x30c   :  { %12215 = vmatpush1.bf16.msra.mxu0 %v20868_v26  ;;  %v20935_v26 = vld [vmem:[#allocation2 + $0x3200] ss:$40 sps:$4 sm:$0xff]  }
 0x30d   :  { %12707 = vmatpush1.bf16.msra.mxu1 %v20871_v27  ;;  %12216 = vmatprep.subr.bf16.mxu0 %v20876_v28  ;;  %v20938_v27 = vld [vmem:[#allocation2 + $0x3208] ss:$40 sps:$4 sm:$0xff]   ;;  %v23988_v28 = vcombine.low %v23972_v60, %v23972_v60 }
 0x30e   :  { %12708 = vmatprep.subr.bf16.mxu1 %v20879_v32  ;;  %v23993_v32 = vld [vmem:[%s24225_s0 + $0x50] sm:$0xff] }
 0x30f   :  { %v20942_v60 = vld [vmem:[#allocation2 + $0x3250] ss:$40 sps:$4 sm:$0xff]  }
 0x310   :  { %12217 = vmatpush1.bf16.msra.mxu0 %v20874_v33  ;;  %v20944_v33 = vld [vmem:[#allocation2 + $0x3254] ss:$40 sps:$4 sm:$0xff]  }
 0x311   :  { %12709 = vmatpush1.bf16.msra.mxu1 %v20877_v34  ;;  %12218 = vmatprep.subr.bf16.mxu0 %v20882_v37  ;;  %v20947_v34 = vld [vmem:[#allocation2 + $0x325c] ss:$40 sps:$4 sm:$0xff]   ;;  %v23997_v37 = vcombine.high %v23993_v32, %v23993_v32 }
 0x312   :  { %12710 = vmatprep.subr.bf16.mxu1 %v20885_v38  ;;  %v20945_v38 = vld [vmem:[#allocation2 + $0x3258] ss:$40 sps:$4 sm:$0xff]  }
 0x314   :  { %12219 = vmatpush1.bf16.msra.mxu0 %v20880_v39  ;;  %v20950_v39 = vld [vmem:[#allocation2 + $0x32a4] ss:$40 sps:$4 sm:$0xff]  }
 0x315   :  { %12711 = vmatpush1.bf16.msra.mxu1 %v20883_v40  ;;  %12220 = vmatprep.subr.bf16.mxu0 %v20888_v9  ;;  %v20953_v40 = vld [vmem:[#allocation2 + $0x32ac] ss:$40 sps:$4 sm:$0xff]   ;;  %v20948_v9 = vld [vmem:[#allocation2 + $0x32a0] ss:$40 sps:$4 sm:$0xff]  }
 0x316   :  { %12712 = vmatprep.subr.bf16.mxu1 %v20891_v44  ;;  %v20951_v44 = vld [vmem:[#allocation2 + $0x32a8] ss:$40 sps:$4 sm:$0xff]  }
 0x318   :  { %12221 = vmatpush1.bf16.msra.mxu0 %v20886_v45  ;;  %v20956_v45 = vld [vmem:[#allocation2 + $0x32f4] ss:$40 sps:$4 sm:$0xff]  }
 0x319   :  { %12713 = vmatpush1.bf16.msra.mxu1 %v20889_v46  ;;  %12222 = vmatprep.subr.bf16.mxu0 %v20894_v31  ;;  %v20959_v46 = vld [vmem:[#allocation2 + $0x32fc] ss:$40 sps:$4 sm:$0xff]   ;;  %v20954_v31 = vld [vmem:[#allocation2 + $0x32f0] ss:$40 sps:$4 sm:$0xff]  }
 0x31a   :  { %12714 = vmatprep.subr.bf16.mxu1 %v20897_v49  ;;  %v20957_v49 = vld [vmem:[#allocation2 + $0x32f8] ss:$40 sps:$4 sm:$0xff]  }
 0x31c   :  { %12223 = vmatpush1.bf16.msra.mxu0 %v20892_v50  ;;  %v20962_v50 = vld [vmem:[#allocation2 + $0x3344] ss:$40 sps:$4 sm:$0xff]  }
 0x31d   :  { %12715 = vmatpush1.bf16.msra.mxu1 %v20895_v51  ;;  %12224 = vmatprep.subr.bf16.mxu0 %v20900_v52  ;;  %v20965_v51 = vld [vmem:[#allocation2 + $0x334c] ss:$40 sps:$4 sm:$0xff]   ;;  %v20960_v52 = vld [vmem:[#allocation2 + $0x3340] ss:$40 sps:$4 sm:$0xff]  }
 0x31e   :  { %12716 = vmatprep.subr.bf16.mxu1 %v20903_v53  ;;  %v20963_v53 = vld [vmem:[#allocation2 + $0x3348] ss:$40 sps:$4 sm:$0xff]  }
 0x320   :  { %12225 = vmatpush1.bf16.msra.mxu0 %v20898_v54  ;;  %v20968_v54 = vld [vmem:[#allocation2 + $0x3394] ss:$40 sps:$4 sm:$0xff]  }
 0x321   :  { %12717 = vmatpush1.bf16.msra.mxu1 %v20901_v55  ;;  %12226 = vmatprep.subr.bf16.mxu0 %v20906_v58  ;;  %v20971_v55 = vld [vmem:[#allocation2 + $0x339c] ss:$40 sps:$4 sm:$0xff]   ;;  %v20966_v58 = vld [vmem:[#allocation2 + $0x3390] ss:$40 sps:$4 sm:$0xff]  }
 0x322   :  { %12718 = vmatprep.subr.bf16.mxu1 %v20909_v59  ;;  %v20969_v59 = vld [vmem:[#allocation2 + $0x3398] ss:$40 sps:$4 sm:$0xff]  }
 0x324   :  { %12227 = vmatpush1.bf16.msra.mxu0 %v20904_v41  ;;  %v20974_v41 = vld [vmem:[#allocation2 + $0x33e4] ss:$40 sps:$4 sm:$0xff]  }
 0x325   :  { %12719 = vmatpush1.bf16.msra.mxu1 %v20907_v63  ;;  %12228 = vmatprep.subr.bf16.mxu0 %v20912_v0  ;;  %v20977_v63 = vld [vmem:[#allocation2 + $0x33ec] ss:$40 sps:$4 sm:$0xff]   ;;  %v20972_v0 = vld [vmem:[#allocation2 + $0x33e0] ss:$40 sps:$4 sm:$0xff]  }
 0x326   :  { %12720 = vmatprep.subr.bf16.mxu1 %v20915_v1  ;;  %v20975_v1 = vld [vmem:[#allocation2 + $0x33e8] ss:$40 sps:$4 sm:$0xff]  }
 0x328   :  { %12229 = vmatpush1.bf16.msra.mxu0 %v20910_v21  ;;  %v20980_v21 = vld [vmem:[#allocation2 + $0x3434] ss:$40 sps:$4 sm:$0xff]  }
 0x329   :  { %12721 = vmatpush1.bf16.msra.mxu1 %v20913_v3  ;;  %12230 = vmatprep.subr.bf16.mxu0 %v20918_v4  ;;  %v20983_v3 = vld [vmem:[#allocation2 + $0x343c] ss:$40 sps:$4 sm:$0xff]   ;;  %v20978_v4 = vld [vmem:[#allocation2 + $0x3430] ss:$40 sps:$4 sm:$0xff]  }
 0x32a   :  { %12722 = vmatprep.subr.bf16.mxu1 %v20921_v6  ;;  %v20981_v6 = vld [vmem:[#allocation2 + $0x3438] ss:$40 sps:$4 sm:$0xff]  }
 0x32c   :  { %12231 = vmatpush1.bf16.msra.mxu0 %v20916_v7  ;;  %v20986_v7 = vld [vmem:[#allocation2 + $0x3484] ss:$40 sps:$4 sm:$0xff]  }
 0x32d   :  { %12723 = vmatpush1.bf16.msra.mxu1 %v20919_v8  ;;  %12232 = vmatprep.subr.bf16.mxu0 %v20924_v12  ;;  %v20989_v8 = vld [vmem:[#allocation2 + $0x348c] ss:$40 sps:$4 sm:$0xff]   ;;  %v20984_v12 = vld [vmem:[#allocation2 + $0x3480] ss:$40 sps:$4 sm:$0xff]  }
 0x32e   :  { %12724 = vmatprep.subr.bf16.mxu1 %v20927_v14  ;;  %v20987_v14 = vld [vmem:[#allocation2 + $0x3488] ss:$40 sps:$4 sm:$0xff]  }
 0x330   :  { %12233 = vmatpush1.bf16.msra.mxu0 %v20922_v16  ;;  %v20992_v16 = vld [vmem:[#allocation2 + $0x34d4] ss:$40 sps:$4 sm:$0xff]  }
 0x331   :  { %12725 = vmatpush1.bf16.msra.mxu1 %v20925_v17  ;;  %12234 = vmatprep.subr.bf16.mxu0 %v20930_v56  ;;  %v20995_v17 = vld [vmem:[#allocation2 + $0x34dc] ss:$40 sps:$4 sm:$0xff]   ;;  %v20990_v56 = vld [vmem:[#allocation2 + $0x34d0] ss:$40 sps:$4 sm:$0xff]  }
 0x332   :  { %12726 = vmatprep.subr.bf16.mxu1 %v20933_v19  ;;  %v20993_v19 = vld [vmem:[#allocation2 + $0x34d8] ss:$40 sps:$4 sm:$0xff]  }
 0x334   :  { %12235 = vmatpush1.bf16.msra.mxu0 %v20928_v22  ;;  %v20998_v22 = vld [vmem:[#allocation2 + $0x3524] ss:$40 sps:$4 sm:$0xff]  }
 0x335   :  { %12727 = vmatpush1.bf16.msra.mxu1 %v20931_v23  ;;  %12245 = vmatprep.subr.bf16.mxu0 %v20937_v13  ;;  %v21001_v23 = vld [vmem:[#allocation2 + $0x352c] ss:$40 sps:$4 sm:$0xff]   ;;  %v20996_v13 = vld [vmem:[#allocation2 + $0x3520] ss:$40 sps:$4 sm:$0xff]  }
 0x336   :  { %12737 = vmatprep.subr.bf16.mxu1 %v20940_v25  ;;  %v20999_v25 = vld [vmem:[#allocation2 + $0x3528] ss:$40 sps:$4 sm:$0xff]  }
 0x337   :  { %12237 = vmatmul.mubr.bf16.vlgmr.msra.gmra.mrb[0].mxu0 %v23988_v28 }
 0x338   :  { %12729 = vmatmul.mubr.bf16.vlgmr.msra.gmra.mrb[0].mxu1 %v23988_v28  ;;  %12246 = vmatpush1.bf16.msra.mxu0 %v20935_v26  ;;  %v21004_v26 = vld [vmem:[#allocation2 + $0x3574] ss:$40 sps:$4 sm:$0xff]  }
 0x339   :  { %12738 = vmatpush1.bf16.msra.mxu1 %v20938_v27  ;;  %12247 = vmatprep.subr.bf16.mxu0 %v20944_v33  ;;  %v21007_v27 = vld [vmem:[#allocation2 + $0x357c] ss:$40 sps:$4 sm:$0xff]   ;;  %v21002_v33 = vld [vmem:[#allocation2 + $0x3570] ss:$40 sps:$4 sm:$0xff]  }
 0x33a   :  { %12739 = vmatprep.subr.bf16.mxu1 %v20947_v34  ;;  %12277 = vmatprep.mubr.bf16.mxu0 %v23997_v37  ;;  %v21005_v34 = vld [vmem:[#allocation2 + $0x3578] ss:$40 sps:$4 sm:$0xff]  }
 0x33b   :  { %12769 = vmatprep.mubr.bf16.mxu1 %v23997_v37 }
 0x33c   :  { %12248 = vmatpush1.bf16.msra.mxu0 %v20942_v60  ;;  %v21010_v60 = vld [vmem:[#allocation2 + $0x35c4] ss:$40 sps:$4 sm:$0xff]  }
 0x33d   :  { %12740 = vmatpush1.bf16.msra.mxu1 %v20945_v38  ;;  %12249 = vmatprep.subr.bf16.mxu0 %v20950_v39  ;;  %v21013_v38 = vld [vmem:[#allocation2 + $0x35cc] ss:$40 sps:$4 sm:$0xff]   ;;  %v21008_v39 = vld [vmem:[#allocation2 + $0x35c0] ss:$40 sps:$4 sm:$0xff]  }
 0x33e   :  { %12741 = vmatprep.subr.bf16.mxu1 %v20953_v40  ;;  %v21011_v40 = vld [vmem:[#allocation2 + $0x35c8] ss:$40 sps:$4 sm:$0xff]  }
 0x340   :  { %12250 = vmatpush1.bf16.msra.mxu0 %v20948_v9  ;;  %v21016_v9 = vld [vmem:[#allocation2 + $0x3614] ss:$40 sps:$4 sm:$0xff]  }
 0x341   :  { %12742 = vmatpush1.bf16.msra.mxu1 %v20951_v44  ;;  %12251 = vmatprep.subr.bf16.mxu0 %v20956_v45  ;;  %v21019_v44 = vld [vmem:[#allocation2 + $0x361c] ss:$40 sps:$4 sm:$0xff]   ;;  %v21014_v45 = vld [vmem:[#allocation2 + $0x3610] ss:$40 sps:$4 sm:$0xff]  }
 0x342   :  { %12743 = vmatprep.subr.bf16.mxu1 %v20959_v46  ;;  %v21017_v46 = vld [vmem:[#allocation2 + $0x3618] ss:$40 sps:$4 sm:$0xff]  }
 0x344   :  { %12252 = vmatpush1.bf16.msra.mxu0 %v20954_v31  ;;  %v21022_v31 = vld [vmem:[#allocation2 + $0x3664] ss:$40 sps:$4 sm:$0xff]  }
 0x345   :  { %12744 = vmatpush1.bf16.msra.mxu1 %v20957_v49  ;;  %12253 = vmatprep.subr.bf16.mxu0 %v20962_v50  ;;  %v21025_v49 = vld [vmem:[#allocation2 + $0x366c] ss:$40 sps:$4 sm:$0xff]   ;;  %v21020_v50 = vld [vmem:[#allocation2 + $0x3660] ss:$40 sps:$4 sm:$0xff]  }
 0x346   :  { %12745 = vmatprep.subr.bf16.mxu1 %v20965_v51  ;;  %v21023_v51 = vld [vmem:[#allocation2 + $0x3668] ss:$40 sps:$4 sm:$0xff]  }
 0x348   :  { %12254 = vmatpush1.bf16.msra.mxu0 %v20960_v52  ;;  %v21028_v52 = vld [vmem:[#allocation2 + $0x36b4] ss:$40 sps:$4 sm:$0xff]  }
 0x349   :  { %12746 = vmatpush1.bf16.msra.mxu1 %v20963_v53  ;;  %12255 = vmatprep.subr.bf16.mxu0 %v20968_v54  ;;  %v21031_v53 = vld [vmem:[#allocation2 + $0x36bc] ss:$40 sps:$4 sm:$0xff]   ;;  %v21026_v54 = vld [vmem:[#allocation2 + $0x36b0] ss:$40 sps:$4 sm:$0xff]  }
 0x34a   :  { %12747 = vmatprep.subr.bf16.mxu1 %v20971_v55  ;;  %v21029_v55 = vld [vmem:[#allocation2 + $0x36b8] ss:$40 sps:$4 sm:$0xff]  }
 0x34c   :  { %12256 = vmatpush1.bf16.msra.mxu0 %v20966_v58  ;;  %v21035_v58 = vld [vmem:[#allocation2 + $0x3704] ss:$40 sps:$4 sm:$0xff]  }
 0x34d   :  { %12748 = vmatpush1.bf16.msra.mxu1 %v20969_v59  ;;  %12257 = vmatprep.subr.bf16.mxu0 %v20974_v41  ;;  %v21038_v59 = vld [vmem:[#allocation2 + $0x370c] ss:$40 sps:$4 sm:$0xff]   ;;  %v24006_v41 = vld [vmem:[%s24225_s0 + $0x58] sm:$0xff] }
 0x34e   :  { %12749 = vmatprep.subr.bf16.mxu1 %v20977_v63  ;;  %v24010_v63 = vcombine.low %v23993_v32, %v23993_v32  ;;  %v21040_v32 = vld [vmem:[#allocation2 + $0x3750] ss:$40 sps:$4 sm:$0xff]  }
 0x350   :  { %12258 = vmatpush1.bf16.msra.mxu0 %v20972_v0  ;;  %v21033_v0 = vld [vmem:[#allocation2 + $0x3700] ss:$40 sps:$4 sm:$0xff]  }
 0x351   :  { %12750 = vmatpush1.bf16.msra.mxu1 %v20975_v1  ;;  %12259 = vmatprep.subr.bf16.mxu0 %v20980_v21  ;;  %v21036_v1 = vld [vmem:[#allocation2 + $0x3708] ss:$40 sps:$4 sm:$0xff]   ;;  %v21042_v21 = vld [vmem:[#allocation2 + $0x3754] ss:$40 sps:$4 sm:$0xff]  }
 0x352   :  { %12751 = vmatprep.subr.bf16.mxu1 %v20983_v3  ;;  %v21045_v3 = vld [vmem:[#allocation2 + $0x375c] ss:$40 sps:$4 sm:$0xff]  }
 0x354   :  { %12260 = vmatpush1.bf16.msra.mxu0 %v20978_v4  ;;  %v24014_v4 = vcombine.high %v24006_v41, %v24006_v41 }
 0x355   :  { %12752 = vmatpush1.bf16.msra.mxu1 %v20981_v6  ;;  %12261 = vmatprep.subr.bf16.mxu0 %v20986_v7  ;;  %v21043_v6 = vld [vmem:[#allocation2 + $0x3758] ss:$40 sps:$4 sm:$0xff]   ;;  %v21048_v7 = vld [vmem:[#allocation2 + $0x37a4] ss:$40 sps:$4 sm:$0xff]  }
 0x356   :  { %12753 = vmatprep.subr.bf16.mxu1 %v20989_v8  ;;  %v21051_v8 = vld [vmem:[#allocation2 + $0x37ac] ss:$40 sps:$4 sm:$0xff]  }
 0x358   :  { %12262 = vmatpush1.bf16.msra.mxu0 %v20984_v12  ;;  %v21046_v12 = vld [vmem:[#allocation2 + $0x37a0] ss:$40 sps:$4 sm:$0xff]  }
 0x359   :  { %12754 = vmatpush1.bf16.msra.mxu1 %v20987_v14  ;;  %12263 = vmatprep.subr.bf16.mxu0 %v20992_v16  ;;  %v21049_v14 = vld [vmem:[#allocation2 + $0x37a8] ss:$40 sps:$4 sm:$0xff]   ;;  %v21054_v16 = vld [vmem:[#allocation2 + $0x37f4] ss:$40 sps:$4 sm:$0xff]  }
 0x35a   :  { %12755 = vmatprep.subr.bf16.mxu1 %v20995_v17  ;;  %v21057_v17 = vld [vmem:[#allocation2 + $0x37fc] ss:$40 sps:$4 sm:$0xff]  }
 0x35c   :  { %12264 = vmatpush1.bf16.msra.mxu0 %v20990_v56  ;;  %v21052_v56 = vld [vmem:[#allocation2 + $0x37f0] ss:$40 sps:$4 sm:$0xff]  }
 0x35d   :  { %12756 = vmatpush1.bf16.msra.mxu1 %v20993_v19  ;;  %12265 = vmatprep.subr.bf16.mxu0 %v20998_v22  ;;  %v21055_v19 = vld [vmem:[#allocation2 + $0x37f8] ss:$40 sps:$4 sm:$0xff]   ;;  %v21060_v22 = vld [vmem:[#allocation2 + $0x3844] ss:$40 sps:$4 sm:$0xff]  }
 0x35e   :  { %12757 = vmatprep.subr.bf16.mxu1 %v21001_v23  ;;  %v21063_v23 = vld [vmem:[#allocation2 + $0x384c] ss:$40 sps:$4 sm:$0xff]  }
 0x360   :  { %12266 = vmatpush1.bf16.msra.mxu0 %v20996_v13  ;;  %v21058_v13 = vld [vmem:[#allocation2 + $0x3840] ss:$40 sps:$4 sm:$0xff]  }
 0x361   :  { %12758 = vmatpush1.bf16.msra.mxu1 %v20999_v25  ;;  %12267 = vmatprep.subr.bf16.mxu0 %v21004_v26  ;;  %v21061_v25 = vld [vmem:[#allocation2 + $0x3848] ss:$40 sps:$4 sm:$0xff]   ;;  %v21066_v26 = vld [vmem:[#allocation2 + $0x3894] ss:$40 sps:$4 sm:$0xff]  }
 0x362   :  { %12759 = vmatprep.subr.bf16.mxu1 %v21007_v27  ;;  %v21069_v27 = vld [vmem:[#allocation2 + $0x389c] ss:$40 sps:$4 sm:$0xff]  }
 0x364   :  { %12268 = vmatpush1.bf16.msra.mxu0 %v21002_v33  ;;  %v21064_v33 = vld [vmem:[#allocation2 + $0x3890] ss:$40 sps:$4 sm:$0xff]  }
 0x365   :  { %12760 = vmatpush1.bf16.msra.mxu1 %v21005_v34  ;;  %12269 = vmatprep.subr.bf16.mxu0 %v21010_v60  ;;  %v21067_v34 = vld [vmem:[#allocation2 + $0x3898] ss:$40 sps:$4 sm:$0xff]   ;;  %v21072_v60 = vld [vmem:[#allocation2 + $0x38e4] ss:$40 sps:$4 sm:$0xff]  }
 0x366   :  { %12761 = vmatprep.subr.bf16.mxu1 %v21013_v38  ;;  %v21075_v38 = vld [vmem:[#allocation2 + $0x38ec] ss:$40 sps:$4 sm:$0xff]  }
 0x368   :  { %12270 = vmatpush1.bf16.msra.mxu0 %v21008_v39  ;;  %v21070_v39 = vld [vmem:[#allocation2 + $0x38e0] ss:$40 sps:$4 sm:$0xff]  }
 0x369   :  { %12762 = vmatpush1.bf16.msra.mxu1 %v21011_v40  ;;  %12271 = vmatprep.subr.bf16.mxu0 %v21016_v9  ;;  %v21073_v40 = vld [vmem:[#allocation2 + $0x38e8] ss:$40 sps:$4 sm:$0xff]   ;;  %v21078_v9 = vld [vmem:[#allocation2 + $0x3934] ss:$40 sps:$4 sm:$0xff]  }
 0x36a   :  { %12763 = vmatprep.subr.bf16.mxu1 %v21019_v44  ;;  %v21081_v44 = vld [vmem:[#allocation2 + $0x393c] ss:$40 sps:$4 sm:$0xff]  }
 0x36c   :  { %12272 = vmatpush1.bf16.msra.mxu0 %v21014_v45  ;;  %v21076_v45 = vld [vmem:[#allocation2 + $0x3930] ss:$40 sps:$4 sm:$0xff]  }
 0x36d   :  { %12764 = vmatpush1.bf16.msra.mxu1 %v21017_v46  ;;  %12273 = vmatprep.subr.bf16.mxu0 %v21022_v31  ;;  %v21079_v46 = vld [vmem:[#allocation2 + $0x3938] ss:$40 sps:$4 sm:$0xff]   ;;  %v21084_v31 = vld [vmem:[#allocation2 + $0x3984] ss:$40 sps:$4 sm:$0xff]  }
 0x36e   :  { %12765 = vmatprep.subr.bf16.mxu1 %v21025_v49  ;;  %v21087_v49 = vld [vmem:[#allocation2 + $0x398c] ss:$40 sps:$4 sm:$0xff]  }
 0x370   :  { %12274 = vmatpush1.bf16.msra.mxu0 %v21020_v50  ;;  %v21082_v50 = vld [vmem:[#allocation2 + $0x3980] ss:$40 sps:$4 sm:$0xff]  }
 0x371   :  { %12766 = vmatpush1.bf16.msra.mxu1 %v21023_v51  ;;  %12275 = vmatprep.subr.bf16.mxu0 %v21028_v52  ;;  %v21085_v51 = vld [vmem:[#allocation2 + $0x3988] ss:$40 sps:$4 sm:$0xff]   ;;  %v21090_v52 = vld [vmem:[#allocation2 + $0x39d4] ss:$40 sps:$4 sm:$0xff]  }
 0x372   :  { %12767 = vmatprep.subr.bf16.mxu1 %v21031_v53  ;;  %v21093_v53 = vld [vmem:[#allocation2 + $0x39dc] ss:$40 sps:$4 sm:$0xff]  }
 0x374   :  { %12276 = vmatpush1.bf16.msra.mxu0 %v21026_v54  ;;  %v21088_v54 = vld [vmem:[#allocation2 + $0x39d0] ss:$40 sps:$4 sm:$0xff]  }
 0x375   :  { %12768 = vmatpush1.bf16.msra.mxu1 %v21029_v55  ;;  %12286 = vmatprep.subr.bf16.mxu0 %v21035_v58  ;;  %v21091_v55 = vld [vmem:[#allocation2 + $0x39d8] ss:$40 sps:$4 sm:$0xff]   ;;  %v21096_v58 = vld [vmem:[#allocation2 + $0x3a24] ss:$40 sps:$4 sm:$0xff]  }
 0x376   :  { %12778 = vmatprep.subr.bf16.mxu1 %v21038_v59  ;;  %v21099_v59 = vld [vmem:[#allocation2 + $0x3a2c] ss:$40 sps:$4 sm:$0xff]  }
 0x377   :  { %12278 = vmatmul.mubr.bf16.vlgmr.msra.gmra.mrb[0].mxu0 %v24010_v63 }
 0x378   :  { %12770 = vmatmul.mubr.bf16.vlgmr.msra.gmra.mrb[0].mxu1 %v24010_v63  ;;  %12287 = vmatpush1.bf16.msra.mxu0 %v21033_v0  ;;  %v21094_v0 = vld [vmem:[#allocation2 + $0x3a20] ss:$40 sps:$4 sm:$0xff]  }
 0x379   :  { %12779 = vmatpush1.bf16.msra.mxu1 %v21036_v1  ;;  %12288 = vmatprep.subr.bf16.mxu0 %v21042_v21  ;;  %v21097_v1 = vld [vmem:[#allocation2 + $0x3a28] ss:$40 sps:$4 sm:$0xff]   ;;  %v21102_v21 = vld [vmem:[#allocation2 + $0x3a74] ss:$40 sps:$4 sm:$0xff]  }
 0x37a   :  { %12780 = vmatprep.subr.bf16.mxu1 %v21045_v3  ;;  %12318 = vmatprep.mubr.bf16.mxu0 %v24014_v4  ;;  %v21105_v3 = vld [vmem:[#allocation2 + $0x3a7c] ss:$40 sps:$4 sm:$0xff]  }
 0x37b   :  { %12810 = vmatprep.mubr.bf16.mxu1 %v24014_v4 }
 0x37c   :  { %12289 = vmatpush1.bf16.msra.mxu0 %v21040_v32  ;;  %v21100_v32 = vld [vmem:[#allocation2 + $0x3a70] ss:$40 sps:$4 sm:$0xff]  }
 0x37d   :  { %12781 = vmatpush1.bf16.msra.mxu1 %v21043_v6  ;;  %12290 = vmatprep.subr.bf16.mxu0 %v21048_v7  ;;  %v21103_v6 = vld [vmem:[#allocation2 + $0x3a78] ss:$40 sps:$4 sm:$0xff]   ;;  %v21108_v7 = vld [vmem:[#allocation2 + $0x3ac4] ss:$40 sps:$4 sm:$0xff]  }
 0x37e   :  { %12782 = vmatprep.subr.bf16.mxu1 %v21051_v8  ;;  %v21111_v8 = vld [vmem:[#allocation2 + $0x3acc] ss:$40 sps:$4 sm:$0xff]  }
 0x380   :  { %12291 = vmatpush1.bf16.msra.mxu0 %v21046_v12  ;;  %v21106_v12 = vld [vmem:[#allocation2 + $0x3ac0] ss:$40 sps:$4 sm:$0xff]  }
 0x381   :  { %12783 = vmatpush1.bf16.msra.mxu1 %v21049_v14  ;;  %12292 = vmatprep.subr.bf16.mxu0 %v21054_v16  ;;  %v21109_v14 = vld [vmem:[#allocation2 + $0x3ac8] ss:$40 sps:$4 sm:$0xff]   ;;  %v21114_v16 = vld [vmem:[#allocation2 + $0x3b14] ss:$40 sps:$4 sm:$0xff]  }
 0x382   :  { %12784 = vmatprep.subr.bf16.mxu1 %v21057_v17  ;;  %v21117_v17 = vld [vmem:[#allocation2 + $0x3b1c] ss:$40 sps:$4 sm:$0xff]  }
 0x384   :  { %12293 = vmatpush1.bf16.msra.mxu0 %v21052_v56  ;;  %v21112_v56 = vld [vmem:[#allocation2 + $0x3b10] ss:$40 sps:$4 sm:$0xff]  }
 0x385   :  { %12785 = vmatpush1.bf16.msra.mxu1 %v21055_v19  ;;  %12294 = vmatprep.subr.bf16.mxu0 %v21060_v22  ;;  %v21115_v19 = vld [vmem:[#allocation2 + $0x3b18] ss:$40 sps:$4 sm:$0xff]   ;;  %v21120_v22 = vld [vmem:[#allocation2 + $0x3b64] ss:$40 sps:$4 sm:$0xff]  }
 0x386   :  { %12786 = vmatprep.subr.bf16.mxu1 %v21063_v23  ;;  %v21123_v23 = vld [vmem:[#allocation2 + $0x3b6c] ss:$40 sps:$4 sm:$0xff]  }
 0x388   :  { %12295 = vmatpush1.bf16.msra.mxu0 %v21058_v13  ;;  %v21118_v13 = vld [vmem:[#allocation2 + $0x3b60] ss:$40 sps:$4 sm:$0xff]  }
 0x389   :  { %12787 = vmatpush1.bf16.msra.mxu1 %v21061_v25  ;;  %12296 = vmatprep.subr.bf16.mxu0 %v21066_v26  ;;  %v21121_v25 = vld [vmem:[#allocation2 + $0x3b68] ss:$40 sps:$4 sm:$0xff]   ;;  %v21126_v26 = vld [vmem:[#allocation2 + $0x3bb4] ss:$40 sps:$4 sm:$0xff]  }
 0x38a   :  { %12788 = vmatprep.subr.bf16.mxu1 %v21069_v27  ;;  %v21129_v27 = vld [vmem:[#allocation2 + $0x3bbc] ss:$40 sps:$4 sm:$0xff]  }
 0x38c   :  { %12297 = vmatpush1.bf16.msra.mxu0 %v21064_v33  ;;  %v21124_v33 = vld [vmem:[#allocation2 + $0x3bb0] ss:$40 sps:$4 sm:$0xff]  }
 0x38d   :  { %12789 = vmatpush1.bf16.msra.mxu1 %v21067_v34  ;;  %12298 = vmatprep.subr.bf16.mxu0 %v21072_v60  ;;  %v21127_v34 = vld [vmem:[#allocation2 + $0x3bb8] ss:$40 sps:$4 sm:$0xff]   ;;  %v21134_v60 = vld [vmem:[#allocation2 + $0x14] ss:$40 sps:$4 sm:$0xff]  }
 0x38e   :  { %12790 = vmatprep.subr.bf16.mxu1 %v21075_v38  ;;  %v21137_v38 = vld [vmem:[#allocation2 + $0x1c] ss:$40 sps:$4 sm:$0xff]  }
 0x390   :  { %12299 = vmatpush1.bf16.msra.mxu0 %v21070_v39  ;;  %v24022_v39 = vcombine.low %v24006_v41, %v24006_v41  ;;  %v21146_v41 = vld [vmem:[#allocation2 + $0xb4] ss:$40 sps:$4 sm:$0xff]  }
 0x391   :  { %12791 = vmatpush1.bf16.msra.mxu1 %v21073_v40  ;;  %12300 = vmatprep.subr.bf16.mxu0 %v21078_v9  ;;  %v21132_v40 = vld [vmem:[#allocation2 + $0x10] ss:$40 sps:$4 sm:$0xff]  }
 0x392   :  { %12792 = vmatprep.subr.bf16.mxu1 %v21081_v44  ;;  %v21135_v9 = vld [vmem:[#allocation2 + $0x18] ss:$40 sps:$4 sm:$0xff]   ;;  %v21140_v44 = vld [vmem:[#allocation2 + $0x64] ss:$40 sps:$4 sm:$0xff]  }
 0x394   :  { %12301 = vmatpush1.bf16.msra.mxu0 %v21076_v45  ;;  %v21143_v45 = vld [vmem:[#allocation2 + $0x6c] ss:$40 sps:$4 sm:$0xff]  }
 0x395   :  { %12793 = vmatpush1.bf16.msra.mxu1 %v21079_v46  ;;  %12302 = vmatprep.subr.bf16.mxu0 %v21084_v31  ;;  %v21138_v46 = vld [vmem:[#allocation2 + $0x60] ss:$40 sps:$4 sm:$0xff]  }
 0x396   :  { %12794 = vmatprep.subr.bf16.mxu1 %v21087_v49  ;;  %v21141_v31 = vld [vmem:[#allocation2 + $0x68] ss:$40 sps:$4 sm:$0xff]   ;;  %v21149_v49 = vld [vmem:[#allocation2 + $0xbc] ss:$40 sps:$4 sm:$0xff]  }
 0x398   :  { %12303 = vmatpush1.bf16.msra.mxu0 %v21082_v50  ;;  %v21144_v50 = vld [vmem:[#allocation2 + $0xb0] ss:$40 sps:$4 sm:$0xff]  }
 0x399   :  { %12795 = vmatpush1.bf16.msra.mxu1 %v21085_v51  ;;  %12304 = vmatprep.subr.bf16.mxu0 %v21090_v52  ;;  %v21147_v51 = vld [vmem:[#allocation2 + $0xb8] ss:$40 sps:$4 sm:$0xff]   ;;  %v21152_v52 = vld [vmem:[#allocation2 + $0x104] ss:$40 sps:$4 sm:$0xff]  }
 0x39a   :  { %12796 = vmatprep.subr.bf16.mxu1 %v21093_v53  ;;  %v21155_v53 = vld [vmem:[#allocation2 + $0x10c] ss:$40 sps:$4 sm:$0xff]  }
 0x39c   :  { %12305 = vmatpush1.bf16.msra.mxu0 %v21088_v54  ;;  %v21150_v54 = vld [vmem:[#allocation2 + $0x100] ss:$40 sps:$4 sm:$0xff]  }
 0x39d   :  { %12797 = vmatpush1.bf16.msra.mxu1 %v21091_v55  ;;  %12306 = vmatprep.subr.bf16.mxu0 %v21096_v58  ;;  %v21153_v55 = vld [vmem:[#allocation2 + $0x108] ss:$40 sps:$4 sm:$0xff]   ;;  %v21158_v58 = vld [vmem:[#allocation2 + $0x154] ss:$40 sps:$4 sm:$0xff]  }
 0x39e   :  { %12798 = vmatprep.subr.bf16.mxu1 %v21099_v59  ;;  %v21161_v59 = vld [vmem:[#allocation2 + $0x15c] ss:$40 sps:$4 sm:$0xff]  }
 0x3a0   :  { %12307 = vmatpush1.bf16.msra.mxu0 %v21094_v0  ;;  %v21156_v0 = vld [vmem:[#allocation2 + $0x150] ss:$40 sps:$4 sm:$0xff]  }
 0x3a1   :  { %12799 = vmatpush1.bf16.msra.mxu1 %v21097_v1  ;;  %12308 = vmatprep.subr.bf16.mxu0 %v21102_v21  ;;  %v21159_v1 = vld [vmem:[#allocation2 + $0x158] ss:$40 sps:$4 sm:$0xff]   ;;  %v21164_v21 = vld [vmem:[#allocation2 + $0x1a4] ss:$40 sps:$4 sm:$0xff]  }
 0x3a2   :  { %12800 = vmatprep.subr.bf16.mxu1 %v21105_v3  ;;  %v21167_v3 = vld [vmem:[#allocation2 + $0x1ac] ss:$40 sps:$4 sm:$0xff]  }
 0x3a4   :  { %12309 = vmatpush1.bf16.msra.mxu0 %v21100_v32  ;;  %v21162_v32 = vld [vmem:[#allocation2 + $0x1a0] ss:$40 sps:$4 sm:$0xff]  }
 0x3a5   :  { %12801 = vmatpush1.bf16.msra.mxu1 %v21103_v6  ;;  %12310 = vmatprep.subr.bf16.mxu0 %v21108_v7  ;;  %v21165_v6 = vld [vmem:[#allocation2 + $0x1a8] ss:$40 sps:$4 sm:$0xff]   ;;  %v21170_v7 = vld [vmem:[#allocation2 + $0x1f4] ss:$40 sps:$4 sm:$0xff]  }
 0x3a6   :  { %12802 = vmatprep.subr.bf16.mxu1 %v21111_v8  ;;  %v21173_v8 = vld [vmem:[#allocation2 + $0x1fc] ss:$40 sps:$4 sm:$0xff]  }
 0x3a8   :  { %12311 = vmatpush1.bf16.msra.mxu0 %v21106_v12  ;;  %v21168_v12 = vld [vmem:[#allocation2 + $0x1f0] ss:$40 sps:$4 sm:$0xff]  }
 0x3a9   :  { %12803 = vmatpush1.bf16.msra.mxu1 %v21109_v14  ;;  %12312 = vmatprep.subr.bf16.mxu0 %v21114_v16  ;;  %v21171_v14 = vld [vmem:[#allocation2 + $0x1f8] ss:$40 sps:$4 sm:$0xff]   ;;  %v21176_v16 = vld [vmem:[#allocation2 + $0x244] ss:$40 sps:$4 sm:$0xff]  }
 0x3aa   :  { %12804 = vmatprep.subr.bf16.mxu1 %v21117_v17  ;;  %v21179_v17 = vld [vmem:[#allocation2 + $0x24c] ss:$40 sps:$4 sm:$0xff]  }
 0x3ac   :  { %12313 = vmatpush1.bf16.msra.mxu0 %v21112_v56  ;;  %v21174_v56 = vld [vmem:[#allocation2 + $0x240] ss:$40 sps:$4 sm:$0xff]  }
 0x3ad   :  { %12805 = vmatpush1.bf16.msra.mxu1 %v21115_v19  ;;  %12314 = vmatprep.subr.bf16.mxu0 %v21120_v22  ;;  %v21177_v19 = vld [vmem:[#allocation2 + $0x248] ss:$40 sps:$4 sm:$0xff]   ;;  %v21182_v22 = vld [vmem:[#allocation2 + $0x294] ss:$40 sps:$4 sm:$0xff]  }
 0x3ae   :  { %12806 = vmatprep.subr.bf16.mxu1 %v21123_v23  ;;  %v21185_v23 = vld [vmem:[#allocation2 + $0x29c] ss:$40 sps:$4 sm:$0xff]  }
 0x3b0   :  { %12315 = vmatpush1.bf16.msra.mxu0 %v21118_v13  ;;  %v21180_v13 = vld [vmem:[#allocation2 + $0x290] ss:$40 sps:$4 sm:$0xff]  }
 0x3b1   :  { %12807 = vmatpush1.bf16.msra.mxu1 %v21121_v25  ;;  %12316 = vmatprep.subr.bf16.mxu0 %v21126_v26  ;;  %v21183_v25 = vld [vmem:[#allocation2 + $0x298] ss:$40 sps:$4 sm:$0xff]   ;;  %v21188_v26 = vld [vmem:[#allocation2 + $0x2e4] ss:$40 sps:$4 sm:$0xff]  }
 0x3b2   :  { %12808 = vmatprep.subr.bf16.mxu1 %v21129_v27  ;;  %v21191_v27 = vld [vmem:[#allocation2 + $0x2ec] ss:$40 sps:$4 sm:$0xff]  }
 0x3b4   :  { %12317 = vmatpush1.bf16.msra.mxu0 %v21124_v33  ;;  %v21186_v33 = vld [vmem:[#allocation2 + $0x2e0] ss:$40 sps:$4 sm:$0xff]  }
 0x3b5   :  { %12809 = vmatpush1.bf16.msra.mxu1 %v21127_v34  ;;  %12819 = vmatprep.subr.bf16.mxu0 %v21134_v60  ;;  %v21189_v34 = vld [vmem:[#allocation2 + $0x2e8] ss:$40 sps:$4 sm:$0xff]   ;;  %v21194_v60 = vld [vmem:[#allocation2 + $0x334] ss:$40 sps:$4 sm:$0xff]  }
 0x3b6   :  { %13311 = vmatprep.subr.bf16.mxu1 %v21137_v38  ;;  %v21197_v38 = vld [vmem:[#allocation2 + $0x33c] ss:$40 sps:$4 sm:$0xff]  }
 0x3b7   :  { %12319 = vmatmul.mubr.bf16.vlgmr.msra.gmra.mrb[0].mxu0 %v24022_v39 }
 0x3b8   :  { %12811 = vmatmul.mubr.bf16.vlgmr.msra.gmra.mrb[0].mxu1 %v24022_v39  ;;  %12820 = vmatpush1.bf16.msra.mxu0 %v21132_v40  ;;  %v21192_v40 = vld [vmem:[#allocation2 + $0x330] ss:$40 sps:$4 sm:$0xff]  }
 0x3b9   :  { %13312 = vmatpush1.bf16.msra.mxu1 %v21135_v9  ;;  %12821 = vmatprep.subr.bf16.mxu0 %v21140_v44  ;;  %v21195_v9 = vld [vmem:[#allocation2 + $0x338] ss:$40 sps:$4 sm:$0xff]   ;;  %v21200_v44 = vld [vmem:[#allocation2 + $0x384] ss:$40 sps:$4 sm:$0xff]  }
 0x3ba   :  { %13313 = vmatprep.subr.bf16.mxu1 %v21143_v45  ;;  %12851 = vmatprep.mubr.bf16.mxu0 %v23831_v48  ;;  %v21203_v45 = vld [vmem:[#allocation2 + $0x38c] ss:$40 sps:$4 sm:$0xff]  }
 0x3bb   :  { %13343 = vmatprep.mubr.bf16.mxu1 %v23831_v48 }
 0x3bc   :  { %12822 = vmatpush1.bf16.msra.mxu0 %v21138_v46  ;;  %v21198_v46 = vld [vmem:[#allocation2 + $0x380] ss:$40 sps:$4 sm:$0xff]  }
 0x3bd   :  { %13314 = vmatpush1.bf16.msra.mxu1 %v21141_v31  ;;  %12823 = vmatprep.subr.bf16.mxu0 %v21146_v41  ;;  %v21201_v31 = vld [vmem:[#allocation2 + $0x388] ss:$40 sps:$4 sm:$0xff]   ;;  %v21206_v41 = vld [vmem:[#allocation2 + $0x3d4] ss:$40 sps:$4 sm:$0xff]  }
 0x3be   :  { %13315 = vmatprep.subr.bf16.mxu1 %v21149_v49  ;;  %v21209_v49 = vld [vmem:[#allocation2 + $0x3dc] ss:$40 sps:$4 sm:$0xff]  }
 0x3c0   :  { %12824 = vmatpush1.bf16.msra.mxu0 %v21144_v50  ;;  %v21204_v50 = vld [vmem:[#allocation2 + $0x3d0] ss:$40 sps:$4 sm:$0xff]  }
 0x3c1   :  { %13316 = vmatpush1.bf16.msra.mxu1 %v21147_v51  ;;  %12825 = vmatprep.subr.bf16.mxu0 %v21152_v52  ;;  %v21207_v51 = vld [vmem:[#allocation2 + $0x3d8] ss:$40 sps:$4 sm:$0xff]   ;;  %v21212_v52 = vld [vmem:[#allocation2 + $0x424] ss:$40 sps:$4 sm:$0xff]  }
 0x3c2   :  { %13317 = vmatprep.subr.bf16.mxu1 %v21155_v53  ;;  %v21215_v53 = vld [vmem:[#allocation2 + $0x42c] ss:$40 sps:$4 sm:$0xff]  }
 0x3c4   :  { %12826 = vmatpush1.bf16.msra.mxu0 %v21150_v54  ;;  %v21210_v54 = vld [vmem:[#allocation2 + $0x420] ss:$40 sps:$4 sm:$0xff]  }
 0x3c5   :  { %13318 = vmatpush1.bf16.msra.mxu1 %v21153_v55  ;;  %12827 = vmatprep.subr.bf16.mxu0 %v21158_v58  ;;  %v21213_v55 = vld [vmem:[#allocation2 + $0x428] ss:$40 sps:$4 sm:$0xff]   ;;  %v21218_v58 = vld [vmem:[#allocation2 + $0x474] ss:$40 sps:$4 sm:$0xff]  }
 0x3c6   :  { %13319 = vmatprep.subr.bf16.mxu1 %v21161_v59  ;;  %v21221_v59 = vld [vmem:[#allocation2 + $0x47c] ss:$40 sps:$4 sm:$0xff]  }
 0x3c8   :  { %12828 = vmatpush1.bf16.msra.mxu0 %v21156_v0  ;;  %v21216_v0 = vld [vmem:[#allocation2 + $0x470] ss:$40 sps:$4 sm:$0xff]  }
 0x3c9   :  { %13320 = vmatpush1.bf16.msra.mxu1 %v21159_v1  ;;  %12829 = vmatprep.subr.bf16.mxu0 %v21164_v21  ;;  %v21219_v1 = vld [vmem:[#allocation2 + $0x478] ss:$40 sps:$4 sm:$0xff]   ;;  %v21224_v21 = vld [vmem:[#allocation2 + $0x4c4] ss:$40 sps:$4 sm:$0xff]  }
 0x3ca   :  { %13321 = vmatprep.subr.bf16.mxu1 %v21167_v3  ;;  %v21227_v3 = vld [vmem:[#allocation2 + $0x4cc] ss:$40 sps:$4 sm:$0xff]  }
 0x3cc   :  { %12830 = vmatpush1.bf16.msra.mxu0 %v21162_v32  ;;  %v21222_v32 = vld [vmem:[#allocation2 + $0x4c0] ss:$40 sps:$4 sm:$0xff]  }
 0x3cd   :  { %13322 = vmatpush1.bf16.msra.mxu1 %v21165_v6  ;;  %12831 = vmatprep.subr.bf16.mxu0 %v21170_v7  ;;  %v21225_v6 = vld [vmem:[#allocation2 + $0x4c8] ss:$40 sps:$4 sm:$0xff]   ;;  %v21230_v7 = vld [vmem:[#allocation2 + $0x514] ss:$40 sps:$4 sm:$0xff]  }
 0x3ce   :  { %13323 = vmatprep.subr.bf16.mxu1 %v21173_v8  ;;  %v21233_v8 = vld [vmem:[#allocation2 + $0x51c] ss:$40 sps:$4 sm:$0xff]  }
 0x3d0   :  { %12832 = vmatpush1.bf16.msra.mxu0 %v21168_v12  ;;  %v21228_v12 = vld [vmem:[#allocation2 + $0x510] ss:$40 sps:$4 sm:$0xff]  }
 0x3d1   :  { %13324 = vmatpush1.bf16.msra.mxu1 %v21171_v14  ;;  %12833 = vmatprep.subr.bf16.mxu0 %v21176_v16  ;;  %v21231_v14 = vld [vmem:[#allocation2 + $0x518] ss:$40 sps:$4 sm:$0xff]   ;;  %v21236_v16 = vld [vmem:[#allocation2 + $0x564] ss:$40 sps:$4 sm:$0xff]  }
 0x3d2   :  { %13325 = vmatprep.subr.bf16.mxu1 %v21179_v17  ;;  %v21239_v17 = vld [vmem:[#allocation2 + $0x56c] ss:$40 sps:$4 sm:$0xff]  }
 0x3d4   :  { %12834 = vmatpush1.bf16.msra.mxu0 %v21174_v56  ;;  %v21234_v56 = vld [vmem:[#allocation2 + $0x560] ss:$40 sps:$4 sm:$0xff]  }
 0x3d5   :  { %13326 = vmatpush1.bf16.msra.mxu1 %v21177_v19  ;;  %12835 = vmatprep.subr.bf16.mxu0 %v21182_v22  ;;  %v21237_v19 = vld [vmem:[#allocation2 + $0x568] ss:$40 sps:$4 sm:$0xff]   ;;  %v21242_v22 = vld [vmem:[#allocation2 + $0x5b4] ss:$40 sps:$4 sm:$0xff]  }
 0x3d6   :  { %13327 = vmatprep.subr.bf16.mxu1 %v21185_v23  ;;  %v21245_v23 = vld [vmem:[#allocation2 + $0x5bc] ss:$40 sps:$4 sm:$0xff]  }
 0x3d8   :  { %12836 = vmatpush1.bf16.msra.mxu0 %v21180_v13  ;;  %v21240_v13 = vld [vmem:[#allocation2 + $0x5b0] ss:$40 sps:$4 sm:$0xff]  }
 0x3d9   :  { %13328 = vmatpush1.bf16.msra.mxu1 %v21183_v25  ;;  %12837 = vmatprep.subr.bf16.mxu0 %v21188_v26  ;;  %v21243_v25 = vld [vmem:[#allocation2 + $0x5b8] ss:$40 sps:$4 sm:$0xff]   ;;  %v21248_v26 = vld [vmem:[#allocation2 + $0x604] ss:$40 sps:$4 sm:$0xff]  }
 0x3da   :  { %13329 = vmatprep.subr.bf16.mxu1 %v21191_v27  ;;  %v21251_v27 = vld [vmem:[#allocation2 + $0x60c] ss:$40 sps:$4 sm:$0xff]  }
 0x3dc   :  { %12838 = vmatpush1.bf16.msra.mxu0 %v21186_v33  ;;  %v21246_v33 = vld [vmem:[#allocation2 + $0x600] ss:$40 sps:$4 sm:$0xff]  }
 0x3dd   :  { %13330 = vmatpush1.bf16.msra.mxu1 %v21189_v34  ;;  %12839 = vmatprep.subr.bf16.mxu0 %v21194_v60  ;;  %v21249_v34 = vld [vmem:[#allocation2 + $0x608] ss:$40 sps:$4 sm:$0xff]   ;;  %v21254_v60 = vld [vmem:[#allocation2 + $0x654] ss:$40 sps:$4 sm:$0xff]  }
 0x3de   :  { %13331 = vmatprep.subr.bf16.mxu1 %v21197_v38  ;;  %v21257_v38 = vld [vmem:[#allocation2 + $0x65c] ss:$40 sps:$4 sm:$0xff]  }
 0x3e0   :  { %12840 = vmatpush1.bf16.msra.mxu0 %v21192_v40  ;;  %v21252_v40 = vld [vmem:[#allocation2 + $0x650] ss:$40 sps:$4 sm:$0xff]  }
 0x3e1   :  { %13332 = vmatpush1.bf16.msra.mxu1 %v21195_v9  ;;  %12841 = vmatprep.subr.bf16.mxu0 %v21200_v44  ;;  %v21255_v9 = vld [vmem:[#allocation2 + $0x658] ss:$40 sps:$4 sm:$0xff]   ;;  %v21260_v44 = vld [vmem:[#allocation2 + $0x6a4] ss:$40 sps:$4 sm:$0xff]  }
 0x3e2   :  { %13333 = vmatprep.subr.bf16.mxu1 %v21203_v45  ;;  %v21263_v45 = vld [vmem:[#allocation2 + $0x6ac] ss:$40 sps:$4 sm:$0xff]  }
 0x3e4   :  { %12842 = vmatpush1.bf16.msra.mxu0 %v21198_v46  ;;  %v21258_v46 = vld [vmem:[#allocation2 + $0x6a0] ss:$40 sps:$4 sm:$0xff]  }
 0x3e5   :  { %13334 = vmatpush1.bf16.msra.mxu1 %v21201_v31  ;;  %12843 = vmatprep.subr.bf16.mxu0 %v21206_v41  ;;  %v21261_v31 = vld [vmem:[#allocation2 + $0x6a8] ss:$40 sps:$4 sm:$0xff]   ;;  %v21266_v41 = vld [vmem:[#allocation2 + $0x6f4] ss:$40 sps:$4 sm:$0xff]  }
 0x3e6   :  { %13335 = vmatprep.subr.bf16.mxu1 %v21209_v49  ;;  %v21269_v49 = vld [vmem:[#allocation2 + $0x6fc] ss:$40 sps:$4 sm:$0xff]  }
 0x3e8   :  { %12844 = vmatpush1.bf16.msra.mxu0 %v21204_v50  ;;  %v21264_v50 = vld [vmem:[#allocation2 + $0x6f0] ss:$40 sps:$4 sm:$0xff]  }
 0x3e9   :  { %13336 = vmatpush1.bf16.msra.mxu1 %v21207_v51  ;;  %12845 = vmatprep.subr.bf16.mxu0 %v21212_v52  ;;  %v21267_v51 = vld [vmem:[#allocation2 + $0x6f8] ss:$40 sps:$4 sm:$0xff]   ;;  %v21272_v52 = vld [vmem:[#allocation2 + $0x744] ss:$40 sps:$4 sm:$0xff]  }
 0x3ea   :  { %13337 = vmatprep.subr.bf16.mxu1 %v21215_v53  ;;  %v21275_v53 = vld [vmem:[#allocation2 + $0x74c] ss:$40 sps:$4 sm:$0xff]  }
 0x3ec   :  { %12846 = vmatpush1.bf16.msra.mxu0 %v21210_v54  ;;  %v21270_v54 = vld [vmem:[#allocation2 + $0x740] ss:$40 sps:$4 sm:$0xff]  }
 0x3ed   :  { %13338 = vmatpush1.bf16.msra.mxu1 %v21213_v55  ;;  %12847 = vmatprep.subr.bf16.mxu0 %v21218_v58  ;;  %v21273_v55 = vld [vmem:[#allocation2 + $0x748] ss:$40 sps:$4 sm:$0xff]   ;;  %v21278_v58 = vld [vmem:[#allocation2 + $0x794] ss:$40 sps:$4 sm:$0xff]  }
 0x3ee   :  { %13339 = vmatprep.subr.bf16.mxu1 %v21221_v59  ;;  %v21281_v59 = vld [vmem:[#allocation2 + $0x79c] ss:$40 sps:$4 sm:$0xff]  }
 0x3f0   :  { %12848 = vmatpush1.bf16.msra.mxu0 %v21216_v0  ;;  %v21276_v0 = vld [vmem:[#allocation2 + $0x790] ss:$40 sps:$4 sm:$0xff]  }
 0x3f1   :  { %13340 = vmatpush1.bf16.msra.mxu1 %v21219_v1  ;;  %12849 = vmatprep.subr.bf16.mxu0 %v21224_v21  ;;  %v21279_v1 = vld [vmem:[#allocation2 + $0x798] ss:$40 sps:$4 sm:$0xff]   ;;  %v21284_v21 = vld [vmem:[#allocation2 + $0x7e4] ss:$40 sps:$4 sm:$0xff]  }
 0x3f2   :  { %13341 = vmatprep.subr.bf16.mxu1 %v21227_v3  ;;  %v21287_v3 = vld [vmem:[#allocation2 + $0x7ec] ss:$40 sps:$4 sm:$0xff]  }
 0x3f4   :  { %12850 = vmatpush1.bf16.msra.mxu0 %v21222_v32  ;;  %v21282_v32 = vld [vmem:[#allocation2 + $0x7e0] ss:$40 sps:$4 sm:$0xff]  }
 0x3f5   :  { %13342 = vmatpush1.bf16.msra.mxu1 %v21225_v6  ;;  %12860 = vmatprep.subr.bf16.mxu0 %v21230_v7  ;;  %v21285_v6 = vld [vmem:[#allocation2 + $0x7e8] ss:$40 sps:$4 sm:$0xff]   ;;  %v21290_v7 = vld [vmem:[#allocation2 + $0x834] ss:$40 sps:$4 sm:$0xff]  }
 0x3f6   :  { %13352 = vmatprep.subr.bf16.mxu1 %v21233_v8  ;;  %v21293_v8 = vld [vmem:[#allocation2 + $0x83c] ss:$40 sps:$4 sm:$0xff]  }
 0x3f7   :  { %12852 = vmatmul.mubr.bf16.vlgmr.msra.gmra.mrb[4].mxu0 %v23835_v5 }
 0x3f8   :  { %13344 = vmatmul.mubr.bf16.vlgmr.msra.gmra.mrb[4].mxu1 %v23835_v5  ;;  %12861 = vmatpush1.bf16.msra.mxu0 %v21228_v12  ;;  %v21288_v12 = vld [vmem:[#allocation2 + $0x830] ss:$40 sps:$4 sm:$0xff]  }
 0x3f9   :  { %13353 = vmatpush1.bf16.msra.mxu1 %v21231_v14  ;;  %12862 = vmatprep.subr.bf16.mxu0 %v21236_v16  ;;  %v21291_v14 = vld [vmem:[#allocation2 + $0x838] ss:$40 sps:$4 sm:$0xff]   ;;  %v21296_v16 = vld [vmem:[#allocation2 + $0x884] ss:$40 sps:$4 sm:$0xff]  }
 0x3fa   :  { %13354 = vmatprep.subr.bf16.mxu1 %v21239_v17  ;;  %12892 = vmatprep.mubr.bf16.mxu0 %v23846_v30  ;;  %v21299_v17 = vld [vmem:[#allocation2 + $0x88c] ss:$40 sps:$4 sm:$0xff]  }
 0x3fb   :  { %13384 = vmatprep.mubr.bf16.mxu1 %v23846_v30 }
 0x3fc   :  { %12863 = vmatpush1.bf16.msra.mxu0 %v21234_v56  ;;  %v21294_v56 = vld [vmem:[#allocation2 + $0x880] ss:$40 sps:$4 sm:$0xff]  }
 0x3fd   :  { %13355 = vmatpush1.bf16.msra.mxu1 %v21237_v19  ;;  %12864 = vmatprep.subr.bf16.mxu0 %v21242_v22  ;;  %v21297_v19 = vld [vmem:[#allocation2 + $0x888] ss:$40 sps:$4 sm:$0xff]   ;;  %v21302_v22 = vld [vmem:[#allocation2 + $0x8d4] ss:$40 sps:$4 sm:$0xff]  }
 0x3fe   :  { %13356 = vmatprep.subr.bf16.mxu1 %v21245_v23  ;;  %v21305_v23 = vld [vmem:[#allocation2 + $0x8dc] ss:$40 sps:$4 sm:$0xff]  }
 0x400   :  { %12865 = vmatpush1.bf16.msra.mxu0 %v21240_v13  ;;  %v21300_v13 = vld [vmem:[#allocation2 + $0x8d0] ss:$40 sps:$4 sm:$0xff]  }
 0x401   :  { %13357 = vmatpush1.bf16.msra.mxu1 %v21243_v25  ;;  %12866 = vmatprep.subr.bf16.mxu0 %v21248_v26  ;;  %v21303_v25 = vld [vmem:[#allocation2 + $0x8d8] ss:$40 sps:$4 sm:$0xff]   ;;  %v21308_v26 = vld [vmem:[#allocation2 + $0x924] ss:$40 sps:$4 sm:$0xff]  }
 0x402   :  { %13358 = vmatprep.subr.bf16.mxu1 %v21251_v27  ;;  %v21311_v27 = vld [vmem:[#allocation2 + $0x92c] ss:$40 sps:$4 sm:$0xff]  }
 0x404   :  { %12867 = vmatpush1.bf16.msra.mxu0 %v21246_v33  ;;  %v21306_v33 = vld [vmem:[#allocation2 + $0x920] ss:$40 sps:$4 sm:$0xff]  }
 0x405   :  { %13359 = vmatpush1.bf16.msra.mxu1 %v21249_v34  ;;  %12868 = vmatprep.subr.bf16.mxu0 %v21254_v60  ;;  %v21309_v34 = vld [vmem:[#allocation2 + $0x928] ss:$40 sps:$4 sm:$0xff]   ;;  %v21314_v60 = vld [vmem:[#allocation2 + $0x974] ss:$40 sps:$4 sm:$0xff]  }
 0x406   :  { %13360 = vmatprep.subr.bf16.mxu1 %v21257_v38  ;;  %v21317_v38 = vld [vmem:[#allocation2 + $0x97c] ss:$40 sps:$4 sm:$0xff]  }
 0x408   :  { %12869 = vmatpush1.bf16.msra.mxu0 %v21252_v40  ;;  %v21312_v40 = vld [vmem:[#allocation2 + $0x970] ss:$40 sps:$4 sm:$0xff]  }
 0x409   :  { %13361 = vmatpush1.bf16.msra.mxu1 %v21255_v9  ;;  %12870 = vmatprep.subr.bf16.mxu0 %v21260_v44  ;;  %v21315_v9 = vld [vmem:[#allocation2 + $0x978] ss:$40 sps:$4 sm:$0xff]   ;;  %v21320_v44 = vld [vmem:[#allocation2 + $0x9c4] ss:$40 sps:$4 sm:$0xff]  }
 0x40a   :  { %13362 = vmatprep.subr.bf16.mxu1 %v21263_v45  ;;  %v21323_v45 = vld [vmem:[#allocation2 + $0x9cc] ss:$40 sps:$4 sm:$0xff]  }
 0x40c   :  { %12871 = vmatpush1.bf16.msra.mxu0 %v21258_v46  ;;  %v21318_v46 = vld [vmem:[#allocation2 + $0x9c0] ss:$40 sps:$4 sm:$0xff]  }
 0x40d   :  { %13363 = vmatpush1.bf16.msra.mxu1 %v21261_v31  ;;  %12872 = vmatprep.subr.bf16.mxu0 %v21266_v41  ;;  %v21321_v31 = vld [vmem:[#allocation2 + $0x9c8] ss:$40 sps:$4 sm:$0xff]   ;;  %v21326_v41 = vld [vmem:[#allocation2 + $0xa14] ss:$40 sps:$4 sm:$0xff]  }
 0x40e   :  { %13364 = vmatprep.subr.bf16.mxu1 %v21269_v49  ;;  %v21329_v49 = vld [vmem:[#allocation2 + $0xa1c] ss:$40 sps:$4 sm:$0xff]  }
 0x410   :  { %12873 = vmatpush1.bf16.msra.mxu0 %v21264_v50  ;;  %v21324_v50 = vld [vmem:[#allocation2 + $0xa10] ss:$40 sps:$4 sm:$0xff]  }
 0x411   :  { %13365 = vmatpush1.bf16.msra.mxu1 %v21267_v51  ;;  %12874 = vmatprep.subr.bf16.mxu0 %v21272_v52  ;;  %v21327_v51 = vld [vmem:[#allocation2 + $0xa18] ss:$40 sps:$4 sm:$0xff]   ;;  %v21332_v52 = vld [vmem:[#allocation2 + $0xa64] ss:$40 sps:$4 sm:$0xff]  }
 0x412   :  { %13366 = vmatprep.subr.bf16.mxu1 %v21275_v53  ;;  %v21335_v53 = vld [vmem:[#allocation2 + $0xa6c] ss:$40 sps:$4 sm:$0xff]  }
 0x414   :  { %12875 = vmatpush1.bf16.msra.mxu0 %v21270_v54  ;;  %v21330_v54 = vld [vmem:[#allocation2 + $0xa60] ss:$40 sps:$4 sm:$0xff]  }
 0x415   :  { %13367 = vmatpush1.bf16.msra.mxu1 %v21273_v55  ;;  %12876 = vmatprep.subr.bf16.mxu0 %v21278_v58  ;;  %v21333_v55 = vld [vmem:[#allocation2 + $0xa68] ss:$40 sps:$4 sm:$0xff]   ;;  %v21338_v58 = vld [vmem:[#allocation2 + $0xab4] ss:$40 sps:$4 sm:$0xff]  }
 0x416   :  { %13368 = vmatprep.subr.bf16.mxu1 %v21281_v59  ;;  %v21341_v59 = vld [vmem:[#allocation2 + $0xabc] ss:$40 sps:$4 sm:$0xff]  }
 0x418   :  { %12877 = vmatpush1.bf16.msra.mxu0 %v21276_v0  ;;  %v21336_v0 = vld [vmem:[#allocation2 + $0xab0] ss:$40 sps:$4 sm:$0xff]  }
 0x419   :  { %13369 = vmatpush1.bf16.msra.mxu1 %v21279_v1  ;;  %12878 = vmatprep.subr.bf16.mxu0 %v21284_v21  ;;  %v21339_v1 = vld [vmem:[#allocation2 + $0xab8] ss:$40 sps:$4 sm:$0xff]   ;;  %v21344_v21 = vld [vmem:[#allocation2 + $0xb04] ss:$40 sps:$4 sm:$0xff]  }
 0x41a   :  { %13370 = vmatprep.subr.bf16.mxu1 %v21287_v3  ;;  %v21347_v3 = vld [vmem:[#allocation2 + $0xb0c] ss:$40 sps:$4 sm:$0xff]  }
 0x41c   :  { %12879 = vmatpush1.bf16.msra.mxu0 %v21282_v32  ;;  %v21342_v32 = vld [vmem:[#allocation2 + $0xb00] ss:$40 sps:$4 sm:$0xff]  }
 0x41d   :  { %13371 = vmatpush1.bf16.msra.mxu1 %v21285_v6  ;;  %12880 = vmatprep.subr.bf16.mxu0 %v21290_v7  ;;  %v21345_v6 = vld [vmem:[#allocation2 + $0xb08] ss:$40 sps:$4 sm:$0xff]   ;;  %v21350_v7 = vld [vmem:[#allocation2 + $0xb54] ss:$40 sps:$4 sm:$0xff]  }
 0x41e   :  { %13372 = vmatprep.subr.bf16.mxu1 %v21293_v8  ;;  %v21353_v8 = vld [vmem:[#allocation2 + $0xb5c] ss:$40 sps:$4 sm:$0xff]  }
 0x420   :  { %12881 = vmatpush1.bf16.msra.mxu0 %v21288_v12  ;;  %v21348_v12 = vld [vmem:[#allocation2 + $0xb50] ss:$40 sps:$4 sm:$0xff]  }
 0x421   :  { %13373 = vmatpush1.bf16.msra.mxu1 %v21291_v14  ;;  %12882 = vmatprep.subr.bf16.mxu0 %v21296_v16  ;;  %v21351_v14 = vld [vmem:[#allocation2 + $0xb58] ss:$40 sps:$4 sm:$0xff]   ;;  %v21356_v16 = vld [vmem:[#allocation2 + $0xba4] ss:$40 sps:$4 sm:$0xff]  }
 0x422   :  { %13374 = vmatprep.subr.bf16.mxu1 %v21299_v17  ;;  %v21359_v17 = vld [vmem:[#allocation2 + $0xbac] ss:$40 sps:$4 sm:$0xff]  }
 0x424   :  { %12883 = vmatpush1.bf16.msra.mxu0 %v21294_v56  ;;  %v21354_v56 = vld [vmem:[#allocation2 + $0xba0] ss:$40 sps:$4 sm:$0xff]  }
 0x425   :  { %13375 = vmatpush1.bf16.msra.mxu1 %v21297_v19  ;;  %12884 = vmatprep.subr.bf16.mxu0 %v21302_v22  ;;  %v21357_v19 = vld [vmem:[#allocation2 + $0xba8] ss:$40 sps:$4 sm:$0xff]   ;;  %v21362_v22 = vld [vmem:[#allocation2 + $0xbf4] ss:$40 sps:$4 sm:$0xff]  }
 0x426   :  { %13376 = vmatprep.subr.bf16.mxu1 %v21305_v23  ;;  %v21365_v23 = vld [vmem:[#allocation2 + $0xbfc] ss:$40 sps:$4 sm:$0xff]  }
 0x428   :  { %12885 = vmatpush1.bf16.msra.mxu0 %v21300_v13  ;;  %v21360_v13 = vld [vmem:[#allocation2 + $0xbf0] ss:$40 sps:$4 sm:$0xff]  }
 0x429   :  { %13377 = vmatpush1.bf16.msra.mxu1 %v21303_v25  ;;  %12886 = vmatprep.subr.bf16.mxu0 %v21308_v26  ;;  %v21363_v25 = vld [vmem:[#allocation2 + $0xbf8] ss:$40 sps:$4 sm:$0xff]   ;;  %v21368_v26 = vld [vmem:[#allocation2 + $0xc44] ss:$40 sps:$4 sm:$0xff]  }
 0x42a   :  { %13378 = vmatprep.subr.bf16.mxu1 %v21311_v27  ;;  %v21371_v27 = vld [vmem:[#allocation2 + $0xc4c] ss:$40 sps:$4 sm:$0xff]  }
 0x42c   :  { %12887 = vmatpush1.bf16.msra.mxu0 %v21306_v33  ;;  %v21366_v33 = vld [vmem:[#allocation2 + $0xc40] ss:$40 sps:$4 sm:$0xff]  }
 0x42d   :  { %13379 = vmatpush1.bf16.msra.mxu1 %v21309_v34  ;;  %12888 = vmatprep.subr.bf16.mxu0 %v21314_v60  ;;  %v21369_v34 = vld [vmem:[#allocation2 + $0xc48] ss:$40 sps:$4 sm:$0xff]   ;;  %v21374_v60 = vld [vmem:[#allocation2 + $0xc94] ss:$40 sps:$4 sm:$0xff]  }
 0x42e   :  { %13380 = vmatprep.subr.bf16.mxu1 %v21317_v38  ;;  %v21377_v38 = vld [vmem:[#allocation2 + $0xc9c] ss:$40 sps:$4 sm:$0xff]  }
 0x430   :  { %12889 = vmatpush1.bf16.msra.mxu0 %v21312_v40  ;;  %v21372_v40 = vld [vmem:[#allocation2 + $0xc90] ss:$40 sps:$4 sm:$0xff]  }
 0x431   :  { %13381 = vmatpush1.bf16.msra.mxu1 %v21315_v9  ;;  %12890 = vmatprep.subr.bf16.mxu0 %v21320_v44  ;;  %v21375_v9 = vld [vmem:[#allocation2 + $0xc98] ss:$40 sps:$4 sm:$0xff]   ;;  %v21380_v44 = vld [vmem:[#allocation2 + $0xce4] ss:$40 sps:$4 sm:$0xff]  }
 0x432   :  { %13382 = vmatprep.subr.bf16.mxu1 %v21323_v45  ;;  %v21383_v45 = vld [vmem:[#allocation2 + $0xcec] ss:$40 sps:$4 sm:$0xff]  }
 0x434   :  { %12891 = vmatpush1.bf16.msra.mxu0 %v21318_v46  ;;  %v21378_v46 = vld [vmem:[#allocation2 + $0xce0] ss:$40 sps:$4 sm:$0xff]  }
 0x435   :  { %13383 = vmatpush1.bf16.msra.mxu1 %v21321_v31  ;;  %12901 = vmatprep.subr.bf16.mxu0 %v21326_v41  ;;  %v21381_v31 = vld [vmem:[#allocation2 + $0xce8] ss:$40 sps:$4 sm:$0xff]   ;;  %v21386_v41 = vld [vmem:[#allocation2 + $0xd34] ss:$40 sps:$4 sm:$0xff]  }
 0x436   :  { %13393 = vmatprep.subr.bf16.mxu1 %v21329_v49  ;;  %v21389_v49 = vld [vmem:[#allocation2 + $0xd3c] ss:$40 sps:$4 sm:$0xff]  }
 0x437   :  { %12893 = vmatmul.mubr.bf16.vlgmr.msra.gmra.mrb[4].mxu0 %v23852_v10 }
 0x438   :  { %13385 = vmatmul.mubr.bf16.vlgmr.msra.gmra.mrb[4].mxu1 %v23852_v10  ;;  %12902 = vmatpush1.bf16.msra.mxu0 %v21324_v50  ;;  %v21384_v50 = vld [vmem:[#allocation2 + $0xd30] ss:$40 sps:$4 sm:$0xff]  }
 0x439   :  { %13394 = vmatpush1.bf16.msra.mxu1 %v21327_v51  ;;  %12903 = vmatprep.subr.bf16.mxu0 %v21332_v52  ;;  %v21387_v51 = vld [vmem:[#allocation2 + $0xd38] ss:$40 sps:$4 sm:$0xff]   ;;  %v21392_v52 = vld [vmem:[#allocation2 + $0xd84] ss:$40 sps:$4 sm:$0xff]  }
 0x43a   :  { %13395 = vmatprep.subr.bf16.mxu1 %v21335_v53  ;;  %12933 = vmatprep.mubr.bf16.mxu0 %v23861_v15  ;;  %v21395_v53 = vld [vmem:[#allocation2 + $0xd8c] ss:$40 sps:$4 sm:$0xff]  }
 0x43b   :  { %13425 = vmatprep.mubr.bf16.mxu1 %v23861_v15 }
 0x43c   :  { %12904 = vmatpush1.bf16.msra.mxu0 %v21330_v54  ;;  %v21390_v54 = vld [vmem:[#allocation2 + $0xd80] ss:$40 sps:$4 sm:$0xff]  }
 0x43d   :  { %13396 = vmatpush1.bf16.msra.mxu1 %v21333_v55  ;;  %12905 = vmatprep.subr.bf16.mxu0 %v21338_v58  ;;  %v21393_v55 = vld [vmem:[#allocation2 + $0xd88] ss:$40 sps:$4 sm:$0xff]   ;;  %v21398_v58 = vld [vmem:[#allocation2 + $0xdd4] ss:$40 sps:$4 sm:$0xff]  }
 0x43e   :  { %13397 = vmatprep.subr.bf16.mxu1 %v21341_v59  ;;  %v21401_v59 = vld [vmem:[#allocation2 + $0xddc] ss:$40 sps:$4 sm:$0xff]  }
 0x440   :  { %12906 = vmatpush1.bf16.msra.mxu0 %v21336_v0  ;;  %v21396_v0 = vld [vmem:[#allocation2 + $0xdd0] ss:$40 sps:$4 sm:$0xff]  }
 0x441   :  { %13398 = vmatpush1.bf16.msra.mxu1 %v21339_v1  ;;  %12907 = vmatprep.subr.bf16.mxu0 %v21344_v21  ;;  %v21399_v1 = vld [vmem:[#allocation2 + $0xdd8] ss:$40 sps:$4 sm:$0xff]   ;;  %v21404_v21 = vld [vmem:[#allocation2 + $0xe24] ss:$40 sps:$4 sm:$0xff]  }
 0x442   :  { %13399 = vmatprep.subr.bf16.mxu1 %v21347_v3  ;;  %v21407_v3 = vld [vmem:[#allocation2 + $0xe2c] ss:$40 sps:$4 sm:$0xff]  }
 0x444   :  { %12908 = vmatpush1.bf16.msra.mxu0 %v21342_v32  ;;  %v21402_v32 = vld [vmem:[#allocation2 + $0xe20] ss:$40 sps:$4 sm:$0xff]  }
 0x445   :  { %13400 = vmatpush1.bf16.msra.mxu1 %v21345_v6  ;;  %12909 = vmatprep.subr.bf16.mxu0 %v21350_v7  ;;  %v21405_v6 = vld [vmem:[#allocation2 + $0xe28] ss:$40 sps:$4 sm:$0xff]   ;;  %v21410_v7 = vld [vmem:[#allocation2 + $0xe74] ss:$40 sps:$4 sm:$0xff]  }
 0x446   :  { %13401 = vmatprep.subr.bf16.mxu1 %v21353_v8  ;;  %v21413_v8 = vld [vmem:[#allocation2 + $0xe7c] ss:$40 sps:$4 sm:$0xff]  }
 0x448   :  { %12910 = vmatpush1.bf16.msra.mxu0 %v21348_v12  ;;  %v21408_v12 = vld [vmem:[#allocation2 + $0xe70] ss:$40 sps:$4 sm:$0xff]  }
 0x449   :  { %13402 = vmatpush1.bf16.msra.mxu1 %v21351_v14  ;;  %12911 = vmatprep.subr.bf16.mxu0 %v21356_v16  ;;  %v21411_v14 = vld [vmem:[#allocation2 + $0xe78] ss:$40 sps:$4 sm:$0xff]   ;;  %v21416_v16 = vld [vmem:[#allocation2 + $0xec4] ss:$40 sps:$4 sm:$0xff]  }
 0x44a   :  { %13403 = vmatprep.subr.bf16.mxu1 %v21359_v17  ;;  %v21419_v17 = vld [vmem:[#allocation2 + $0xecc] ss:$40 sps:$4 sm:$0xff]  }
 0x44c   :  { %12912 = vmatpush1.bf16.msra.mxu0 %v21354_v56  ;;  %v21414_v56 = vld [vmem:[#allocation2 + $0xec0] ss:$40 sps:$4 sm:$0xff]  }
 0x44d   :  { %13404 = vmatpush1.bf16.msra.mxu1 %v21357_v19  ;;  %12913 = vmatprep.subr.bf16.mxu0 %v21362_v22  ;;  %v21417_v19 = vld [vmem:[#allocation2 + $0xec8] ss:$40 sps:$4 sm:$0xff]   ;;  %v21422_v22 = vld [vmem:[#allocation2 + $0xf14] ss:$40 sps:$4 sm:$0xff]  }
 0x44e   :  { %13405 = vmatprep.subr.bf16.mxu1 %v21365_v23  ;;  %v21425_v23 = vld [vmem:[#allocation2 + $0xf1c] ss:$40 sps:$4 sm:$0xff]  }
 0x450   :  { %12914 = vmatpush1.bf16.msra.mxu0 %v21360_v13  ;;  %v21420_v13 = vld [vmem:[#allocation2 + $0xf10] ss:$40 sps:$4 sm:$0xff]  }
 0x451   :  { %13406 = vmatpush1.bf16.msra.mxu1 %v21363_v25  ;;  %12915 = vmatprep.subr.bf16.mxu0 %v21368_v26  ;;  %v21423_v25 = vld [vmem:[#allocation2 + $0xf18] ss:$40 sps:$4 sm:$0xff]   ;;  %v21428_v26 = vld [vmem:[#allocation2 + $0xf64] ss:$40 sps:$4 sm:$0xff]  }
 0x452   :  { %13407 = vmatprep.subr.bf16.mxu1 %v21371_v27  ;;  %v21431_v27 = vld [vmem:[#allocation2 + $0xf6c] ss:$40 sps:$4 sm:$0xff]  }
 0x454   :  { %12916 = vmatpush1.bf16.msra.mxu0 %v21366_v33  ;;  %v21426_v33 = vld [vmem:[#allocation2 + $0xf60] ss:$40 sps:$4 sm:$0xff]  }
 0x455   :  { %13408 = vmatpush1.bf16.msra.mxu1 %v21369_v34  ;;  %12917 = vmatprep.subr.bf16.mxu0 %v21374_v60  ;;  %v21429_v34 = vld [vmem:[#allocation2 + $0xf68] ss:$40 sps:$4 sm:$0xff]   ;;  %v21434_v60 = vld [vmem:[#allocation2 + $0xfb4] ss:$40 sps:$4 sm:$0xff]  }
 0x456   :  { %13409 = vmatprep.subr.bf16.mxu1 %v21377_v38  ;;  %v21437_v38 = vld [vmem:[#allocation2 + $0xfbc] ss:$40 sps:$4 sm:$0xff]  }
 0x458   :  { %12918 = vmatpush1.bf16.msra.mxu0 %v21372_v40  ;;  %v21432_v40 = vld [vmem:[#allocation2 + $0xfb0] ss:$40 sps:$4 sm:$0xff]  }
 0x459   :  { %13410 = vmatpush1.bf16.msra.mxu1 %v21375_v9  ;;  %12919 = vmatprep.subr.bf16.mxu0 %v21380_v44  ;;  %v21435_v9 = vld [vmem:[#allocation2 + $0xfb8] ss:$40 sps:$4 sm:$0xff]   ;;  %v21440_v44 = vld [vmem:[#allocation2 + $0x1004] ss:$40 sps:$4 sm:$0xff]  }
 0x45a   :  { %13411 = vmatprep.subr.bf16.mxu1 %v21383_v45  ;;  %v21443_v45 = vld [vmem:[#allocation2 + $0x100c] ss:$40 sps:$4 sm:$0xff]  }
 0x45c   :  { %12920 = vmatpush1.bf16.msra.mxu0 %v21378_v46  ;;  %v21438_v46 = vld [vmem:[#allocation2 + $0x1000] ss:$40 sps:$4 sm:$0xff]  }
 0x45d   :  { %13412 = vmatpush1.bf16.msra.mxu1 %v21381_v31  ;;  %12921 = vmatprep.subr.bf16.mxu0 %v21386_v41  ;;  %v21441_v31 = vld [vmem:[#allocation2 + $0x1008] ss:$40 sps:$4 sm:$0xff]   ;;  %v21446_v41 = vld [vmem:[#allocation2 + $0x1054] ss:$40 sps:$4 sm:$0xff]  }
 0x45e   :  { %13413 = vmatprep.subr.bf16.mxu1 %v21389_v49  ;;  %v21449_v49 = vld [vmem:[#allocation2 + $0x105c] ss:$40 sps:$4 sm:$0xff]  }
 0x460   :  { %12922 = vmatpush1.bf16.msra.mxu0 %v21384_v50  ;;  %v21444_v50 = vld [vmem:[#allocation2 + $0x1050] ss:$40 sps:$4 sm:$0xff]  }
 0x461   :  { %13414 = vmatpush1.bf16.msra.mxu1 %v21387_v51  ;;  %12923 = vmatprep.subr.bf16.mxu0 %v21392_v52  ;;  %v21447_v51 = vld [vmem:[#allocation2 + $0x1058] ss:$40 sps:$4 sm:$0xff]   ;;  %v21452_v52 = vld [vmem:[#allocation2 + $0x10a4] ss:$40 sps:$4 sm:$0xff]  }
 0x462   :  { %13415 = vmatprep.subr.bf16.mxu1 %v21395_v53  ;;  %v21455_v53 = vld [vmem:[#allocation2 + $0x10ac] ss:$40 sps:$4 sm:$0xff]  }
 0x464   :  { %12924 = vmatpush1.bf16.msra.mxu0 %v21390_v54  ;;  %v21450_v54 = vld [vmem:[#allocation2 + $0x10a0] ss:$40 sps:$4 sm:$0xff]  }
 0x465   :  { %13416 = vmatpush1.bf16.msra.mxu1 %v21393_v55  ;;  %12925 = vmatprep.subr.bf16.mxu0 %v21398_v58  ;;  %v21453_v55 = vld [vmem:[#allocation2 + $0x10a8] ss:$40 sps:$4 sm:$0xff]   ;;  %v21458_v58 = vld [vmem:[#allocation2 + $0x10f4] ss:$40 sps:$4 sm:$0xff]  }
 0x466   :  { %13417 = vmatprep.subr.bf16.mxu1 %v21401_v59  ;;  %v21461_v59 = vld [vmem:[#allocation2 + $0x10fc] ss:$40 sps:$4 sm:$0xff]  }
 0x468   :  { %12926 = vmatpush1.bf16.msra.mxu0 %v21396_v0 }
 0x469   :  { %13418 = vmatpush1.bf16.msra.mxu1 %v21399_v1  ;;  %12927 = vmatprep.subr.bf16.mxu0 %v21404_v21 }
 0x46a   :  { %13419 = vmatprep.subr.bf16.mxu1 %v21407_v3 }
 0x46c   :  { %12928 = vmatpush1.bf16.msra.mxu0 %v21402_v32 }
 0x46d   :  { %13420 = vmatpush1.bf16.msra.mxu1 %v21405_v6  ;;  %12929 = vmatprep.subr.bf16.mxu0 %v21410_v7  ;;  %v21456_v7 = vld [vmem:[#allocation2 + $0x10f0] ss:$40 sps:$4 sm:$0xff]  }
 0x46e   :  { %13421 = vmatprep.subr.bf16.mxu1 %v21413_v8  ;;  %v21459_v8 = vld [vmem:[#allocation2 + $0x10f8] ss:$40 sps:$4 sm:$0xff]  }
 0x470   :  { %12930 = vmatpush1.bf16.msra.mxu0 %v21408_v12 }
 0x471   :  { %13422 = vmatpush1.bf16.msra.mxu1 %v21411_v14  ;;  %12931 = vmatprep.subr.bf16.mxu0 %v21416_v16  ;;  %v21464_v16 = vld [vmem:[#allocation2 + $0x1144] ss:$40 sps:$4 sm:$0xff]  }
 0x472   :  { %13423 = vmatprep.subr.bf16.mxu1 %v21419_v17  ;;  %v21467_v17 = vld [vmem:[#allocation2 + $0x114c] ss:$40 sps:$4 sm:$0xff]  }
 0x474   :  { %12932 = vmatpush1.bf16.msra.mxu0 %v21414_v56  ;;  %v21462_v56 = vld [vmem:[#allocation2 + $0x1140] ss:$40 sps:$4 sm:$0xff]  }
 0x475   :  { %13424 = vmatpush1.bf16.msra.mxu1 %v21417_v19  ;;  %12942 = vmatprep.subr.bf16.mxu0 %v21422_v22  ;;  %v21465_v19 = vld [vmem:[#allocation2 + $0x1148] ss:$40 sps:$4 sm:$0xff]   ;;  %v21470_v22 = vld [vmem:[#allocation2 + $0x1194] ss:$40 sps:$4 sm:$0xff]  }
 0x476   :  { %13434 = vmatprep.subr.bf16.mxu1 %v21425_v23  ;;  %v21473_v23 = vld [vmem:[#allocation2 + $0x119c] ss:$40 sps:$4 sm:$0xff]  }
 0x477   :  { %12934 = vmatmul.mubr.bf16.vlgmr.msra.gmra.mrb[4].mxu0 %v23869_v20 }
 0x478   :  { %13426 = vmatmul.mubr.bf16.vlgmr.msra.gmra.mrb[4].mxu1 %v23869_v20  ;;  %12943 = vmatpush1.bf16.msra.mxu0 %v21420_v13  ;;  %v21468_v13 = vld [vmem:[#allocation2 + $0x1190] ss:$40 sps:$4 sm:$0xff]  }
 0x479   :  { %13435 = vmatpush1.bf16.msra.mxu1 %v21423_v25  ;;  %12944 = vmatprep.subr.bf16.mxu0 %v21428_v26  ;;  %v21471_v25 = vld [vmem:[#allocation2 + $0x1198] ss:$40 sps:$4 sm:$0xff]   ;;  %v21476_v26 = vld [vmem:[#allocation2 + $0x11e4] ss:$40 sps:$4 sm:$0xff]  }
 0x47a   :  { %13436 = vmatprep.subr.bf16.mxu1 %v21431_v27  ;;  %12974 = vmatprep.mubr.bf16.mxu0 %v23878_v24  ;;  %v21479_v27 = vld [vmem:[#allocation2 + $0x11ec] ss:$40 sps:$4 sm:$0xff]  }
 0x47b   :  { %13466 = vmatprep.mubr.bf16.mxu1 %v23878_v24 }
 0x47c   :  { %12945 = vmatpush1.bf16.msra.mxu0 %v21426_v33  ;;  %v21474_v33 = vld [vmem:[#allocation2 + $0x11e0] ss:$40 sps:$4 sm:$0xff]  }
 0x47d   :  { %13437 = vmatpush1.bf16.msra.mxu1 %v21429_v34  ;;  %12946 = vmatprep.subr.bf16.mxu0 %v21434_v60  ;;  %v21477_v34 = vld [vmem:[#allocation2 + $0x11e8] ss:$40 sps:$4 sm:$0xff]   ;;  %v21482_v60 = vld [vmem:[#allocation2 + $0x1234] ss:$40 sps:$4 sm:$0xff]  }
 0x47e   :  { %13438 = vmatprep.subr.bf16.mxu1 %v21437_v38  ;;  %v21485_v38 = vld [vmem:[#allocation2 + $0x123c] ss:$40 sps:$4 sm:$0xff]  }
 0x480   :  { %12947 = vmatpush1.bf16.msra.mxu0 %v21432_v40  ;;  %v21480_v40 = vld [vmem:[#allocation2 + $0x1230] ss:$40 sps:$4 sm:$0xff]  }
 0x481   :  { %13439 = vmatpush1.bf16.msra.mxu1 %v21435_v9  ;;  %12948 = vmatprep.subr.bf16.mxu0 %v21440_v44  ;;  %v21483_v9 = vld [vmem:[#allocation2 + $0x1238] ss:$40 sps:$4 sm:$0xff]   ;;  %v21488_v44 = vld [vmem:[#allocation2 + $0x1284] ss:$40 sps:$4 sm:$0xff]  }
 0x482   :  { %13440 = vmatprep.subr.bf16.mxu1 %v21443_v45  ;;  %v21491_v45 = vld [vmem:[#allocation2 + $0x128c] ss:$40 sps:$4 sm:$0xff]  }
 0x484   :  { %12949 = vmatpush1.bf16.msra.mxu0 %v21438_v46  ;;  %v21486_v46 = vld [vmem:[#allocation2 + $0x1280] ss:$40 sps:$4 sm:$0xff]  }
 0x485   :  { %13441 = vmatpush1.bf16.msra.mxu1 %v21441_v31  ;;  %12950 = vmatprep.subr.bf16.mxu0 %v21446_v41  ;;  %v21489_v31 = vld [vmem:[#allocation2 + $0x1288] ss:$40 sps:$4 sm:$0xff]   ;;  %v21494_v41 = vld [vmem:[#allocation2 + $0x12d4] ss:$40 sps:$4 sm:$0xff]  }
 0x486   :  { %13442 = vmatprep.subr.bf16.mxu1 %v21449_v49  ;;  %v21497_v49 = vld [vmem:[#allocation2 + $0x12dc] ss:$40 sps:$4 sm:$0xff]  }
 0x488   :  { %12951 = vmatpush1.bf16.msra.mxu0 %v21444_v50  ;;  %v21492_v50 = vld [vmem:[#allocation2 + $0x12d0] ss:$40 sps:$4 sm:$0xff]  }
 0x489   :  { %13443 = vmatpush1.bf16.msra.mxu1 %v21447_v51  ;;  %12952 = vmatprep.subr.bf16.mxu0 %v21452_v52  ;;  %v21495_v51 = vld [vmem:[#allocation2 + $0x12d8] ss:$40 sps:$4 sm:$0xff]   ;;  %v21500_v52 = vld [vmem:[#allocation2 + $0x1324] ss:$40 sps:$4 sm:$0xff]  }
 0x48a   :  { %13444 = vmatprep.subr.bf16.mxu1 %v21455_v53  ;;  %v24040_v0 = vpop.f32.mrb[0].mxu0  ;;  %v21503_v53 = vld [vmem:[#allocation2 + $0x132c] ss:$40 sps:$4 sm:$0xff]  }
 0x48b   :  { %v24042_v1 = vpop.f32.mrb[0].mxu1  ;;  %v24044_v21 = vpop.f32.mrb[1].mxu0 }
 0x48c   :  { %v24046_v3 = vpop.f32.mrb[1].mxu1  ;;  %v12324_v32 = vpop.f32.mrb[2].mxu0  ;;  %12953 = vmatpush1.bf16.msra.mxu0 %v21450_v54  ;;  %v21498_v54 = vld [vmem:[#allocation2 + $0x1320] ss:$40 sps:$4 sm:$0xff]  }
 0x48d   :  { %v12816_v6 = vpop.f32.mrb[2].mxu1  ;;  %13445 = vmatpush1.bf16.msra.mxu1 %v21453_v55  ;;  %v12325_v12 = vpop.f32.mrb[3].mxu0  ;;  %12954 = vmatprep.subr.bf16.mxu0 %v21458_v58  ;;  %v21501_v55 = vld [vmem:[#allocation2 + $0x1328] ss:$40 sps:$4 sm:$0xff]   ;;  %v21506_v58 = vld [vmem:[#allocation2 + $0x1374] ss:$40 sps:$4 sm:$0xff]  }
 0x48e   :  { %v12817_v14 = vpop.f32.mrb[3].mxu1  ;;  %13446 = vmatprep.subr.bf16.mxu1 %v21461_v59  ;;  %v21509_v59 = vld [vmem:[#allocation2 + $0x137c] ss:$40 sps:$4 sm:$0xff]   ;;  %v21504_v32 = vld [vmem:[#allocation2 + $0x1370] ss:$40 sps:$4 sm:$0xff]  }
 0x48f   :  { %v21507_v6 = vld [vmem:[#allocation2 + $0x1378] ss:$40 sps:$4 sm:$0xff]   ;;  %v21513_v14 = vld [vmem:[#allocation2 + $0x13c8] ss:$40 sps:$4 sm:$0xff]  }
 0x490   :  { %12955 = vmatpush1.bf16.msra.mxu0 %v21456_v7  ;;  %v21512_v7 = vld [vmem:[#allocation2 + $0x13c4] ss:$40 sps:$4 sm:$0xff]   ;;  %v21510_v12 = vld [vmem:[#allocation2 + $0x13c0] ss:$40 sps:$4 sm:$0xff]  }
 0x491   :  { %13447 = vmatpush1.bf16.msra.mxu1 %v21459_v8  ;;  %12956 = vmatprep.subr.bf16.mxu0 %v21464_v16  ;;  %v21515_v8 = vld [vmem:[#allocation2 + $0x13cc] ss:$40 sps:$4 sm:$0xff]  }
 0x492   :  { %13448 = vmatprep.subr.bf16.mxu1 %v21467_v17  ;;  %v21518_v16 = vld [vmem:[#allocation2 + $0x1414] ss:$40 sps:$4 sm:$0xff]  }
 0x493   :  { %v21521_v17 = vld [vmem:[#allocation2 + $0x141c] ss:$40 sps:$4 sm:$0xff]  }
 0x494   :  { %12957 = vmatpush1.bf16.msra.mxu0 %v21462_v56  ;;  %v21516_v56 = vld [vmem:[#allocation2 + $0x1410] ss:$40 sps:$4 sm:$0xff]  }
 0x495   :  { %13449 = vmatpush1.bf16.msra.mxu1 %v21465_v19  ;;  %12958 = vmatprep.subr.bf16.mxu0 %v21470_v22  ;;  %v21519_v19 = vld [vmem:[#allocation2 + $0x1418] ss:$40 sps:$4 sm:$0xff]   ;;  %v21524_v22 = vld [vmem:[#allocation2 + $0x1464] ss:$40 sps:$4 sm:$0xff]  }
 0x496   :  { %13450 = vmatprep.subr.bf16.mxu1 %v21473_v23  ;;  %v21527_v23 = vld [vmem:[#allocation2 + $0x146c] ss:$40 sps:$4 sm:$0xff]  }
 0x498   :  { %12959 = vmatpush1.bf16.msra.mxu0 %v21468_v13  ;;  %v21522_v13 = vld [vmem:[#allocation2 + $0x1460] ss:$40 sps:$4 sm:$0xff]  }
 0x499   :  { %13451 = vmatpush1.bf16.msra.mxu1 %v21471_v25  ;;  %12960 = vmatprep.subr.bf16.mxu0 %v21476_v26  ;;  %v21525_v25 = vld [vmem:[#allocation2 + $0x1468] ss:$40 sps:$4 sm:$0xff]   ;;  %v21530_v26 = vld [vmem:[#allocation2 + $0x14b4] ss:$40 sps:$4 sm:$0xff]  }
 0x49a   :  { %13452 = vmatprep.subr.bf16.mxu1 %v21479_v27  ;;  %v21533_v27 = vld [vmem:[#allocation2 + $0x14bc] ss:$40 sps:$4 sm:$0xff]  }
 0x49c   :  { %12961 = vmatpush1.bf16.msra.mxu0 %v21474_v33  ;;  %v21528_v33 = vld [vmem:[#allocation2 + $0x14b0] ss:$40 sps:$4 sm:$0xff]  }
 0x49d   :  { %13453 = vmatpush1.bf16.msra.mxu1 %v21477_v34  ;;  %12962 = vmatprep.subr.bf16.mxu0 %v21482_v60  ;;  %v21531_v34 = vld [vmem:[#allocation2 + $0x14b8] ss:$40 sps:$4 sm:$0xff]   ;;  %v21536_v60 = vld [vmem:[#allocation2 + $0x1504] ss:$40 sps:$4 sm:$0xff]  }
 0x49e   :  { %13454 = vmatprep.subr.bf16.mxu1 %v21485_v38  ;;  %v21539_v38 = vld [vmem:[#allocation2 + $0x150c] ss:$40 sps:$4 sm:$0xff]  }
 0x4a0   :  { %12963 = vmatpush1.bf16.msra.mxu0 %v21480_v40  ;;  %v21534_v40 = vld [vmem:[#allocation2 + $0x1500] ss:$40 sps:$4 sm:$0xff]  }
 0x4a1   :  { %13455 = vmatpush1.bf16.msra.mxu1 %v21483_v9  ;;  %12964 = vmatprep.subr.bf16.mxu0 %v21488_v44  ;;  %v21537_v9 = vld [vmem:[#allocation2 + $0x1508] ss:$40 sps:$4 sm:$0xff]   ;;  %v21542_v44 = vld [vmem:[#allocation2 + $0x1554] ss:$40 sps:$4 sm:$0xff]  }
 0x4a2   :  { %13456 = vmatprep.subr.bf16.mxu1 %v21491_v45  ;;  %v21545_v45 = vld [vmem:[#allocation2 + $0x155c] ss:$40 sps:$4 sm:$0xff]  }
 0x4a4   :  { %12965 = vmatpush1.bf16.msra.mxu0 %v21486_v46  ;;  %v21540_v46 = vld [vmem:[#allocation2 + $0x1550] ss:$40 sps:$4 sm:$0xff]  }
 0x4a5   :  { %13457 = vmatpush1.bf16.msra.mxu1 %v21489_v31  ;;  %12966 = vmatprep.subr.bf16.mxu0 %v21494_v41  ;;  %v21543_v31 = vld [vmem:[#allocation2 + $0x1558] ss:$40 sps:$4 sm:$0xff]   ;;  %v21548_v41 = vld [vmem:[#allocation2 + $0x15a4] ss:$40 sps:$4 sm:$0xff]  }
 0x4a6   :  { %13458 = vmatprep.subr.bf16.mxu1 %v21497_v49  ;;  %v21551_v49 = vld [vmem:[#allocation2 + $0x15ac] ss:$40 sps:$4 sm:$0xff]  }
 0x4a8   :  { %12967 = vmatpush1.bf16.msra.mxu0 %v21492_v50  ;;  %v21546_v50 = vld [vmem:[#allocation2 + $0x15a0] ss:$40 sps:$4 sm:$0xff]  }
 0x4a9   :  { %13459 = vmatpush1.bf16.msra.mxu1 %v21495_v51  ;;  %12968 = vmatprep.subr.bf16.mxu0 %v21500_v52  ;;  %v21549_v51 = vld [vmem:[#allocation2 + $0x15a8] ss:$40 sps:$4 sm:$0xff]   ;;  %v21554_v52 = vld [vmem:[#allocation2 + $0x15f4] ss:$40 sps:$4 sm:$0xff]  }
 0x4aa   :  { %13460 = vmatprep.subr.bf16.mxu1 %v21503_v53  ;;  %v21557_v53 = vld [vmem:[#allocation2 + $0x15fc] ss:$40 sps:$4 sm:$0xff]  }
 0x4ac   :  { %12969 = vmatpush1.bf16.msra.mxu0 %v21498_v54  ;;  %v21552_v54 = vld [vmem:[#allocation2 + $0x15f0] ss:$40 sps:$4 sm:$0xff]  }
 0x4ad   :  { %13461 = vmatpush1.bf16.msra.mxu1 %v21501_v55  ;;  %12970 = vmatprep.subr.bf16.mxu0 %v21506_v58  ;;  %v21555_v55 = vld [vmem:[#allocation2 + $0x15f8] ss:$40 sps:$4 sm:$0xff]   ;;  %v21560_v58 = vld [vmem:[#allocation2 + $0x1644] ss:$40 sps:$4 sm:$0xff]  }
 0x4ae   :  { %13462 = vmatprep.subr.bf16.mxu1 %v21509_v59  ;;  %v21563_v59 = vld [vmem:[#allocation2 + $0x164c] ss:$40 sps:$4 sm:$0xff]  }
 0x4b0   :  { %12971 = vmatpush1.bf16.msra.mxu0 %v21504_v32  ;;  %v21558_v32 = vld [vmem:[#allocation2 + $0x1640] ss:$40 sps:$4 sm:$0xff]  }
 0x4b1   :  { %13463 = vmatpush1.bf16.msra.mxu1 %v21507_v6  ;;  %12972 = vmatprep.subr.bf16.mxu0 %v21512_v7  ;;  %v21561_v6 = vld [vmem:[#allocation2 + $0x1648] ss:$40 sps:$4 sm:$0xff]   ;;  %v21566_v7 = vld [vmem:[#allocation2 + $0x1694] ss:$40 sps:$4 sm:$0xff]  }
 0x4b2   :  { %13464 = vmatprep.subr.bf16.mxu1 %v21515_v8  ;;  %v21569_v8 = vld [vmem:[#allocation2 + $0x169c] ss:$40 sps:$4 sm:$0xff]  }
 0x4b4   :  { %12973 = vmatpush1.bf16.msra.mxu0 %v21510_v12  ;;  %v21564_v12 = vld [vmem:[#allocation2 + $0x1690] ss:$40 sps:$4 sm:$0xff]  }
 0x4b5   :  { %13465 = vmatpush1.bf16.msra.mxu1 %v21513_v14  ;;  %12983 = vmatprep.subr.bf16.mxu0 %v21518_v16  ;;  %v21567_v14 = vld [vmem:[#allocation2 + $0x1698] ss:$40 sps:$4 sm:$0xff]   ;;  %v21572_v16 = vld [vmem:[#allocation2 + $0x16e4] ss:$40 sps:$4 sm:$0xff]  }
 0x4b6   :  { %13475 = vmatprep.subr.bf16.mxu1 %v21521_v17  ;;  %v21575_v17 = vld [vmem:[#allocation2 + $0x16ec] ss:$40 sps:$4 sm:$0xff]  }
 0x4b7   :  { %12975 = vmatmul.mubr.bf16.vlgmr.msra.gmra.mrb[4].mxu0 %v23886_v29 }
 0x4b8   :  { %13467 = vmatmul.mubr.bf16.vlgmr.msra.gmra.mrb[4].mxu1 %v23886_v29  ;;  %12984 = vmatpush1.bf16.msra.mxu0 %v21516_v56  ;;  %v21570_v56 = vld [vmem:[#allocation2 + $0x16e0] ss:$40 sps:$4 sm:$0xff]  }
 0x4b9   :  { %13476 = vmatpush1.bf16.msra.mxu1 %v21519_v19  ;;  %12985 = vmatprep.subr.bf16.mxu0 %v21524_v22  ;;  %v21573_v19 = vld [vmem:[#allocation2 + $0x16e8] ss:$40 sps:$4 sm:$0xff]   ;;  %v21578_v22 = vld [vmem:[#allocation2 + $0x1734] ss:$40 sps:$4 sm:$0xff]  }
 0x4ba   :  { %13477 = vmatprep.subr.bf16.mxu1 %v21527_v23  ;;  %13015 = vmatprep.mubr.bf16.mxu0 %v23895_v35  ;;  %v21581_v23 = vld [vmem:[#allocation2 + $0x173c] ss:$40 sps:$4 sm:$0xff]  }
 0x4bb   :  { %13507 = vmatprep.mubr.bf16.mxu1 %v23895_v35 }
 0x4bc   :  { %12986 = vmatpush1.bf16.msra.mxu0 %v21522_v13  ;;  %v21576_v13 = vld [vmem:[#allocation2 + $0x1730] ss:$40 sps:$4 sm:$0xff]  }
 0x4bd   :  { %13478 = vmatpush1.bf16.msra.mxu1 %v21525_v25  ;;  %12987 = vmatprep.subr.bf16.mxu0 %v21530_v26  ;;  %v21579_v25 = vld [vmem:[#allocation2 + $0x1738] ss:$40 sps:$4 sm:$0xff]   ;;  %v21584_v26 = vld [vmem:[#allocation2 + $0x1784] ss:$40 sps:$4 sm:$0xff]  }
 0x4be   :  { %13479 = vmatprep.subr.bf16.mxu1 %v21533_v27  ;;  %v21587_v27 = vld [vmem:[#allocation2 + $0x178c] ss:$40 sps:$4 sm:$0xff]  }
 0x4c0   :  { %12988 = vmatpush1.bf16.msra.mxu0 %v21528_v33  ;;  %v21582_v33 = vld [vmem:[#allocation2 + $0x1780] ss:$40 sps:$4 sm:$0xff]  }
 0x4c1   :  { %13480 = vmatpush1.bf16.msra.mxu1 %v21531_v34  ;;  %12989 = vmatprep.subr.bf16.mxu0 %v21536_v60  ;;  %v21585_v34 = vld [vmem:[#allocation2 + $0x1788] ss:$40 sps:$4 sm:$0xff]   ;;  %v21590_v60 = vld [vmem:[#allocation2 + $0x17d4] ss:$40 sps:$4 sm:$0xff]  }
 0x4c2   :  { %13481 = vmatprep.subr.bf16.mxu1 %v21539_v38  ;;  %v21593_v38 = vld [vmem:[#allocation2 + $0x17dc] ss:$40 sps:$4 sm:$0xff]  }
 0x4c4   :  { %12990 = vmatpush1.bf16.msra.mxu0 %v21534_v40  ;;  %v21588_v40 = vld [vmem:[#allocation2 + $0x17d0] ss:$40 sps:$4 sm:$0xff]  }
 0x4c5   :  { %13482 = vmatpush1.bf16.msra.mxu1 %v21537_v9  ;;  %12991 = vmatprep.subr.bf16.mxu0 %v21542_v44  ;;  %v21591_v9 = vld [vmem:[#allocation2 + $0x17d8] ss:$40 sps:$4 sm:$0xff]   ;;  %v21596_v44 = vld [vmem:[#allocation2 + $0x1824] ss:$40 sps:$4 sm:$0xff]  }
 0x4c6   :  { %13483 = vmatprep.subr.bf16.mxu1 %v21545_v45  ;;  %v21599_v45 = vld [vmem:[#allocation2 + $0x182c] ss:$40 sps:$4 sm:$0xff]  }
 0x4c8   :  { %12992 = vmatpush1.bf16.msra.mxu0 %v21540_v46  ;;  %v21594_v46 = vld [vmem:[#allocation2 + $0x1820] ss:$40 sps:$4 sm:$0xff]  }
 0x4c9   :  { %13484 = vmatpush1.bf16.msra.mxu1 %v21543_v31  ;;  %12993 = vmatprep.subr.bf16.mxu0 %v21548_v41  ;;  %v21597_v31 = vld [vmem:[#allocation2 + $0x1828] ss:$40 sps:$4 sm:$0xff]   ;;  %v21602_v41 = vld [vmem:[#allocation2 + $0x1874] ss:$40 sps:$4 sm:$0xff]  }
 0x4ca   :  { %13485 = vmatprep.subr.bf16.mxu1 %v21551_v49  ;;  %v21605_v49 = vld [vmem:[#allocation2 + $0x187c] ss:$40 sps:$4 sm:$0xff]  }
 0x4cc   :  { %12994 = vmatpush1.bf16.msra.mxu0 %v21546_v50  ;;  %v21600_v50 = vld [vmem:[#allocation2 + $0x1870] ss:$40 sps:$4 sm:$0xff]  }
 0x4cd   :  { %13486 = vmatpush1.bf16.msra.mxu1 %v21549_v51  ;;  %12995 = vmatprep.subr.bf16.mxu0 %v21554_v52  ;;  %v21603_v51 = vld [vmem:[#allocation2 + $0x1878] ss:$40 sps:$4 sm:$0xff]   ;;  %v21608_v52 = vld [vmem:[#allocation2 + $0x18c4] ss:$40 sps:$4 sm:$0xff]  }
 0x4ce   :  { %13487 = vmatprep.subr.bf16.mxu1 %v21557_v53  ;;  %v21611_v53 = vld [vmem:[#allocation2 + $0x18cc] ss:$40 sps:$4 sm:$0xff]  }
 0x4d0   :  { %12996 = vmatpush1.bf16.msra.mxu0 %v21552_v54  ;;  %v21606_v54 = vld [vmem:[#allocation2 + $0x18c0] ss:$40 sps:$4 sm:$0xff]  }
 0x4d1   :  { %13488 = vmatpush1.bf16.msra.mxu1 %v21555_v55  ;;  %12997 = vmatprep.subr.bf16.mxu0 %v21560_v58  ;;  %v21609_v55 = vld [vmem:[#allocation2 + $0x18c8] ss:$40 sps:$4 sm:$0xff]   ;;  %v21614_v58 = vld [vmem:[#allocation2 + $0x1914] ss:$40 sps:$4 sm:$0xff]  }
 0x4d2   :  { %13489 = vmatprep.subr.bf16.mxu1 %v21563_v59  ;;  %v21617_v59 = vld [vmem:[#allocation2 + $0x191c] ss:$40 sps:$4 sm:$0xff]  }
 0x4d4   :  { %12998 = vmatpush1.bf16.msra.mxu0 %v21558_v32  ;;  %v21612_v32 = vld [vmem:[#allocation2 + $0x1910] ss:$40 sps:$4 sm:$0xff]  }
 0x4d5   :  { %13490 = vmatpush1.bf16.msra.mxu1 %v21561_v6  ;;  %12999 = vmatprep.subr.bf16.mxu0 %v21566_v7  ;;  %v21615_v6 = vld [vmem:[#allocation2 + $0x1918] ss:$40 sps:$4 sm:$0xff]   ;;  %v21620_v7 = vld [vmem:[#allocation2 + $0x1964] ss:$40 sps:$4 sm:$0xff]  }
 0x4d6   :  { %13491 = vmatprep.subr.bf16.mxu1 %v21569_v8  ;;  %v21623_v8 = vld [vmem:[#allocation2 + $0x196c] ss:$40 sps:$4 sm:$0xff]  }
 0x4d8   :  { %13000 = vmatpush1.bf16.msra.mxu0 %v21564_v12  ;;  %v21618_v12 = vld [vmem:[#allocation2 + $0x1960] ss:$40 sps:$4 sm:$0xff]  }
 0x4d9   :  { %13492 = vmatpush1.bf16.msra.mxu1 %v21567_v14  ;;  %13001 = vmatprep.subr.bf16.mxu0 %v21572_v16  ;;  %v21621_v14 = vld [vmem:[#allocation2 + $0x1968] ss:$40 sps:$4 sm:$0xff]   ;;  %v21626_v16 = vld [vmem:[#allocation2 + $0x19b4] ss:$40 sps:$4 sm:$0xff]  }
 0x4da   :  { %13493 = vmatprep.subr.bf16.mxu1 %v21575_v17  ;;  %v21629_v17 = vld [vmem:[#allocation2 + $0x19bc] ss:$40 sps:$4 sm:$0xff]  }
 0x4dc   :  { %13002 = vmatpush1.bf16.msra.mxu0 %v21570_v56  ;;  %v21624_v56 = vld [vmem:[#allocation2 + $0x19b0] ss:$40 sps:$4 sm:$0xff]  }
 0x4dd   :  { %13494 = vmatpush1.bf16.msra.mxu1 %v21573_v19  ;;  %13003 = vmatprep.subr.bf16.mxu0 %v21578_v22  ;;  %v21627_v19 = vld [vmem:[#allocation2 + $0x19b8] ss:$40 sps:$4 sm:$0xff]   ;;  %v21632_v22 = vld [vmem:[#allocation2 + $0x1a04] ss:$40 sps:$4 sm:$0xff]  }
 0x4de   :  { %13495 = vmatprep.subr.bf16.mxu1 %v21581_v23  ;;  %v21635_v23 = vld [vmem:[#allocation2 + $0x1a0c] ss:$40 sps:$4 sm:$0xff]  }
 0x4e0   :  { %13004 = vmatpush1.bf16.msra.mxu0 %v21576_v13  ;;  %v21630_v13 = vld [vmem:[#allocation2 + $0x1a00] ss:$40 sps:$4 sm:$0xff]  }
 0x4e1   :  { %13496 = vmatpush1.bf16.msra.mxu1 %v21579_v25  ;;  %13005 = vmatprep.subr.bf16.mxu0 %v21584_v26  ;;  %v21633_v25 = vld [vmem:[#allocation2 + $0x1a08] ss:$40 sps:$4 sm:$0xff]   ;;  %v21638_v26 = vld [vmem:[#allocation2 + $0x1a54] ss:$40 sps:$4 sm:$0xff]  }
 0x4e2   :  { %13497 = vmatprep.subr.bf16.mxu1 %v21587_v27  ;;  %v21641_v27 = vld [vmem:[#allocation2 + $0x1a5c] ss:$40 sps:$4 sm:$0xff]  }
 0x4e4   :  { %13006 = vmatpush1.bf16.msra.mxu0 %v21582_v33  ;;  %v21636_v33 = vld [vmem:[#allocation2 + $0x1a50] ss:$40 sps:$4 sm:$0xff]  }
 0x4e5   :  { %13498 = vmatpush1.bf16.msra.mxu1 %v21585_v34  ;;  %13007 = vmatprep.subr.bf16.mxu0 %v21590_v60  ;;  %v21639_v34 = vld [vmem:[#allocation2 + $0x1a58] ss:$40 sps:$4 sm:$0xff]   ;;  %v21644_v60 = vld [vmem:[#allocation2 + $0x1aa4] ss:$40 sps:$4 sm:$0xff]  }
 0x4e6   :  { %13499 = vmatprep.subr.bf16.mxu1 %v21593_v38  ;;  %v21647_v38 = vld [vmem:[#allocation2 + $0x1aac] ss:$40 sps:$4 sm:$0xff]  }
 0x4e8   :  { %13008 = vmatpush1.bf16.msra.mxu0 %v21588_v40  ;;  %v21642_v40 = vld [vmem:[#allocation2 + $0x1aa0] ss:$40 sps:$4 sm:$0xff]  }
 0x4e9   :  { %13500 = vmatpush1.bf16.msra.mxu1 %v21591_v9  ;;  %13009 = vmatprep.subr.bf16.mxu0 %v21596_v44  ;;  %v21645_v9 = vld [vmem:[#allocation2 + $0x1aa8] ss:$40 sps:$4 sm:$0xff]   ;;  %v21650_v44 = vld [vmem:[#allocation2 + $0x1af4] ss:$40 sps:$4 sm:$0xff]  }
 0x4ea   :  { %13501 = vmatprep.subr.bf16.mxu1 %v21599_v45  ;;  %v21653_v45 = vld [vmem:[#allocation2 + $0x1afc] ss:$40 sps:$4 sm:$0xff]  }
 0x4ec   :  { %13010 = vmatpush1.bf16.msra.mxu0 %v21594_v46  ;;  %v21648_v46 = vld [vmem:[#allocation2 + $0x1af0] ss:$40 sps:$4 sm:$0xff]  }
 0x4ed   :  { %13502 = vmatpush1.bf16.msra.mxu1 %v21597_v31  ;;  %13011 = vmatprep.subr.bf16.mxu0 %v21602_v41  ;;  %v21651_v31 = vld [vmem:[#allocation2 + $0x1af8] ss:$40 sps:$4 sm:$0xff]   ;;  %v21656_v41 = vld [vmem:[#allocation2 + $0x1b44] ss:$40 sps:$4 sm:$0xff]  }
 0x4ee   :  { %13503 = vmatprep.subr.bf16.mxu1 %v21605_v49  ;;  %v21659_v49 = vld [vmem:[#allocation2 + $0x1b4c] ss:$40 sps:$4 sm:$0xff]  }
 0x4f0   :  { %13012 = vmatpush1.bf16.msra.mxu0 %v21600_v50  ;;  %v21654_v50 = vld [vmem:[#allocation2 + $0x1b40] ss:$40 sps:$4 sm:$0xff]  }
 0x4f1   :  { %13504 = vmatpush1.bf16.msra.mxu1 %v21603_v51  ;;  %13013 = vmatprep.subr.bf16.mxu0 %v21608_v52  ;;  %v21657_v51 = vld [vmem:[#allocation2 + $0x1b48] ss:$40 sps:$4 sm:$0xff]   ;;  %v21662_v52 = vld [vmem:[#allocation2 + $0x1b94] ss:$40 sps:$4 sm:$0xff]  }
 0x4f2   :  { %13505 = vmatprep.subr.bf16.mxu1 %v21611_v53  ;;  %v21665_v53 = vld [vmem:[#allocation2 + $0x1b9c] ss:$40 sps:$4 sm:$0xff]  }
 0x4f4   :  { %13014 = vmatpush1.bf16.msra.mxu0 %v21606_v54  ;;  %v21660_v54 = vld [vmem:[#allocation2 + $0x1b90] ss:$40 sps:$4 sm:$0xff]  }
 0x4f5   :  { %13506 = vmatpush1.bf16.msra.mxu1 %v21609_v55  ;;  %13024 = vmatprep.subr.bf16.mxu0 %v21614_v58  ;;  %v21663_v55 = vld [vmem:[#allocation2 + $0x1b98] ss:$40 sps:$4 sm:$0xff]   ;;  %v21668_v58 = vld [vmem:[#allocation2 + $0x1be4] ss:$40 sps:$4 sm:$0xff]  }
 0x4f6   :  { %13516 = vmatprep.subr.bf16.mxu1 %v21617_v59  ;;  %v21671_v59 = vld [vmem:[#allocation2 + $0x1bec] ss:$40 sps:$4 sm:$0xff]  }
 0x4f7   :  { %13016 = vmatmul.mubr.bf16.vlgmr.msra.gmra.mrb[4].mxu0 %v23908_v42 }
 0x4f8   :  { %13508 = vmatmul.mubr.bf16.vlgmr.msra.gmra.mrb[4].mxu1 %v23908_v42  ;;  %13025 = vmatpush1.bf16.msra.mxu0 %v21612_v32  ;;  %v21666_v32 = vld [vmem:[#allocation2 + $0x1be0] ss:$40 sps:$4 sm:$0xff]  }
 0x4f9   :  { %13517 = vmatpush1.bf16.msra.mxu1 %v21615_v6  ;;  %13026 = vmatprep.subr.bf16.mxu0 %v21620_v7  ;;  %v21669_v6 = vld [vmem:[#allocation2 + $0x1be8] ss:$40 sps:$4 sm:$0xff]   ;;  %v21674_v7 = vld [vmem:[#allocation2 + $0x1c34] ss:$40 sps:$4 sm:$0xff]  }
 0x4fa   :  { %13518 = vmatprep.subr.bf16.mxu1 %v21623_v8  ;;  %13056 = vmatprep.mubr.bf16.mxu0 %v23912_v47  ;;  %v21677_v8 = vld [vmem:[#allocation2 + $0x1c3c] ss:$40 sps:$4 sm:$0xff]  }
 0x4fb   :  { %13548 = vmatprep.mubr.bf16.mxu1 %v23912_v47 }
 0x4fc   :  { %13027 = vmatpush1.bf16.msra.mxu0 %v21618_v12  ;;  %v21672_v12 = vld [vmem:[#allocation2 + $0x1c30] ss:$40 sps:$4 sm:$0xff]  }
 0x4fd   :  { %13519 = vmatpush1.bf16.msra.mxu1 %v21621_v14  ;;  %13028 = vmatprep.subr.bf16.mxu0 %v21626_v16  ;;  %v21675_v14 = vld [vmem:[#allocation2 + $0x1c38] ss:$40 sps:$4 sm:$0xff]   ;;  %v21680_v16 = vld [vmem:[#allocation2 + $0x1c84] ss:$40 sps:$4 sm:$0xff]  }
 0x4fe   :  { %13520 = vmatprep.subr.bf16.mxu1 %v21629_v17  ;;  %v21683_v17 = vld [vmem:[#allocation2 + $0x1c8c] ss:$40 sps:$4 sm:$0xff]  }
 0x500   :  { %13029 = vmatpush1.bf16.msra.mxu0 %v21624_v56  ;;  %v21678_v56 = vld [vmem:[#allocation2 + $0x1c80] ss:$40 sps:$4 sm:$0xff]  }
 0x501   :  { %13521 = vmatpush1.bf16.msra.mxu1 %v21627_v19  ;;  %13030 = vmatprep.subr.bf16.mxu0 %v21632_v22  ;;  %v21681_v19 = vld [vmem:[#allocation2 + $0x1c88] ss:$40 sps:$4 sm:$0xff]   ;;  %v21686_v22 = vld [vmem:[#allocation2 + $0x1cd4] ss:$40 sps:$4 sm:$0xff]  }
 0x502   :  { %13522 = vmatprep.subr.bf16.mxu1 %v21635_v23  ;;  %v21689_v23 = vld [vmem:[#allocation2 + $0x1cdc] ss:$40 sps:$4 sm:$0xff]  }
 0x504   :  { %13031 = vmatpush1.bf16.msra.mxu0 %v21630_v13  ;;  %v21684_v13 = vld [vmem:[#allocation2 + $0x1cd0] ss:$40 sps:$4 sm:$0xff]  }
 0x505   :  { %13523 = vmatpush1.bf16.msra.mxu1 %v21633_v25  ;;  %13032 = vmatprep.subr.bf16.mxu0 %v21638_v26  ;;  %v21687_v25 = vld [vmem:[#allocation2 + $0x1cd8] ss:$40 sps:$4 sm:$0xff]   ;;  %v21692_v26 = vld [vmem:[#allocation2 + $0x1d24] ss:$40 sps:$4 sm:$0xff]  }
 0x506   :  { %13524 = vmatprep.subr.bf16.mxu1 %v21641_v27  ;;  %v21695_v27 = vld [vmem:[#allocation2 + $0x1d2c] ss:$40 sps:$4 sm:$0xff]  }
 0x508   :  { %13033 = vmatpush1.bf16.msra.mxu0 %v21636_v33  ;;  %v21690_v33 = vld [vmem:[#allocation2 + $0x1d20] ss:$40 sps:$4 sm:$0xff]  }
 0x509   :  { %13525 = vmatpush1.bf16.msra.mxu1 %v21639_v34  ;;  %13034 = vmatprep.subr.bf16.mxu0 %v21644_v60  ;;  %v21693_v34 = vld [vmem:[#allocation2 + $0x1d28] ss:$40 sps:$4 sm:$0xff]   ;;  %v21698_v60 = vld [vmem:[#allocation2 + $0x1d74] ss:$40 sps:$4 sm:$0xff]  }
 0x50a   :  { %13526 = vmatprep.subr.bf16.mxu1 %v21647_v38  ;;  %v21701_v38 = vld [vmem:[#allocation2 + $0x1d7c] ss:$40 sps:$4 sm:$0xff]  }
 0x50c   :  { %13035 = vmatpush1.bf16.msra.mxu0 %v21642_v40  ;;  %v21696_v40 = vld [vmem:[#allocation2 + $0x1d70] ss:$40 sps:$4 sm:$0xff]  }
 0x50d   :  { %13527 = vmatpush1.bf16.msra.mxu1 %v21645_v9  ;;  %13036 = vmatprep.subr.bf16.mxu0 %v21650_v44  ;;  %v21699_v9 = vld [vmem:[#allocation2 + $0x1d78] ss:$40 sps:$4 sm:$0xff]   ;;  %v21704_v44 = vld [vmem:[#allocation2 + $0x1dc4] ss:$40 sps:$4 sm:$0xff]  }
 0x50e   :  { %13528 = vmatprep.subr.bf16.mxu1 %v21653_v45  ;;  %v21707_v45 = vld [vmem:[#allocation2 + $0x1dcc] ss:$40 sps:$4 sm:$0xff]  }
 0x510   :  { %13037 = vmatpush1.bf16.msra.mxu0 %v21648_v46  ;;  %v21702_v46 = vld [vmem:[#allocation2 + $0x1dc0] ss:$40 sps:$4 sm:$0xff]  }
 0x511   :  { %13529 = vmatpush1.bf16.msra.mxu1 %v21651_v31  ;;  %13038 = vmatprep.subr.bf16.mxu0 %v21656_v41  ;;  %v21705_v31 = vld [vmem:[#allocation2 + $0x1dc8] ss:$40 sps:$4 sm:$0xff]   ;;  %v21710_v41 = vld [vmem:[#allocation2 + $0x1e14] ss:$40 sps:$4 sm:$0xff]  }
 0x512   :  { %13530 = vmatprep.subr.bf16.mxu1 %v21659_v49  ;;  %v21713_v49 = vld [vmem:[#allocation2 + $0x1e1c] ss:$40 sps:$4 sm:$0xff]  }
 0x514   :  { %13039 = vmatpush1.bf16.msra.mxu0 %v21654_v50  ;;  %v21708_v50 = vld [vmem:[#allocation2 + $0x1e10] ss:$40 sps:$4 sm:$0xff]  }
 0x515   :  { %13531 = vmatpush1.bf16.msra.mxu1 %v21657_v51  ;;  %13040 = vmatprep.subr.bf16.mxu0 %v21662_v52  ;;  %v21711_v51 = vld [vmem:[#allocation2 + $0x1e18] ss:$40 sps:$4 sm:$0xff]   ;;  %v21716_v52 = vld [vmem:[#allocation2 + $0x1e64] ss:$40 sps:$4 sm:$0xff]  }
 0x516   :  { %13532 = vmatprep.subr.bf16.mxu1 %v21665_v53  ;;  %v21719_v53 = vld [vmem:[#allocation2 + $0x1e6c] ss:$40 sps:$4 sm:$0xff]  }
 0x518   :  { %13041 = vmatpush1.bf16.msra.mxu0 %v21660_v54  ;;  %v21714_v54 = vld [vmem:[#allocation2 + $0x1e60] ss:$40 sps:$4 sm:$0xff]  }
 0x519   :  { %13533 = vmatpush1.bf16.msra.mxu1 %v21663_v55  ;;  %13042 = vmatprep.subr.bf16.mxu0 %v21668_v58  ;;  %v21717_v55 = vld [vmem:[#allocation2 + $0x1e68] ss:$40 sps:$4 sm:$0xff]   ;;  %v21722_v58 = vld [vmem:[#allocation2 + $0x1eb4] ss:$40 sps:$4 sm:$0xff]  }
 0x51a   :  { %13534 = vmatprep.subr.bf16.mxu1 %v21671_v59  ;;  %v21725_v59 = vld [vmem:[#allocation2 + $0x1ebc] ss:$40 sps:$4 sm:$0xff]  }
 0x51c   :  { %13043 = vmatpush1.bf16.msra.mxu0 %v21666_v32  ;;  %v21720_v32 = vld [vmem:[#allocation2 + $0x1eb0] ss:$40 sps:$4 sm:$0xff]  }
 0x51d   :  { %13535 = vmatpush1.bf16.msra.mxu1 %v21669_v6  ;;  %13044 = vmatprep.subr.bf16.mxu0 %v21674_v7  ;;  %v21723_v6 = vld [vmem:[#allocation2 + $0x1eb8] ss:$40 sps:$4 sm:$0xff]   ;;  %v21728_v7 = vld [vmem:[#allocation2 + $0x1f04] ss:$40 sps:$4 sm:$0xff]  }
 0x51e   :  { %13536 = vmatprep.subr.bf16.mxu1 %v21677_v8  ;;  %v21731_v8 = vld [vmem:[#allocation2 + $0x1f0c] ss:$40 sps:$4 sm:$0xff]  }
 0x520   :  { %13045 = vmatpush1.bf16.msra.mxu0 %v21672_v12  ;;  %v21726_v12 = vld [vmem:[#allocation2 + $0x1f00] ss:$40 sps:$4 sm:$0xff]  }
 0x521   :  { %13537 = vmatpush1.bf16.msra.mxu1 %v21675_v14  ;;  %13046 = vmatprep.subr.bf16.mxu0 %v21680_v16  ;;  %v21729_v14 = vld [vmem:[#allocation2 + $0x1f08] ss:$40 sps:$4 sm:$0xff]   ;;  %v21734_v16 = vld [vmem:[#allocation2 + $0x1f54] ss:$40 sps:$4 sm:$0xff]  }
 0x522   :  { %13538 = vmatprep.subr.bf16.mxu1 %v21683_v17  ;;  %v21737_v17 = vld [vmem:[#allocation2 + $0x1f5c] ss:$40 sps:$4 sm:$0xff]  }
 0x524   :  { %13047 = vmatpush1.bf16.msra.mxu0 %v21678_v56  ;;  %v21732_v56 = vld [vmem:[#allocation2 + $0x1f50] ss:$40 sps:$4 sm:$0xff]  }
 0x525   :  { %13539 = vmatpush1.bf16.msra.mxu1 %v21681_v19  ;;  %13048 = vmatprep.subr.bf16.mxu0 %v21686_v22  ;;  %v21735_v19 = vld [vmem:[#allocation2 + $0x1f58] ss:$40 sps:$4 sm:$0xff]   ;;  %v21740_v22 = vld [vmem:[#allocation2 + $0x1fa4] ss:$40 sps:$4 sm:$0xff]  }
 0x526   :  { %13540 = vmatprep.subr.bf16.mxu1 %v21689_v23  ;;  %v21743_v23 = vld [vmem:[#allocation2 + $0x1fac] ss:$40 sps:$4 sm:$0xff]  }
 0x528   :  { %13049 = vmatpush1.bf16.msra.mxu0 %v21684_v13  ;;  %v21738_v13 = vld [vmem:[#allocation2 + $0x1fa0] ss:$40 sps:$4 sm:$0xff]  }
 0x529   :  { %13541 = vmatpush1.bf16.msra.mxu1 %v21687_v25  ;;  %13050 = vmatprep.subr.bf16.mxu0 %v21692_v26  ;;  %v21741_v25 = vld [vmem:[#allocation2 + $0x1fa8] ss:$40 sps:$4 sm:$0xff]   ;;  %v21746_v26 = vld [vmem:[#allocation2 + $0x1ff4] ss:$40 sps:$4 sm:$0xff]  }
 0x52a   :  { %13542 = vmatprep.subr.bf16.mxu1 %v21695_v27  ;;  %v21749_v27 = vld [vmem:[#allocation2 + $0x1ffc] ss:$40 sps:$4 sm:$0xff]  }
 0x52c   :  { %13051 = vmatpush1.bf16.msra.mxu0 %v21690_v33  ;;  %v21744_v33 = vld [vmem:[#allocation2 + $0x1ff0] ss:$40 sps:$4 sm:$0xff]  }
 0x52d   :  { %13543 = vmatpush1.bf16.msra.mxu1 %v21693_v34  ;;  %13052 = vmatprep.subr.bf16.mxu0 %v21698_v60  ;;  %v21747_v34 = vld [vmem:[#allocation2 + $0x1ff8] ss:$40 sps:$4 sm:$0xff]   ;;  %v21752_v60 = vld [vmem:[#allocation2 + $0x2044] ss:$40 sps:$4 sm:$0xff]  }
 0x52e   :  { %13544 = vmatprep.subr.bf16.mxu1 %v21701_v38  ;;  %v21755_v38 = vld [vmem:[#allocation2 + $0x204c] ss:$40 sps:$4 sm:$0xff]  }
 0x530   :  { %13053 = vmatpush1.bf16.msra.mxu0 %v21696_v40  ;;  %v21750_v40 = vld [vmem:[#allocation2 + $0x2040] ss:$40 sps:$4 sm:$0xff]  }
 0x531   :  { %13545 = vmatpush1.bf16.msra.mxu1 %v21699_v9  ;;  %13054 = vmatprep.subr.bf16.mxu0 %v21704_v44  ;;  %v21753_v9 = vld [vmem:[#allocation2 + $0x2048] ss:$40 sps:$4 sm:$0xff]   ;;  %v21758_v44 = vld [vmem:[#allocation2 + $0x2094] ss:$40 sps:$4 sm:$0xff]  }
 0x532   :  { %13546 = vmatprep.subr.bf16.mxu1 %v21707_v45  ;;  %v21761_v45 = vld [vmem:[#allocation2 + $0x209c] ss:$40 sps:$4 sm:$0xff]  }
 0x534   :  { %13055 = vmatpush1.bf16.msra.mxu0 %v21702_v46  ;;  %v21756_v46 = vld [vmem:[#allocation2 + $0x2090] ss:$40 sps:$4 sm:$0xff]  }
 0x535   :  { %13547 = vmatpush1.bf16.msra.mxu1 %v21705_v31  ;;  %13065 = vmatprep.subr.bf16.mxu0 %v21710_v41  ;;  %v21759_v31 = vld [vmem:[#allocation2 + $0x2098] ss:$40 sps:$4 sm:$0xff]   ;;  %v21764_v41 = vld [vmem:[#allocation2 + $0x20e4] ss:$40 sps:$4 sm:$0xff]  }
 0x536   :  { %13557 = vmatprep.subr.bf16.mxu1 %v21713_v49  ;;  %v21767_v49 = vld [vmem:[#allocation2 + $0x20ec] ss:$40 sps:$4 sm:$0xff]  }
 0x537   :  { %13057 = vmatmul.mubr.bf16.vlgmr.msra.gmra.mrb[4].mxu0 %v23925_v57 }
 0x538   :  { %13549 = vmatmul.mubr.bf16.vlgmr.msra.gmra.mrb[4].mxu1 %v23925_v57  ;;  %13066 = vmatpush1.bf16.msra.mxu0 %v21708_v50  ;;  %v21762_v50 = vld [vmem:[#allocation2 + $0x20e0] ss:$40 sps:$4 sm:$0xff]  }
 0x539   :  { %13558 = vmatpush1.bf16.msra.mxu1 %v21711_v51  ;;  %13067 = vmatprep.subr.bf16.mxu0 %v21716_v52  ;;  %v21765_v51 = vld [vmem:[#allocation2 + $0x20e8] ss:$40 sps:$4 sm:$0xff]   ;;  %v21770_v52 = vld [vmem:[#allocation2 + $0x2134] ss:$40 sps:$4 sm:$0xff]  }
 0x53a   :  { %13559 = vmatprep.subr.bf16.mxu1 %v21719_v53  ;;  %13097 = vmatprep.mubr.bf16.mxu0 %v23929_v62  ;;  %v21773_v53 = vld [vmem:[#allocation2 + $0x213c] ss:$40 sps:$4 sm:$0xff]  }
 0x53b   :  { %13589 = vmatprep.mubr.bf16.mxu1 %v23929_v62 }
 0x53c   :  { %13068 = vmatpush1.bf16.msra.mxu0 %v21714_v54  ;;  %v21768_v54 = vld [vmem:[#allocation2 + $0x2130] ss:$40 sps:$4 sm:$0xff]  }
 0x53d   :  { %13560 = vmatpush1.bf16.msra.mxu1 %v21717_v55  ;;  %13069 = vmatprep.subr.bf16.mxu0 %v21722_v58  ;;  %v21771_v55 = vld [vmem:[#allocation2 + $0x2138] ss:$40 sps:$4 sm:$0xff]   ;;  %v21776_v58 = vld [vmem:[#allocation2 + $0x2184] ss:$40 sps:$4 sm:$0xff]  }
 0x53e   :  { %13561 = vmatprep.subr.bf16.mxu1 %v21725_v59  ;;  %v21779_v59 = vld [vmem:[#allocation2 + $0x218c] ss:$40 sps:$4 sm:$0xff]  }
 0x540   :  { %13070 = vmatpush1.bf16.msra.mxu0 %v21720_v32  ;;  %v21774_v32 = vld [vmem:[#allocation2 + $0x2180] ss:$40 sps:$4 sm:$0xff]  }
 0x541   :  { %13562 = vmatpush1.bf16.msra.mxu1 %v21723_v6  ;;  %13071 = vmatprep.subr.bf16.mxu0 %v21728_v7  ;;  %v21777_v6 = vld [vmem:[#allocation2 + $0x2188] ss:$40 sps:$4 sm:$0xff]   ;;  %v21782_v7 = vld [vmem:[#allocation2 + $0x21d4] ss:$40 sps:$4 sm:$0xff]  }
 0x542   :  { %13563 = vmatprep.subr.bf16.mxu1 %v21731_v8  ;;  %v21785_v8 = vld [vmem:[#allocation2 + $0x21dc] ss:$40 sps:$4 sm:$0xff]  }
 0x544   :  { %13072 = vmatpush1.bf16.msra.mxu0 %v21726_v12  ;;  %v21780_v12 = vld [vmem:[#allocation2 + $0x21d0] ss:$40 sps:$4 sm:$0xff]  }
 0x545   :  { %13564 = vmatpush1.bf16.msra.mxu1 %v21729_v14  ;;  %13073 = vmatprep.subr.bf16.mxu0 %v21734_v16  ;;  %v21783_v14 = vld [vmem:[#allocation2 + $0x21d8] ss:$40 sps:$4 sm:$0xff]   ;;  %v21788_v16 = vld [vmem:[#allocation2 + $0x2224] ss:$40 sps:$4 sm:$0xff]  }
 0x546   :  { %13565 = vmatprep.subr.bf16.mxu1 %v21737_v17  ;;  %v21791_v17 = vld [vmem:[#allocation2 + $0x222c] ss:$40 sps:$4 sm:$0xff]  }
 0x548   :  { %13074 = vmatpush1.bf16.msra.mxu0 %v21732_v56  ;;  %v21786_v56 = vld [vmem:[#allocation2 + $0x2220] ss:$40 sps:$4 sm:$0xff]  }
 0x549   :  { %13566 = vmatpush1.bf16.msra.mxu1 %v21735_v19  ;;  %13075 = vmatprep.subr.bf16.mxu0 %v21740_v22  ;;  %v21789_v19 = vld [vmem:[#allocation2 + $0x2228] ss:$40 sps:$4 sm:$0xff]   ;;  %v21794_v22 = vld [vmem:[#allocation2 + $0x2274] ss:$40 sps:$4 sm:$0xff]  }
 0x54a   :  { %13567 = vmatprep.subr.bf16.mxu1 %v21743_v23  ;;  %v21797_v23 = vld [vmem:[#allocation2 + $0x227c] ss:$40 sps:$4 sm:$0xff]  }
 0x54c   :  { %13076 = vmatpush1.bf16.msra.mxu0 %v21738_v13  ;;  %v21792_v13 = vld [vmem:[#allocation2 + $0x2270] ss:$40 sps:$4 sm:$0xff]  }
 0x54d   :  { %13568 = vmatpush1.bf16.msra.mxu1 %v21741_v25  ;;  %13077 = vmatprep.subr.bf16.mxu0 %v21746_v26  ;;  %v21795_v25 = vld [vmem:[#allocation2 + $0x2278] ss:$40 sps:$4 sm:$0xff]   ;;  %v21800_v26 = vld [vmem:[#allocation2 + $0x22c4] ss:$40 sps:$4 sm:$0xff]  }
 0x54e   :  { %13569 = vmatprep.subr.bf16.mxu1 %v21749_v27  ;;  %v21803_v27 = vld [vmem:[#allocation2 + $0x22cc] ss:$40 sps:$4 sm:$0xff]  }
 0x550   :  { %13078 = vmatpush1.bf16.msra.mxu0 %v21744_v33  ;;  %v21798_v33 = vld [vmem:[#allocation2 + $0x22c0] ss:$40 sps:$4 sm:$0xff]  }
 0x551   :  { %13570 = vmatpush1.bf16.msra.mxu1 %v21747_v34  ;;  %13079 = vmatprep.subr.bf16.mxu0 %v21752_v60  ;;  %v21801_v34 = vld [vmem:[#allocation2 + $0x22c8] ss:$40 sps:$4 sm:$0xff]   ;;  %v21806_v60 = vld [vmem:[#allocation2 + $0x2314] ss:$40 sps:$4 sm:$0xff]  }
 0x552   :  { %13571 = vmatprep.subr.bf16.mxu1 %v21755_v38  ;;  %v21809_v38 = vld [vmem:[#allocation2 + $0x231c] ss:$40 sps:$4 sm:$0xff]  }
 0x554   :  { %13080 = vmatpush1.bf16.msra.mxu0 %v21750_v40  ;;  %v21804_v40 = vld [vmem:[#allocation2 + $0x2310] ss:$40 sps:$4 sm:$0xff]  }
 0x555   :  { %13572 = vmatpush1.bf16.msra.mxu1 %v21753_v9  ;;  %13081 = vmatprep.subr.bf16.mxu0 %v21758_v44  ;;  %v21807_v9 = vld [vmem:[#allocation2 + $0x2318] ss:$40 sps:$4 sm:$0xff]   ;;  %v21812_v44 = vld [vmem:[#allocation2 + $0x2364] ss:$40 sps:$4 sm:$0xff]  }
 0x556   :  { %13573 = vmatprep.subr.bf16.mxu1 %v21761_v45  ;;  %v21815_v45 = vld [vmem:[#allocation2 + $0x236c] ss:$40 sps:$4 sm:$0xff]  }
 0x558   :  { %13082 = vmatpush1.bf16.msra.mxu0 %v21756_v46  ;;  %v21810_v46 = vld [vmem:[#allocation2 + $0x2360] ss:$40 sps:$4 sm:$0xff]  }
 0x559   :  { %13574 = vmatpush1.bf16.msra.mxu1 %v21759_v31  ;;  %13083 = vmatprep.subr.bf16.mxu0 %v21764_v41  ;;  %v21813_v31 = vld [vmem:[#allocation2 + $0x2368] ss:$40 sps:$4 sm:$0xff]   ;;  %v21818_v41 = vld [vmem:[#allocation2 + $0x23b4] ss:$40 sps:$4 sm:$0xff]  }
 0x55a   :  { %13575 = vmatprep.subr.bf16.mxu1 %v21767_v49  ;;  %v21821_v49 = vld [vmem:[#allocation2 + $0x23bc] ss:$40 sps:$4 sm:$0xff]  }
 0x55c   :  { %13084 = vmatpush1.bf16.msra.mxu0 %v21762_v50  ;;  %v21816_v50 = vld [vmem:[#allocation2 + $0x23b0] ss:$40 sps:$4 sm:$0xff]  }
 0x55d   :  { %13576 = vmatpush1.bf16.msra.mxu1 %v21765_v51  ;;  %13085 = vmatprep.subr.bf16.mxu0 %v21770_v52  ;;  %v21819_v51 = vld [vmem:[#allocation2 + $0x23b8] ss:$40 sps:$4 sm:$0xff]   ;;  %v21824_v52 = vld [vmem:[#allocation2 + $0x2404] ss:$40 sps:$4 sm:$0xff]  }
 0x55e   :  { %13577 = vmatprep.subr.bf16.mxu1 %v21773_v53  ;;  %v21827_v53 = vld [vmem:[#allocation2 + $0x240c] ss:$40 sps:$4 sm:$0xff]  }
 0x560   :  { %13086 = vmatpush1.bf16.msra.mxu0 %v21768_v54  ;;  %v21822_v54 = vld [vmem:[#allocation2 + $0x2400] ss:$40 sps:$4 sm:$0xff]  }
 0x561   :  { %13578 = vmatpush1.bf16.msra.mxu1 %v21771_v55  ;;  %13087 = vmatprep.subr.bf16.mxu0 %v21776_v58  ;;  %v21825_v55 = vld [vmem:[#allocation2 + $0x2408] ss:$40 sps:$4 sm:$0xff]   ;;  %v21830_v58 = vld [vmem:[#allocation2 + $0x2454] ss:$40 sps:$4 sm:$0xff]  }
 0x562   :  { %13579 = vmatprep.subr.bf16.mxu1 %v21779_v59  ;;  %v21833_v59 = vld [vmem:[#allocation2 + $0x245c] ss:$40 sps:$4 sm:$0xff]  }
 0x564   :  { %13088 = vmatpush1.bf16.msra.mxu0 %v21774_v32  ;;  %v21828_v32 = vld [vmem:[#allocation2 + $0x2450] ss:$40 sps:$4 sm:$0xff]  }
 0x565   :  { %13580 = vmatpush1.bf16.msra.mxu1 %v21777_v6  ;;  %13089 = vmatprep.subr.bf16.mxu0 %v21782_v7  ;;  %v21831_v6 = vld [vmem:[#allocation2 + $0x2458] ss:$40 sps:$4 sm:$0xff]   ;;  %v21836_v7 = vld [vmem:[#allocation2 + $0x24a4] ss:$40 sps:$4 sm:$0xff]  }
 0x566   :  { %13581 = vmatprep.subr.bf16.mxu1 %v21785_v8  ;;  %v21839_v8 = vld [vmem:[#allocation2 + $0x24ac] ss:$40 sps:$4 sm:$0xff]  }
 0x568   :  { %13090 = vmatpush1.bf16.msra.mxu0 %v21780_v12  ;;  %v21834_v12 = vld [vmem:[#allocation2 + $0x24a0] ss:$40 sps:$4 sm:$0xff]  }
 0x569   :  { %13582 = vmatpush1.bf16.msra.mxu1 %v21783_v14  ;;  %13091 = vmatprep.subr.bf16.mxu0 %v21788_v16  ;;  %v21837_v14 = vld [vmem:[#allocation2 + $0x24a8] ss:$40 sps:$4 sm:$0xff]   ;;  %v21842_v16 = vld [vmem:[#allocation2 + $0x24f4] ss:$40 sps:$4 sm:$0xff]  }
 0x56a   :  { %13583 = vmatprep.subr.bf16.mxu1 %v21791_v17  ;;  %v21845_v17 = vld [vmem:[#allocation2 + $0x24fc] ss:$40 sps:$4 sm:$0xff]  }
 0x56c   :  { %13092 = vmatpush1.bf16.msra.mxu0 %v21786_v56  ;;  %v21840_v56 = vld [vmem:[#allocation2 + $0x24f0] ss:$40 sps:$4 sm:$0xff]  }
 0x56d   :  { %13584 = vmatpush1.bf16.msra.mxu1 %v21789_v19  ;;  %13093 = vmatprep.subr.bf16.mxu0 %v21794_v22  ;;  %v21843_v19 = vld [vmem:[#allocation2 + $0x24f8] ss:$40 sps:$4 sm:$0xff]   ;;  %v21848_v22 = vld [vmem:[#allocation2 + $0x2544] ss:$40 sps:$4 sm:$0xff]  }
 0x56e   :  { %13585 = vmatprep.subr.bf16.mxu1 %v21797_v23  ;;  %v21851_v23 = vld [vmem:[#allocation2 + $0x254c] ss:$40 sps:$4 sm:$0xff]  }
 0x570   :  { %13094 = vmatpush1.bf16.msra.mxu0 %v21792_v13  ;;  %v21846_v13 = vld [vmem:[#allocation2 + $0x2540] ss:$40 sps:$4 sm:$0xff]  }
 0x571   :  { %13586 = vmatpush1.bf16.msra.mxu1 %v21795_v25  ;;  %13095 = vmatprep.subr.bf16.mxu0 %v21800_v26  ;;  %v21849_v25 = vld [vmem:[#allocation2 + $0x2548] ss:$40 sps:$4 sm:$0xff]   ;;  %v21854_v26 = vld [vmem:[#allocation2 + $0x2594] ss:$40 sps:$4 sm:$0xff]  }
 0x572   :  { %13587 = vmatprep.subr.bf16.mxu1 %v21803_v27  ;;  %v21857_v27 = vld [vmem:[#allocation2 + $0x259c] ss:$40 sps:$4 sm:$0xff]  }
 0x574   :  { %13096 = vmatpush1.bf16.msra.mxu0 %v21798_v33  ;;  %v21852_v33 = vld [vmem:[#allocation2 + $0x2590] ss:$40 sps:$4 sm:$0xff]  }
 0x575   :  { %13588 = vmatpush1.bf16.msra.mxu1 %v21801_v34  ;;  %13106 = vmatprep.subr.bf16.mxu0 %v21806_v60  ;;  %v21855_v34 = vld [vmem:[#allocation2 + $0x2598] ss:$40 sps:$4 sm:$0xff]   ;;  %v21860_v60 = vld [vmem:[#allocation2 + $0x25e4] ss:$40 sps:$4 sm:$0xff]  }
 0x576   :  { %13598 = vmatprep.subr.bf16.mxu1 %v21809_v38  ;;  %v21863_v38 = vld [vmem:[#allocation2 + $0x25ec] ss:$40 sps:$4 sm:$0xff]  }
 0x577   :  { %13098 = vmatmul.mubr.bf16.vlgmr.msra.gmra.mrb[4].mxu0 %v23942_v11 }
 0x578   :  { %13590 = vmatmul.mubr.bf16.vlgmr.msra.gmra.mrb[4].mxu1 %v23942_v11  ;;  %13107 = vmatpush1.bf16.msra.mxu0 %v21804_v40  ;;  %v21858_v40 = vld [vmem:[#allocation2 + $0x25e0] ss:$40 sps:$4 sm:$0xff]  }
 0x579   :  { %13599 = vmatpush1.bf16.msra.mxu1 %v21807_v9  ;;  %13108 = vmatprep.subr.bf16.mxu0 %v21812_v44  ;;  %v21861_v9 = vld [vmem:[#allocation2 + $0x25e8] ss:$40 sps:$4 sm:$0xff]   ;;  %v21866_v44 = vld [vmem:[#allocation2 + $0x2634] ss:$40 sps:$4 sm:$0xff]  }
 0x57a   :  { %13600 = vmatprep.subr.bf16.mxu1 %v21815_v45  ;;  %13138 = vmatprep.mubr.bf16.mxu0 %v23946_v18  ;;  %v21869_v45 = vld [vmem:[#allocation2 + $0x263c] ss:$40 sps:$4 sm:$0xff]  }
 0x57b   :  { %13630 = vmatprep.mubr.bf16.mxu1 %v23946_v18 }
 0x57c   :  { %13109 = vmatpush1.bf16.msra.mxu0 %v21810_v46  ;;  %v21864_v46 = vld [vmem:[#allocation2 + $0x2630] ss:$40 sps:$4 sm:$0xff]  }
 0x57d   :  { %13601 = vmatpush1.bf16.msra.mxu1 %v21813_v31  ;;  %13110 = vmatprep.subr.bf16.mxu0 %v21818_v41  ;;  %v21867_v31 = vld [vmem:[#allocation2 + $0x2638] ss:$40 sps:$4 sm:$0xff]   ;;  %v21872_v41 = vld [vmem:[#allocation2 + $0x2684] ss:$40 sps:$4 sm:$0xff]  }
 0x57e   :  { %13602 = vmatprep.subr.bf16.mxu1 %v21821_v49  ;;  %v21875_v49 = vld [vmem:[#allocation2 + $0x268c] ss:$40 sps:$4 sm:$0xff]  }
 0x580   :  { %13111 = vmatpush1.bf16.msra.mxu0 %v21816_v50  ;;  %v21870_v50 = vld [vmem:[#allocation2 + $0x2680] ss:$40 sps:$4 sm:$0xff]  }
 0x581   :  { %13603 = vmatpush1.bf16.msra.mxu1 %v21819_v51  ;;  %13112 = vmatprep.subr.bf16.mxu0 %v21824_v52  ;;  %v21873_v51 = vld [vmem:[#allocation2 + $0x2688] ss:$40 sps:$4 sm:$0xff]   ;;  %v21878_v52 = vld [vmem:[#allocation2 + $0x26d4] ss:$40 sps:$4 sm:$0xff]  }
 0x582   :  { %13604 = vmatprep.subr.bf16.mxu1 %v21827_v53  ;;  %v21881_v53 = vld [vmem:[#allocation2 + $0x26dc] ss:$40 sps:$4 sm:$0xff]  }
 0x584   :  { %13113 = vmatpush1.bf16.msra.mxu0 %v21822_v54  ;;  %v21876_v54 = vld [vmem:[#allocation2 + $0x26d0] ss:$40 sps:$4 sm:$0xff]  }
 0x585   :  { %13605 = vmatpush1.bf16.msra.mxu1 %v21825_v55  ;;  %13114 = vmatprep.subr.bf16.mxu0 %v21830_v58  ;;  %v21879_v55 = vld [vmem:[#allocation2 + $0x26d8] ss:$40 sps:$4 sm:$0xff]   ;;  %v21884_v58 = vld [vmem:[#allocation2 + $0x2724] ss:$40 sps:$4 sm:$0xff]  }
 0x586   :  { %13606 = vmatprep.subr.bf16.mxu1 %v21833_v59  ;;  %v21887_v59 = vld [vmem:[#allocation2 + $0x272c] ss:$40 sps:$4 sm:$0xff]  }
 0x588   :  { %13115 = vmatpush1.bf16.msra.mxu0 %v21828_v32  ;;  %v21882_v32 = vld [vmem:[#allocation2 + $0x2720] ss:$40 sps:$4 sm:$0xff]  }
 0x589   :  { %13607 = vmatpush1.bf16.msra.mxu1 %v21831_v6  ;;  %13116 = vmatprep.subr.bf16.mxu0 %v21836_v7  ;;  %v21885_v6 = vld [vmem:[#allocation2 + $0x2728] ss:$40 sps:$4 sm:$0xff]   ;;  %v21890_v7 = vld [vmem:[#allocation2 + $0x2774] ss:$40 sps:$4 sm:$0xff]  }
 0x58a   :  { %13608 = vmatprep.subr.bf16.mxu1 %v21839_v8  ;;  %v21893_v8 = vld [vmem:[#allocation2 + $0x277c] ss:$40 sps:$4 sm:$0xff]  }
 0x58c   :  { %13117 = vmatpush1.bf16.msra.mxu0 %v21834_v12  ;;  %v21888_v12 = vld [vmem:[#allocation2 + $0x2770] ss:$40 sps:$4 sm:$0xff]  }
 0x58d   :  { %13609 = vmatpush1.bf16.msra.mxu1 %v21837_v14  ;;  %13118 = vmatprep.subr.bf16.mxu0 %v21842_v16  ;;  %v21891_v14 = vld [vmem:[#allocation2 + $0x2778] ss:$40 sps:$4 sm:$0xff]   ;;  %v21896_v16 = vld [vmem:[#allocation2 + $0x27c4] ss:$40 sps:$4 sm:$0xff]  }
 0x58e   :  { %13610 = vmatprep.subr.bf16.mxu1 %v21845_v17  ;;  %v21899_v17 = vld [vmem:[#allocation2 + $0x27cc] ss:$40 sps:$4 sm:$0xff]  }
 0x590   :  { %13119 = vmatpush1.bf16.msra.mxu0 %v21840_v56  ;;  %v21894_v56 = vld [vmem:[#allocation2 + $0x27c0] ss:$40 sps:$4 sm:$0xff]  }
 0x591   :  { %13611 = vmatpush1.bf16.msra.mxu1 %v21843_v19  ;;  %13120 = vmatprep.subr.bf16.mxu0 %v21848_v22  ;;  %v21897_v19 = vld [vmem:[#allocation2 + $0x27c8] ss:$40 sps:$4 sm:$0xff]   ;;  %v21902_v22 = vld [vmem:[#allocation2 + $0x2814] ss:$40 sps:$4 sm:$0xff]  }
 0x592   :  { %13612 = vmatprep.subr.bf16.mxu1 %v21851_v23  ;;  %v21905_v23 = vld [vmem:[#allocation2 + $0x281c] ss:$40 sps:$4 sm:$0xff]  }
 0x594   :  { %13121 = vmatpush1.bf16.msra.mxu0 %v21846_v13  ;;  %v21900_v13 = vld [vmem:[#allocation2 + $0x2810] ss:$40 sps:$4 sm:$0xff]  }
 0x595   :  { %13613 = vmatpush1.bf16.msra.mxu1 %v21849_v25  ;;  %13122 = vmatprep.subr.bf16.mxu0 %v21854_v26  ;;  %v21903_v25 = vld [vmem:[#allocation2 + $0x2818] ss:$40 sps:$4 sm:$0xff]   ;;  %v21908_v26 = vld [vmem:[#allocation2 + $0x2864] ss:$40 sps:$4 sm:$0xff]  }
 0x596   :  { %13614 = vmatprep.subr.bf16.mxu1 %v21857_v27  ;;  %v21911_v27 = vld [vmem:[#allocation2 + $0x286c] ss:$40 sps:$4 sm:$0xff]  }
 0x598   :  { %13123 = vmatpush1.bf16.msra.mxu0 %v21852_v33  ;;  %v21906_v33 = vld [vmem:[#allocation2 + $0x2860] ss:$40 sps:$4 sm:$0xff]  }
 0x599   :  { %13615 = vmatpush1.bf16.msra.mxu1 %v21855_v34  ;;  %13124 = vmatprep.subr.bf16.mxu0 %v21860_v60  ;;  %v21909_v34 = vld [vmem:[#allocation2 + $0x2868] ss:$40 sps:$4 sm:$0xff]   ;;  %v21914_v60 = vld [vmem:[#allocation2 + $0x28b4] ss:$40 sps:$4 sm:$0xff]  }
 0x59a   :  { %13616 = vmatprep.subr.bf16.mxu1 %v21863_v38  ;;  %v21917_v38 = vld [vmem:[#allocation2 + $0x28bc] ss:$40 sps:$4 sm:$0xff]  }
 0x59c   :  { %13125 = vmatpush1.bf16.msra.mxu0 %v21858_v40  ;;  %v21912_v40 = vld [vmem:[#allocation2 + $0x28b0] ss:$40 sps:$4 sm:$0xff]  }
 0x59d   :  { %13617 = vmatpush1.bf16.msra.mxu1 %v21861_v9  ;;  %13126 = vmatprep.subr.bf16.mxu0 %v21866_v44  ;;  %v21915_v9 = vld [vmem:[#allocation2 + $0x28b8] ss:$40 sps:$4 sm:$0xff]   ;;  %v21920_v44 = vld [vmem:[#allocation2 + $0x2904] ss:$40 sps:$4 sm:$0xff]  }
 0x59e   :  { %13618 = vmatprep.subr.bf16.mxu1 %v21869_v45  ;;  %v21923_v45 = vld [vmem:[#allocation2 + $0x290c] ss:$40 sps:$4 sm:$0xff]  }
 0x5a0   :  { %13127 = vmatpush1.bf16.msra.mxu0 %v21864_v46  ;;  %v21918_v46 = vld [vmem:[#allocation2 + $0x2900] ss:$40 sps:$4 sm:$0xff]  }
 0x5a1   :  { %13619 = vmatpush1.bf16.msra.mxu1 %v21867_v31  ;;  %13128 = vmatprep.subr.bf16.mxu0 %v21872_v41  ;;  %v21921_v31 = vld [vmem:[#allocation2 + $0x2908] ss:$40 sps:$4 sm:$0xff]   ;;  %v21926_v41 = vld [vmem:[#allocation2 + $0x2954] ss:$40 sps:$4 sm:$0xff]  }
 0x5a2   :  { %13620 = vmatprep.subr.bf16.mxu1 %v21875_v49  ;;  %v21929_v49 = vld [vmem:[#allocation2 + $0x295c] ss:$40 sps:$4 sm:$0xff]  }
 0x5a4   :  { %13129 = vmatpush1.bf16.msra.mxu0 %v21870_v50  ;;  %v21924_v50 = vld [vmem:[#allocation2 + $0x2950] ss:$40 sps:$4 sm:$0xff]  }
 0x5a5   :  { %13621 = vmatpush1.bf16.msra.mxu1 %v21873_v51  ;;  %13130 = vmatprep.subr.bf16.mxu0 %v21878_v52  ;;  %v21927_v51 = vld [vmem:[#allocation2 + $0x2958] ss:$40 sps:$4 sm:$0xff]   ;;  %v21932_v52 = vld [vmem:[#allocation2 + $0x29a4] ss:$40 sps:$4 sm:$0xff]  }
 0x5a6   :  { %13622 = vmatprep.subr.bf16.mxu1 %v21881_v53  ;;  %v21935_v53 = vld [vmem:[#allocation2 + $0x29ac] ss:$40 sps:$4 sm:$0xff]  }
 0x5a8   :  { %13131 = vmatpush1.bf16.msra.mxu0 %v21876_v54  ;;  %v21930_v54 = vld [vmem:[#allocation2 + $0x29a0] ss:$40 sps:$4 sm:$0xff]  }
 0x5a9   :  { %13623 = vmatpush1.bf16.msra.mxu1 %v21879_v55  ;;  %13132 = vmatprep.subr.bf16.mxu0 %v21884_v58  ;;  %v21933_v55 = vld [vmem:[#allocation2 + $0x29a8] ss:$40 sps:$4 sm:$0xff]   ;;  %v21938_v58 = vld [vmem:[#allocation2 + $0x29f4] ss:$40 sps:$4 sm:$0xff]  }
 0x5aa   :  { %13624 = vmatprep.subr.bf16.mxu1 %v21887_v59  ;;  %v21941_v59 = vld [vmem:[#allocation2 + $0x29fc] ss:$40 sps:$4 sm:$0xff]  }
 0x5ac   :  { %13133 = vmatpush1.bf16.msra.mxu0 %v21882_v32  ;;  %v21936_v32 = vld [vmem:[#allocation2 + $0x29f0] ss:$40 sps:$4 sm:$0xff]  }
 0x5ad   :  { %13625 = vmatpush1.bf16.msra.mxu1 %v21885_v6  ;;  %13134 = vmatprep.subr.bf16.mxu0 %v21890_v7  ;;  %v21939_v6 = vld [vmem:[#allocation2 + $0x29f8] ss:$40 sps:$4 sm:$0xff]   ;;  %v21944_v7 = vld [vmem:[#allocation2 + $0x2a44] ss:$40 sps:$4 sm:$0xff]  }
 0x5ae   :  { %13626 = vmatprep.subr.bf16.mxu1 %v21893_v8  ;;  %v21947_v8 = vld [vmem:[#allocation2 + $0x2a4c] ss:$40 sps:$4 sm:$0xff]  }
 0x5b0   :  { %13135 = vmatpush1.bf16.msra.mxu0 %v21888_v12  ;;  %v21942_v12 = vld [vmem:[#allocation2 + $0x2a40] ss:$40 sps:$4 sm:$0xff]  }
 0x5b1   :  { %13627 = vmatpush1.bf16.msra.mxu1 %v21891_v14  ;;  %13136 = vmatprep.subr.bf16.mxu0 %v21896_v16  ;;  %v21945_v14 = vld [vmem:[#allocation2 + $0x2a48] ss:$40 sps:$4 sm:$0xff]   ;;  %v21950_v16 = vld [vmem:[#allocation2 + $0x2a94] ss:$40 sps:$4 sm:$0xff]  }
 0x5b2   :  { %13628 = vmatprep.subr.bf16.mxu1 %v21899_v17  ;;  %v21953_v17 = vld [vmem:[#allocation2 + $0x2a9c] ss:$40 sps:$4 sm:$0xff]  }
 0x5b4   :  { %13137 = vmatpush1.bf16.msra.mxu0 %v21894_v56  ;;  %v21948_v56 = vld [vmem:[#allocation2 + $0x2a90] ss:$40 sps:$4 sm:$0xff]  }
 0x5b5   :  { %13629 = vmatpush1.bf16.msra.mxu1 %v21897_v19  ;;  %13147 = vmatprep.subr.bf16.mxu0 %v21902_v22  ;;  %v21951_v19 = vld [vmem:[#allocation2 + $0x2a98] ss:$40 sps:$4 sm:$0xff]   ;;  %v21956_v22 = vld [vmem:[#allocation2 + $0x2ae4] ss:$40 sps:$4 sm:$0xff]  }
 0x5b6   :  { %13639 = vmatprep.subr.bf16.mxu1 %v21905_v23  ;;  %v21959_v23 = vld [vmem:[#allocation2 + $0x2aec] ss:$40 sps:$4 sm:$0xff]  }
 0x5b7   :  { %13139 = vmatmul.mubr.bf16.vlgmr.msra.gmra.mrb[4].mxu0 %v23959_v36 }
 0x5b8   :  { %13631 = vmatmul.mubr.bf16.vlgmr.msra.gmra.mrb[4].mxu1 %v23959_v36  ;;  %13148 = vmatpush1.bf16.msra.mxu0 %v21900_v13  ;;  %v21954_v13 = vld [vmem:[#allocation2 + $0x2ae0] ss:$40 sps:$4 sm:$0xff]  }
 0x5b9   :  { %13640 = vmatpush1.bf16.msra.mxu1 %v21903_v25  ;;  %13149 = vmatprep.subr.bf16.mxu0 %v21908_v26  ;;  %v21957_v25 = vld [vmem:[#allocation2 + $0x2ae8] ss:$40 sps:$4 sm:$0xff]   ;;  %v21962_v26 = vld [vmem:[#allocation2 + $0x2b34] ss:$40 sps:$4 sm:$0xff]  }
 0x5ba   :  { %13641 = vmatprep.subr.bf16.mxu1 %v21911_v27  ;;  %13179 = vmatprep.mubr.bf16.mxu0 %v23963_v43  ;;  %v21965_v27 = vld [vmem:[#allocation2 + $0x2b3c] ss:$40 sps:$4 sm:$0xff]  }
 0x5bb   :  { %13671 = vmatprep.mubr.bf16.mxu1 %v23963_v43 }
 0x5bc   :  { %13150 = vmatpush1.bf16.msra.mxu0 %v21906_v33  ;;  %v21960_v33 = vld [vmem:[#allocation2 + $0x2b30] ss:$40 sps:$4 sm:$0xff]  }
 0x5bd   :  { %13642 = vmatpush1.bf16.msra.mxu1 %v21909_v34  ;;  %13151 = vmatprep.subr.bf16.mxu0 %v21914_v60  ;;  %v21963_v34 = vld [vmem:[#allocation2 + $0x2b38] ss:$40 sps:$4 sm:$0xff]   ;;  %v21968_v60 = vld [vmem:[#allocation2 + $0x2b84] ss:$40 sps:$4 sm:$0xff]  }
 0x5be   :  { %13643 = vmatprep.subr.bf16.mxu1 %v21917_v38  ;;  %v21971_v38 = vld [vmem:[#allocation2 + $0x2b8c] ss:$40 sps:$4 sm:$0xff]  }
 0x5c0   :  { %13152 = vmatpush1.bf16.msra.mxu0 %v21912_v40  ;;  %v21966_v40 = vld [vmem:[#allocation2 + $0x2b80] ss:$40 sps:$4 sm:$0xff]  }
 0x5c1   :  { %13644 = vmatpush1.bf16.msra.mxu1 %v21915_v9  ;;  %13153 = vmatprep.subr.bf16.mxu0 %v21920_v44  ;;  %v21969_v9 = vld [vmem:[#allocation2 + $0x2b88] ss:$40 sps:$4 sm:$0xff]   ;;  %v21974_v44 = vld [vmem:[#allocation2 + $0x2bd4] ss:$40 sps:$4 sm:$0xff]  }
 0x5c2   :  { %13645 = vmatprep.subr.bf16.mxu1 %v21923_v45  ;;  %v21977_v45 = vld [vmem:[#allocation2 + $0x2bdc] ss:$40 sps:$4 sm:$0xff]  }
 0x5c4   :  { %13154 = vmatpush1.bf16.msra.mxu0 %v21918_v46  ;;  %v21972_v46 = vld [vmem:[#allocation2 + $0x2bd0] ss:$40 sps:$4 sm:$0xff]  }
 0x5c5   :  { %13646 = vmatpush1.bf16.msra.mxu1 %v21921_v31  ;;  %13155 = vmatprep.subr.bf16.mxu0 %v21926_v41  ;;  %v21975_v31 = vld [vmem:[#allocation2 + $0x2bd8] ss:$40 sps:$4 sm:$0xff]   ;;  %v21980_v41 = vld [vmem:[#allocation2 + $0x2c24] ss:$40 sps:$4 sm:$0xff]  }
 0x5c6   :  { %13647 = vmatprep.subr.bf16.mxu1 %v21929_v49  ;;  %v21983_v49 = vld [vmem:[#allocation2 + $0x2c2c] ss:$40 sps:$4 sm:$0xff]  }
 0x5c8   :  { %13156 = vmatpush1.bf16.msra.mxu0 %v21924_v50  ;;  %v21978_v50 = vld [vmem:[#allocation2 + $0x2c20] ss:$40 sps:$4 sm:$0xff]  }
 0x5c9   :  { %13648 = vmatpush1.bf16.msra.mxu1 %v21927_v51  ;;  %13157 = vmatprep.subr.bf16.mxu0 %v21932_v52  ;;  %v21981_v51 = vld [vmem:[#allocation2 + $0x2c28] ss:$40 sps:$4 sm:$0xff]   ;;  %v21986_v52 = vld [vmem:[#allocation2 + $0x2c74] ss:$40 sps:$4 sm:$0xff]  }
 0x5ca   :  { %13649 = vmatprep.subr.bf16.mxu1 %v21935_v53  ;;  %v21989_v53 = vld [vmem:[#allocation2 + $0x2c7c] ss:$40 sps:$4 sm:$0xff]  }
 0x5cc   :  { %13158 = vmatpush1.bf16.msra.mxu0 %v21930_v54  ;;  %v21984_v54 = vld [vmem:[#allocation2 + $0x2c70] ss:$40 sps:$4 sm:$0xff]  }
 0x5cd   :  { %13650 = vmatpush1.bf16.msra.mxu1 %v21933_v55  ;;  %13159 = vmatprep.subr.bf16.mxu0 %v21938_v58  ;;  %v21987_v55 = vld [vmem:[#allocation2 + $0x2c78] ss:$40 sps:$4 sm:$0xff]   ;;  %v21992_v58 = vld [vmem:[#allocation2 + $0x2cc4] ss:$40 sps:$4 sm:$0xff]  }
 0x5ce   :  { %13651 = vmatprep.subr.bf16.mxu1 %v21941_v59  ;;  %v21995_v59 = vld [vmem:[#allocation2 + $0x2ccc] ss:$40 sps:$4 sm:$0xff]  }
 0x5d0   :  { %13160 = vmatpush1.bf16.msra.mxu0 %v21936_v32  ;;  %v21990_v32 = vld [vmem:[#allocation2 + $0x2cc0] ss:$40 sps:$4 sm:$0xff]  }
 0x5d1   :  { %13652 = vmatpush1.bf16.msra.mxu1 %v21939_v6  ;;  %13161 = vmatprep.subr.bf16.mxu0 %v21944_v7  ;;  %v21993_v6 = vld [vmem:[#allocation2 + $0x2cc8] ss:$40 sps:$4 sm:$0xff]   ;;  %v21998_v7 = vld [vmem:[#allocation2 + $0x2d14] ss:$40 sps:$4 sm:$0xff]  }
 0x5d2   :  { %13653 = vmatprep.subr.bf16.mxu1 %v21947_v8  ;;  %v22001_v8 = vld [vmem:[#allocation2 + $0x2d1c] ss:$40 sps:$4 sm:$0xff]  }
 0x5d4   :  { %13162 = vmatpush1.bf16.msra.mxu0 %v21942_v12  ;;  %v21996_v12 = vld [vmem:[#allocation2 + $0x2d10] ss:$40 sps:$4 sm:$0xff]  }
 0x5d5   :  { %13654 = vmatpush1.bf16.msra.mxu1 %v21945_v14  ;;  %13163 = vmatprep.subr.bf16.mxu0 %v21950_v16  ;;  %v21999_v14 = vld [vmem:[#allocation2 + $0x2d18] ss:$40 sps:$4 sm:$0xff]   ;;  %v22004_v16 = vld [vmem:[#allocation2 + $0x2d64] ss:$40 sps:$4 sm:$0xff]  }
 0x5d6   :  { %13655 = vmatprep.subr.bf16.mxu1 %v21953_v17  ;;  %v22007_v17 = vld [vmem:[#allocation2 + $0x2d6c] ss:$40 sps:$4 sm:$0xff]  }
 0x5d8   :  { %13164 = vmatpush1.bf16.msra.mxu0 %v21948_v56  ;;  %v22002_v56 = vld [vmem:[#allocation2 + $0x2d60] ss:$40 sps:$4 sm:$0xff]  }
 0x5d9   :  { %13656 = vmatpush1.bf16.msra.mxu1 %v21951_v19  ;;  %13165 = vmatprep.subr.bf16.mxu0 %v21956_v22  ;;  %v22005_v19 = vld [vmem:[#allocation2 + $0x2d68] ss:$40 sps:$4 sm:$0xff]   ;;  %v22010_v22 = vld [vmem:[#allocation2 + $0x2db4] ss:$40 sps:$4 sm:$0xff]  }
 0x5da   :  { %13657 = vmatprep.subr.bf16.mxu1 %v21959_v23  ;;  %v22013_v23 = vld [vmem:[#allocation2 + $0x2dbc] ss:$40 sps:$4 sm:$0xff]  }
 0x5dc   :  { %13166 = vmatpush1.bf16.msra.mxu0 %v21954_v13  ;;  %v22008_v13 = vld [vmem:[#allocation2 + $0x2db0] ss:$40 sps:$4 sm:$0xff]  }
 0x5dd   :  { %13658 = vmatpush1.bf16.msra.mxu1 %v21957_v25  ;;  %13167 = vmatprep.subr.bf16.mxu0 %v21962_v26  ;;  %v22011_v25 = vld [vmem:[#allocation2 + $0x2db8] ss:$40 sps:$4 sm:$0xff]   ;;  %v22016_v26 = vld [vmem:[#allocation2 + $0x2e04] ss:$40 sps:$4 sm:$0xff]  }
 0x5de   :  { %13659 = vmatprep.subr.bf16.mxu1 %v21965_v27  ;;  %v22019_v27 = vld [vmem:[#allocation2 + $0x2e0c] ss:$40 sps:$4 sm:$0xff]  }
 0x5e0   :  { %13168 = vmatpush1.bf16.msra.mxu0 %v21960_v33  ;;  %v22014_v33 = vld [vmem:[#allocation2 + $0x2e00] ss:$40 sps:$4 sm:$0xff]  }
 0x5e1   :  { %13660 = vmatpush1.bf16.msra.mxu1 %v21963_v34  ;;  %13169 = vmatprep.subr.bf16.mxu0 %v21968_v60  ;;  %v22017_v34 = vld [vmem:[#allocation2 + $0x2e08] ss:$40 sps:$4 sm:$0xff]   ;;  %v22022_v60 = vld [vmem:[#allocation2 + $0x2e54] ss:$40 sps:$4 sm:$0xff]  }
 0x5e2   :  { %13661 = vmatprep.subr.bf16.mxu1 %v21971_v38  ;;  %v22025_v38 = vld [vmem:[#allocation2 + $0x2e5c] ss:$40 sps:$4 sm:$0xff]  }
 0x5e4   :  { %13170 = vmatpush1.bf16.msra.mxu0 %v21966_v40  ;;  %v22020_v40 = vld [vmem:[#allocation2 + $0x2e50] ss:$40 sps:$4 sm:$0xff]  }
 0x5e5   :  { %13662 = vmatpush1.bf16.msra.mxu1 %v21969_v9  ;;  %13171 = vmatprep.subr.bf16.mxu0 %v21974_v44  ;;  %v22023_v9 = vld [vmem:[#allocation2 + $0x2e58] ss:$40 sps:$4 sm:$0xff]   ;;  %v22028_v44 = vld [vmem:[#allocation2 + $0x2ea4] ss:$40 sps:$4 sm:$0xff]  }
 0x5e6   :  { %13663 = vmatprep.subr.bf16.mxu1 %v21977_v45  ;;  %v22031_v45 = vld [vmem:[#allocation2 + $0x2eac] ss:$40 sps:$4 sm:$0xff]  }
 0x5e8   :  { %13172 = vmatpush1.bf16.msra.mxu0 %v21972_v46  ;;  %v22026_v46 = vld [vmem:[#allocation2 + $0x2ea0] ss:$40 sps:$4 sm:$0xff]  }
 0x5e9   :  { %13664 = vmatpush1.bf16.msra.mxu1 %v21975_v31  ;;  %13173 = vmatprep.subr.bf16.mxu0 %v21980_v41  ;;  %v22029_v31 = vld [vmem:[#allocation2 + $0x2ea8] ss:$40 sps:$4 sm:$0xff]   ;;  %v22034_v41 = vld [vmem:[#allocation2 + $0x2ef4] ss:$40 sps:$4 sm:$0xff]  }
 0x5ea   :  { %13665 = vmatprep.subr.bf16.mxu1 %v21983_v49  ;;  %v22037_v49 = vld [vmem:[#allocation2 + $0x2efc] ss:$40 sps:$4 sm:$0xff]  }
 0x5ec   :  { %13174 = vmatpush1.bf16.msra.mxu0 %v21978_v50  ;;  %v22032_v50 = vld [vmem:[#allocation2 + $0x2ef0] ss:$40 sps:$4 sm:$0xff]  }
 0x5ed   :  { %13666 = vmatpush1.bf16.msra.mxu1 %v21981_v51  ;;  %13175 = vmatprep.subr.bf16.mxu0 %v21986_v52  ;;  %v22035_v51 = vld [vmem:[#allocation2 + $0x2ef8] ss:$40 sps:$4 sm:$0xff]   ;;  %v22040_v52 = vld [vmem:[#allocation2 + $0x2f44] ss:$40 sps:$4 sm:$0xff]  }
 0x5ee   :  { %13667 = vmatprep.subr.bf16.mxu1 %v21989_v53  ;;  %v22043_v53 = vld [vmem:[#allocation2 + $0x2f4c] ss:$40 sps:$4 sm:$0xff]  }
 0x5f0   :  { %13176 = vmatpush1.bf16.msra.mxu0 %v21984_v54  ;;  %v22038_v54 = vld [vmem:[#allocation2 + $0x2f40] ss:$40 sps:$4 sm:$0xff]  }
 0x5f1   :  { %13668 = vmatpush1.bf16.msra.mxu1 %v21987_v55  ;;  %13177 = vmatprep.subr.bf16.mxu0 %v21992_v58  ;;  %v22041_v55 = vld [vmem:[#allocation2 + $0x2f48] ss:$40 sps:$4 sm:$0xff]   ;;  %v22046_v58 = vld [vmem:[#allocation2 + $0x2f94] ss:$40 sps:$4 sm:$0xff]  }
 0x5f2   :  { %13669 = vmatprep.subr.bf16.mxu1 %v21995_v59  ;;  %v22049_v59 = vld [vmem:[#allocation2 + $0x2f9c] ss:$40 sps:$4 sm:$0xff]  }
 0x5f4   :  { %13178 = vmatpush1.bf16.msra.mxu0 %v21990_v32  ;;  %v22044_v32 = vld [vmem:[#allocation2 + $0x2f90] ss:$40 sps:$4 sm:$0xff]  }
 0x5f5   :  { %13670 = vmatpush1.bf16.msra.mxu1 %v21993_v6  ;;  %13188 = vmatprep.subr.bf16.mxu0 %v21998_v7  ;;  %v22047_v6 = vld [vmem:[#allocation2 + $0x2f98] ss:$40 sps:$4 sm:$0xff]   ;;  %v22052_v7 = vld [vmem:[#allocation2 + $0x2fe4] ss:$40 sps:$4 sm:$0xff]  }
 0x5f6   :  { %13680 = vmatprep.subr.bf16.mxu1 %v22001_v8  ;;  %v22055_v8 = vld [vmem:[#allocation2 + $0x2fec] ss:$40 sps:$4 sm:$0xff]  }
 0x5f7   :  { %13180 = vmatmul.mubr.bf16.vlgmr.msra.gmra.mrb[4].mxu0 %v23976_v61 }
 0x5f8   :  { %13672 = vmatmul.mubr.bf16.vlgmr.msra.gmra.mrb[4].mxu1 %v23976_v61  ;;  %13189 = vmatpush1.bf16.msra.mxu0 %v21996_v12  ;;  %v22050_v12 = vld [vmem:[#allocation2 + $0x2fe0] ss:$40 sps:$4 sm:$0xff]  }
 0x5f9   :  { %13681 = vmatpush1.bf16.msra.mxu1 %v21999_v14  ;;  %13190 = vmatprep.subr.bf16.mxu0 %v22004_v16  ;;  %v22053_v14 = vld [vmem:[#allocation2 + $0x2fe8] ss:$40 sps:$4 sm:$0xff]   ;;  %v22058_v16 = vld [vmem:[#allocation2 + $0x3034] ss:$40 sps:$4 sm:$0xff]  }
 0x5fa   :  { %13682 = vmatprep.subr.bf16.mxu1 %v22007_v17  ;;  %13220 = vmatprep.mubr.bf16.mxu0 %v23980_v2  ;;  %v22061_v17 = vld [vmem:[#allocation2 + $0x303c] ss:$40 sps:$4 sm:$0xff]  }
 0x5fb   :  { %13712 = vmatprep.mubr.bf16.mxu1 %v23980_v2 }
 0x5fc   :  { %13191 = vmatpush1.bf16.msra.mxu0 %v22002_v56  ;;  %v22056_v56 = vld [vmem:[#allocation2 + $0x3030] ss:$40 sps:$4 sm:$0xff]  }
 0x5fd   :  { %13683 = vmatpush1.bf16.msra.mxu1 %v22005_v19  ;;  %13192 = vmatprep.subr.bf16.mxu0 %v22010_v22  ;;  %v22059_v19 = vld [vmem:[#allocation2 + $0x3038] ss:$40 sps:$4 sm:$0xff]   ;;  %v22064_v22 = vld [vmem:[#allocation2 + $0x3084] ss:$40 sps:$4 sm:$0xff]  }
 0x5fe   :  { %13684 = vmatprep.subr.bf16.mxu1 %v22013_v23  ;;  %v22067_v23 = vld [vmem:[#allocation2 + $0x308c] ss:$40 sps:$4 sm:$0xff]  }
 0x600   :  { %13193 = vmatpush1.bf16.msra.mxu0 %v22008_v13  ;;  %v22062_v13 = vld [vmem:[#allocation2 + $0x3080] ss:$40 sps:$4 sm:$0xff]  }
 0x601   :  { %13685 = vmatpush1.bf16.msra.mxu1 %v22011_v25  ;;  %13194 = vmatprep.subr.bf16.mxu0 %v22016_v26  ;;  %v22065_v25 = vld [vmem:[#allocation2 + $0x3088] ss:$40 sps:$4 sm:$0xff]   ;;  %v22070_v26 = vld [vmem:[#allocation2 + $0x30d4] ss:$40 sps:$4 sm:$0xff]  }
 0x602   :  { %13686 = vmatprep.subr.bf16.mxu1 %v22019_v27  ;;  %v22073_v27 = vld [vmem:[#allocation2 + $0x30dc] ss:$40 sps:$4 sm:$0xff]  }
 0x604   :  { %13195 = vmatpush1.bf16.msra.mxu0 %v22014_v33  ;;  %v22068_v33 = vld [vmem:[#allocation2 + $0x30d0] ss:$40 sps:$4 sm:$0xff]  }
 0x605   :  { %13687 = vmatpush1.bf16.msra.mxu1 %v22017_v34  ;;  %13196 = vmatprep.subr.bf16.mxu0 %v22022_v60  ;;  %v22071_v34 = vld [vmem:[#allocation2 + $0x30d8] ss:$40 sps:$4 sm:$0xff]   ;;  %v22076_v60 = vld [vmem:[#allocation2 + $0x3124] ss:$40 sps:$4 sm:$0xff]  }
 0x606   :  { %13688 = vmatprep.subr.bf16.mxu1 %v22025_v38  ;;  %v22079_v38 = vld [vmem:[#allocation2 + $0x312c] ss:$40 sps:$4 sm:$0xff]  }
 0x608   :  { %13197 = vmatpush1.bf16.msra.mxu0 %v22020_v40  ;;  %v22074_v40 = vld [vmem:[#allocation2 + $0x3120] ss:$40 sps:$4 sm:$0xff]  }
 0x609   :  { %13689 = vmatpush1.bf16.msra.mxu1 %v22023_v9  ;;  %13198 = vmatprep.subr.bf16.mxu0 %v22028_v44  ;;  %v22077_v9 = vld [vmem:[#allocation2 + $0x3128] ss:$40 sps:$4 sm:$0xff]   ;;  %v22082_v44 = vld [vmem:[#allocation2 + $0x3174] ss:$40 sps:$4 sm:$0xff]  }
 0x60a   :  { %13690 = vmatprep.subr.bf16.mxu1 %v22031_v45  ;;  %v22085_v45 = vld [vmem:[#allocation2 + $0x317c] ss:$40 sps:$4 sm:$0xff]  }
 0x60c   :  { %13199 = vmatpush1.bf16.msra.mxu0 %v22026_v46  ;;  %v22080_v46 = vld [vmem:[#allocation2 + $0x3170] ss:$40 sps:$4 sm:$0xff]  }
 0x60d   :  { %13691 = vmatpush1.bf16.msra.mxu1 %v22029_v31  ;;  %13200 = vmatprep.subr.bf16.mxu0 %v22034_v41  ;;  %v22083_v31 = vld [vmem:[#allocation2 + $0x3178] ss:$40 sps:$4 sm:$0xff]   ;;  %v22088_v41 = vld [vmem:[#allocation2 + $0x31c4] ss:$40 sps:$4 sm:$0xff]  }
 0x60e   :  { %13692 = vmatprep.subr.bf16.mxu1 %v22037_v49  ;;  %v22091_v49 = vld [vmem:[#allocation2 + $0x31cc] ss:$40 sps:$4 sm:$0xff]  }
 0x610   :  { %13201 = vmatpush1.bf16.msra.mxu0 %v22032_v50  ;;  %v22086_v50 = vld [vmem:[#allocation2 + $0x31c0] ss:$40 sps:$4 sm:$0xff]  }
 0x611   :  { %13693 = vmatpush1.bf16.msra.mxu1 %v22035_v51  ;;  %13202 = vmatprep.subr.bf16.mxu0 %v22040_v52  ;;  %v22089_v51 = vld [vmem:[#allocation2 + $0x31c8] ss:$40 sps:$4 sm:$0xff]   ;;  %v22094_v52 = vld [vmem:[#allocation2 + $0x3214] ss:$40 sps:$4 sm:$0xff]  }
 0x612   :  { %13694 = vmatprep.subr.bf16.mxu1 %v22043_v53  ;;  %v22097_v53 = vld [vmem:[#allocation2 + $0x321c] ss:$40 sps:$4 sm:$0xff]  }
 0x614   :  { %13203 = vmatpush1.bf16.msra.mxu0 %v22038_v54  ;;  %v22092_v54 = vld [vmem:[#allocation2 + $0x3210] ss:$40 sps:$4 sm:$0xff]  }
 0x615   :  { %13695 = vmatpush1.bf16.msra.mxu1 %v22041_v55  ;;  %13204 = vmatprep.subr.bf16.mxu0 %v22046_v58  ;;  %v22095_v55 = vld [vmem:[#allocation2 + $0x3218] ss:$40 sps:$4 sm:$0xff]   ;;  %v22100_v58 = vld [vmem:[#allocation2 + $0x3264] ss:$40 sps:$4 sm:$0xff]  }
 0x616   :  { %13696 = vmatprep.subr.bf16.mxu1 %v22049_v59  ;;  %v22103_v59 = vld [vmem:[#allocation2 + $0x326c] ss:$40 sps:$4 sm:$0xff]  }
 0x618   :  { %13205 = vmatpush1.bf16.msra.mxu0 %v22044_v32  ;;  %v22098_v32 = vld [vmem:[#allocation2 + $0x3260] ss:$40 sps:$4 sm:$0xff]  }
 0x619   :  { %13697 = vmatpush1.bf16.msra.mxu1 %v22047_v6  ;;  %13206 = vmatprep.subr.bf16.mxu0 %v22052_v7  ;;  %v22101_v6 = vld [vmem:[#allocation2 + $0x3268] ss:$40 sps:$4 sm:$0xff]   ;;  %v22106_v7 = vld [vmem:[#allocation2 + $0x32b4] ss:$40 sps:$4 sm:$0xff]  }
 0x61a   :  { %13698 = vmatprep.subr.bf16.mxu1 %v22055_v8  ;;  %v22109_v8 = vld [vmem:[#allocation2 + $0x32bc] ss:$40 sps:$4 sm:$0xff]  }
 0x61c   :  { %13207 = vmatpush1.bf16.msra.mxu0 %v22050_v12  ;;  %v22104_v12 = vld [vmem:[#allocation2 + $0x32b0] ss:$40 sps:$4 sm:$0xff]  }
 0x61d   :  { %13699 = vmatpush1.bf16.msra.mxu1 %v22053_v14  ;;  %13208 = vmatprep.subr.bf16.mxu0 %v22058_v16  ;;  %v22107_v14 = vld [vmem:[#allocation2 + $0x32b8] ss:$40 sps:$4 sm:$0xff]   ;;  %v22112_v16 = vld [vmem:[#allocation2 + $0x3304] ss:$40 sps:$4 sm:$0xff]  }
 0x61e   :  { %13700 = vmatprep.subr.bf16.mxu1 %v22061_v17  ;;  %v22115_v17 = vld [vmem:[#allocation2 + $0x330c] ss:$40 sps:$4 sm:$0xff]  }
 0x620   :  { %13209 = vmatpush1.bf16.msra.mxu0 %v22056_v56  ;;  %v22110_v56 = vld [vmem:[#allocation2 + $0x3300] ss:$40 sps:$4 sm:$0xff]  }
 0x621   :  { %13701 = vmatpush1.bf16.msra.mxu1 %v22059_v19  ;;  %13210 = vmatprep.subr.bf16.mxu0 %v22064_v22  ;;  %v22113_v19 = vld [vmem:[#allocation2 + $0x3308] ss:$40 sps:$4 sm:$0xff]   ;;  %v22118_v22 = vld [vmem:[#allocation2 + $0x3354] ss:$40 sps:$4 sm:$0xff]  }
 0x622   :  { %13702 = vmatprep.subr.bf16.mxu1 %v22067_v23  ;;  %v22121_v23 = vld [vmem:[#allocation2 + $0x335c] ss:$40 sps:$4 sm:$0xff]  }
 0x624   :  { %13211 = vmatpush1.bf16.msra.mxu0 %v22062_v13  ;;  %v22116_v13 = vld [vmem:[#allocation2 + $0x3350] ss:$40 sps:$4 sm:$0xff]  }
 0x625   :  { %13703 = vmatpush1.bf16.msra.mxu1 %v22065_v25  ;;  %13212 = vmatprep.subr.bf16.mxu0 %v22070_v26  ;;  %v22119_v25 = vld [vmem:[#allocation2 + $0x3358] ss:$40 sps:$4 sm:$0xff]   ;;  %v22124_v26 = vld [vmem:[#allocation2 + $0x33a4] ss:$40 sps:$4 sm:$0xff]  }
 0x626   :  { %13704 = vmatprep.subr.bf16.mxu1 %v22073_v27  ;;  %v22127_v27 = vld [vmem:[#allocation2 + $0x33ac] ss:$40 sps:$4 sm:$0xff]  }
 0x628   :  { %13213 = vmatpush1.bf16.msra.mxu0 %v22068_v33  ;;  %v22122_v33 = vld [vmem:[#allocation2 + $0x33a0] ss:$40 sps:$4 sm:$0xff]  }
 0x629   :  { %13705 = vmatpush1.bf16.msra.mxu1 %v22071_v34  ;;  %13214 = vmatprep.subr.bf16.mxu0 %v22076_v60  ;;  %v22125_v34 = vld [vmem:[#allocation2 + $0x33a8] ss:$40 sps:$4 sm:$0xff]   ;;  %v22130_v60 = vld [vmem:[#allocation2 + $0x33f4] ss:$40 sps:$4 sm:$0xff]  }
 0x62a   :  { %13706 = vmatprep.subr.bf16.mxu1 %v22079_v38  ;;  %v22133_v38 = vld [vmem:[#allocation2 + $0x33fc] ss:$40 sps:$4 sm:$0xff]  }
 0x62c   :  { %13215 = vmatpush1.bf16.msra.mxu0 %v22074_v40  ;;  %v22128_v40 = vld [vmem:[#allocation2 + $0x33f0] ss:$40 sps:$4 sm:$0xff]  }
 0x62d   :  { %13707 = vmatpush1.bf16.msra.mxu1 %v22077_v9  ;;  %13216 = vmatprep.subr.bf16.mxu0 %v22082_v44  ;;  %v22131_v9 = vld [vmem:[#allocation2 + $0x33f8] ss:$40 sps:$4 sm:$0xff]   ;;  %v22136_v44 = vld [vmem:[#allocation2 + $0x3444] ss:$40 sps:$4 sm:$0xff]  }
 0x62e   :  { %13708 = vmatprep.subr.bf16.mxu1 %v22085_v45  ;;  %v22139_v45 = vld [vmem:[#allocation2 + $0x344c] ss:$40 sps:$4 sm:$0xff]  }
 0x630   :  { %13217 = vmatpush1.bf16.msra.mxu0 %v22080_v46  ;;  %v22134_v46 = vld [vmem:[#allocation2 + $0x3440] ss:$40 sps:$4 sm:$0xff]  }
 0x631   :  { %13709 = vmatpush1.bf16.msra.mxu1 %v22083_v31  ;;  %13218 = vmatprep.subr.bf16.mxu0 %v22088_v41  ;;  %v22137_v31 = vld [vmem:[#allocation2 + $0x3448] ss:$40 sps:$4 sm:$0xff]   ;;  %v22142_v41 = vld [vmem:[#allocation2 + $0x3494] ss:$40 sps:$4 sm:$0xff]  }
 0x632   :  { %13710 = vmatprep.subr.bf16.mxu1 %v22091_v49  ;;  %v22145_v49 = vld [vmem:[#allocation2 + $0x349c] ss:$40 sps:$4 sm:$0xff]  }
 0x634   :  { %13219 = vmatpush1.bf16.msra.mxu0 %v22086_v50  ;;  %v22140_v50 = vld [vmem:[#allocation2 + $0x3490] ss:$40 sps:$4 sm:$0xff]  }
 0x635   :  { %13711 = vmatpush1.bf16.msra.mxu1 %v22089_v51  ;;  %13229 = vmatprep.subr.bf16.mxu0 %v22094_v52  ;;  %v22143_v51 = vld [vmem:[#allocation2 + $0x3498] ss:$40 sps:$4 sm:$0xff]   ;;  %v22148_v52 = vld [vmem:[#allocation2 + $0x34e4] ss:$40 sps:$4 sm:$0xff]  }
 0x636   :  { %13721 = vmatprep.subr.bf16.mxu1 %v22097_v53  ;;  %v22151_v53 = vld [vmem:[#allocation2 + $0x34ec] ss:$40 sps:$4 sm:$0xff]  }
 0x637   :  { %13221 = vmatmul.mubr.bf16.vlgmr.msra.gmra.mrb[4].mxu0 %v23988_v28 }
 0x638   :  { %13713 = vmatmul.mubr.bf16.vlgmr.msra.gmra.mrb[4].mxu1 %v23988_v28  ;;  %13230 = vmatpush1.bf16.msra.mxu0 %v22092_v54  ;;  %v22146_v54 = vld [vmem:[#allocation2 + $0x34e0] ss:$40 sps:$4 sm:$0xff]  }
 0x639   :  { %13722 = vmatpush1.bf16.msra.mxu1 %v22095_v55  ;;  %13231 = vmatprep.subr.bf16.mxu0 %v22100_v58  ;;  %v22149_v55 = vld [vmem:[#allocation2 + $0x34e8] ss:$40 sps:$4 sm:$0xff]   ;;  %v22154_v58 = vld [vmem:[#allocation2 + $0x3534] ss:$40 sps:$4 sm:$0xff]  }
 0x63a   :  { %13723 = vmatprep.subr.bf16.mxu1 %v22103_v59  ;;  %13261 = vmatprep.mubr.bf16.mxu0 %v23997_v37  ;;  %v22157_v59 = vld [vmem:[#allocation2 + $0x353c] ss:$40 sps:$4 sm:$0xff]  }
 0x63b   :  { %13753 = vmatprep.mubr.bf16.mxu1 %v23997_v37 }
 0x63c   :  { %13232 = vmatpush1.bf16.msra.mxu0 %v22098_v32  ;;  %v22152_v32 = vld [vmem:[#allocation2 + $0x3530] ss:$40 sps:$4 sm:$0xff]  }
 0x63d   :  { %13724 = vmatpush1.bf16.msra.mxu1 %v22101_v6  ;;  %13233 = vmatprep.subr.bf16.mxu0 %v22106_v7  ;;  %v22155_v6 = vld [vmem:[#allocation2 + $0x3538] ss:$40 sps:$4 sm:$0xff]   ;;  %v22160_v7 = vld [vmem:[#allocation2 + $0x3584] ss:$40 sps:$4 sm:$0xff]  }
 0x63e   :  { %13725 = vmatprep.subr.bf16.mxu1 %v22109_v8  ;;  %v22163_v8 = vld [vmem:[#allocation2 + $0x358c] ss:$40 sps:$4 sm:$0xff]  }
 0x640   :  { %13234 = vmatpush1.bf16.msra.mxu0 %v22104_v12  ;;  %v22158_v12 = vld [vmem:[#allocation2 + $0x3580] ss:$40 sps:$4 sm:$0xff]  }
 0x641   :  { %13726 = vmatpush1.bf16.msra.mxu1 %v22107_v14  ;;  %13235 = vmatprep.subr.bf16.mxu0 %v22112_v16  ;;  %v22161_v14 = vld [vmem:[#allocation2 + $0x3588] ss:$40 sps:$4 sm:$0xff]   ;;  %v22166_v16 = vld [vmem:[#allocation2 + $0x35d4] ss:$40 sps:$4 sm:$0xff]  }
 0x642   :  { %13727 = vmatprep.subr.bf16.mxu1 %v22115_v17  ;;  %v22169_v17 = vld [vmem:[#allocation2 + $0x35dc] ss:$40 sps:$4 sm:$0xff]  }
 0x644   :  { %13236 = vmatpush1.bf16.msra.mxu0 %v22110_v56  ;;  %v22164_v56 = vld [vmem:[#allocation2 + $0x35d0] ss:$40 sps:$4 sm:$0xff]  }
 0x645   :  { %13728 = vmatpush1.bf16.msra.mxu1 %v22113_v19  ;;  %13237 = vmatprep.subr.bf16.mxu0 %v22118_v22  ;;  %v22167_v19 = vld [vmem:[#allocation2 + $0x35d8] ss:$40 sps:$4 sm:$0xff]   ;;  %v22172_v22 = vld [vmem:[#allocation2 + $0x3624] ss:$40 sps:$4 sm:$0xff]  }
 0x646   :  { %13729 = vmatprep.subr.bf16.mxu1 %v22121_v23  ;;  %v22175_v23 = vld [vmem:[#allocation2 + $0x362c] ss:$40 sps:$4 sm:$0xff]  }
 0x648   :  { %13238 = vmatpush1.bf16.msra.mxu0 %v22116_v13  ;;  %v22170_v13 = vld [vmem:[#allocation2 + $0x3620] ss:$40 sps:$4 sm:$0xff]  }
 0x649   :  { %13730 = vmatpush1.bf16.msra.mxu1 %v22119_v25  ;;  %13239 = vmatprep.subr.bf16.mxu0 %v22124_v26  ;;  %v22173_v25 = vld [vmem:[#allocation2 + $0x3628] ss:$40 sps:$4 sm:$0xff]   ;;  %v22178_v26 = vld [vmem:[#allocation2 + $0x3674] ss:$40 sps:$4 sm:$0xff]  }
 0x64a   :  { %13731 = vmatprep.subr.bf16.mxu1 %v22127_v27  ;;  %v22181_v27 = vld [vmem:[#allocation2 + $0x367c] ss:$40 sps:$4 sm:$0xff]  }
 0x64c   :  { %13240 = vmatpush1.bf16.msra.mxu0 %v22122_v33  ;;  %v22176_v33 = vld [vmem:[#allocation2 + $0x3670] ss:$40 sps:$4 sm:$0xff]  }
 0x64d   :  { %13732 = vmatpush1.bf16.msra.mxu1 %v22125_v34  ;;  %13241 = vmatprep.subr.bf16.mxu0 %v22130_v60  ;;  %v22179_v34 = vld [vmem:[#allocation2 + $0x3678] ss:$40 sps:$4 sm:$0xff]   ;;  %v22184_v60 = vld [vmem:[#allocation2 + $0x36c4] ss:$40 sps:$4 sm:$0xff]  }
 0x64e   :  { %13733 = vmatprep.subr.bf16.mxu1 %v22133_v38  ;;  %v22187_v38 = vld [vmem:[#allocation2 + $0x36cc] ss:$40 sps:$4 sm:$0xff]  }
 0x650   :  { %13242 = vmatpush1.bf16.msra.mxu0 %v22128_v40  ;;  %v22182_v40 = vld [vmem:[#allocation2 + $0x36c0] ss:$40 sps:$4 sm:$0xff]  }
 0x651   :  { %13734 = vmatpush1.bf16.msra.mxu1 %v22131_v9  ;;  %13243 = vmatprep.subr.bf16.mxu0 %v22136_v44  ;;  %v22185_v9 = vld [vmem:[#allocation2 + $0x36c8] ss:$40 sps:$4 sm:$0xff]   ;;  %v22190_v44 = vld [vmem:[#allocation2 + $0x3714] ss:$40 sps:$4 sm:$0xff]  }
 0x652   :  { %13735 = vmatprep.subr.bf16.mxu1 %v22139_v45  ;;  %v22193_v45 = vld [vmem:[#allocation2 + $0x371c] ss:$40 sps:$4 sm:$0xff]  }
 0x654   :  { %13244 = vmatpush1.bf16.msra.mxu0 %v22134_v46  ;;  %v22188_v46 = vld [vmem:[#allocation2 + $0x3710] ss:$40 sps:$4 sm:$0xff]  }
 0x655   :  { %13736 = vmatpush1.bf16.msra.mxu1 %v22137_v31  ;;  %13245 = vmatprep.subr.bf16.mxu0 %v22142_v41  ;;  %v22191_v31 = vld [vmem:[#allocation2 + $0x3718] ss:$40 sps:$4 sm:$0xff]   ;;  %v22196_v41 = vld [vmem:[#allocation2 + $0x3764] ss:$40 sps:$4 sm:$0xff]  }
 0x656   :  { %13737 = vmatprep.subr.bf16.mxu1 %v22145_v49  ;;  %v22199_v49 = vld [vmem:[#allocation2 + $0x376c] ss:$40 sps:$4 sm:$0xff]  }
 0x658   :  { %13246 = vmatpush1.bf16.msra.mxu0 %v22140_v50  ;;  %v22194_v50 = vld [vmem:[#allocation2 + $0x3760] ss:$40 sps:$4 sm:$0xff]  }
 0x659   :  { %13738 = vmatpush1.bf16.msra.mxu1 %v22143_v51  ;;  %13247 = vmatprep.subr.bf16.mxu0 %v22148_v52  ;;  %v22197_v51 = vld [vmem:[#allocation2 + $0x3768] ss:$40 sps:$4 sm:$0xff]   ;;  %v22202_v52 = vld [vmem:[#allocation2 + $0x37b4] ss:$40 sps:$4 sm:$0xff]  }
 0x65a   :  { %13739 = vmatprep.subr.bf16.mxu1 %v22151_v53  ;;  %v22205_v53 = vld [vmem:[#allocation2 + $0x37bc] ss:$40 sps:$4 sm:$0xff]  }
 0x65c   :  { %13248 = vmatpush1.bf16.msra.mxu0 %v22146_v54  ;;  %v22200_v54 = vld [vmem:[#allocation2 + $0x37b0] ss:$40 sps:$4 sm:$0xff]  }
 0x65d   :  { %13740 = vmatpush1.bf16.msra.mxu1 %v22149_v55  ;;  %13249 = vmatprep.subr.bf16.mxu0 %v22154_v58  ;;  %v22203_v55 = vld [vmem:[#allocation2 + $0x37b8] ss:$40 sps:$4 sm:$0xff]   ;;  %v22208_v58 = vld [vmem:[#allocation2 + $0x3804] ss:$40 sps:$4 sm:$0xff]  }
 0x65e   :  { %13741 = vmatprep.subr.bf16.mxu1 %v22157_v59  ;;  %v22211_v59 = vld [vmem:[#allocation2 + $0x380c] ss:$40 sps:$4 sm:$0xff]  }
 0x660   :  { %13250 = vmatpush1.bf16.msra.mxu0 %v22152_v32  ;;  %v22206_v32 = vld [vmem:[#allocation2 + $0x3800] ss:$40 sps:$4 sm:$0xff]  }
 0x661   :  { %13742 = vmatpush1.bf16.msra.mxu1 %v22155_v6  ;;  %13251 = vmatprep.subr.bf16.mxu0 %v22160_v7  ;;  %v22209_v6 = vld [vmem:[#allocation2 + $0x3808] ss:$40 sps:$4 sm:$0xff]   ;;  %v22214_v7 = vld [vmem:[#allocation2 + $0x3854] ss:$40 sps:$4 sm:$0xff]  }
 0x662   :  { %13743 = vmatprep.subr.bf16.mxu1 %v22163_v8  ;;  %v22217_v8 = vld [vmem:[#allocation2 + $0x385c] ss:$40 sps:$4 sm:$0xff]  }
 0x664   :  { %13252 = vmatpush1.bf16.msra.mxu0 %v22158_v12  ;;  %v22212_v12 = vld [vmem:[#allocation2 + $0x3850] ss:$40 sps:$4 sm:$0xff]  }
 0x665   :  { %13744 = vmatpush1.bf16.msra.mxu1 %v22161_v14  ;;  %13253 = vmatprep.subr.bf16.mxu0 %v22166_v16  ;;  %v22215_v14 = vld [vmem:[#allocation2 + $0x3858] ss:$40 sps:$4 sm:$0xff]   ;;  %v22220_v16 = vld [vmem:[#allocation2 + $0x38a4] ss:$40 sps:$4 sm:$0xff]  }
 0x666   :  { %13745 = vmatprep.subr.bf16.mxu1 %v22169_v17  ;;  %v22223_v17 = vld [vmem:[#allocation2 + $0x38ac] ss:$40 sps:$4 sm:$0xff]  }
 0x668   :  { %13254 = vmatpush1.bf16.msra.mxu0 %v22164_v56  ;;  %v22218_v56 = vld [vmem:[#allocation2 + $0x38a0] ss:$40 sps:$4 sm:$0xff]  }
 0x669   :  { %13746 = vmatpush1.bf16.msra.mxu1 %v22167_v19  ;;  %13255 = vmatprep.subr.bf16.mxu0 %v22172_v22  ;;  %v22221_v19 = vld [vmem:[#allocation2 + $0x38a8] ss:$40 sps:$4 sm:$0xff]   ;;  %v22226_v22 = vld [vmem:[#allocation2 + $0x38f4] ss:$40 sps:$4 sm:$0xff]  }
 0x66a   :  { %13747 = vmatprep.subr.bf16.mxu1 %v22175_v23  ;;  %v22229_v23 = vld [vmem:[#allocation2 + $0x38fc] ss:$40 sps:$4 sm:$0xff]  }
 0x66c   :  { %13256 = vmatpush1.bf16.msra.mxu0 %v22170_v13  ;;  %v22224_v13 = vld [vmem:[#allocation2 + $0x38f0] ss:$40 sps:$4 sm:$0xff]  }
 0x66d   :  { %13748 = vmatpush1.bf16.msra.mxu1 %v22173_v25  ;;  %13257 = vmatprep.subr.bf16.mxu0 %v22178_v26  ;;  %v22227_v25 = vld [vmem:[#allocation2 + $0x38f8] ss:$40 sps:$4 sm:$0xff]   ;;  %v22232_v26 = vld [vmem:[#allocation2 + $0x3944] ss:$40 sps:$4 sm:$0xff]  }
 0x66e   :  { %13749 = vmatprep.subr.bf16.mxu1 %v22181_v27  ;;  %v22235_v27 = vld [vmem:[#allocation2 + $0x394c] ss:$40 sps:$4 sm:$0xff]  }
 0x670   :  { %13258 = vmatpush1.bf16.msra.mxu0 %v22176_v33  ;;  %v22230_v33 = vld [vmem:[#allocation2 + $0x3940] ss:$40 sps:$4 sm:$0xff]  }
 0x671   :  { %13750 = vmatpush1.bf16.msra.mxu1 %v22179_v34  ;;  %13259 = vmatprep.subr.bf16.mxu0 %v22184_v60  ;;  %v22233_v34 = vld [vmem:[#allocation2 + $0x3948] ss:$40 sps:$4 sm:$0xff]   ;;  %v22238_v60 = vld [vmem:[#allocation2 + $0x3994] ss:$40 sps:$4 sm:$0xff]  }
 0x672   :  { %13751 = vmatprep.subr.bf16.mxu1 %v22187_v38  ;;  %v22241_v38 = vld [vmem:[#allocation2 + $0x399c] ss:$40 sps:$4 sm:$0xff]  }
 0x674   :  { %13260 = vmatpush1.bf16.msra.mxu0 %v22182_v40  ;;  %v22236_v40 = vld [vmem:[#allocation2 + $0x3990] ss:$40 sps:$4 sm:$0xff]  }
 0x675   :  { %13752 = vmatpush1.bf16.msra.mxu1 %v22185_v9  ;;  %13270 = vmatprep.subr.bf16.mxu0 %v22190_v44  ;;  %v22239_v9 = vld [vmem:[#allocation2 + $0x3998] ss:$40 sps:$4 sm:$0xff]   ;;  %v22244_v44 = vld [vmem:[#allocation2 + $0x39e4] ss:$40 sps:$4 sm:$0xff]  }
 0x676   :  { %13762 = vmatprep.subr.bf16.mxu1 %v22193_v45  ;;  %v22247_v45 = vld [vmem:[#allocation2 + $0x39ec] ss:$40 sps:$4 sm:$0xff]  }
 0x677   :  { %13262 = vmatmul.mubr.bf16.vlgmr.msra.gmra.mrb[4].mxu0 %v24010_v63 }
 0x678   :  { %13754 = vmatmul.mubr.bf16.vlgmr.msra.gmra.mrb[4].mxu1 %v24010_v63  ;;  %13271 = vmatpush1.bf16.msra.mxu0 %v22188_v46  ;;  %v22242_v46 = vld [vmem:[#allocation2 + $0x39e0] ss:$40 sps:$4 sm:$0xff]  }
 0x679   :  { %13763 = vmatpush1.bf16.msra.mxu1 %v22191_v31  ;;  %13272 = vmatprep.subr.bf16.mxu0 %v22196_v41  ;;  %v22245_v31 = vld [vmem:[#allocation2 + $0x39e8] ss:$40 sps:$4 sm:$0xff]   ;;  %v22250_v41 = vld [vmem:[#allocation2 + $0x3a34] ss:$40 sps:$4 sm:$0xff]  }
 0x67a   :  { %13764 = vmatprep.subr.bf16.mxu1 %v22199_v49  ;;  %13302 = vmatprep.mubr.bf16.mxu0 %v24014_v4  ;;  %v22253_v49 = vld [vmem:[#allocation2 + $0x3a3c] ss:$40 sps:$4 sm:$0xff]  }
 0x67b   :  { %13794 = vmatprep.mubr.bf16.mxu1 %v24014_v4 }
 0x67c   :  { %13273 = vmatpush1.bf16.msra.mxu0 %v22194_v50  ;;  %v22248_v50 = vld [vmem:[#allocation2 + $0x3a30] ss:$40 sps:$4 sm:$0xff]  }
 0x67d   :  { %13765 = vmatpush1.bf16.msra.mxu1 %v22197_v51  ;;  %13274 = vmatprep.subr.bf16.mxu0 %v22202_v52  ;;  %v22251_v51 = vld [vmem:[#allocation2 + $0x3a38] ss:$40 sps:$4 sm:$0xff]   ;;  %v22256_v52 = vld [vmem:[#allocation2 + $0x3a84] ss:$40 sps:$4 sm:$0xff]  }
 0x67e   :  { %13766 = vmatprep.subr.bf16.mxu1 %v22205_v53  ;;  %v22259_v53 = vld [vmem:[#allocation2 + $0x3a8c] ss:$40 sps:$4 sm:$0xff]  }
 0x680   :  { %13275 = vmatpush1.bf16.msra.mxu0 %v22200_v54  ;;  %v2101_v54 = vlaneseq }
 0x681   :  { %13767 = vmatpush1.bf16.msra.mxu1 %v22203_v55  ;;  %13276 = vmatprep.subr.bf16.mxu0 %v22208_v58  ;;  %v22254_v55 = vld [vmem:[#allocation2 + $0x3a80] ss:$40 sps:$4 sm:$0xff]  }
 0x682   :  { %13768 = vmatprep.subr.bf16.mxu1 %v22211_v59  ;;  %v22257_v58 = vld [vmem:[#allocation2 + $0x3a88] ss:$40 sps:$4 sm:$0xff]   ;;  %v22262_v59 = vld [vmem:[#allocation2 + $0x3ad4] ss:$40 sps:$4 sm:$0xff]  }
 0x684   :  { %13277 = vmatpush1.bf16.msra.mxu0 %v22206_v32  ;;  %v22265_v32 = vld [vmem:[#allocation2 + $0x3adc] ss:$40 sps:$4 sm:$0xff]  }
 0x685   :  { %13769 = vmatpush1.bf16.msra.mxu1 %v22209_v6  ;;  %13278 = vmatprep.subr.bf16.mxu0 %v22214_v7  ;;  %v24080_v6 = vshrl.u32 %v2101_v54, 7  ;;  %v22260_v7 = vld [vmem:[#allocation2 + $0x3ad0] ss:$40 sps:$4 sm:$0xff]  }
 0x686   :  { %13770 = vmatprep.subr.bf16.mxu1 %v22217_v8  ;;  %v22263_v8 = vld [vmem:[#allocation2 + $0x3ad8] ss:$40 sps:$4 sm:$0xff]  }
 0x687   :  { %v22299_v54 = vld [vmem:[#allocation6 + $0x40] ss:$16 sps:$4 sm:$0xff]  }
 0x688   :  { %13279 = vmatpush1.bf16.msra.mxu0 %v22212_v12  ;;  %v22268_v12 = vld [vmem:[#allocation2 + $0x3b24] ss:$40 sps:$4 sm:$0xff]  }
 0x689   :  { %13771 = vmatpush1.bf16.msra.mxu1 %v22215_v14  ;;  %13280 = vmatprep.subr.bf16.mxu0 %v22220_v16  ;;  %v22271_v14 = vld [vmem:[#allocation2 + $0x3b2c] ss:$40 sps:$4 sm:$0xff]   ;;  %v24083_v16 = vsub.s32 1, %v24080_v6 }
 0x68a   :  { %13772 = vmatprep.subr.bf16.mxu1 %v22223_v17  ;;  %v24085_v17 = vld [vmem:[#allocation4] sm:$0xff] }
 0x68c   :  { %13281 = vmatpush1.bf16.msra.mxu0 %v22218_v56  ;;  %v22266_v56 = vld [vmem:[#allocation2 + $0x3b20] ss:$40 sps:$4 sm:$0xff]  }
 0x68d   :  { %13773 = vmatpush1.bf16.msra.mxu1 %v22221_v19  ;;  %13282 = vmatprep.subr.bf16.mxu0 %v22226_v22  ;;  %v22269_v19 = vld [vmem:[#allocation2 + $0x3b28] ss:$40 sps:$4 sm:$0xff]   ;;  %v22274_v22 = vld [vmem:[#allocation2 + $0x3b74] ss:$40 sps:$4 sm:$0xff]  }
 0x68e   :  { %13774 = vmatprep.subr.bf16.mxu1 %v22229_v23  ;;  %v22277_v23 = vld [vmem:[#allocation2 + $0x3b7c] ss:$40 sps:$4 sm:$0xff]  }
 0x690   :  { %13283 = vmatpush1.bf16.msra.mxu0 %v22224_v13  ;;  %v2108_v13 = vrot.slane %v24085_v17, %v24083_v16 }
 0x691   :  { %13775 = vmatpush1.bf16.msra.mxu1 %v22227_v25  ;;  %13284 = vmatprep.subr.bf16.mxu0 %v22232_v26  ;;  %v22272_v25 = vld [vmem:[#allocation2 + $0x3b70] ss:$40 sps:$4 sm:$0xff]  }
 0x692   :  { %13776 = vmatprep.subr.bf16.mxu1 %v22235_v27  ;;  %v22275_v26 = vld [vmem:[#allocation2 + $0x3b78] ss:$40 sps:$4 sm:$0xff]   ;;  %v22280_v27 = vld [vmem:[#allocation2 + $0x3bc4] ss:$40 sps:$4 sm:$0xff]  }
 0x694   :  { %13285 = vmatpush1.bf16.msra.mxu0 %v22230_v33  ;;  %v22283_v33 = vld [vmem:[#allocation2 + $0x3bcc] ss:$40 sps:$4 sm:$0xff]  }
 0x695   :  { %13777 = vmatpush1.bf16.msra.mxu1 %v22233_v34  ;;  %13286 = vmatprep.subr.bf16.mxu0 %v22238_v60  ;;  %v19673_v34 = vadd.f32 %v24044_v21, %v2108_v13  ;;  %v22278_v60 = vld [vmem:[#allocation2 + $0x3bc0] ss:$40 sps:$4 sm:$0xff]   ;;  %v22290_v21 = vld [vmem:[#allocation2 + $0x70] ss:$40 sps:$4 sm:$0xff]  }
 0x696   :  { %13778 = vmatprep.subr.bf16.mxu1 %v22241_v38  ;;  %v22281_v38 = vld [vmem:[#allocation2 + $0x3bc8] ss:$40 sps:$4 sm:$0xff]  }
 0x697   :  { %v22325_v13 = vld [vmem:[#allocation6 + $0xc4] ss:$16 sps:$4 sm:$0xff]  }
 0x698   :  { %13287 = vmatpush1.bf16.msra.mxu0 %v22236_v40  ;;  %v22286_v40 = vld [vmem:[#allocation2 + $0x24] ss:$40 sps:$4 sm:$0xff]  }
 0x699   :  { %13779 = vmatpush1.bf16.msra.mxu1 %v22239_v9  ;;  %13288 = vmatprep.subr.bf16.mxu0 %v22244_v44  ;;  %v22289_v9 = vld [vmem:[#allocation6 + $0x4] ss:$16 sps:$4 sm:$0xff]   ;;  %v14296_v44 = vmax.f32 %v19673_v34, 0.0 }
 0x69a   :  { %13780 = vmatprep.subr.bf16.mxu1 %v22247_v45  ;;  %v22284_v45 = vld [vmem:[#allocation2 + $0x20] ss:$40 sps:$4 sm:$0xff]   ;;  %v22326_v34 = vld [vmem:[#allocation2 + $0x250] ss:$40 sps:$4 sm:$0xff]  }
 0x69c   :  { %13289 = vmatpush1.bf16.msra.mxu0 %v22242_v46  ;;  %v22287_v46 = vld [vmem:[#allocation6] ss:$16 sps:$4 sm:$0xff]  }
 0x69d   :  { %13781 = vmatpush1.bf16.msra.mxu1 %v22245_v31  ;;  %13290 = vmatprep.subr.bf16.mxu0 %v22250_v41  ;;  %v22292_v31 = vld [vmem:[#allocation2 + $0x74] ss:$40 sps:$4 sm:$0xff]  }
 0x69e   :  { %13782 = vmatprep.subr.bf16.mxu1 %v22253_v49  ;;  %v22295_v41 = vld [vmem:[#allocation6 + $0x24] ss:$16 sps:$4 sm:$0xff]   ;;  %v24090_v49 = vpack.c.bf16 %v14296_v44, %v14296_v44  ;;  %v22335_v44 = vld [vmem:[#allocation6 + $0x100] ss:$16 sps:$4 sm:$0xff]  }
 0x6a0   :  { %13291 = vmatpush1.bf16.msra.mxu0 %v22248_v50  ;;  %v22293_v50 = vld [vmem:[#allocation6 + $0x20] ss:$16 sps:$4 sm:$0xff]  }
 0x6a1   :  { %13783 = vmatpush1.bf16.msra.mxu1 %v22251_v51  ;;  %13292 = vmatprep.subr.bf16.mxu0 %v22256_v52  ;;  %v22298_v51 = vld [vmem:[#allocation2 + $0xc4] ss:$40 sps:$4 sm:$0xff]  }
 0x6a2   :  { %13784 = vmatprep.subr.bf16.mxu1 %v22259_v53  ;;  %v22301_v52 = vld [vmem:[#allocation6 + $0x44] ss:$16 sps:$4 sm:$0xff]  }
 0x6a3   :  { %v22296_v53 = vld [vmem:[#allocation2 + $0xc0] ss:$40 sps:$4 sm:$0xff]  }
 0x6a4   :  { %13293 = vmatpush1.bf16.msra.mxu0 %v22254_v55  ;;  %v22304_v55 = vld [vmem:[#allocation2 + $0x114] ss:$40 sps:$4 sm:$0xff]  }
 0x6a5   :  { %13785 = vmatpush1.bf16.msra.mxu1 %v22257_v58  ;;  %13294 = vmatprep.subr.bf16.mxu0 %v22262_v59  ;;  %v22307_v58 = vld [vmem:[#allocation6 + $0x64] ss:$16 sps:$4 sm:$0xff]  }
 0x6a6   :  { %13786 = vmatprep.subr.bf16.mxu1 %v22265_v32  ;;  %v22302_v59 = vld [vmem:[#allocation2 + $0x110] ss:$40 sps:$4 sm:$0xff]  }
 0x6a7   :  { %v22305_v32 = vld [vmem:[#allocation6 + $0x60] ss:$16 sps:$4 sm:$0xff]  }
 0x6a8   :  { %13295 = vmatpush1.bf16.msra.mxu0 %v22260_v7  ;;  %v22310_v7 = vld [vmem:[#allocation2 + $0x164] ss:$40 sps:$4 sm:$0xff]  }
 0x6a9   :  { %13787 = vmatpush1.bf16.msra.mxu1 %v22263_v8  ;;  %13296 = vmatprep.subr.bf16.mxu0 %v22268_v12  ;;  %v22313_v8 = vld [vmem:[#allocation6 + $0x84] ss:$16 sps:$4 sm:$0xff]  }
 0x6aa   :  { %13788 = vmatprep.subr.bf16.mxu1 %v22271_v14  ;;  %v22308_v12 = vld [vmem:[#allocation2 + $0x160] ss:$40 sps:$4 sm:$0xff]   ;;  %v22316_v14 = vld [vmem:[#allocation2 + $0x1b4] ss:$40 sps:$4 sm:$0xff]  }
 0x6ac   :  { %13297 = vmatpush1.bf16.msra.mxu0 %v22266_v56  ;;  %v22319_v56 = vld [vmem:[#allocation6 + $0xa4] ss:$16 sps:$4 sm:$0xff]  }
 0x6ad   :  { %13789 = vmatpush1.bf16.msra.mxu1 %v22269_v19  ;;  %13298 = vmatprep.subr.bf16.mxu0 %v22274_v22  ;;  %v22314_v19 = vld [vmem:[#allocation2 + $0x1b0] ss:$40 sps:$4 sm:$0xff]  }
 0x6ae   :  { %13790 = vmatprep.subr.bf16.mxu1 %v22277_v23  ;;  %v22317_v22 = vld [vmem:[#allocation6 + $0xa0] ss:$16 sps:$4 sm:$0xff]  }
 0x6af   :  { %v22322_v23 = vld [vmem:[#allocation2 + $0x204] ss:$40 sps:$4 sm:$0xff]  }
 0x6b0   :  { %13299 = vmatpush1.bf16.msra.mxu0 %v22272_v25  ;;  %v22320_v25 = vld [vmem:[#allocation2 + $0x200] ss:$40 sps:$4 sm:$0xff]  }
 0x6b1   :  { %13791 = vmatpush1.bf16.msra.mxu1 %v22275_v26  ;;  %13300 = vmatprep.subr.bf16.mxu0 %v22280_v27  ;;  %v22323_v26 = vld [vmem:[#allocation6 + $0xc0] ss:$16 sps:$4 sm:$0xff]  }
 0x6b2   :  { %13792 = vmatprep.subr.bf16.mxu1 %v22283_v33  ;;  %v22328_v27 = vld [vmem:[#allocation2 + $0x254] ss:$40 sps:$4 sm:$0xff]  }
 0x6b3   :  { %v22331_v33 = vld [vmem:[#allocation6 + $0xe4] ss:$16 sps:$4 sm:$0xff]  }
 0x6b4   :  { %13301 = vmatpush1.bf16.msra.mxu0 %v22278_v60  ;;  %v22329_v60 = vld [vmem:[#allocation6 + $0xe0] ss:$16 sps:$4 sm:$0xff]  }
 0x6b5   :  { %13793 = vmatpush1.bf16.msra.mxu1 %v22281_v38  ;;  %13803 = vmatprep.subr.bf16.mxu0 %v22286_v40  ;;  %v22334_v38 = vld [vmem:[#allocation2 + $0x2a4] ss:$40 sps:$4 sm:$0xff]  }
 0x6b6   :  { %16257 = vmatprep.subr.bf16.mxu1 %v22289_v9  ;;  %v22337_v40 = vld [vmem:[#allocation6 + $0x104] ss:$16 sps:$4 sm:$0xff]  }
 0x6b7   :  { %13303 = vmatmul.mubr.bf16.vlgmr.msra.gmra.mrb[4].mxu0 %v24022_v39  ;;  %v22332_v9 = vld [vmem:[#allocation2 + $0x2a0] ss:$40 sps:$4 sm:$0xff]  }
 0x6b8   :  { %13795 = vmatmul.mubr.bf16.vlgmr.msra.gmra.mrb[4].mxu1 %v24022_v39  ;;  %13804 = vmatpush1.bf16.msra.mxu0 %v22284_v45  ;;  %v22340_v45 = vld [vmem:[#allocation2 + $0x2f4] ss:$40 sps:$4 sm:$0xff]  }
 0x6b9   :  { %16258 = vmatpush1.bf16.msra.mxu1 %v22287_v46  ;;  %16289 = vmatprep.mubr.bf16.mxu1 %v24090_v49  ;;  %v22343_v46 = vld [vmem:[#allocation6 + $0x124] ss:$16 sps:$4 sm:$0xff]  }
 0x6ba   :  { %13805 = vmatprep.subr.bf16.mxu0 %v22292_v31  ;;  %16259 = vmatprep.subr.bf16.mxu1 %v22295_v41  ;;  %v22338_v31 = vld [vmem:[#allocation2 + $0x2f0] ss:$40 sps:$4 sm:$0xff]  }
 0x6bb   :  { %13835 = vmatprep.mubr.bf16.mxu0 %v23831_v48  ;;  %v22311_v48 = vld [vmem:[#allocation6 + $0x80] ss:$16 sps:$4 sm:$0xff]  }
 0x6bc   :  { %13806 = vmatpush1.bf16.msra.mxu0 %v22290_v21  ;;  %v22341_v41 = vld [vmem:[#allocation6 + $0x120] ss:$16 sps:$4 sm:$0xff]  }
 0x6bd   :  { %16260 = vmatpush1.bf16.msra.mxu1 %v22293_v50  ;;  %13807 = vmatprep.subr.bf16.mxu0 %v22298_v51  ;;  %v22346_v21 = vld [vmem:[#allocation2 + $0x344] ss:$40 sps:$4 sm:$0xff]   ;;  %v22344_v51 = vld [vmem:[#allocation2 + $0x340] ss:$40 sps:$4 sm:$0xff]  }
 0x6be   :  { %16261 = vmatprep.subr.bf16.mxu1 %v22301_v52  ;;  %v22349_v50 = vld [vmem:[#allocation6 + $0x144] ss:$16 sps:$4 sm:$0xff]   ;;  %v22347_v52 = vld [vmem:[#allocation6 + $0x140] ss:$16 sps:$4 sm:$0xff]  }
 0x6c0   :  { %13808 = vmatpush1.bf16.msra.mxu0 %v22296_v53  ;;  %v22352_v53 = vld [vmem:[#allocation2 + $0x394] ss:$40 sps:$4 sm:$0xff]  }
 0x6c1   :  { %16262 = vmatpush1.bf16.msra.mxu1 %v22299_v54  ;;  %13809 = vmatprep.subr.bf16.mxu0 %v22304_v55  ;;  %v22355_v54 = vld [vmem:[#allocation6 + $0x164] ss:$16 sps:$4 sm:$0xff]  }
 0x6c2   :  { %16263 = vmatprep.subr.bf16.mxu1 %v22307_v58  ;;  %v22350_v55 = vld [vmem:[#allocation2 + $0x390] ss:$40 sps:$4 sm:$0xff]  }
 0x6c3   :  { %v22353_v58 = vld [vmem:[#allocation6 + $0x160] ss:$16 sps:$4 sm:$0xff]  }
 0x6c4   :  { %13810 = vmatpush1.bf16.msra.mxu0 %v22302_v59  ;;  %v22358_v59 = vld [vmem:[#allocation2 + $0x3e4] ss:$40 sps:$4 sm:$0xff]  }
 0x6c5   :  { %16264 = vmatpush1.bf16.msra.mxu1 %v22305_v32  ;;  %13811 = vmatprep.subr.bf16.mxu0 %v22310_v7  ;;  %v22361_v32 = vld [vmem:[#allocation6 + $0x184] ss:$16 sps:$4 sm:$0xff]  }
 0x6c6   :  { %16265 = vmatprep.subr.bf16.mxu1 %v22313_v8  ;;  %v22356_v7 = vld [vmem:[#allocation2 + $0x3e0] ss:$40 sps:$4 sm:$0xff]  }
 0x6c7   :  { %v22359_v8 = vld [vmem:[#allocation6 + $0x180] ss:$16 sps:$4 sm:$0xff]  }
 0x6c8   :  { %13812 = vmatpush1.bf16.msra.mxu0 %v22308_v12  ;;  %v24097_v12 = vsub.s32 0, %v24080_v6 }
 0x6c9   :  { %16266 = vmatpush1.bf16.msra.mxu1 %v22311_v48  ;;  %13813 = vmatprep.subr.bf16.mxu0 %v22316_v14  ;;  %v22364_v48 = vld [vmem:[#allocation2 + $0x434] ss:$40 sps:$4 sm:$0xff]  }
 0x6ca   :  { %16267 = vmatprep.subr.bf16.mxu1 %v22319_v56  ;;  %v22367_v14 = vld [vmem:[#allocation6 + $0x1a4] ss:$16 sps:$4 sm:$0xff]   ;;  %v2115_v56 = vsub.s32 3, %v24080_v6 }
 0x6cc   :  { %13814 = vmatpush1.bf16.msra.mxu0 %v22314_v19  ;;  %v22362_v19 = vld [vmem:[#allocation2 + $0x430] ss:$40 sps:$4 sm:$0xff]  }
 0x6cd   :  { %16268 = vmatpush1.bf16.msra.mxu1 %v22317_v22  ;;  %13815 = vmatprep.subr.bf16.mxu0 %v22322_v23  ;;  %v22365_v22 = vld [vmem:[#allocation6 + $0x1a0] ss:$16 sps:$4 sm:$0xff]   ;;  %v2104_v23 = vrot.slane %v24085_v17, %v24097_v12 }
 0x6ce   :  { %16269 = vmatprep.subr.bf16.mxu1 %v22325_v13  ;;  %v22370_v13 = vld [vmem:[#allocation2 + $0x484] ss:$40 sps:$4 sm:$0xff]  }
 0x6d0   :  { %13816 = vmatpush1.bf16.msra.mxu0 %v22320_v25  ;;  %v22373_v25 = vld [vmem:[#allocation6 + $0x1c4] ss:$16 sps:$4 sm:$0xff]  }
 0x6d1   :  { %16270 = vmatpush1.bf16.msra.mxu1 %v22323_v26  ;;  %13817 = vmatprep.subr.bf16.mxu0 %v22328_v27  ;;  %v2116_v26 = vrot.slane %v24085_v17, %v2115_v56  ;;  %v22368_v27 = vld [vmem:[#allocation2 + $0x480] ss:$40 sps:$4 sm:$0xff]  }
 0x6d2   :  { %16271 = vmatprep.subr.bf16.mxu1 %v22331_v33  ;;  %v22371_v33 = vld [vmem:[#allocation6 + $0x1c0] ss:$16 sps:$4 sm:$0xff]  }
 0x6d4   :  { %13818 = vmatpush1.bf16.msra.mxu0 %v22326_v34  ;;  %v19672_v34 = vadd.f32 %v24040_v0, %v2104_v23  ;;  %v22383_v0 = vld [vmem:[#allocation6 + $0x200] ss:$16 sps:$4 sm:$0xff]  }
 0x6d5   :  { %16272 = vmatpush1.bf16.msra.mxu1 %v22329_v60  ;;  %13819 = vmatprep.subr.bf16.mxu0 %v22334_v38  ;;  %v22376_v60 = vld [vmem:[#allocation2 + $0x4d4] ss:$40 sps:$4 sm:$0xff]  }
 0x6d6   :  { %16273 = vmatprep.subr.bf16.mxu1 %v22337_v40  ;;  %v22379_v38 = vld [vmem:[#allocation6 + $0x1e4] ss:$16 sps:$4 sm:$0xff]   ;;  %v19675_v40 = vadd.f32 %v24046_v3, %v2116_v26  ;;  %v22413_v26 = vld [vmem:[#allocation6 + $0x2a0] ss:$16 sps:$4 sm:$0xff]  }
 0x6d7   :  { %v22391_v3 = vld [vmem:[#allocation6 + $0x224] ss:$16 sps:$4 sm:$0xff]  }
 0x6d8   :  { %13820 = vmatpush1.bf16.msra.mxu0 %v22332_v9  ;;  %v22374_v9 = vld [vmem:[#allocation2 + $0x4d0] ss:$40 sps:$4 sm:$0xff]   ;;  %v22412_v23 = vld [vmem:[#allocation2 + $0x6b4] ss:$40 sps:$4 sm:$0xff]  }
 0x6d9   :  { %16274 = vmatpush1.bf16.msra.mxu1 %v22335_v44  ;;  %13821 = vmatprep.subr.bf16.mxu0 %v22340_v45  ;;  %v22377_v44 = vld [vmem:[#allocation6 + $0x1e0] ss:$16 sps:$4 sm:$0xff]   ;;  %v14295_v45 = vmax.f32 %v19672_v34, 0.0 }
 0x6da   :  { %16275 = vmatprep.subr.bf16.mxu1 %v22343_v46  ;;  %v22382_v46 = vld [vmem:[#allocation2 + $0x524] ss:$40 sps:$4 sm:$0xff]   ;;  %v22416_v34 = vld [vmem:[#allocation2 + $0x700] ss:$40 sps:$4 sm:$0xff]  }
 0x6dc   :  { %13822 = vmatpush1.bf16.msra.mxu0 %v22338_v31  ;;  %v22385_v31 = vld [vmem:[#allocation6 + $0x204] ss:$16 sps:$4 sm:$0xff]  }
 0x6dd   :  { %16276 = vmatpush1.bf16.msra.mxu1 %v22341_v41  ;;  %13823 = vmatprep.subr.bf16.mxu0 %v22346_v21  ;;  %v14298_v41 = vmax.f32 %v19675_v40, 0.0  ;;  %v22380_v21 = vld [vmem:[#allocation2 + $0x520] ss:$40 sps:$4 sm:$0xff]  }
 0x6de   :  { %16277 = vmatprep.subr.bf16.mxu1 %v22349_v50  ;;  %v24107_v50 = vpack.c.bf16 %v14295_v45, %v14295_v45  ;;  %v22427_v40 = vld [vmem:[#allocation6 + $0x2e4] ss:$16 sps:$4 sm:$0xff]  }
 0x6df   :  { %v22430_v45 = vld [vmem:[#allocation2 + $0x7a4] ss:$40 sps:$4 sm:$0xff]  }
 0x6e0   :  { %13824 = vmatpush1.bf16.msra.mxu0 %v22344_v51  ;;  %v22388_v51 = vld [vmem:[#allocation2 + $0x574] ss:$40 sps:$4 sm:$0xff]  }
 0x6e1   :  { %16278 = vmatpush1.bf16.msra.mxu1 %v22347_v52  ;;  %13825 = vmatprep.subr.bf16.mxu0 %v22352_v53  ;;  %v24109_v52 = vpack.c.bf16 %v14298_v41, %v14298_v41  ;;  %v22386_v53 = vld [vmem:[#allocation2 + $0x570] ss:$40 sps:$4 sm:$0xff]  }
 0x6e2   :  { %16279 = vmatprep.subr.bf16.mxu1 %v22355_v54  ;;  %v22389_v54 = vld [vmem:[#allocation6 + $0x220] ss:$16 sps:$4 sm:$0xff]  }
 0x6e3   :  { %v22431_v41 = vld [vmem:[#allocation6 + $0x300] ss:$16 sps:$4 sm:$0xff]  }
 0x6e4   :  { %13826 = vmatpush1.bf16.msra.mxu0 %v22350_v55  ;;  %v22394_v55 = vld [vmem:[#allocation2 + $0x5c4] ss:$40 sps:$4 sm:$0xff]  }
 0x6e5   :  { %16280 = vmatpush1.bf16.msra.mxu1 %v22353_v58  ;;  %13827 = vmatprep.subr.bf16.mxu0 %v22358_v59  ;;  %v22397_v58 = vld [vmem:[#allocation6 + $0x244] ss:$16 sps:$4 sm:$0xff]  }
 0x6e6   :  { %16281 = vmatprep.subr.bf16.mxu1 %v22361_v32  ;;  %v22392_v59 = vld [vmem:[#allocation2 + $0x5c0] ss:$40 sps:$4 sm:$0xff]  }
 0x6e7   :  { %v22395_v32 = vld [vmem:[#allocation6 + $0x240] ss:$16 sps:$4 sm:$0xff]  }
 0x6e8   :  { %13828 = vmatpush1.bf16.msra.mxu0 %v22356_v7  ;;  %v22400_v7 = vld [vmem:[#allocation2 + $0x614] ss:$40 sps:$4 sm:$0xff]  }
 0x6e9   :  { %16282 = vmatpush1.bf16.msra.mxu1 %v22359_v8  ;;  %13829 = vmatprep.subr.bf16.mxu0 %v22364_v48  ;;  %v22398_v8 = vld [vmem:[#allocation2 + $0x610] ss:$40 sps:$4 sm:$0xff]  }
 0x6ea   :  { %16283 = vmatprep.subr.bf16.mxu1 %v22367_v14  ;;  %v22401_v48 = vld [vmem:[#allocation6 + $0x260] ss:$16 sps:$4 sm:$0xff]  }
 0x6eb   :  { %v22406_v14 = vld [vmem:[#allocation2 + $0x664] ss:$40 sps:$4 sm:$0xff]  }
 0x6ec   :  { %13830 = vmatpush1.bf16.msra.mxu0 %v22362_v19  ;;  %v22409_v19 = vld [vmem:[#allocation6 + $0x284] ss:$16 sps:$4 sm:$0xff]  }
 0x6ed   :  { %16284 = vmatpush1.bf16.msra.mxu1 %v22365_v22  ;;  %13831 = vmatprep.subr.bf16.mxu0 %v22370_v13  ;;  %v22404_v22 = vld [vmem:[#allocation2 + $0x660] ss:$40 sps:$4 sm:$0xff]  }
 0x6ee   :  { %16285 = vmatprep.subr.bf16.mxu1 %v22373_v25  ;;  %v22415_v13 = vld [vmem:[#allocation6 + $0x2a4] ss:$16 sps:$4 sm:$0xff]  }
 0x6ef   :  { %v22410_v25 = vld [vmem:[#allocation2 + $0x6b0] ss:$40 sps:$4 sm:$0xff]  }
 0x6f0   :  { %13832 = vmatpush1.bf16.msra.mxu0 %v22368_v27  ;;  %v22418_v27 = vld [vmem:[#allocation2 + $0x704] ss:$40 sps:$4 sm:$0xff]  }
 0x6f1   :  { %16286 = vmatpush1.bf16.msra.mxu1 %v22371_v33  ;;  %13833 = vmatprep.subr.bf16.mxu0 %v22376_v60  ;;  %v22421_v33 = vld [vmem:[#allocation6 + $0x2c4] ss:$16 sps:$4 sm:$0xff]   ;;  %v22419_v60 = vld [vmem:[#allocation6 + $0x2c0] ss:$16 sps:$4 sm:$0xff]  }
 0x6f2   :  { %16287 = vmatprep.subr.bf16.mxu1 %v22379_v38  ;;  %v22424_v38 = vld [vmem:[#allocation2 + $0x754] ss:$40 sps:$4 sm:$0xff]  }
 0x6f4   :  { %13834 = vmatpush1.bf16.msra.mxu0 %v22374_v9  ;;  %v22422_v9 = vld [vmem:[#allocation2 + $0x750] ss:$40 sps:$4 sm:$0xff]  }
 0x6f5   :  { %16288 = vmatpush1.bf16.msra.mxu1 %v22377_v44  ;;  %13844 = vmatprep.subr.bf16.mxu0 %v22382_v46  ;;  %v22425_v44 = vld [vmem:[#allocation6 + $0x2e0] ss:$16 sps:$4 sm:$0xff]   ;;  %v22433_v46 = vld [vmem:[#allocation6 + $0x304] ss:$16 sps:$4 sm:$0xff]  }
 0x6f6   :  { %16298 = vmatprep.subr.bf16.mxu1 %v22385_v31  ;;  %v22428_v31 = vld [vmem:[#allocation2 + $0x7a0] ss:$40 sps:$4 sm:$0xff]  }
 0x6f7   :  { %13836 = vmatmul.mubr.bf16.vlgmr.msra.gmra.mrb[8].mxu0 %v23835_v5  ;;  %v22403_v5 = vld [vmem:[#allocation6 + $0x264] ss:$16 sps:$4 sm:$0xff]  }
 0x6f8   :  { %16290 = vmatmul.mubr.bf16.vlgmr.msra.gmra.mrb[8].mxu1 %v24107_v50  ;;  %13845 = vmatpush1.bf16.msra.mxu0 %v22380_v21  ;;  %v22436_v21 = vld [vmem:[#allocation2 + $0x7f4] ss:$40 sps:$4 sm:$0xff]  }
 0x6f9   :  { %16299 = vmatpush1.bf16.msra.mxu1 %v22383_v0  ;;  %16330 = vmatprep.mubr.bf16.mxu1 %v24109_v52  ;;  %v22439_v0 = vld [vmem:[#allocation6 + $0x324] ss:$16 sps:$4 sm:$0xff]  }
 0x6fa   :  { %13846 = vmatprep.subr.bf16.mxu0 %v22388_v51  ;;  %16300 = vmatprep.subr.bf16.mxu1 %v22391_v3  ;;  %v22434_v51 = vld [vmem:[#allocation2 + $0x7f0] ss:$40 sps:$4 sm:$0xff]  }
 0x6fb   :  { %13876 = vmatprep.mubr.bf16.mxu0 %v23846_v30  ;;  %v22407_v30 = vld [vmem:[#allocation6 + $0x280] ss:$16 sps:$4 sm:$0xff]  }
 0x6fc   :  { %13847 = vmatpush1.bf16.msra.mxu0 %v22386_v53  ;;  %v22437_v3 = vld [vmem:[#allocation6 + $0x320] ss:$16 sps:$4 sm:$0xff]  }
 0x6fd   :  { %16301 = vmatpush1.bf16.msra.mxu1 %v22389_v54  ;;  %13848 = vmatprep.subr.bf16.mxu0 %v22394_v55  ;;  %v22442_v53 = vld [vmem:[#allocation2 + $0x844] ss:$40 sps:$4 sm:$0xff]   ;;  %v22440_v55 = vld [vmem:[#allocation2 + $0x840] ss:$40 sps:$4 sm:$0xff]  }
 0x6fe   :  { %16302 = vmatprep.subr.bf16.mxu1 %v22397_v58  ;;  %v22445_v54 = vld [vmem:[#allocation6 + $0x344] ss:$16 sps:$4 sm:$0xff]   ;;  %v22443_v58 = vld [vmem:[#allocation6 + $0x340] ss:$16 sps:$4 sm:$0xff]  }
 0x700   :  { %13849 = vmatpush1.bf16.msra.mxu0 %v22392_v59  ;;  %v22448_v59 = vld [vmem:[#allocation2 + $0x894] ss:$40 sps:$4 sm:$0xff]  }
 0x701   :  { %16303 = vmatpush1.bf16.msra.mxu1 %v22395_v32  ;;  %13850 = vmatprep.subr.bf16.mxu0 %v22400_v7  ;;  %v22451_v32 = vld [vmem:[#allocation6 + $0x364] ss:$16 sps:$4 sm:$0xff]  }
 0x702   :  { %16304 = vmatprep.subr.bf16.mxu1 %v22403_v5  ;;  %v22446_v7 = vld [vmem:[#allocation2 + $0x890] ss:$40 sps:$4 sm:$0xff]  }
 0x703   :  { %v22449_v5 = vld [vmem:[#allocation6 + $0x360] ss:$16 sps:$4 sm:$0xff]  }
 0x704   :  { %13851 = vmatpush1.bf16.msra.mxu0 %v22398_v8  ;;  %v22454_v8 = vld [vmem:[#allocation2 + $0x8e4] ss:$40 sps:$4 sm:$0xff]  }
 0x705   :  { %16305 = vmatpush1.bf16.msra.mxu1 %v22401_v48  ;;  %13852 = vmatprep.subr.bf16.mxu0 %v22406_v14  ;;  %v22457_v48 = vld [vmem:[#allocation6 + $0x384] ss:$16 sps:$4 sm:$0xff]  }
 0x706   :  { %16306 = vmatprep.subr.bf16.mxu1 %v22409_v19  ;;  %v22452_v14 = vld [vmem:[#allocation2 + $0x8e0] ss:$40 sps:$4 sm:$0xff]  }
 0x707   :  { %v22455_v19 = vld [vmem:[#allocation6 + $0x380] ss:$16 sps:$4 sm:$0xff]  }
 0x708   :  { %13853 = vmatpush1.bf16.msra.mxu0 %v22404_v22  ;;  %v2111_v22 = vsub.s32 2, %v24080_v6 }
 0x709   :  { %16307 = vmatpush1.bf16.msra.mxu1 %v22407_v30  ;;  %13854 = vmatprep.subr.bf16.mxu0 %v22412_v23  ;;  %v22460_v30 = vld [vmem:[#allocation2 + $0x934] ss:$40 sps:$4 sm:$0xff]  }
 0x70a   :  { %16308 = vmatprep.subr.bf16.mxu1 %v22415_v13  ;;  %v22463_v23 = vld [vmem:[#allocation6 + $0x3a4] ss:$16 sps:$4 sm:$0xff]  }
 0x70b   :  { %v22458_v13 = vld [vmem:[#allocation2 + $0x930] ss:$40 sps:$4 sm:$0xff]  }
 0x70c   :  { %13855 = vmatpush1.bf16.msra.mxu0 %v22410_v25  ;;  %v22461_v25 = vld [vmem:[#allocation6 + $0x3a0] ss:$16 sps:$4 sm:$0xff]  }
 0x70d   :  { %16309 = vmatpush1.bf16.msra.mxu1 %v22413_v26  ;;  %13856 = vmatprep.subr.bf16.mxu0 %v22418_v27  ;;  %v2112_v26 = vrot.slane %v24085_v17, %v2111_v22  ;;  %v22466_v27 = vld [vmem:[#allocation2 + $0x984] ss:$40 sps:$4 sm:$0xff]  }
 0x70e   :  { %16310 = vmatprep.subr.bf16.mxu1 %v22421_v33  ;;  %v22469_v33 = vld [vmem:[#allocation6 + $0x3c4] ss:$16 sps:$4 sm:$0xff]  }
 0x710   :  { %13857 = vmatpush1.bf16.msra.mxu0 %v22416_v34  ;;  %v22464_v34 = vld [vmem:[#allocation2 + $0x980] ss:$40 sps:$4 sm:$0xff]  }
 0x711   :  { %16311 = vmatpush1.bf16.msra.mxu1 %v22419_v60  ;;  %13858 = vmatprep.subr.bf16.mxu0 %v22424_v38  ;;  %v22467_v60 = vld [vmem:[#allocation6 + $0x3c0] ss:$16 sps:$4 sm:$0xff]   ;;  %v19674_v38 = vadd.f32 %v24042_v1, %v2112_v26 }
 0x712   :  { %16312 = vmatprep.subr.bf16.mxu1 %v22427_v40  ;;  %v22472_v40 = vld [vmem:[#allocation2 + $0x9d4] ss:$40 sps:$4 sm:$0xff]   ;;  %v22496_v26 = vld [vmem:[#allocation2 + $0xc04] ss:$40 sps:$4 sm:$0xff]  }
 0x713   :  { %v22481_v1 = vld [vmem:[#allocation2 + $0xa74] ss:$40 sps:$4 sm:$0xff]  }
 0x714   :  { %13859 = vmatpush1.bf16.msra.mxu0 %v22422_v9  ;;  %v22475_v9 = vld [vmem:[#allocation6 + $0x3e4] ss:$16 sps:$4 sm:$0xff]  }
 0x715   :  { %16313 = vmatpush1.bf16.msra.mxu1 %v22425_v44  ;;  %13860 = vmatprep.subr.bf16.mxu0 %v22430_v45  ;;  %v22470_v44 = vld [vmem:[#allocation2 + $0x9d0] ss:$40 sps:$4 sm:$0xff]  }
 0x716   :  { %16314 = vmatprep.subr.bf16.mxu1 %v22433_v46  ;;  %v22473_v45 = vld [vmem:[#allocation6 + $0x3e0] ss:$16 sps:$4 sm:$0xff]   ;;  %v14297_v46 = vmax.f32 %v19674_v38, 0.0  ;;  %v22541_v38 = vld [vmem:[#allocation6 + $0x4e4] ss:$16 sps:$4 sm:$0xff]  }
 0x718   :  { %13861 = vmatpush1.bf16.msra.mxu0 %v22428_v31  ;;  %v22478_v31 = vld [vmem:[#allocation2 + $0xa24] ss:$40 sps:$4 sm:$0xff]  }
 0x719   :  { %16315 = vmatpush1.bf16.msra.mxu1 %v22431_v41  ;;  %13862 = vmatprep.subr.bf16.mxu0 %v22436_v21  ;;  %v22499_v41 = vld [vmem:[#allocation6 + $0x404] ss:$16 sps:$4 sm:$0xff]  }
 0x71a   :  { %16316 = vmatprep.subr.bf16.mxu1 %v22439_v0  ;;  %v22476_v21 = vld [vmem:[#allocation2 + $0xa20] ss:$40 sps:$4 sm:$0xff]  }
 0x71b   :  { %v22497_v0 = vld [vmem:[#allocation6 + $0x400] ss:$16 sps:$4 sm:$0xff]  }
 0x71c   :  { %13863 = vmatpush1.bf16.msra.mxu0 %v22434_v51  ;;  %v24120_v51 = vpack.c.bf16 %v14297_v46, %v14297_v46  ;;  %v22506_v46 = vld [vmem:[#allocation2 + $0xca0] ss:$40 sps:$4 sm:$0xff]  }
 0x71d   :  { %16317 = vmatpush1.bf16.msra.mxu1 %v22437_v3  ;;  %13864 = vmatprep.subr.bf16.mxu0 %v22442_v53  ;;  %v22505_v3 = vld [vmem:[#allocation6 + $0x424] ss:$16 sps:$4 sm:$0xff]  }
 0x71e   :  { %16318 = vmatprep.subr.bf16.mxu1 %v22445_v54  ;;  %v22479_v53 = vld [vmem:[#allocation2 + $0xa70] ss:$40 sps:$4 sm:$0xff]  }
 0x71f   :  { %v22503_v54 = vld [vmem:[#allocation6 + $0x420] ss:$16 sps:$4 sm:$0xff]  }
 0x720   :  { %13865 = vmatpush1.bf16.msra.mxu0 %v22440_v55  ;;  %v22484_v55 = vld [vmem:[#allocation2 + $0xac4] ss:$40 sps:$4 sm:$0xff]  }
 0x721   :  { %16319 = vmatpush1.bf16.msra.mxu1 %v22443_v58  ;;  %13866 = vmatprep.subr.bf16.mxu0 %v22448_v59  ;;  %v22511_v58 = vld [vmem:[#allocation6 + $0x444] ss:$16 sps:$4 sm:$0xff]  }
 0x722   :  { %16320 = vmatprep.subr.bf16.mxu1 %v22451_v32  ;;  %v22482_v59 = vld [vmem:[#allocation2 + $0xac0] ss:$40 sps:$4 sm:$0xff]  }
 0x723   :  { %v22509_v32 = vld [vmem:[#allocation6 + $0x440] ss:$16 sps:$4 sm:$0xff]  }
 0x724   :  { %13867 = vmatpush1.bf16.msra.mxu0 %v22446_v7  ;;  %v22487_v7 = vld [vmem:[#allocation2 + $0xb14] ss:$40 sps:$4 sm:$0xff]  }
 0x725   :  { %16321 = vmatpush1.bf16.msra.mxu1 %v22449_v5  ;;  %13868 = vmatprep.subr.bf16.mxu0 %v22454_v8  ;;  %v22517_v5 = vld [vmem:[#allocation6 + $0x464] ss:$16 sps:$4 sm:$0xff]   ;;  %v22515_v8 = vld [vmem:[#allocation6 + $0x460] ss:$16 sps:$4 sm:$0xff]  }
 0x726   :  { %16322 = vmatprep.subr.bf16.mxu1 %v22457_v48  ;;  %v22490_v48 = vld [vmem:[#allocation2 + $0xb64] ss:$40 sps:$4 sm:$0xff]  }
 0x728   :  { %13869 = vmatpush1.bf16.msra.mxu0 %v22452_v14  ;;  %v22523_v14 = vld [vmem:[#allocation6 + $0x484] ss:$16 sps:$4 sm:$0xff]  }
 0x729   :  { %16323 = vmatpush1.bf16.msra.mxu1 %v22455_v19  ;;  %13870 = vmatprep.subr.bf16.mxu0 %v22460_v30  ;;  %v22488_v19 = vld [vmem:[#allocation2 + $0xb60] ss:$40 sps:$4 sm:$0xff]   ;;  %v22493_v30 = vld [vmem:[#allocation2 + $0xbb4] ss:$40 sps:$4 sm:$0xff]  }
 0x72a   :  { %16324 = vmatprep.subr.bf16.mxu1 %v22463_v23  ;;  %v22529_v23 = vld [vmem:[#allocation6 + $0x4a4] ss:$16 sps:$4 sm:$0xff]  }
 0x72c   :  { %13871 = vmatpush1.bf16.msra.mxu0 %v22458_v13  ;;  %v22491_v13 = vld [vmem:[#allocation2 + $0xbb0] ss:$40 sps:$4 sm:$0xff]  }
 0x72d   :  { %16325 = vmatpush1.bf16.msra.mxu1 %v22461_v25  ;;  %13872 = vmatprep.subr.bf16.mxu0 %v22466_v27  ;;  %v22527_v25 = vld [vmem:[#allocation6 + $0x4a0] ss:$16 sps:$4 sm:$0xff]   ;;  %v22535_v27 = vld [vmem:[#allocation6 + $0x4c4] ss:$16 sps:$4 sm:$0xff]  }
 0x72e   :  { %16326 = vmatprep.subr.bf16.mxu1 %v22469_v33  ;;  %v22494_v33 = vld [vmem:[#allocation2 + $0xc00] ss:$40 sps:$4 sm:$0xff]  }
 0x730   :  { %13873 = vmatpush1.bf16.msra.mxu0 %v22464_v34  ;;  %v22533_v34 = vld [vmem:[#allocation6 + $0x4c0] ss:$16 sps:$4 sm:$0xff]  }
 0x731   :  { %16327 = vmatpush1.bf16.msra.mxu1 %v22467_v60  ;;  %13874 = vmatprep.subr.bf16.mxu0 %v22472_v40  ;;  %v22502_v60 = vld [vmem:[#allocation2 + $0xc54] ss:$40 sps:$4 sm:$0xff]   ;;  %v22500_v40 = vld [vmem:[#allocation2 + $0xc50] ss:$40 sps:$4 sm:$0xff]  }
 0x732   :  { %16328 = vmatprep.subr.bf16.mxu1 %v22475_v9  ;;  %v22539_v9 = vld [vmem:[#allocation6 + $0x4e0] ss:$16 sps:$4 sm:$0xff]  }
 0x734   :  { %13875 = vmatpush1.bf16.msra.mxu0 %v22470_v44  ;;  %v22508_v44 = vld [vmem:[#allocation2 + $0xca4] ss:$40 sps:$4 sm:$0xff]  }
 0x735   :  { %16329 = vmatpush1.bf16.msra.mxu1 %v22473_v45  ;;  %13885 = vmatprep.subr.bf16.mxu0 %v22478_v31  ;;  %v22547_v45 = vld [vmem:[#allocation6 + $0x504] ss:$16 sps:$4 sm:$0xff]   ;;  %v22545_v31 = vld [vmem:[#allocation6 + $0x500] ss:$16 sps:$4 sm:$0xff]  }
 0x736   :  { %16339 = vmatprep.subr.bf16.mxu1 %v22499_v41  ;;  %v22514_v41 = vld [vmem:[#allocation2 + $0xcf4] ss:$40 sps:$4 sm:$0xff]  }
 0x737   :  { %13877 = vmatmul.mubr.bf16.vlgmr.msra.gmra.mrb[8].mxu0 %v23852_v10  ;;  %v22485_v10 = vld [vmem:[#allocation2 + $0xb10] ss:$40 sps:$4 sm:$0xff]  }
 0x738   :  { %16331 = vmatmul.mubr.bf16.vlgmr.msra.gmra.mrb[8].mxu1 %v24120_v51  ;;  %13886 = vmatpush1.bf16.msra.mxu0 %v22476_v21  ;;  %v22553_v21 = vld [vmem:[#allocation6 + $0x524] ss:$16 sps:$4 sm:$0xff]  }
 0x739   :  { %16340 = vmatpush1.bf16.msra.mxu1 %v22497_v0  ;;  %13887 = vmatprep.subr.bf16.mxu0 %v22481_v1  ;;  %v22512_v0 = vld [vmem:[#allocation2 + $0xcf0] ss:$40 sps:$4 sm:$0xff]  }
 0x73a   :  { %16341 = vmatprep.subr.bf16.mxu1 %v22505_v3  ;;  %13917 = vmatprep.mubr.bf16.mxu0 %v23861_v15  ;;  %v22521_v15 = vld [vmem:[#allocation6 + $0x480] ss:$16 sps:$4 sm:$0xff]  }
 0x73b   :  { %v22551_v1 = vld [vmem:[#allocation6 + $0x520] ss:$16 sps:$4 sm:$0xff]  }
 0x73c   :  { %13888 = vmatpush1.bf16.msra.mxu0 %v22479_v53  ;;  %v22520_v3 = vld [vmem:[#allocation2 + $0xd44] ss:$40 sps:$4 sm:$0xff]  }
 0x73d   :  { %16342 = vmatpush1.bf16.msra.mxu1 %v22503_v54  ;;  %13889 = vmatprep.subr.bf16.mxu0 %v22484_v55  ;;  %v22559_v53 = vld [vmem:[#allocation6 + $0x544] ss:$16 sps:$4 sm:$0xff]   ;;  %v22557_v55 = vld [vmem:[#allocation6 + $0x540] ss:$16 sps:$4 sm:$0xff]  }
 0x73e   :  { %16343 = vmatprep.subr.bf16.mxu1 %v22511_v58  ;;  %v22518_v54 = vld [vmem:[#allocation2 + $0xd40] ss:$40 sps:$4 sm:$0xff]   ;;  %v22526_v58 = vld [vmem:[#allocation2 + $0xd94] ss:$40 sps:$4 sm:$0xff]  }
 0x740   :  { %13890 = vmatpush1.bf16.msra.mxu0 %v22482_v59  ;;  %v22565_v59 = vld [vmem:[#allocation6 + $0x564] ss:$16 sps:$4 sm:$0xff]  }
 0x741   :  { %16344 = vmatpush1.bf16.msra.mxu1 %v22509_v32  ;;  %13891 = vmatprep.subr.bf16.mxu0 %v22487_v7  ;;  %v22524_v32 = vld [vmem:[#allocation2 + $0xd90] ss:$40 sps:$4 sm:$0xff]  }
 0x742   :  { %16345 = vmatprep.subr.bf16.mxu1 %v22517_v5  ;;  %v22563_v7 = vld [vmem:[#allocation6 + $0x560] ss:$16 sps:$4 sm:$0xff]  }
 0x743   :  { %v22532_v5 = vld [vmem:[#allocation2 + $0xde4] ss:$40 sps:$4 sm:$0xff]  }
 0x744   :  { %13892 = vmatpush1.bf16.msra.mxu0 %v22485_v10  ;;  %v22571_v10 = vld [vmem:[#allocation6 + $0x584] ss:$16 sps:$4 sm:$0xff]  }
 0x745   :  { %16346 = vmatpush1.bf16.msra.mxu1 %v22515_v8  ;;  %13893 = vmatprep.subr.bf16.mxu0 %v22490_v48  ;;  %v22530_v8 = vld [vmem:[#allocation2 + $0xde0] ss:$40 sps:$4 sm:$0xff]  }
 0x746   :  { %16347 = vmatprep.subr.bf16.mxu1 %v22523_v14  ;;  %v22569_v48 = vld [vmem:[#allocation6 + $0x580] ss:$16 sps:$4 sm:$0xff]  }
 0x747   :  { %v22538_v14 = vld [vmem:[#allocation2 + $0xe34] ss:$40 sps:$4 sm:$0xff]  }
 0x748   :  { %13894 = vmatpush1.bf16.msra.mxu0 %v22488_v19  ;;  %v22577_v19 = vld [vmem:[#allocation6 + $0x5a4] ss:$16 sps:$4 sm:$0xff]  }
 0x749   :  { %16348 = vmatpush1.bf16.msra.mxu1 %v22521_v15  ;;  %13895 = vmatprep.subr.bf16.mxu0 %v22493_v30  ;;  %v22536_v15 = vld [vmem:[#allocation2 + $0xe30] ss:$40 sps:$4 sm:$0xff]  }
 0x74a   :  { %16349 = vmatprep.subr.bf16.mxu1 %v22529_v23  ;;  %v22575_v30 = vld [vmem:[#allocation6 + $0x5a0] ss:$16 sps:$4 sm:$0xff]  }
 0x74b   :  { %v22544_v23 = vld [vmem:[#allocation2 + $0xe84] ss:$40 sps:$4 sm:$0xff]  }
 0x74c   :  { %13896 = vmatpush1.bf16.msra.mxu0 %v22491_v13  ;;  %v22583_v13 = vld [vmem:[#allocation6 + $0x5c4] ss:$16 sps:$4 sm:$0xff]  }
 0x74d   :  { %16350 = vmatpush1.bf16.msra.mxu1 %v22527_v25  ;;  %13897 = vmatprep.subr.bf16.mxu0 %v22496_v26  ;;  %v22542_v25 = vld [vmem:[#allocation2 + $0xe80] ss:$40 sps:$4 sm:$0xff]  }
 0x74e   :  { %16351 = vmatprep.subr.bf16.mxu1 %v22535_v27  ;;  %v22581_v26 = vld [vmem:[#allocation6 + $0x5c0] ss:$16 sps:$4 sm:$0xff]  }
 0x74f   :  { %v22550_v27 = vld [vmem:[#allocation2 + $0xed4] ss:$40 sps:$4 sm:$0xff]  }
 0x750   :  { %13898 = vmatpush1.bf16.msra.mxu0 %v22494_v33  ;;  %v22589_v33 = vld [vmem:[#allocation6 + $0x5e4] ss:$16 sps:$4 sm:$0xff]  }
 0x751   :  { %16352 = vmatpush1.bf16.msra.mxu1 %v22533_v34  ;;  %13899 = vmatprep.subr.bf16.mxu0 %v22502_v60  ;;  %v22548_v34 = vld [vmem:[#allocation2 + $0xed0] ss:$40 sps:$4 sm:$0xff]  }
 0x752   :  { %16353 = vmatprep.subr.bf16.mxu1 %v22541_v38  ;;  %v22587_v60 = vld [vmem:[#allocation6 + $0x5e0] ss:$16 sps:$4 sm:$0xff]  }
 0x753   :  { %v22556_v38 = vld [vmem:[#allocation2 + $0xf24] ss:$40 sps:$4 sm:$0xff]  }
 0x754   :  { %13900 = vmatpush1.bf16.msra.mxu0 %v22500_v40  ;;  %v22595_v40 = vld [vmem:[#allocation6 + $0x604] ss:$16 sps:$4 sm:$0xff]  }
 0x755   :  { %16354 = vmatpush1.bf16.msra.mxu1 %v22539_v9  ;;  %13901 = vmatprep.subr.bf16.mxu0 %v22508_v44  ;;  %v22554_v9 = vld [vmem:[#allocation2 + $0xf20] ss:$40 sps:$4 sm:$0xff]   ;;  %v22562_v44 = vld [vmem:[#allocation2 + $0xf74] ss:$40 sps:$4 sm:$0xff]  }
 0x756   :  { %16355 = vmatprep.subr.bf16.mxu1 %v22547_v45  ;;  %v22560_v45 = vld [vmem:[#allocation2 + $0xf70] ss:$40 sps:$4 sm:$0xff]  }
 0x758   :  { %13902 = vmatpush1.bf16.msra.mxu0 %v22506_v46  ;;  %v22568_v46 = vld [vmem:[#allocation2 + $0xfc4] ss:$40 sps:$4 sm:$0xff]  }
 0x759   :  { %16356 = vmatpush1.bf16.msra.mxu1 %v22545_v31  ;;  %13903 = vmatprep.subr.bf16.mxu0 %v22514_v41  ;;  %v22566_v31 = vld [vmem:[#allocation2 + $0xfc0] ss:$40 sps:$4 sm:$0xff]   ;;  %v22574_v41 = vld [vmem:[#allocation2 + $0x1014] ss:$40 sps:$4 sm:$0xff]  }
 0x75a   :  { %16357 = vmatprep.subr.bf16.mxu1 %v22553_v21  ;;  %v22572_v21 = vld [vmem:[#allocation2 + $0x1010] ss:$40 sps:$4 sm:$0xff]  }
 0x75c   :  { %13904 = vmatpush1.bf16.msra.mxu0 %v22512_v0  ;;  %v22580_v0 = vld [vmem:[#allocation2 + $0x1064] ss:$40 sps:$4 sm:$0xff]  }
 0x75d   :  { %16358 = vmatpush1.bf16.msra.mxu1 %v22551_v1  ;;  %13905 = vmatprep.subr.bf16.mxu0 %v22520_v3  ;;  %v2119_v1 = vsub.s32 4, %v24080_v6  ;;  %v22578_v3 = vld [vmem:[#allocation2 + $0x1060] ss:$40 sps:$4 sm:$0xff]  }
 0x75e   :  { %16359 = vmatprep.subr.bf16.mxu1 %v22559_v53  ;;  %v2131_v53 = vsub.s32 7, %v24080_v6 }
 0x760   :  { %13906 = vmatpush1.bf16.msra.mxu0 %v22518_v54  ;;  %v2120_v54 = vrot.slane %v24085_v17, %v2119_v1  ;;  %v22608_v1 = vld [vmem:[#allocation2 + $0x11f0] ss:$40 sps:$4 sm:$0xff]  }
 0x761   :  { %16360 = vmatpush1.bf16.msra.mxu1 %v22557_v55  ;;  %13907 = vmatprep.subr.bf16.mxu0 %v22526_v58  ;;  %v2132_v58 = vrot.slane %v24085_v17, %v2131_v53  ;;  %v22611_v53 = vld [vmem:[#allocation6 + $0x660] ss:$16 sps:$4 sm:$0xff]  }
 0x762   :  { %16361 = vmatprep.subr.bf16.mxu1 %v22565_v59  ;;  %v22584_v59 = vld [vmem:[#allocation2 + $0x10b0] ss:$40 sps:$4 sm:$0xff]  }
 0x764   :  { %13908 = vmatpush1.bf16.msra.mxu0 %v22524_v32  ;;  %v22592_v32 = vld [vmem:[#allocation2 + $0x1104] ss:$40 sps:$4 sm:$0xff]  }
 0x765   :  { %16362 = vmatpush1.bf16.msra.mxu1 %v22563_v7  ;;  %13909 = vmatprep.subr.bf16.mxu0 %v22532_v5 }
 0x766   :  { %16363 = vmatprep.subr.bf16.mxu1 %v22571_v10 }
 0x768   :  { %13910 = vmatpush1.bf16.msra.mxu0 %v22530_v8 }
 0x769   :  { %16364 = vmatpush1.bf16.msra.mxu1 %v22569_v48  ;;  %13911 = vmatprep.subr.bf16.mxu0 %v22538_v14 }
 0x76a   :  { %16365 = vmatprep.subr.bf16.mxu1 %v22577_v19 }
 0x76c   :  { %13912 = vmatpush1.bf16.msra.mxu0 %v22536_v15 }
 0x76d   :  { %16366 = vmatpush1.bf16.msra.mxu1 %v22575_v30  ;;  %13913 = vmatprep.subr.bf16.mxu0 %v22544_v23  ;;  %v22590_v23 = vld [vmem:[#allocation2 + $0x1100] ss:$40 sps:$4 sm:$0xff]  }
 0x76e   :  { %16367 = vmatprep.subr.bf16.mxu1 %v22583_v13 }
 0x770   :  { %13914 = vmatpush1.bf16.msra.mxu0 %v22542_v25 }
 0x771   :  { %16368 = vmatpush1.bf16.msra.mxu1 %v22581_v26  ;;  %13915 = vmatprep.subr.bf16.mxu0 %v22550_v27 }
 0x772   :  { %16369 = vmatprep.subr.bf16.mxu1 %v22589_v33 }
 0x774   :  { %13916 = vmatpush1.bf16.msra.mxu0 %v22548_v34 }
 0x775   :  { %16370 = vmatpush1.bf16.msra.mxu1 %v22587_v60  ;;  %13926 = vmatprep.subr.bf16.mxu0 %v22556_v38  ;;  %v22593_v60 = vld [vmem:[#allocation6 + $0x600] ss:$16 sps:$4 sm:$0xff]  }
 0x776   :  { %16380 = vmatprep.subr.bf16.mxu1 %v22595_v40  ;;  %v22596_v38 = vld [vmem:[#allocation2 + $0x1150] ss:$40 sps:$4 sm:$0xff]  }
 0x777   :  { %13918 = vmatmul.mubr.bf16.vlgmr.msra.gmra.mrb[8].mxu0 %v23869_v20  ;;  %v2123_v20 = vsub.s32 5, %v24080_v6 }
 0x778   :  { %13927 = vmatpush1.bf16.msra.mxu0 %v22554_v9  ;;  %13958 = vmatprep.mubr.bf16.mxu0 %v23878_v24  ;;  %v22586_v24 = vld [vmem:[#allocation2 + $0x10b4] ss:$40 sps:$4 sm:$0xff]  }
 0x779   :  { %13928 = vmatprep.subr.bf16.mxu0 %v22562_v44  ;;  %v2124_v55 = vrot.slane %v24085_v17, %v2123_v20  ;;  %v22598_v17 = vld [vmem:[#allocation2 + $0x1154] ss:$40 sps:$4 sm:$0xff]   ;;  %v22604_v44 = vld [vmem:[#allocation2 + $0x11a4] ss:$40 sps:$4 sm:$0xff]  }
 0x77a   :  { %v22601_v9 = vld [vmem:[#allocation6 + $0x624] ss:$16 sps:$4 sm:$0xff]  }
 0x77b   :  { %v22616_v20 = vld [vmem:[#allocation2 + $0x1244] ss:$40 sps:$4 sm:$0xff]  }
 0x77c   :  { %13929 = vmatpush1.bf16.msra.mxu0 %v22560_v45 }
 0x77d   :  { %13930 = vmatprep.subr.bf16.mxu0 %v22568_v46  ;;  %v22599_v46 = vld [vmem:[#allocation6 + $0x620] ss:$16 sps:$4 sm:$0xff]  }
 0x780   :  { %13931 = vmatpush1.bf16.msra.mxu0 %v22566_v31  ;;  %v22602_v31 = vld [vmem:[#allocation2 + $0x11a0] ss:$40 sps:$4 sm:$0xff]  }
 0x781   :  { %13932 = vmatprep.subr.bf16.mxu0 %v22574_v41  ;;  %v22607_v41 = vld [vmem:[#allocation6 + $0x644] ss:$16 sps:$4 sm:$0xff]  }
 0x784   :  { %13933 = vmatpush1.bf16.msra.mxu0 %v22572_v21  ;;  %v22610_v21 = vld [vmem:[#allocation2 + $0x11f4] ss:$40 sps:$4 sm:$0xff]  }
 0x785   :  { %13934 = vmatprep.subr.bf16.mxu0 %v22580_v0  ;;  %v22605_v0 = vld [vmem:[#allocation6 + $0x640] ss:$16 sps:$4 sm:$0xff]  }
 0x788   :  { %13935 = vmatpush1.bf16.msra.mxu0 %v22578_v3  ;;  %v22613_v3 = vld [vmem:[#allocation6 + $0x664] ss:$16 sps:$4 sm:$0xff]  }
 0x789   :  { %13936 = vmatprep.subr.bf16.mxu0 %v22586_v24  ;;  %v22614_v24 = vld [vmem:[#allocation2 + $0x1240] ss:$40 sps:$4 sm:$0xff]  }
 0x78a   :  { %v13304_v7 = vpop.f32.mrb[4].mxu0 }
 0x78b   :  { %v24133_v5 = vpop.f32.mrb[4].mxu1  ;;  %v19676_v10 = vadd.f32 %v13304_v7, %v2120_v54  ;;  %v13306_v8 = vpop.f32.mrb[5].mxu0  ;;  %v22619_v54 = vld [vmem:[#allocation6 + $0x684] ss:$16 sps:$4 sm:$0xff]  }
 0x78c   :  { %v13798_v48 = vpop.f32.mrb[5].mxu1  ;;  %v19677_v14 = vadd.f32 %v13306_v8, %v2124_v55  ;;  %v13308_v15 = vpop.f32.mrb[6].mxu0  ;;  %13937 = vmatpush1.bf16.msra.mxu0 %v22584_v59  ;;  %v22622_v55 = vld [vmem:[#allocation2 + $0x1294] ss:$40 sps:$4 sm:$0xff]   ;;  %v22620_v59 = vld [vmem:[#allocation2 + $0x1290] ss:$40 sps:$4 sm:$0xff]  }
 0x78d   :  { %v19679_v19 = vadd.f32 %v13798_v48, %v2132_v58  ;;  %v13800_v30 = vpop.f32.mrb[6].mxu1  ;;  %v14299_v13 = vmax.f32 %v19676_v10, 0.0  ;;  %v13309_v25 = vpop.f32.mrb[7].mxu0  ;;  %13938 = vmatprep.subr.bf16.mxu0 %v22592_v32  ;;  %v22617_v58 = vld [vmem:[#allocation6 + $0x680] ss:$16 sps:$4 sm:$0xff]  }
 0x78e   :  { %v13801_v26 = vpop.f32.mrb[7].mxu1  ;;  %v14300_v27 = vmax.f32 %v19677_v14, 0.0  ;;  %v22625_v32 = vld [vmem:[#allocation6 + $0x6a4] ss:$16 sps:$4 sm:$0xff]   ;;  %v22623_v10 = vld [vmem:[#allocation6 + $0x6a0] ss:$16 sps:$4 sm:$0xff]  }
 0x78f   :  { %v14302_v33 = vmax.f32 %v19679_v19, 0.0  ;;  %v24137_v40 = vpack.c.bf16 %v14299_v13, %v14299_v13  ;;  %v22628_v7 = vld [vmem:[#allocation2 + $0x12e4] ss:$40 sps:$4 sm:$0xff]   ;;  %v22626_v8 = vld [vmem:[#allocation2 + $0x12e0] ss:$40 sps:$4 sm:$0xff]  }
 0x790   :  { %v24135_v34 = vpack.c.bf16 %v14300_v27, %v14300_v27  ;;  %13939 = vmatpush1.bf16.msra.mxu0 %v22590_v23  ;;  %v22631_v48 = vld [vmem:[#allocation6 + $0x6c4] ss:$16 sps:$4 sm:$0xff]   ;;  %v22629_v19 = vld [vmem:[#allocation6 + $0x6c0] ss:$16 sps:$4 sm:$0xff]  }
 0x791   :  { %13940 = vmatprep.subr.bf16.mxu0 %v22598_v17  ;;  %v24140_v45 = vpack.c.bf16 %v14302_v33, %v14302_v33  ;;  %v22634_v14 = vld [vmem:[#allocation2 + $0x1334] ss:$40 sps:$4 sm:$0xff]   ;;  %v22632_v15 = vld [vmem:[#allocation2 + $0x1330] ss:$40 sps:$4 sm:$0xff]   ;;  %v22640_v23 = vld [vmem:[#allocation2 + $0x1384] ss:$40 sps:$4 sm:$0xff]  }
 0x792   :  { %16371 = vmatprep.mubr.bf16.mxu1 %v24135_v34  ;;  %v22637_v30 = vld [vmem:[#allocation6 + $0x6e4] ss:$16 sps:$4 sm:$0xff]   ;;  %v22635_v13 = vld [vmem:[#allocation6 + $0x6e0] ss:$16 sps:$4 sm:$0xff]  }
 0x793   :  { %16372 = vmatmul.mubr.bf16.vlgmr.msra.gmra.mrb[8].mxu1 %v24137_v40  ;;  %v22638_v25 = vld [vmem:[#allocation2 + $0x1380] ss:$40 sps:$4 sm:$0xff]   ;;  %v22646_v17 = vld [vmem:[#allocation2 + $0x13d4] ss:$40 sps:$4 sm:$0xff]   ;;  %v22644_v33 = vld [vmem:[#allocation2 + $0x13d0] ss:$40 sps:$4 sm:$0xff]  }
 0x794   :  { %16381 = vmatpush1.bf16.msra.mxu1 %v22593_v60  ;;  %13941 = vmatpush1.bf16.msra.mxu0 %v22596_v38  ;;  %v22643_v26 = vld [vmem:[#allocation6 + $0x704] ss:$16 sps:$4 sm:$0xff]   ;;  %v22641_v27 = vld [vmem:[#allocation6 + $0x700] ss:$16 sps:$4 sm:$0xff]  }
 0x795   :  { %16412 = vmatprep.mubr.bf16.mxu1 %v24140_v45  ;;  %16382 = vmatprep.subr.bf16.mxu1 %v22601_v9  ;;  %v22649_v60 = vld [vmem:[#allocation6 + $0x724] ss:$16 sps:$4 sm:$0xff]   ;;  %v22647_v9 = vld [vmem:[#allocation6 + $0x720] ss:$16 sps:$4 sm:$0xff]  }
 0x796   :  { %13942 = vmatprep.subr.bf16.mxu0 %v22604_v44  ;;  %v22652_v38 = vld [vmem:[#allocation2 + $0x1424] ss:$40 sps:$4 sm:$0xff]   ;;  %v22650_v44 = vld [vmem:[#allocation2 + $0x1420] ss:$40 sps:$4 sm:$0xff]  }
 0x798   :  { %16383 = vmatpush1.bf16.msra.mxu1 %v22599_v46  ;;  %13943 = vmatpush1.bf16.msra.mxu0 %v22602_v31  ;;  %v22655_v46 = vld [vmem:[#allocation6 + $0x744] ss:$16 sps:$4 sm:$0xff]  }
 0x799   :  { %16384 = vmatprep.subr.bf16.mxu1 %v22607_v41  ;;  %13944 = vmatprep.subr.bf16.mxu0 %v22610_v21  ;;  %v22658_v31 = vld [vmem:[#allocation2 + $0x1474] ss:$40 sps:$4 sm:$0xff]   ;;  %v22656_v21 = vld [vmem:[#allocation2 + $0x1470] ss:$40 sps:$4 sm:$0xff]  }
 0x79a   :  { %v22653_v41 = vld [vmem:[#allocation6 + $0x740] ss:$16 sps:$4 sm:$0xff]  }
 0x79c   :  { %16385 = vmatpush1.bf16.msra.mxu1 %v22605_v0  ;;  %13945 = vmatpush1.bf16.msra.mxu0 %v22608_v1  ;;  %v22661_v0 = vld [vmem:[#allocation6 + $0x764] ss:$16 sps:$4 sm:$0xff]  }
 0x79d   :  { %16386 = vmatprep.subr.bf16.mxu1 %v22613_v3  ;;  %13946 = vmatprep.subr.bf16.mxu0 %v22616_v20  ;;  %v22664_v1 = vld [vmem:[#allocation2 + $0x14c4] ss:$40 sps:$4 sm:$0xff]   ;;  %v22662_v20 = vld [vmem:[#allocation2 + $0x14c0] ss:$40 sps:$4 sm:$0xff]  }
 0x79e   :  { %v22659_v3 = vld [vmem:[#allocation6 + $0x760] ss:$16 sps:$4 sm:$0xff]  }
 0x7a0   :  { %16387 = vmatpush1.bf16.msra.mxu1 %v22611_v53  ;;  %13947 = vmatpush1.bf16.msra.mxu0 %v22614_v24  ;;  %v22667_v53 = vld [vmem:[#allocation6 + $0x784] ss:$16 sps:$4 sm:$0xff]  }
 0x7a1   :  { %16388 = vmatprep.subr.bf16.mxu1 %v22619_v54  ;;  %13948 = vmatprep.subr.bf16.mxu0 %v22622_v55  ;;  %v22670_v24 = vld [vmem:[#allocation2 + $0x1514] ss:$40 sps:$4 sm:$0xff]   ;;  %v22668_v54 = vld [vmem:[#allocation2 + $0x1510] ss:$40 sps:$4 sm:$0xff]   ;;  %v2127_v55 = vsub.s32 6, %v24080_v6  ;;  %v23374_v6 = vld [vmem:[#allocation12 + $0x10] sm:$0xff]  }
 0x7a4   :  { %16389 = vmatpush1.bf16.msra.mxu1 %v22617_v58  ;;  %13949 = vmatpush1.bf16.msra.mxu0 %v22620_v59  ;;  %v22673_v58 = vld [vmem:[#allocation6 + $0x7a4] ss:$16 sps:$4 sm:$0xff]  }
 0x7a5   :  { %16390 = vmatprep.subr.bf16.mxu1 %v22625_v32  ;;  %13950 = vmatprep.subr.bf16.mxu0 %v22628_v7  ;;  %v22676_v59 = vld [vmem:[#allocation2 + $0x1564] ss:$40 sps:$4 sm:$0xff]   ;;  %v22674_v32 = vld [vmem:[#allocation2 + $0x1560] ss:$40 sps:$4 sm:$0xff]  }
 0x7a6   :  { %v23388_v7 = vld [vmem:[#allocation4] sm:$0xff] }
 0x7a8   :  { %16391 = vmatpush1.bf16.msra.mxu1 %v22623_v10  ;;  %13951 = vmatpush1.bf16.msra.mxu0 %v22626_v8  ;;  %v2128_v10 = vrot.slane %v23388_v7, %v2127_v55  ;;  %v22679_v8 = vld [vmem:[#allocation6 + $0x7c4] ss:$16 sps:$4 sm:$0xff]  }
 0x7a9   :  { %16392 = vmatprep.subr.bf16.mxu1 %v22631_v48  ;;  %13952 = vmatprep.subr.bf16.mxu0 %v22634_v14  ;;  %v22682_v48 = vld [vmem:[#allocation2 + $0x15b4] ss:$40 sps:$4 sm:$0xff]   ;;  %v22716_v55 = vld [vmem:[#allocation2 + $0x1920] ss:$40 sps:$4 sm:$0xff]  }
 0x7aa   :  { %v22677_v14 = vld [vmem:[#allocation6 + $0x7c0] ss:$16 sps:$4 sm:$0xff]  }
 0x7ab   :  { %v22727_v7 = vld [vmem:[#allocation2 + $0x1a14] ss:$40 sps:$4 sm:$0xff]  }
 0x7ac   :  { %16393 = vmatpush1.bf16.msra.mxu1 %v22629_v19  ;;  %13953 = vmatpush1.bf16.msra.mxu0 %v22632_v15  ;;  %v22680_v19 = vld [vmem:[#allocation2 + $0x15b0] ss:$40 sps:$4 sm:$0xff]   ;;  %v19678_v15 = vadd.f32 %v24133_v5, %v2128_v10  ;;  %v22692_v5 = vld [vmem:[#allocation2 + $0x16a0] ss:$40 sps:$4 sm:$0xff]  }
 0x7ad   :  { %16394 = vmatprep.subr.bf16.mxu1 %v22637_v30  ;;  %13954 = vmatprep.subr.bf16.mxu0 %v22640_v23  ;;  %v22685_v30 = vld [vmem:[#allocation6 + $0x7e4] ss:$16 sps:$4 sm:$0xff]  }
 0x7ae   :  { %v22688_v23 = vld [vmem:[#allocation2 + $0x1604] ss:$40 sps:$4 sm:$0xff]   ;;  %v22725_v10 = vld [vmem:[#allocation2 + $0x1a10] ss:$40 sps:$4 sm:$0xff]  }
 0x7b0   :  { %16395 = vmatpush1.bf16.msra.mxu1 %v22635_v13  ;;  %13955 = vmatpush1.bf16.msra.mxu0 %v22638_v25  ;;  %v22683_v13 = vld [vmem:[#allocation6 + $0x7e0] ss:$16 sps:$4 sm:$0xff]  }
 0x7b1   :  { %16396 = vmatprep.subr.bf16.mxu1 %v22643_v26  ;;  %13956 = vmatprep.subr.bf16.mxu0 %v22646_v17  ;;  %v22686_v25 = vld [vmem:[#allocation2 + $0x1600] ss:$40 sps:$4 sm:$0xff]   ;;  %v14301_v26 = vmax.f32 %v19678_v15, 0.0  ;;  %v22691_v17 = vld [vmem:[#allocation2 + $0x1654] ss:$40 sps:$4 sm:$0xff]  }
 0x7b2   :  { %v22739_v15 = vld [vmem:[#allocation2 + $0x1b54] ss:$40 sps:$4 sm:$0xff]  }
 0x7b4   :  { %16397 = vmatpush1.bf16.msra.mxu1 %v22641_v27  ;;  %13957 = vmatpush1.bf16.msra.mxu0 %v22644_v33  ;;  %v22689_v27 = vld [vmem:[#allocation2 + $0x1650] ss:$40 sps:$4 sm:$0xff]   ;;  %v24148_v33 = vpack.c.bf16 %v14301_v26, %v14301_v26 }
 0x7b5   :  { %16398 = vmatprep.subr.bf16.mxu1 %v22649_v60  ;;  %13967 = vmatprep.subr.bf16.mxu0 %v22652_v38  ;;  %v22694_v60 = vld [vmem:[#allocation2 + $0x16a4] ss:$40 sps:$4 sm:$0xff]   ;;  %v22697_v38 = vld [vmem:[#allocation2 + $0x16f4] ss:$40 sps:$4 sm:$0xff]   ;;  %v22743_v26 = vld [vmem:[#allocation2 + $0x1bf0] ss:$40 sps:$4 sm:$0xff]  }
 0x7b7   :  { %13959 = vmatmul.mubr.bf16.vlgmr.msra.gmra.mrb[8].mxu0 %v23886_v29  ;;  %v22665_v29 = vld [vmem:[#allocation6 + $0x780] ss:$16 sps:$4 sm:$0xff]  }
 0x7b8   :  { %16399 = vmatpush1.bf16.msra.mxu1 %v22647_v9  ;;  %13968 = vmatpush1.bf16.msra.mxu0 %v22650_v44  ;;  %v22695_v9 = vld [vmem:[#allocation2 + $0x16f0] ss:$40 sps:$4 sm:$0xff]   ;;  %v22700_v44 = vld [vmem:[#allocation2 + $0x1744] ss:$40 sps:$4 sm:$0xff]  }
 0x7b9   :  { %16400 = vmatprep.subr.bf16.mxu1 %v22655_v46  ;;  %13969 = vmatprep.subr.bf16.mxu0 %v22658_v31  ;;  %v22698_v46 = vld [vmem:[#allocation2 + $0x1740] ss:$40 sps:$4 sm:$0xff]   ;;  %v22703_v31 = vld [vmem:[#allocation2 + $0x1794] ss:$40 sps:$4 sm:$0xff]  }
 0x7ba   :  { %13999 = vmatprep.mubr.bf16.mxu0 %v23895_v35  ;;  %v22671_v35 = vld [vmem:[#allocation6 + $0x7a0] ss:$16 sps:$4 sm:$0xff]  }
 0x7bc   :  { %16401 = vmatpush1.bf16.msra.mxu1 %v22653_v41  ;;  %13970 = vmatpush1.bf16.msra.mxu0 %v22656_v21  ;;  %v22701_v41 = vld [vmem:[#allocation2 + $0x1790] ss:$40 sps:$4 sm:$0xff]   ;;  %v22706_v21 = vld [vmem:[#allocation2 + $0x17e4] ss:$40 sps:$4 sm:$0xff]  }
 0x7bd   :  { %16402 = vmatprep.subr.bf16.mxu1 %v22661_v0  ;;  %13971 = vmatprep.subr.bf16.mxu0 %v22664_v1  ;;  %v22704_v0 = vld [vmem:[#allocation2 + $0x17e0] ss:$40 sps:$4 sm:$0xff]   ;;  %v22709_v1 = vld [vmem:[#allocation2 + $0x1834] ss:$40 sps:$4 sm:$0xff]  }
 0x7c0   :  { %16403 = vmatpush1.bf16.msra.mxu1 %v22659_v3  ;;  %13972 = vmatpush1.bf16.msra.mxu0 %v22662_v20  ;;  %v22707_v3 = vld [vmem:[#allocation2 + $0x1830] ss:$40 sps:$4 sm:$0xff]   ;;  %v22712_v20 = vld [vmem:[#allocation2 + $0x1884] ss:$40 sps:$4 sm:$0xff]  }
 0x7c1   :  { %16404 = vmatprep.subr.bf16.mxu1 %v22667_v53  ;;  %13973 = vmatprep.subr.bf16.mxu0 %v22670_v24  ;;  %v22710_v53 = vld [vmem:[#allocation2 + $0x1880] ss:$40 sps:$4 sm:$0xff]   ;;  %v22715_v24 = vld [vmem:[#allocation2 + $0x18d4] ss:$40 sps:$4 sm:$0xff]  }
 0x7c4   :  { %16405 = vmatpush1.bf16.msra.mxu1 %v22665_v29  ;;  %13974 = vmatpush1.bf16.msra.mxu0 %v22668_v54  ;;  %v22713_v29 = vld [vmem:[#allocation2 + $0x18d0] ss:$40 sps:$4 sm:$0xff]   ;;  %v22718_v54 = vld [vmem:[#allocation2 + $0x1924] ss:$40 sps:$4 sm:$0xff]  }
 0x7c5   :  { %16406 = vmatprep.subr.bf16.mxu1 %v22673_v58  ;;  %13975 = vmatprep.subr.bf16.mxu0 %v22676_v59  ;;  %v22721_v58 = vld [vmem:[#allocation2 + $0x1974] ss:$40 sps:$4 sm:$0xff]   ;;  %v22719_v59 = vld [vmem:[#allocation2 + $0x1970] ss:$40 sps:$4 sm:$0xff]  }
 0x7c8   :  { %16407 = vmatpush1.bf16.msra.mxu1 %v22671_v35  ;;  %13976 = vmatpush1.bf16.msra.mxu0 %v22674_v32  ;;  %v22724_v35 = vld [vmem:[#allocation2 + $0x19c4] ss:$40 sps:$4 sm:$0xff]   ;;  %v22722_v32 = vld [vmem:[#allocation2 + $0x19c0] ss:$40 sps:$4 sm:$0xff]  }
 0x7c9   :  { %16408 = vmatprep.subr.bf16.mxu1 %v22679_v8  ;;  %13977 = vmatprep.subr.bf16.mxu0 %v22682_v48  ;;  %v22730_v8 = vld [vmem:[#allocation2 + $0x1a64] ss:$40 sps:$4 sm:$0xff]   ;;  %v22728_v48 = vld [vmem:[#allocation2 + $0x1a60] ss:$40 sps:$4 sm:$0xff]  }
 0x7cc   :  { %16409 = vmatpush1.bf16.msra.mxu1 %v22677_v14  ;;  %13978 = vmatpush1.bf16.msra.mxu0 %v22680_v19  ;;  %v22733_v14 = vld [vmem:[#allocation2 + $0x1ab4] ss:$40 sps:$4 sm:$0xff]   ;;  %v22736_v19 = vld [vmem:[#allocation2 + $0x1b04] ss:$40 sps:$4 sm:$0xff]  }
 0x7cd   :  { %16410 = vmatprep.subr.bf16.mxu1 %v22685_v30  ;;  %13979 = vmatprep.subr.bf16.mxu0 %v22688_v23  ;;  %v22737_v30 = vld [vmem:[#allocation2 + $0x1b50] ss:$40 sps:$4 sm:$0xff]   ;;  %v22742_v23 = vld [vmem:[#allocation2 + $0x1ba4] ss:$40 sps:$4 sm:$0xff]  }
 0x7d0   :  { %16411 = vmatpush1.bf16.msra.mxu1 %v22683_v13  ;;  %13980 = vmatpush1.bf16.msra.mxu0 %v22686_v25  ;;  %v22740_v13 = vld [vmem:[#allocation2 + $0x1ba0] ss:$40 sps:$4 sm:$0xff]   ;;  %v22745_v25 = vld [vmem:[#allocation2 + $0x1bf4] ss:$40 sps:$4 sm:$0xff]  }
 0x7d1   :  { %13981 = vmatprep.subr.bf16.mxu0 %v22691_v17  ;;  %v22748_v17 = vld [vmem:[#allocation2 + $0x1c44] ss:$40 sps:$4 sm:$0xff]  }
 0x7d3   :  { %16413 = vmatmul.mubr.bf16.vlgmr.msra.gmra.mrb[8].mxu1 %v24148_v33 }
 0x7d4   :  { %13982 = vmatpush1.bf16.msra.mxu0 %v22689_v27  ;;  %v22746_v27 = vld [vmem:[#allocation2 + $0x1c40] ss:$40 sps:$4 sm:$0xff]  }
 0x7d5   :  { %13983 = vmatprep.subr.bf16.mxu0 %v22694_v60  ;;  %v22751_v60 = vld [vmem:[#allocation2 + $0x1c94] ss:$40 sps:$4 sm:$0xff]  }
 0x7d8   :  { %13984 = vmatpush1.bf16.msra.mxu0 %v22692_v5  ;;  %v22749_v5 = vld [vmem:[#allocation2 + $0x1c90] ss:$40 sps:$4 sm:$0xff]  }
 0x7d9   :  { %13985 = vmatprep.subr.bf16.mxu0 %v22697_v38  ;;  %v22754_v38 = vld [vmem:[#allocation2 + $0x1ce4] ss:$40 sps:$4 sm:$0xff]  }
 0x7dc   :  { %13986 = vmatpush1.bf16.msra.mxu0 %v22695_v9  ;;  %v22752_v9 = vld [vmem:[#allocation2 + $0x1ce0] ss:$40 sps:$4 sm:$0xff]  }
 0x7dd   :  { %13987 = vmatprep.subr.bf16.mxu0 %v22700_v44  ;;  %v22757_v44 = vld [vmem:[#allocation2 + $0x1d34] ss:$40 sps:$4 sm:$0xff]  }
 0x7e0   :  { %13988 = vmatpush1.bf16.msra.mxu0 %v22698_v46  ;;  %v22755_v46 = vld [vmem:[#allocation2 + $0x1d30] ss:$40 sps:$4 sm:$0xff]  }
 0x7e1   :  { %13989 = vmatprep.subr.bf16.mxu0 %v22703_v31  ;;  %v22760_v31 = vld [vmem:[#allocation2 + $0x1d84] ss:$40 sps:$4 sm:$0xff]  }
 0x7e4   :  { %13990 = vmatpush1.bf16.msra.mxu0 %v22701_v41  ;;  %v22758_v41 = vld [vmem:[#allocation2 + $0x1d80] ss:$40 sps:$4 sm:$0xff]  }
 0x7e5   :  { %13991 = vmatprep.subr.bf16.mxu0 %v22706_v21  ;;  %v22763_v21 = vld [vmem:[#allocation2 + $0x1dd4] ss:$40 sps:$4 sm:$0xff]  }
 0x7e8   :  { %13992 = vmatpush1.bf16.msra.mxu0 %v22704_v0  ;;  %v22761_v0 = vld [vmem:[#allocation2 + $0x1dd0] ss:$40 sps:$4 sm:$0xff]  }
 0x7e9   :  { %13993 = vmatprep.subr.bf16.mxu0 %v22709_v1  ;;  %v22766_v1 = vld [vmem:[#allocation2 + $0x1e24] ss:$40 sps:$4 sm:$0xff]  }
 0x7ec   :  { %13994 = vmatpush1.bf16.msra.mxu0 %v22707_v3  ;;  %v22764_v3 = vld [vmem:[#allocation2 + $0x1e20] ss:$40 sps:$4 sm:$0xff]  }
 0x7ed   :  { %13995 = vmatprep.subr.bf16.mxu0 %v22712_v20  ;;  %v22769_v20 = vld [vmem:[#allocation2 + $0x1e74] ss:$40 sps:$4 sm:$0xff]  }
 0x7f0   :  { %13996 = vmatpush1.bf16.msra.mxu0 %v22710_v53  ;;  %v22767_v53 = vld [vmem:[#allocation2 + $0x1e70] ss:$40 sps:$4 sm:$0xff]  }
 0x7f1   :  { %13997 = vmatprep.subr.bf16.mxu0 %v22715_v24  ;;  %v22772_v24 = vld [vmem:[#allocation2 + $0x1ec4] ss:$40 sps:$4 sm:$0xff]  }
 0x7f4   :  { %13998 = vmatpush1.bf16.msra.mxu0 %v22713_v29  ;;  %v22770_v29 = vld [vmem:[#allocation2 + $0x1ec0] ss:$40 sps:$4 sm:$0xff]  }
 0x7f5   :  { %14008 = vmatprep.subr.bf16.mxu0 %v22718_v54  ;;  %v22775_v54 = vld [vmem:[#allocation2 + $0x1f14] ss:$40 sps:$4 sm:$0xff]  }
 0x7f7   :  { %14000 = vmatmul.mubr.bf16.vlgmr.msra.gmra.mrb[8].mxu0 %v23908_v42  ;;  %v22731_v42 = vld [vmem:[#allocation2 + $0x1ab0] ss:$40 sps:$4 sm:$0xff]  }
 0x7f8   :  { %14009 = vmatpush1.bf16.msra.mxu0 %v22716_v55  ;;  %14040 = vmatprep.mubr.bf16.mxu0 %v23912_v47  ;;  %v22734_v47 = vld [vmem:[#allocation2 + $0x1b00] ss:$40 sps:$4 sm:$0xff]   ;;  %v22773_v55 = vld [vmem:[#allocation2 + $0x1f10] ss:$40 sps:$4 sm:$0xff]  }
 0x7f9   :  { %14010 = vmatprep.subr.bf16.mxu0 %v22721_v58  ;;  %v22778_v58 = vld [vmem:[#allocation2 + $0x1f64] ss:$40 sps:$4 sm:$0xff]  }
 0x7fc   :  { %14011 = vmatpush1.bf16.msra.mxu0 %v22719_v59  ;;  %v22776_v59 = vld [vmem:[#allocation2 + $0x1f60] ss:$40 sps:$4 sm:$0xff]  }
 0x7fd   :  { %14012 = vmatprep.subr.bf16.mxu0 %v22724_v35  ;;  %v22781_v35 = vld [vmem:[#allocation2 + $0x1fb4] ss:$40 sps:$4 sm:$0xff]  }
 0x800   :  { %14013 = vmatpush1.bf16.msra.mxu0 %v22722_v32  ;;  %v22784_v32 = vld [vmem:[#allocation2 + $0x2004] ss:$40 sps:$4 sm:$0xff]  }
 0x801   :  { %14014 = vmatprep.subr.bf16.mxu0 %v22727_v7  ;;  %v22787_v7 = vld [vmem:[#allocation2 + $0x2054] ss:$40 sps:$4 sm:$0xff]  }
 0x804   :  { %14015 = vmatpush1.bf16.msra.mxu0 %v22725_v10  ;;  %v22785_v10 = vld [vmem:[#allocation2 + $0x2050] ss:$40 sps:$4 sm:$0xff]  }
 0x805   :  { %14016 = vmatprep.subr.bf16.mxu0 %v22730_v8  ;;  %v22790_v8 = vld [vmem:[#allocation2 + $0x20a4] ss:$40 sps:$4 sm:$0xff]  }
 0x808   :  { %14017 = vmatpush1.bf16.msra.mxu0 %v22728_v48  ;;  %v22788_v48 = vld [vmem:[#allocation2 + $0x20a0] ss:$40 sps:$4 sm:$0xff]  }
 0x809   :  { %14018 = vmatprep.subr.bf16.mxu0 %v22733_v14  ;;  %v22793_v14 = vld [vmem:[#allocation2 + $0x20f4] ss:$40 sps:$4 sm:$0xff]  }
 0x80c   :  { %14019 = vmatpush1.bf16.msra.mxu0 %v22731_v42  ;;  %v22791_v42 = vld [vmem:[#allocation2 + $0x20f0] ss:$40 sps:$4 sm:$0xff]  }
 0x80d   :  { %14020 = vmatprep.subr.bf16.mxu0 %v22736_v19  ;;  %v22796_v19 = vld [vmem:[#allocation2 + $0x2144] ss:$40 sps:$4 sm:$0xff]  }
 0x810   :  { %14021 = vmatpush1.bf16.msra.mxu0 %v22734_v47  ;;  %v22794_v47 = vld [vmem:[#allocation2 + $0x2140] ss:$40 sps:$4 sm:$0xff]  }
 0x811   :  { %14022 = vmatprep.subr.bf16.mxu0 %v22739_v15  ;;  %v22799_v15 = vld [vmem:[#allocation2 + $0x2194] ss:$40 sps:$4 sm:$0xff]  }
 0x814   :  { %14023 = vmatpush1.bf16.msra.mxu0 %v22737_v30  ;;  %v22797_v30 = vld [vmem:[#allocation2 + $0x2190] ss:$40 sps:$4 sm:$0xff]  }
 0x815   :  { %14024 = vmatprep.subr.bf16.mxu0 %v22742_v23  ;;  %v22802_v23 = vld [vmem:[#allocation2 + $0x21e4] ss:$40 sps:$4 sm:$0xff]  }
 0x818   :  { %14025 = vmatpush1.bf16.msra.mxu0 %v22740_v13  ;;  %v22800_v13 = vld [vmem:[#allocation2 + $0x21e0] ss:$40 sps:$4 sm:$0xff]  }
 0x819   :  { %14026 = vmatprep.subr.bf16.mxu0 %v22745_v25  ;;  %v22805_v25 = vld [vmem:[#allocation2 + $0x2234] ss:$40 sps:$4 sm:$0xff]  }
 0x81c   :  { %14027 = vmatpush1.bf16.msra.mxu0 %v22743_v26  ;;  %v22803_v26 = vld [vmem:[#allocation2 + $0x2230] ss:$40 sps:$4 sm:$0xff]  }
 0x81d   :  { %14028 = vmatprep.subr.bf16.mxu0 %v22748_v17  ;;  %v22808_v17 = vld [vmem:[#allocation2 + $0x2284] ss:$40 sps:$4 sm:$0xff]  }
 0x820   :  { %14029 = vmatpush1.bf16.msra.mxu0 %v22746_v27  ;;  %v22806_v27 = vld [vmem:[#allocation2 + $0x2280] ss:$40 sps:$4 sm:$0xff]  }
 0x821   :  { %14030 = vmatprep.subr.bf16.mxu0 %v22751_v60  ;;  %v22811_v60 = vld [vmem:[#allocation2 + $0x22d4] ss:$40 sps:$4 sm:$0xff]  }
 0x824   :  { %14031 = vmatpush1.bf16.msra.mxu0 %v22749_v5  ;;  %v22809_v5 = vld [vmem:[#allocation2 + $0x22d0] ss:$40 sps:$4 sm:$0xff]  }
 0x825   :  { %14032 = vmatprep.subr.bf16.mxu0 %v22754_v38  ;;  %v22814_v38 = vld [vmem:[#allocation2 + $0x2324] ss:$40 sps:$4 sm:$0xff]  }
 0x828   :  { %14033 = vmatpush1.bf16.msra.mxu0 %v22752_v9  ;;  %v22812_v9 = vld [vmem:[#allocation2 + $0x2320] ss:$40 sps:$4 sm:$0xff]  }
 0x829   :  { %14034 = vmatprep.subr.bf16.mxu0 %v22757_v44  ;;  %v22817_v44 = vld [vmem:[#allocation2 + $0x2374] ss:$40 sps:$4 sm:$0xff]  }
 0x82c   :  { %14035 = vmatpush1.bf16.msra.mxu0 %v22755_v46  ;;  %v22815_v46 = vld [vmem:[#allocation2 + $0x2370] ss:$40 sps:$4 sm:$0xff]  }
 0x82d   :  { %14036 = vmatprep.subr.bf16.mxu0 %v22760_v31  ;;  %v22820_v31 = vld [vmem:[#allocation2 + $0x23c4] ss:$40 sps:$4 sm:$0xff]  }
 0x830   :  { %14037 = vmatpush1.bf16.msra.mxu0 %v22758_v41  ;;  %v22818_v41 = vld [vmem:[#allocation2 + $0x23c0] ss:$40 sps:$4 sm:$0xff]  }
 0x831   :  { %14038 = vmatprep.subr.bf16.mxu0 %v22763_v21  ;;  %v22823_v21 = vld [vmem:[#allocation2 + $0x2414] ss:$40 sps:$4 sm:$0xff]  }
 0x834   :  { %14039 = vmatpush1.bf16.msra.mxu0 %v22761_v0  ;;  %v22821_v0 = vld [vmem:[#allocation2 + $0x2410] ss:$40 sps:$4 sm:$0xff]  }
 0x835   :  { %14049 = vmatprep.subr.bf16.mxu0 %v22766_v1  ;;  %v22826_v1 = vld [vmem:[#allocation2 + $0x2464] ss:$40 sps:$4 sm:$0xff]  }
 0x837   :  { %14041 = vmatmul.mubr.bf16.vlgmr.msra.gmra.mrb[8].mxu0 %v23925_v57  ;;  %v22779_v57 = vld [vmem:[#allocation2 + $0x1fb0] ss:$40 sps:$4 sm:$0xff]  }
 0x838   :  { %14050 = vmatpush1.bf16.msra.mxu0 %v22764_v3  ;;  %14081 = vmatprep.mubr.bf16.mxu0 %v23929_v62  ;;  %v22782_v62 = vld [vmem:[#allocation2 + $0x2000] ss:$40 sps:$4 sm:$0xff]  }
 0x839   :  { %14051 = vmatprep.subr.bf16.mxu0 %v22769_v20  ;;  %v22824_v3 = vld [vmem:[#allocation2 + $0x2460] ss:$40 sps:$4 sm:$0xff]   ;;  %v22829_v20 = vld [vmem:[#allocation2 + $0x24b4] ss:$40 sps:$4 sm:$0xff]  }
 0x83c   :  { %14052 = vmatpush1.bf16.msra.mxu0 %v22767_v53  ;;  %v22832_v53 = vld [vmem:[#allocation2 + $0x2504] ss:$40 sps:$4 sm:$0xff]  }
 0x83d   :  { %14053 = vmatprep.subr.bf16.mxu0 %v22772_v24  ;;  %v22835_v24 = vld [vmem:[#allocation2 + $0x2554] ss:$40 sps:$4 sm:$0xff]  }
 0x840   :  { %14054 = vmatpush1.bf16.msra.mxu0 %v22770_v29  ;;  %v22833_v29 = vld [vmem:[#allocation2 + $0x2550] ss:$40 sps:$4 sm:$0xff]  }
 0x841   :  { %14055 = vmatprep.subr.bf16.mxu0 %v22775_v54  ;;  %v22838_v54 = vld [vmem:[#allocation2 + $0x25a4] ss:$40 sps:$4 sm:$0xff]  }
 0x844   :  { %14056 = vmatpush1.bf16.msra.mxu0 %v22773_v55  ;;  %v22836_v55 = vld [vmem:[#allocation2 + $0x25a0] ss:$40 sps:$4 sm:$0xff]  }
 0x845   :  { %14057 = vmatprep.subr.bf16.mxu0 %v22778_v58  ;;  %v22841_v58 = vld [vmem:[#allocation2 + $0x25f4] ss:$40 sps:$4 sm:$0xff]  }
 0x848   :  { %14058 = vmatpush1.bf16.msra.mxu0 %v22776_v59  ;;  %v22839_v59 = vld [vmem:[#allocation2 + $0x25f0] ss:$40 sps:$4 sm:$0xff]  }
 0x849   :  { %14059 = vmatprep.subr.bf16.mxu0 %v22781_v35  ;;  %v22844_v35 = vld [vmem:[#allocation2 + $0x2644] ss:$40 sps:$4 sm:$0xff]  }
 0x84c   :  { %14060 = vmatpush1.bf16.msra.mxu0 %v22779_v57  ;;  %v22842_v57 = vld [vmem:[#allocation2 + $0x2640] ss:$40 sps:$4 sm:$0xff]  }
 0x84d   :  { %14061 = vmatprep.subr.bf16.mxu0 %v22784_v32  ;;  %v22847_v32 = vld [vmem:[#allocation2 + $0x2694] ss:$40 sps:$4 sm:$0xff]  }
 0x850   :  { %14062 = vmatpush1.bf16.msra.mxu0 %v22782_v62  ;;  %v22845_v62 = vld [vmem:[#allocation2 + $0x2690] ss:$40 sps:$4 sm:$0xff]  }
 0x851   :  { %14063 = vmatprep.subr.bf16.mxu0 %v22787_v7  ;;  %v22850_v7 = vld [vmem:[#allocation2 + $0x26e4] ss:$40 sps:$4 sm:$0xff]  }
 0x854   :  { %14064 = vmatpush1.bf16.msra.mxu0 %v22785_v10  ;;  %v22848_v10 = vld [vmem:[#allocation2 + $0x26e0] ss:$40 sps:$4 sm:$0xff]  }
 0x855   :  { %14065 = vmatprep.subr.bf16.mxu0 %v22790_v8  ;;  %v22853_v8 = vld [vmem:[#allocation2 + $0x2734] ss:$40 sps:$4 sm:$0xff]  }
 0x858   :  { %14066 = vmatpush1.bf16.msra.mxu0 %v22788_v48  ;;  %v22851_v48 = vld [vmem:[#allocation2 + $0x2730] ss:$40 sps:$4 sm:$0xff]  }
 0x859   :  { %14067 = vmatprep.subr.bf16.mxu0 %v22793_v14  ;;  %v22856_v14 = vld [vmem:[#allocation2 + $0x2784] ss:$40 sps:$4 sm:$0xff]  }
 0x85c   :  { %14068 = vmatpush1.bf16.msra.mxu0 %v22791_v42  ;;  %v22854_v42 = vld [vmem:[#allocation2 + $0x2780] ss:$40 sps:$4 sm:$0xff]  }
 0x85d   :  { %14069 = vmatprep.subr.bf16.mxu0 %v22796_v19  ;;  %v22859_v19 = vld [vmem:[#allocation2 + $0x27d4] ss:$40 sps:$4 sm:$0xff]  }
 0x860   :  { %14070 = vmatpush1.bf16.msra.mxu0 %v22794_v47  ;;  %v22857_v47 = vld [vmem:[#allocation2 + $0x27d0] ss:$40 sps:$4 sm:$0xff]  }
 0x861   :  { %14071 = vmatprep.subr.bf16.mxu0 %v22799_v15  ;;  %v22862_v15 = vld [vmem:[#allocation2 + $0x2824] ss:$40 sps:$4 sm:$0xff]  }
 0x864   :  { %14072 = vmatpush1.bf16.msra.mxu0 %v22797_v30  ;;  %v22860_v30 = vld [vmem:[#allocation2 + $0x2820] ss:$40 sps:$4 sm:$0xff]  }
 0x865   :  { %14073 = vmatprep.subr.bf16.mxu0 %v22802_v23  ;;  %v22865_v23 = vld [vmem:[#allocation2 + $0x2874] ss:$40 sps:$4 sm:$0xff]  }
 0x868   :  { %14074 = vmatpush1.bf16.msra.mxu0 %v22800_v13  ;;  %v22863_v13 = vld [vmem:[#allocation2 + $0x2870] ss:$40 sps:$4 sm:$0xff]  }
 0x869   :  { %14075 = vmatprep.subr.bf16.mxu0 %v22805_v25  ;;  %v22868_v25 = vld [vmem:[#allocation2 + $0x28c4] ss:$40 sps:$4 sm:$0xff]  }
 0x86c   :  { %14076 = vmatpush1.bf16.msra.mxu0 %v22803_v26  ;;  %v22866_v26 = vld [vmem:[#allocation2 + $0x28c0] ss:$40 sps:$4 sm:$0xff]  }
 0x86d   :  { %14077 = vmatprep.subr.bf16.mxu0 %v22808_v17  ;;  %v22871_v17 = vld [vmem:[#allocation2 + $0x2914] ss:$40 sps:$4 sm:$0xff]  }
 0x870   :  { %14078 = vmatpush1.bf16.msra.mxu0 %v22806_v27  ;;  %v22869_v27 = vld [vmem:[#allocation2 + $0x2910] ss:$40 sps:$4 sm:$0xff]  }
 0x871   :  { %14079 = vmatprep.subr.bf16.mxu0 %v22811_v60  ;;  %v22874_v60 = vld [vmem:[#allocation2 + $0x2964] ss:$40 sps:$4 sm:$0xff]  }
 0x874   :  { %14080 = vmatpush1.bf16.msra.mxu0 %v22809_v5  ;;  %v22872_v5 = vld [vmem:[#allocation2 + $0x2960] ss:$40 sps:$4 sm:$0xff]  }
 0x875   :  { %14090 = vmatprep.subr.bf16.mxu0 %v22814_v38  ;;  %v22877_v38 = vld [vmem:[#allocation2 + $0x29b4] ss:$40 sps:$4 sm:$0xff]  }
 0x877   :  { %14082 = vmatmul.mubr.bf16.vlgmr.msra.gmra.mrb[8].mxu0 %v23942_v11  ;;  %v22827_v11 = vld [vmem:[#allocation2 + $0x24b0] ss:$40 sps:$4 sm:$0xff]  }
 0x878   :  { %14091 = vmatpush1.bf16.msra.mxu0 %v22812_v9  ;;  %14122 = vmatprep.mubr.bf16.mxu0 %v23946_v18  ;;  %v22830_v18 = vld [vmem:[#allocation2 + $0x2500] ss:$40 sps:$4 sm:$0xff]   ;;  %v22880_v9 = vld [vmem:[#allocation2 + $0x2a04] ss:$40 sps:$4 sm:$0xff]  }
 0x879   :  { %14092 = vmatprep.subr.bf16.mxu0 %v22817_v44  ;;  %v22883_v44 = vld [vmem:[#allocation2 + $0x2a54] ss:$40 sps:$4 sm:$0xff]  }
 0x87c   :  { %14093 = vmatpush1.bf16.msra.mxu0 %v22815_v46  ;;  %v22881_v46 = vld [vmem:[#allocation2 + $0x2a50] ss:$40 sps:$4 sm:$0xff]  }
 0x87d   :  { %14094 = vmatprep.subr.bf16.mxu0 %v22820_v31  ;;  %v22886_v31 = vld [vmem:[#allocation2 + $0x2aa4] ss:$40 sps:$4 sm:$0xff]  }
 0x880   :  { %14095 = vmatpush1.bf16.msra.mxu0 %v22818_v41  ;;  %v22884_v41 = vld [vmem:[#allocation2 + $0x2aa0] ss:$40 sps:$4 sm:$0xff]  }
 0x881   :  { %14096 = vmatprep.subr.bf16.mxu0 %v22823_v21  ;;  %v22889_v21 = vld [vmem:[#allocation2 + $0x2af4] ss:$40 sps:$4 sm:$0xff]  }
 0x884   :  { %14097 = vmatpush1.bf16.msra.mxu0 %v22821_v0  ;;  %v22887_v0 = vld [vmem:[#allocation2 + $0x2af0] ss:$40 sps:$4 sm:$0xff]  }
 0x885   :  { %14098 = vmatprep.subr.bf16.mxu0 %v22826_v1  ;;  %v22892_v1 = vld [vmem:[#allocation2 + $0x2b44] ss:$40 sps:$4 sm:$0xff]  }
 0x888   :  { %14099 = vmatpush1.bf16.msra.mxu0 %v22824_v3  ;;  %v22890_v3 = vld [vmem:[#allocation2 + $0x2b40] ss:$40 sps:$4 sm:$0xff]  }
 0x889   :  { %14100 = vmatprep.subr.bf16.mxu0 %v22829_v20  ;;  %v22895_v20 = vld [vmem:[#allocation2 + $0x2b94] ss:$40 sps:$4 sm:$0xff]  }
 0x88c   :  { %14101 = vmatpush1.bf16.msra.mxu0 %v22827_v11  ;;  %v22893_v11 = vld [vmem:[#allocation2 + $0x2b90] ss:$40 sps:$4 sm:$0xff]  }
 0x88d   :  { %14102 = vmatprep.subr.bf16.mxu0 %v22832_v53  ;;  %v22898_v53 = vld [vmem:[#allocation2 + $0x2be4] ss:$40 sps:$4 sm:$0xff]  }
 0x890   :  { %14103 = vmatpush1.bf16.msra.mxu0 %v22830_v18  ;;  %v22896_v18 = vld [vmem:[#allocation2 + $0x2be0] ss:$40 sps:$4 sm:$0xff]  }
 0x891   :  { %14104 = vmatprep.subr.bf16.mxu0 %v22835_v24  ;;  %v22901_v24 = vld [vmem:[#allocation2 + $0x2c34] ss:$40 sps:$4 sm:$0xff]  }
 0x894   :  { %14105 = vmatpush1.bf16.msra.mxu0 %v22833_v29  ;;  %v22899_v29 = vld [vmem:[#allocation2 + $0x2c30] ss:$40 sps:$4 sm:$0xff]  }
 0x895   :  { %14106 = vmatprep.subr.bf16.mxu0 %v22838_v54  ;;  %v22904_v54 = vld [vmem:[#allocation2 + $0x2c84] ss:$40 sps:$4 sm:$0xff]  }
 0x898   :  { %14107 = vmatpush1.bf16.msra.mxu0 %v22836_v55  ;;  %v22902_v55 = vld [vmem:[#allocation2 + $0x2c80] ss:$40 sps:$4 sm:$0xff]  }
 0x899   :  { %14108 = vmatprep.subr.bf16.mxu0 %v22841_v58  ;;  %v22907_v58 = vld [vmem:[#allocation2 + $0x2cd4] ss:$40 sps:$4 sm:$0xff]  }
 0x89c   :  { %14109 = vmatpush1.bf16.msra.mxu0 %v22839_v59  ;;  %v22905_v59 = vld [vmem:[#allocation2 + $0x2cd0] ss:$40 sps:$4 sm:$0xff]  }
 0x89d   :  { %14110 = vmatprep.subr.bf16.mxu0 %v22844_v35  ;;  %v22910_v35 = vld [vmem:[#allocation2 + $0x2d24] ss:$40 sps:$4 sm:$0xff]  }
 0x8a0   :  { %14111 = vmatpush1.bf16.msra.mxu0 %v22842_v57  ;;  %v22908_v57 = vld [vmem:[#allocation2 + $0x2d20] ss:$40 sps:$4 sm:$0xff]  }
 0x8a1   :  { %14112 = vmatprep.subr.bf16.mxu0 %v22847_v32  ;;  %v22913_v32 = vld [vmem:[#allocation2 + $0x2d74] ss:$40 sps:$4 sm:$0xff]  }
 0x8a4   :  { %14113 = vmatpush1.bf16.msra.mxu0 %v22845_v62  ;;  %v22911_v62 = vld [vmem:[#allocation2 + $0x2d70] ss:$40 sps:$4 sm:$0xff]  }
 0x8a5   :  { %14114 = vmatprep.subr.bf16.mxu0 %v22850_v7  ;;  %v22916_v7 = vld [vmem:[#allocation2 + $0x2dc4] ss:$40 sps:$4 sm:$0xff]  }
 0x8a8   :  { %14115 = vmatpush1.bf16.msra.mxu0 %v22848_v10  ;;  %v22914_v10 = vld [vmem:[#allocation2 + $0x2dc0] ss:$40 sps:$4 sm:$0xff]  }
 0x8a9   :  { %14116 = vmatprep.subr.bf16.mxu0 %v22853_v8  ;;  %v22919_v8 = vld [vmem:[#allocation2 + $0x2e14] ss:$40 sps:$4 sm:$0xff]  }
 0x8ac   :  { %14117 = vmatpush1.bf16.msra.mxu0 %v22851_v48  ;;  %v22917_v48 = vld [vmem:[#allocation2 + $0x2e10] ss:$40 sps:$4 sm:$0xff]  }
 0x8ad   :  { %14118 = vmatprep.subr.bf16.mxu0 %v22856_v14  ;;  %v22922_v14 = vld [vmem:[#allocation2 + $0x2e64] ss:$40 sps:$4 sm:$0xff]  }
 0x8b0   :  { %14119 = vmatpush1.bf16.msra.mxu0 %v22854_v42  ;;  %v22920_v42 = vld [vmem:[#allocation2 + $0x2e60] ss:$40 sps:$4 sm:$0xff]  }
 0x8b1   :  { %14120 = vmatprep.subr.bf16.mxu0 %v22859_v19  ;;  %v22925_v19 = vld [vmem:[#allocation2 + $0x2eb4] ss:$40 sps:$4 sm:$0xff]  }
 0x8b4   :  { %14121 = vmatpush1.bf16.msra.mxu0 %v22857_v47  ;;  %v22928_v47 = vld [vmem:[#allocation2 + $0x2f04] ss:$40 sps:$4 sm:$0xff]  }
 0x8b5   :  { %14131 = vmatprep.subr.bf16.mxu0 %v22862_v15  ;;  %v22931_v15 = vld [vmem:[#allocation2 + $0x2f54] ss:$40 sps:$4 sm:$0xff]  }
 0x8b7   :  { %14123 = vmatmul.mubr.bf16.vlgmr.msra.gmra.mrb[8].mxu0 %v23959_v36  ;;  %v22875_v36 = vld [vmem:[#allocation2 + $0x29b0] ss:$40 sps:$4 sm:$0xff]  }
 0x8b8   :  { %14132 = vmatpush1.bf16.msra.mxu0 %v22860_v30  ;;  %14163 = vmatprep.mubr.bf16.mxu0 %v23963_v43  ;;  %v22878_v43 = vld [vmem:[#allocation2 + $0x2a00] ss:$40 sps:$4 sm:$0xff]   ;;  %v22929_v30 = vld [vmem:[#allocation2 + $0x2f50] ss:$40 sps:$4 sm:$0xff]  }
 0x8b9   :  { %14133 = vmatprep.subr.bf16.mxu0 %v22865_v23  ;;  %v22934_v23 = vld [vmem:[#allocation2 + $0x2fa4] ss:$40 sps:$4 sm:$0xff]  }
 0x8bc   :  { %14134 = vmatpush1.bf16.msra.mxu0 %v22863_v13  ;;  %v22932_v13 = vld [vmem:[#allocation2 + $0x2fa0] ss:$40 sps:$4 sm:$0xff]  }
 0x8bd   :  { %14135 = vmatprep.subr.bf16.mxu0 %v22868_v25  ;;  %v22937_v25 = vld [vmem:[#allocation2 + $0x2ff4] ss:$40 sps:$4 sm:$0xff]  }
 0x8c0   :  { %14136 = vmatpush1.bf16.msra.mxu0 %v22866_v26  ;;  %v22935_v26 = vld [vmem:[#allocation2 + $0x2ff0] ss:$40 sps:$4 sm:$0xff]  }
 0x8c1   :  { %14137 = vmatprep.subr.bf16.mxu0 %v22871_v17  ;;  %v22940_v17 = vld [vmem:[#allocation2 + $0x3044] ss:$40 sps:$4 sm:$0xff]  }
 0x8c4   :  { %14138 = vmatpush1.bf16.msra.mxu0 %v22869_v27  ;;  %v22938_v27 = vld [vmem:[#allocation2 + $0x3040] ss:$40 sps:$4 sm:$0xff]  }
 0x8c5   :  { %14139 = vmatprep.subr.bf16.mxu0 %v22874_v60  ;;  %v22943_v60 = vld [vmem:[#allocation2 + $0x3094] ss:$40 sps:$4 sm:$0xff]  }
 0x8c8   :  { %14140 = vmatpush1.bf16.msra.mxu0 %v22872_v5  ;;  %v22941_v5 = vld [vmem:[#allocation2 + $0x3090] ss:$40 sps:$4 sm:$0xff]  }
 0x8c9   :  { %14141 = vmatprep.subr.bf16.mxu0 %v22877_v38  ;;  %v22946_v38 = vld [vmem:[#allocation2 + $0x30e4] ss:$40 sps:$4 sm:$0xff]  }
 0x8cc   :  { %14142 = vmatpush1.bf16.msra.mxu0 %v22875_v36  ;;  %v22944_v36 = vld [vmem:[#allocation2 + $0x30e0] ss:$40 sps:$4 sm:$0xff]  }
 0x8cd   :  { %14143 = vmatprep.subr.bf16.mxu0 %v22880_v9  ;;  %v22949_v9 = vld [vmem:[#allocation2 + $0x3134] ss:$40 sps:$4 sm:$0xff]  }
 0x8d0   :  { %14144 = vmatpush1.bf16.msra.mxu0 %v22878_v43  ;;  %v22947_v43 = vld [vmem:[#allocation2 + $0x3130] ss:$40 sps:$4 sm:$0xff]  }
 0x8d1   :  { %14145 = vmatprep.subr.bf16.mxu0 %v22883_v44  ;;  %v22952_v44 = vld [vmem:[#allocation2 + $0x3184] ss:$40 sps:$4 sm:$0xff]  }
 0x8d4   :  { %14146 = vmatpush1.bf16.msra.mxu0 %v22881_v46  ;;  %v22950_v46 = vld [vmem:[#allocation2 + $0x3180] ss:$40 sps:$4 sm:$0xff]  }
 0x8d5   :  { %14147 = vmatprep.subr.bf16.mxu0 %v22886_v31  ;;  %v22955_v31 = vld [vmem:[#allocation2 + $0x31d4] ss:$40 sps:$4 sm:$0xff]  }
 0x8d8   :  { %14148 = vmatpush1.bf16.msra.mxu0 %v22884_v41  ;;  %v22953_v41 = vld [vmem:[#allocation2 + $0x31d0] ss:$40 sps:$4 sm:$0xff]  }
 0x8d9   :  { %14149 = vmatprep.subr.bf16.mxu0 %v22889_v21  ;;  %v22958_v21 = vld [vmem:[#allocation2 + $0x3224] ss:$40 sps:$4 sm:$0xff]  }
 0x8dc   :  { %14150 = vmatpush1.bf16.msra.mxu0 %v22887_v0  ;;  %v22956_v0 = vld [vmem:[#allocation2 + $0x3220] ss:$40 sps:$4 sm:$0xff]  }
 0x8dd   :  { %14151 = vmatprep.subr.bf16.mxu0 %v22892_v1  ;;  %v22961_v1 = vld [vmem:[#allocation2 + $0x3274] ss:$40 sps:$4 sm:$0xff]  }
 0x8e0   :  { %14152 = vmatpush1.bf16.msra.mxu0 %v22890_v3  ;;  %v23052_v3 = vld [vmem:[#allocation6 + $0x800] ss:$16 sps:$4 sm:$0xff]  }
 0x8e1   :  { %14153 = vmatprep.subr.bf16.mxu0 %v22895_v20  ;;  %v23054_v20 = vld [vmem:[#allocation6 + $0x804] ss:$16 sps:$4 sm:$0xff]  }
 0x8e2   :  { %16421 = vmatprep.subr.bf16.mxu1 %v23054_v20  ;;  %v23088_v20 = vld [vmem:[#allocation6 + $0x980] ss:$16 sps:$4 sm:$0xff]  }
 0x8e3   :  { %16422 = vmatpush1.bf16.msra.mxu1 %v23052_v3  ;;  %v22997_v3 = vld [vmem:[#allocation2 + $0x3634] ss:$40 sps:$4 sm:$0xff]  }
 0x8e4   :  { %14154 = vmatpush1.bf16.msra.mxu0 %v22893_v11  ;;  %v22959_v11 = vld [vmem:[#allocation2 + $0x3270] ss:$40 sps:$4 sm:$0xff]  }
 0x8e5   :  { %14155 = vmatprep.subr.bf16.mxu0 %v22898_v53  ;;  %v23057_v53 = vld [vmem:[#allocation6 + $0x824] ss:$16 sps:$4 sm:$0xff]  }
 0x8e6   :  { %16423 = vmatprep.subr.bf16.mxu1 %v23057_v53  ;;  %v22995_v53 = vld [vmem:[#allocation2 + $0x3630] ss:$40 sps:$4 sm:$0xff]  }
 0x8e8   :  { %14156 = vmatpush1.bf16.msra.mxu0 %v22896_v18  ;;  %v22964_v18 = vld [vmem:[#allocation2 + $0x32c4] ss:$40 sps:$4 sm:$0xff]  }
 0x8e9   :  { %14157 = vmatprep.subr.bf16.mxu0 %v22901_v24  ;;  %v23055_v24 = vld [vmem:[#allocation6 + $0x820] ss:$16 sps:$4 sm:$0xff]  }
 0x8ea   :  { %16424 = vmatpush1.bf16.msra.mxu1 %v23055_v24  ;;  %v23091_v24 = vld [vmem:[#allocation6 + $0x9a0] ss:$16 sps:$4 sm:$0xff]  }
 0x8ec   :  { %14158 = vmatpush1.bf16.msra.mxu0 %v22899_v29  ;;  %v23060_v29 = vld [vmem:[#allocation6 + $0x844] ss:$16 sps:$4 sm:$0xff]  }
 0x8ed   :  { %14159 = vmatprep.subr.bf16.mxu0 %v22904_v54  ;;  %v22962_v54 = vld [vmem:[#allocation2 + $0x32c0] ss:$40 sps:$4 sm:$0xff]   ;;  %16425 = vmatprep.subr.bf16.mxu1 %v23060_v29 }
 0x8ee   :  { %v22998_v29 = vld [vmem:[#allocation2 + $0x3680] ss:$40 sps:$4 sm:$0xff]  }
 0x8f0   :  { %14160 = vmatpush1.bf16.msra.mxu0 %v22902_v55  ;;  %v22967_v55 = vld [vmem:[#allocation2 + $0x3314] ss:$40 sps:$4 sm:$0xff]  }
 0x8f1   :  { %14161 = vmatprep.subr.bf16.mxu0 %v22907_v58  ;;  %v23063_v58 = vld [vmem:[#allocation6 + $0x864] ss:$16 sps:$4 sm:$0xff]  }
 0x8f4   :  { %14162 = vmatpush1.bf16.msra.mxu0 %v22905_v59  ;;  %v22965_v59 = vld [vmem:[#allocation2 + $0x3310] ss:$40 sps:$4 sm:$0xff]  }
 0x8f5   :  { %14172 = vmatprep.subr.bf16.mxu0 %v22910_v35  ;;  %v23061_v35 = vld [vmem:[#allocation6 + $0x860] ss:$16 sps:$4 sm:$0xff]  }
 0x8f7   :  { %14164 = vmatmul.mubr.bf16.vlgmr.msra.gmra.mrb[8].mxu0 %v23976_v61  ;;  %v22923_v61 = vld [vmem:[#allocation2 + $0x2eb0] ss:$40 sps:$4 sm:$0xff]  }
 0x8f8   :  { %14173 = vmatpush1.bf16.msra.mxu0 %v22908_v57  ;;  %14204 = vmatprep.mubr.bf16.mxu0 %v23980_v2  ;;  %v22926_v2 = vld [vmem:[#allocation2 + $0x2f00] ss:$40 sps:$4 sm:$0xff]  }
 0x8f9   :  { %14174 = vmatprep.subr.bf16.mxu0 %v22913_v32  ;;  %v23066_v57 = vld [vmem:[#allocation6 + $0x884] ss:$16 sps:$4 sm:$0xff]  }
 0x8fa   :  { %v22968_v32 = vld [vmem:[#allocation2 + $0x3360] ss:$40 sps:$4 sm:$0xff]  }
 0x8fc   :  { %14175 = vmatpush1.bf16.msra.mxu0 %v22911_v62  ;;  %v22973_v62 = vld [vmem:[#allocation2 + $0x33b4] ss:$40 sps:$4 sm:$0xff]  }
 0x8fd   :  { %14176 = vmatprep.subr.bf16.mxu0 %v22916_v7  ;;  %v23064_v7 = vld [vmem:[#allocation6 + $0x880] ss:$16 sps:$4 sm:$0xff]  }
 0x900   :  { %14177 = vmatpush1.bf16.msra.mxu0 %v22914_v10  ;;  %v23069_v10 = vld [vmem:[#allocation6 + $0x8a4] ss:$16 sps:$4 sm:$0xff]  }
 0x901   :  { %14178 = vmatprep.subr.bf16.mxu0 %v22919_v8  ;;  %v22971_v8 = vld [vmem:[#allocation2 + $0x33b0] ss:$40 sps:$4 sm:$0xff]  }
 0x904   :  { %14179 = vmatpush1.bf16.msra.mxu0 %v22917_v48  ;;  %v22976_v48 = vld [vmem:[#allocation2 + $0x3404] ss:$40 sps:$4 sm:$0xff]  }
 0x905   :  { %14180 = vmatprep.subr.bf16.mxu0 %v22922_v14  ;;  %v23067_v14 = vld [vmem:[#allocation6 + $0x8a0] ss:$16 sps:$4 sm:$0xff]  }
 0x908   :  { %14181 = vmatpush1.bf16.msra.mxu0 %v22920_v42  ;;  %v23072_v42 = vld [vmem:[#allocation6 + $0x8c4] ss:$16 sps:$4 sm:$0xff]  }
 0x909   :  { %14182 = vmatprep.subr.bf16.mxu0 %v22925_v19  ;;  %v22974_v19 = vld [vmem:[#allocation2 + $0x3400] ss:$40 sps:$4 sm:$0xff]  }
 0x90c   :  { %14183 = vmatpush1.bf16.msra.mxu0 %v22923_v61  ;;  %v22979_v61 = vld [vmem:[#allocation2 + $0x3454] ss:$40 sps:$4 sm:$0xff]  }
 0x90d   :  { %14184 = vmatprep.subr.bf16.mxu0 %v22928_v47  ;;  %v23070_v47 = vld [vmem:[#allocation6 + $0x8c0] ss:$16 sps:$4 sm:$0xff]  }
 0x910   :  { %14185 = vmatpush1.bf16.msra.mxu0 %v22926_v2  ;;  %v23075_v2 = vld [vmem:[#allocation6 + $0x8e4] ss:$16 sps:$4 sm:$0xff]  }
 0x911   :  { %14186 = vmatprep.subr.bf16.mxu0 %v22931_v15  ;;  %v22977_v15 = vld [vmem:[#allocation2 + $0x3450] ss:$40 sps:$4 sm:$0xff]  }
 0x914   :  { %14187 = vmatpush1.bf16.msra.mxu0 %v22929_v30  ;;  %v22982_v30 = vld [vmem:[#allocation2 + $0x34a4] ss:$40 sps:$4 sm:$0xff]  }
 0x915   :  { %14188 = vmatprep.subr.bf16.mxu0 %v22934_v23  ;;  %v23073_v23 = vld [vmem:[#allocation6 + $0x8e0] ss:$16 sps:$4 sm:$0xff]  }
 0x918   :  { %14189 = vmatpush1.bf16.msra.mxu0 %v22932_v13  ;;  %v23078_v13 = vld [vmem:[#allocation6 + $0x904] ss:$16 sps:$4 sm:$0xff]  }
 0x919   :  { %14190 = vmatprep.subr.bf16.mxu0 %v22937_v25  ;;  %v22980_v25 = vld [vmem:[#allocation2 + $0x34a0] ss:$40 sps:$4 sm:$0xff]  }
 0x91c   :  { %14191 = vmatpush1.bf16.msra.mxu0 %v22935_v26  ;;  %v22985_v26 = vld [vmem:[#allocation2 + $0x34f4] ss:$40 sps:$4 sm:$0xff]  }
 0x91d   :  { %14192 = vmatprep.subr.bf16.mxu0 %v22940_v17  ;;  %v23076_v17 = vld [vmem:[#allocation6 + $0x900] ss:$16 sps:$4 sm:$0xff]  }
 0x920   :  { %14193 = vmatpush1.bf16.msra.mxu0 %v22938_v27  ;;  %v23081_v27 = vld [vmem:[#allocation6 + $0x924] ss:$16 sps:$4 sm:$0xff]  }
 0x921   :  { %14194 = vmatprep.subr.bf16.mxu0 %v22943_v60  ;;  %v22983_v60 = vld [vmem:[#allocation2 + $0x34f0] ss:$40 sps:$4 sm:$0xff]  }
 0x924   :  { %14195 = vmatpush1.bf16.msra.mxu0 %v22941_v5  ;;  %v22988_v5 = vld [vmem:[#allocation2 + $0x3544] ss:$40 sps:$4 sm:$0xff]  }
 0x925   :  { %14196 = vmatprep.subr.bf16.mxu0 %v22946_v38  ;;  %v23079_v38 = vld [vmem:[#allocation6 + $0x920] ss:$16 sps:$4 sm:$0xff]  }
 0x928   :  { %14197 = vmatpush1.bf16.msra.mxu0 %v22944_v36  ;;  %v23084_v36 = vld [vmem:[#allocation6 + $0x944] ss:$16 sps:$4 sm:$0xff]  }
 0x929   :  { %14198 = vmatprep.subr.bf16.mxu0 %v22949_v9  ;;  %v22986_v9 = vld [vmem:[#allocation2 + $0x3540] ss:$40 sps:$4 sm:$0xff]  }
 0x92c   :  { %14199 = vmatpush1.bf16.msra.mxu0 %v22947_v43  ;;  %v22991_v43 = vld [vmem:[#allocation2 + $0x3594] ss:$40 sps:$4 sm:$0xff]  }
 0x92d   :  { %14200 = vmatprep.subr.bf16.mxu0 %v22952_v44  ;;  %v23082_v44 = vld [vmem:[#allocation6 + $0x940] ss:$16 sps:$4 sm:$0xff]  }
 0x930   :  { %14201 = vmatpush1.bf16.msra.mxu0 %v22950_v46  ;;  %v23087_v46 = vld [vmem:[#allocation6 + $0x964] ss:$16 sps:$4 sm:$0xff]  }
 0x931   :  { %14202 = vmatprep.subr.bf16.mxu0 %v22955_v31  ;;  %v22989_v31 = vld [vmem:[#allocation2 + $0x3590] ss:$40 sps:$4 sm:$0xff]  }
 0x934   :  { %14203 = vmatpush1.bf16.msra.mxu0 %v22953_v41  ;;  %v22994_v41 = vld [vmem:[#allocation2 + $0x35e4] ss:$40 sps:$4 sm:$0xff]  }
 0x935   :  { %14213 = vmatprep.subr.bf16.mxu0 %v22958_v21  ;;  %v23085_v21 = vld [vmem:[#allocation6 + $0x960] ss:$16 sps:$4 sm:$0xff]  }
 0x937   :  { %14205 = vmatmul.mubr.bf16.vlgmr.msra.gmra.mrb[8].mxu0 %v23988_v28  ;;  %v23058_v28 = vld [vmem:[#allocation6 + $0x840] ss:$16 sps:$4 sm:$0xff]  }
 0x938   :  { %14214 = vmatpush1.bf16.msra.mxu0 %v22956_v0  ;;  %14245 = vmatprep.mubr.bf16.mxu0 %v23997_v37  ;;  %v22970_v37 = vld [vmem:[#allocation2 + $0x3364] ss:$40 sps:$4 sm:$0xff]  }
 0x939   :  { %14215 = vmatprep.subr.bf16.mxu0 %v22961_v1  ;;  %16426 = vmatpush1.bf16.msra.mxu1 %v23058_v28  ;;  %v23090_v0 = vld [vmem:[#allocation6 + $0x984] ss:$16 sps:$4 sm:$0xff]  }
 0x93a   :  { %16427 = vmatprep.subr.bf16.mxu1 %v23063_v58  ;;  %v22992_v1 = vld [vmem:[#allocation2 + $0x35e0] ss:$40 sps:$4 sm:$0xff]   ;;  %v23006_v28 = vld [vmem:[#allocation2 + $0x3724] ss:$40 sps:$4 sm:$0xff]  }
 0x93b   :  { %v23004_v58 = vld [vmem:[#allocation2 + $0x3720] ss:$40 sps:$4 sm:$0xff]  }
 0x93c   :  { %14216 = vmatpush1.bf16.msra.mxu0 %v22959_v11  ;;  %v23093_v11 = vld [vmem:[#allocation6 + $0x9a4] ss:$16 sps:$4 sm:$0xff]  }
 0x93d   :  { %14217 = vmatprep.subr.bf16.mxu0 %v22964_v18  ;;  %16428 = vmatpush1.bf16.msra.mxu1 %v23061_v35  ;;  %v23000_v18 = vld [vmem:[#allocation2 + $0x3684] ss:$40 sps:$4 sm:$0xff]  }
 0x93e   :  { %16429 = vmatprep.subr.bf16.mxu1 %v23066_v57  ;;  %v23012_v35 = vld [vmem:[#allocation2 + $0x37c4] ss:$40 sps:$4 sm:$0xff]   ;;  %v23010_v57 = vld [vmem:[#allocation2 + $0x37c0] ss:$40 sps:$4 sm:$0xff]  }
 0x940   :  { %14218 = vmatpush1.bf16.msra.mxu0 %v22962_v54  ;;  %v23003_v54 = vld [vmem:[#allocation2 + $0x36d4] ss:$40 sps:$4 sm:$0xff]  }
 0x941   :  { %14219 = vmatprep.subr.bf16.mxu0 %v22967_v55  ;;  %16430 = vmatpush1.bf16.msra.mxu1 %v23064_v7  ;;  %v23001_v55 = vld [vmem:[#allocation2 + $0x36d0] ss:$40 sps:$4 sm:$0xff]   ;;  %v23018_v7 = vld [vmem:[#allocation2 + $0x3864] ss:$40 sps:$4 sm:$0xff]  }
 0x942   :  { %16431 = vmatprep.subr.bf16.mxu1 %v23069_v10  ;;  %v23016_v10 = vld [vmem:[#allocation2 + $0x3860] ss:$40 sps:$4 sm:$0xff]  }
 0x944   :  { %14220 = vmatpush1.bf16.msra.mxu0 %v22965_v59  ;;  %v23009_v59 = vld [vmem:[#allocation2 + $0x3774] ss:$40 sps:$4 sm:$0xff]  }
 0x945   :  { %14221 = vmatprep.subr.bf16.mxu0 %v22970_v37  ;;  %16432 = vmatpush1.bf16.msra.mxu1 %v23067_v14  ;;  %v23007_v37 = vld [vmem:[#allocation2 + $0x3770] ss:$40 sps:$4 sm:$0xff]   ;;  %v23027_v14 = vld [vmem:[#allocation2 + $0x3954] ss:$40 sps:$4 sm:$0xff]  }
 0x946   :  { %16433 = vmatprep.subr.bf16.mxu1 %v23072_v42  ;;  %v23025_v42 = vld [vmem:[#allocation2 + $0x3950] ss:$40 sps:$4 sm:$0xff]  }
 0x948   :  { %14222 = vmatpush1.bf16.msra.mxu0 %v22968_v32  ;;  %v23015_v32 = vld [vmem:[#allocation2 + $0x3814] ss:$40 sps:$4 sm:$0xff]  }
 0x949   :  { %14223 = vmatprep.subr.bf16.mxu0 %v22973_v62  ;;  %16434 = vmatpush1.bf16.msra.mxu1 %v23070_v47  ;;  %v23013_v62 = vld [vmem:[#allocation2 + $0x3810] ss:$40 sps:$4 sm:$0xff]   ;;  %v23033_v47 = vld [vmem:[#allocation2 + $0x39f4] ss:$40 sps:$4 sm:$0xff]  }
 0x94a   :  { %16435 = vmatprep.subr.bf16.mxu1 %v23075_v2  ;;  %v23031_v2 = vld [vmem:[#allocation2 + $0x39f0] ss:$40 sps:$4 sm:$0xff]  }
 0x94c   :  { %14224 = vmatpush1.bf16.msra.mxu0 %v22971_v8  ;;  %v23021_v8 = vld [vmem:[#allocation2 + $0x38b4] ss:$40 sps:$4 sm:$0xff]  }
 0x94d   :  { %14225 = vmatprep.subr.bf16.mxu0 %v22976_v48  ;;  %16436 = vmatpush1.bf16.msra.mxu1 %v23073_v23  ;;  %v23024_v48 = vld [vmem:[#allocation2 + $0x3904] ss:$40 sps:$4 sm:$0xff]   ;;  %v23039_v23 = vld [vmem:[#allocation2 + $0x3a94] ss:$40 sps:$4 sm:$0xff]  }
 0x94e   :  { %16437 = vmatprep.subr.bf16.mxu1 %v23078_v13  ;;  %v23037_v13 = vld [vmem:[#allocation2 + $0x3a90] ss:$40 sps:$4 sm:$0xff]  }
 0x950   :  { %14226 = vmatpush1.bf16.msra.mxu0 %v22974_v19  ;;  %v23030_v19 = vld [vmem:[#allocation2 + $0x39a4] ss:$40 sps:$4 sm:$0xff]  }
 0x951   :  { %14227 = vmatprep.subr.bf16.mxu0 %v22979_v61  ;;  %16438 = vmatpush1.bf16.msra.mxu1 %v23076_v17  ;;  %v23028_v61 = vld [vmem:[#allocation2 + $0x39a0] ss:$40 sps:$4 sm:$0xff]   ;;  %v23045_v17 = vld [vmem:[#allocation2 + $0x3b34] ss:$40 sps:$4 sm:$0xff]  }
 0x952   :  { %16439 = vmatprep.subr.bf16.mxu1 %v23081_v27  ;;  %v23043_v27 = vld [vmem:[#allocation2 + $0x3b30] ss:$40 sps:$4 sm:$0xff]  }
 0x954   :  { %14228 = vmatpush1.bf16.msra.mxu0 %v22977_v15  ;;  %v23036_v15 = vld [vmem:[#allocation2 + $0x3a44] ss:$40 sps:$4 sm:$0xff]  }
 0x955   :  { %14229 = vmatprep.subr.bf16.mxu0 %v22982_v30  ;;  %16440 = vmatpush1.bf16.msra.mxu1 %v23079_v38  ;;  %v23034_v30 = vld [vmem:[#allocation2 + $0x3a40] ss:$40 sps:$4 sm:$0xff]   ;;  %v23051_v38 = vld [vmem:[#allocation2 + $0x3bd4] ss:$40 sps:$4 sm:$0xff]  }
 0x956   :  { %16441 = vmatprep.subr.bf16.mxu1 %v23084_v36  ;;  %v23049_v36 = vld [vmem:[#allocation2 + $0x3bd0] ss:$40 sps:$4 sm:$0xff]  }
 0x958   :  { %14230 = vmatpush1.bf16.msra.mxu0 %v22980_v25  ;;  %v23042_v25 = vld [vmem:[#allocation2 + $0x3ae4] ss:$40 sps:$4 sm:$0xff]  }
 0x959   :  { %14231 = vmatprep.subr.bf16.mxu0 %v22985_v26  ;;  %16442 = vmatpush1.bf16.msra.mxu1 %v23082_v44  ;;  %v23040_v26 = vld [vmem:[#allocation2 + $0x3ae0] ss:$40 sps:$4 sm:$0xff]  }
 0x95a   :  { %16443 = vmatprep.subr.bf16.mxu1 %v23087_v46  ;;  %v23099_v44 = vld [vmem:[#allocation6 + $0x9e4] ss:$16 sps:$4 sm:$0xff]   ;;  %v23097_v46 = vld [vmem:[#allocation6 + $0x9e0] ss:$16 sps:$4 sm:$0xff]  }
 0x95c   :  { %14232 = vmatpush1.bf16.msra.mxu0 %v22983_v60  ;;  %v23048_v60 = vld [vmem:[#allocation2 + $0x3b84] ss:$40 sps:$4 sm:$0xff]  }
 0x95d   :  { %14233 = vmatprep.subr.bf16.mxu0 %v22988_v5  ;;  %16444 = vmatpush1.bf16.msra.mxu1 %v23085_v21  ;;  %v23046_v5 = vld [vmem:[#allocation2 + $0x3b80] ss:$40 sps:$4 sm:$0xff]  }
 0x95e   :  { %16445 = vmatprep.subr.bf16.mxu1 %v23090_v0 }
 0x960   :  { %14234 = vmatpush1.bf16.msra.mxu0 %v22986_v9  ;;  %v23096_v9 = vld [vmem:[#allocation6 + $0x9c4] ss:$16 sps:$4 sm:$0xff]  }
 0x961   :  { %14235 = vmatprep.subr.bf16.mxu0 %v22991_v43  ;;  %16446 = vmatpush1.bf16.msra.mxu1 %v23088_v20  ;;  %v23094_v43 = vld [vmem:[#allocation6 + $0x9c0] ss:$16 sps:$4 sm:$0xff]  }
 0x962   :  { %16447 = vmatprep.subr.bf16.mxu1 %v23093_v11 }
 0x964   :  { %14236 = vmatpush1.bf16.msra.mxu0 %v22989_v31  ;;  %v23102_v31 = vld [vmem:[#allocation6 + $0xc] ss:$16 sps:$4 sm:$0xff]  }
 0x965   :  { %14237 = vmatprep.subr.bf16.mxu0 %v22994_v41  ;;  %16448 = vmatpush1.bf16.msra.mxu1 %v23091_v24  ;;  %v2098_v41 = vld [vmem:[#allocation4 + $0x8] sm:$0x3] }
 0x966   :  { %16449 = vmatprep.subr.bf16.mxu1 %v23096_v9  ;;  %v2136_v21 = vrot.slane %v2098_v41, %v24097_v12  ;;  %v2140_v0 = vrot.slane %v2098_v41, %v24083_v16  ;;  %v23151_v9 = vld [vmem:[#allocation6 + $0x228] ss:$16 sps:$4 sm:$0xff]   ;;  %v23162_v41 = vld [vmem:[#allocation6 + $0x28c] ss:$16 sps:$4 sm:$0xff]  }
 0x968   :  { %14238 = vmatpush1.bf16.msra.mxu0 %v22992_v1 }
 0x969   :  { %14239 = vmatprep.subr.bf16.mxu0 %v22997_v3  ;;  %16450 = vmatpush1.bf16.msra.mxu1 %v23094_v43  ;;  %v23156_v43 = vld [vmem:[#allocation6 + $0x24c] ss:$16 sps:$4 sm:$0xff]  }
 0x96a   :  { %16451 = vmatprep.subr.bf16.mxu1 %v23099_v44  ;;  %v23154_v44 = vld [vmem:[#allocation6 + $0x248] ss:$16 sps:$4 sm:$0xff]  }
 0x96c   :  { %14240 = vmatpush1.bf16.msra.mxu0 %v22995_v53 }
 0x96d   :  { %14241 = vmatprep.subr.bf16.mxu0 %v23000_v18  ;;  %16452 = vmatpush1.bf16.msra.mxu1 %v23097_v46  ;;  %v23159_v46 = vld [vmem:[#allocation6 + $0x26c] ss:$16 sps:$4 sm:$0xff]  }
 0x96e   :  { %16462 = vmatprep.subr.bf16.mxu1 %v23102_v31  ;;  %v23157_v31 = vld [vmem:[#allocation6 + $0x268] ss:$16 sps:$4 sm:$0xff]  }
 0x970   :  { %14242 = vmatpush1.bf16.msra.mxu0 %v22998_v29 }
 0x971   :  { %14243 = vmatprep.subr.bf16.mxu0 %v23003_v54  ;;  %v23100_v54 = vld [vmem:[#allocation6 + $0x8] ss:$16 sps:$4 sm:$0xff]  }
 0x974   :  { %14244 = vmatpush1.bf16.msra.mxu0 %v23001_v55 }
 0x975   :  { %14254 = vmatprep.subr.bf16.mxu0 %v23006_v28  ;;  %v23105_v28 = vld [vmem:[#allocation6 + $0x2c] ss:$16 sps:$4 sm:$0xff]  }
 0x977   :  { %14246 = vmatmul.mubr.bf16.vlgmr.msra.gmra.mrb[8].mxu0 %v24010_v63  ;;  %v23019_v63 = vld [vmem:[#allocation2 + $0x38b0] ss:$40 sps:$4 sm:$0xff]  }
 0x978   :  { %14255 = vmatpush1.bf16.msra.mxu0 %v23004_v58  ;;  %14286 = vmatprep.mubr.bf16.mxu0 %v24014_v4  ;;  %v23022_v4 = vld [vmem:[#allocation2 + $0x3900] ss:$40 sps:$4 sm:$0xff]  }
 0x979   :  { %14256 = vmatprep.subr.bf16.mxu0 %v23009_v59  ;;  %v23103_v58 = vld [vmem:[#allocation6 + $0x28] ss:$16 sps:$4 sm:$0xff]   ;;  %v23108_v59 = vld [vmem:[#allocation6 + $0x4c] ss:$16 sps:$4 sm:$0xff]  }
 0x97c   :  { %14257 = vmatpush1.bf16.msra.mxu0 %v23007_v37  ;;  %v23106_v37 = vld [vmem:[#allocation6 + $0x48] ss:$16 sps:$4 sm:$0xff]  }
 0x97d   :  { %14258 = vmatprep.subr.bf16.mxu0 %v23012_v35  ;;  %v23111_v35 = vld [vmem:[#allocation6 + $0x6c] ss:$16 sps:$4 sm:$0xff]  }
 0x980   :  { %14259 = vmatpush1.bf16.msra.mxu0 %v23010_v57  ;;  %v23109_v57 = vld [vmem:[#allocation6 + $0x68] ss:$16 sps:$4 sm:$0xff]  }
 0x981   :  { %14260 = vmatprep.subr.bf16.mxu0 %v23015_v32  ;;  %v23114_v32 = vld [vmem:[#allocation6 + $0x8c] ss:$16 sps:$4 sm:$0xff]  }
 0x984   :  { %14261 = vmatpush1.bf16.msra.mxu0 %v23013_v62  ;;  %v23112_v62 = vld [vmem:[#allocation6 + $0x88] ss:$16 sps:$4 sm:$0xff]  }
 0x985   :  { %14262 = vmatprep.subr.bf16.mxu0 %v23018_v7  ;;  %v23117_v7 = vld [vmem:[#allocation6 + $0xac] ss:$16 sps:$4 sm:$0xff]  }
 0x988   :  { %14263 = vmatpush1.bf16.msra.mxu0 %v23016_v10  ;;  %v23115_v10 = vld [vmem:[#allocation6 + $0xa8] ss:$16 sps:$4 sm:$0xff]  }
 0x989   :  { %14264 = vmatprep.subr.bf16.mxu0 %v23021_v8  ;;  %v23120_v8 = vld [vmem:[#allocation6 + $0xcc] ss:$16 sps:$4 sm:$0xff]  }
 0x98c   :  { %14265 = vmatpush1.bf16.msra.mxu0 %v23019_v63  ;;  %v23123_v63 = vld [vmem:[#allocation6 + $0xec] ss:$16 sps:$4 sm:$0xff]  }
 0x98d   :  { %14266 = vmatprep.subr.bf16.mxu0 %v23024_v48  ;;  %v23121_v48 = vld [vmem:[#allocation6 + $0xe8] ss:$16 sps:$4 sm:$0xff]  }
 0x990   :  { %14267 = vmatpush1.bf16.msra.mxu0 %v23022_v4  ;;  %v23126_v4 = vld [vmem:[#allocation6 + $0x10c] ss:$16 sps:$4 sm:$0xff]  }
 0x991   :  { %14268 = vmatprep.subr.bf16.mxu0 %v23027_v14  ;;  %v23124_v14 = vld [vmem:[#allocation6 + $0x108] ss:$16 sps:$4 sm:$0xff]  }
 0x994   :  { %14269 = vmatpush1.bf16.msra.mxu0 %v23025_v42  ;;  %v23129_v42 = vld [vmem:[#allocation6 + $0x12c] ss:$16 sps:$4 sm:$0xff]  }
 0x995   :  { %14270 = vmatprep.subr.bf16.mxu0 %v23030_v19  ;;  %v23127_v19 = vld [vmem:[#allocation6 + $0x128] ss:$16 sps:$4 sm:$0xff]  }
 0x998   :  { %14271 = vmatpush1.bf16.msra.mxu0 %v23028_v61  ;;  %v23132_v61 = vld [vmem:[#allocation6 + $0x14c] ss:$16 sps:$4 sm:$0xff]  }
 0x999   :  { %14272 = vmatprep.subr.bf16.mxu0 %v23033_v47  ;;  %v23130_v47 = vld [vmem:[#allocation6 + $0x148] ss:$16 sps:$4 sm:$0xff]  }
 0x99c   :  { %14273 = vmatpush1.bf16.msra.mxu0 %v23031_v2  ;;  %v23135_v2 = vld [vmem:[#allocation6 + $0x16c] ss:$16 sps:$4 sm:$0xff]  }
 0x99d   :  { %14274 = vmatprep.subr.bf16.mxu0 %v23036_v15  ;;  %v23133_v15 = vld [vmem:[#allocation6 + $0x168] ss:$16 sps:$4 sm:$0xff]  }
 0x9a0   :  { %14275 = vmatpush1.bf16.msra.mxu0 %v23034_v30  ;;  %v23138_v30 = vld [vmem:[#allocation6 + $0x18c] ss:$16 sps:$4 sm:$0xff]  }
 0x9a1   :  { %14276 = vmatprep.subr.bf16.mxu0 %v23039_v23  ;;  %v23136_v23 = vld [vmem:[#allocation6 + $0x188] ss:$16 sps:$4 sm:$0xff]  }
 0x9a4   :  { %14277 = vmatpush1.bf16.msra.mxu0 %v23037_v13  ;;  %v23141_v13 = vld [vmem:[#allocation6 + $0x1ac] ss:$16 sps:$4 sm:$0xff]  }
 0x9a5   :  { %14278 = vmatprep.subr.bf16.mxu0 %v23042_v25  ;;  %v23139_v25 = vld [vmem:[#allocation6 + $0x1a8] ss:$16 sps:$4 sm:$0xff]  }
 0x9a8   :  { %14279 = vmatpush1.bf16.msra.mxu0 %v23040_v26  ;;  %v23144_v26 = vld [vmem:[#allocation6 + $0x1cc] ss:$16 sps:$4 sm:$0xff]  }
 0x9a9   :  { %14280 = vmatprep.subr.bf16.mxu0 %v23045_v17  ;;  %v23142_v17 = vld [vmem:[#allocation6 + $0x1c8] ss:$16 sps:$4 sm:$0xff]  }
 0x9ac   :  { %14281 = vmatpush1.bf16.msra.mxu0 %v23043_v27  ;;  %v23147_v27 = vld [vmem:[#allocation6 + $0x1ec] ss:$16 sps:$4 sm:$0xff]  }
 0x9ad   :  { %14282 = vmatprep.subr.bf16.mxu0 %v23048_v60  ;;  %v23145_v60 = vld [vmem:[#allocation6 + $0x1e8] ss:$16 sps:$4 sm:$0xff]  }
 0x9b0   :  { %14283 = vmatpush1.bf16.msra.mxu0 %v23046_v5  ;;  %v23150_v5 = vld [vmem:[#allocation6 + $0x20c] ss:$16 sps:$4 sm:$0xff]  }
 0x9b1   :  { %14284 = vmatprep.subr.bf16.mxu0 %v23051_v38  ;;  %v23148_v38 = vld [vmem:[#allocation6 + $0x208] ss:$16 sps:$4 sm:$0xff]  }
 0x9b4   :  { %14285 = vmatpush1.bf16.msra.mxu0 %v23049_v36  ;;  %v23153_v36 = vld [vmem:[#allocation6 + $0x22c] ss:$16 sps:$4 sm:$0xff]  }
 0x9b7   :  { %14287 = vmatmul.mubr.bf16.vlgmr.msra.gmra.mrb[8].mxu0 %v24022_v39 }
 0xa8a   :  { %v14288_v1 = vpop.f32.mrb[8].mxu0 }
 0xa8b   :  { %v19680_v3 = vadd.f32 %v14288_v1, %v2136_v21  ;;  %v14290_v20 = vpop.f32.mrb[9].mxu0  ;;  %v23160_v21 = vld [vmem:[#allocation6 + $0x288] ss:$16 sps:$4 sm:$0xff]   ;;  %v23168_v1 = vld [vmem:[#allocation6 + $0x2cc] ss:$16 sps:$4 sm:$0xff]  }
 0xa8c   :  { %v19681_v11 = vadd.f32 %v14290_v20, %v2140_v0  ;;  %v14292_v39 = vpop.f32.mrb[10].mxu0  ;;  %v23165_v0 = vld [vmem:[#allocation6 + $0x2ac] ss:$16 sps:$4 sm:$0xff]   ;;  %v23169_v20 = vld [vmem:[#allocation6 + $0x2e8] ss:$16 sps:$4 sm:$0xff]  }
 0xa8d   :  { %v14303_v53 = vmax.f32 %v19680_v3, 0.0  ;;  %v14293_v18 = vpop.f32.mrb[11].mxu0  ;;  %v23171_v3 = vld [vmem:[#allocation6 + $0x2ec] ss:$16 sps:$4 sm:$0xff]   ;;  %v23172_v39 = vld [vmem:[#allocation6 + $0x308] ss:$16 sps:$4 sm:$0xff]  }
 0xa8e   :  { %v14304_v24 = vmax.f32 %v19681_v11, 0.0  ;;  %v23174_v11 = vld [vmem:[#allocation6 + $0x30c] ss:$16 sps:$4 sm:$0xff]   ;;  %v23175_v18 = vld [vmem:[#allocation6 + $0x328] ss:$16 sps:$4 sm:$0xff]  }
 0xa8f   :  { %v24170_v55 = vpack.c.bf16 %v14303_v53, %v14303_v53  ;;  %v23177_v53 = vld [vmem:[#allocation6 + $0x32c] ss:$16 sps:$4 sm:$0xff]  }
 0xa90   :  { %v24168_v29 = vpack.c.bf16 %v14304_v24, %v14304_v24  ;;  %v23180_v24 = vld [vmem:[#allocation6 + $0x34c] ss:$16 sps:$4 sm:$0xff]  }
 0xa92   :  { %16453 = vmatprep.mubr.bf16.mxu1 %v24168_v29 }
 0xa93   :  { %16454 = vmatmul.mubr.bf16.vlgmr.msra.gmra.mrb[8].mxu1 %v24170_v55 }
 0xa94   :  { %16463 = vmatpush1.bf16.msra.mxu1 %v23100_v54  ;;  %16494 = vmatprep.mubr.bf16.mxu1 %v24090_v49  ;;  %v23118_v49 = vld [vmem:[#allocation6 + $0xc8] ss:$16 sps:$4 sm:$0xff]  }
 0xa95   :  { %16464 = vmatprep.subr.bf16.mxu1 %v23105_v28  ;;  %v23178_v54 = vld [vmem:[#allocation6 + $0x348] ss:$16 sps:$4 sm:$0xff]   ;;  %v23183_v28 = vld [vmem:[#allocation6 + $0x36c] ss:$16 sps:$4 sm:$0xff]  }
 0xa98   :  { %16465 = vmatpush1.bf16.msra.mxu1 %v23103_v58  ;;  %v23181_v58 = vld [vmem:[#allocation6 + $0x368] ss:$16 sps:$4 sm:$0xff]  }
 0xa99   :  { %16466 = vmatprep.subr.bf16.mxu1 %v23108_v59  ;;  %v23186_v59 = vld [vmem:[#allocation6 + $0x38c] ss:$16 sps:$4 sm:$0xff]  }
 0xa9c   :  { %16467 = vmatpush1.bf16.msra.mxu1 %v23106_v37  ;;  %v23184_v37 = vld [vmem:[#allocation6 + $0x388] ss:$16 sps:$4 sm:$0xff]  }
 0xa9d   :  { %16468 = vmatprep.subr.bf16.mxu1 %v23111_v35  ;;  %v23189_v35 = vld [vmem:[#allocation6 + $0x3ac] ss:$16 sps:$4 sm:$0xff]  }
 0xaa0   :  { %16469 = vmatpush1.bf16.msra.mxu1 %v23109_v57  ;;  %v23187_v57 = vld [vmem:[#allocation6 + $0x3a8] ss:$16 sps:$4 sm:$0xff]  }
 0xaa1   :  { %16470 = vmatprep.subr.bf16.mxu1 %v23114_v32  ;;  %v23192_v32 = vld [vmem:[#allocation6 + $0x3cc] ss:$16 sps:$4 sm:$0xff]  }
 0xaa4   :  { %16471 = vmatpush1.bf16.msra.mxu1 %v23112_v62  ;;  %v23190_v62 = vld [vmem:[#allocation6 + $0x3c8] ss:$16 sps:$4 sm:$0xff]  }
 0xaa5   :  { %16472 = vmatprep.subr.bf16.mxu1 %v23117_v7  ;;  %v23195_v7 = vld [vmem:[#allocation6 + $0x3ec] ss:$16 sps:$4 sm:$0xff]  }
 0xaa8   :  { %16473 = vmatpush1.bf16.msra.mxu1 %v23115_v10  ;;  %v23193_v10 = vld [vmem:[#allocation6 + $0x3e8] ss:$16 sps:$4 sm:$0xff]  }
 0xaa9   :  { %16474 = vmatprep.subr.bf16.mxu1 %v23120_v8  ;;  %v23198_v8 = vld [vmem:[#allocation6 + $0x40c] ss:$16 sps:$4 sm:$0xff]  }
 0xaac   :  { %16475 = vmatpush1.bf16.msra.mxu1 %v23118_v49  ;;  %v23196_v49 = vld [vmem:[#allocation6 + $0x408] ss:$16 sps:$4 sm:$0xff]  }
 0xaad   :  { %16476 = vmatprep.subr.bf16.mxu1 %v23123_v63  ;;  %v23201_v63 = vld [vmem:[#allocation6 + $0x42c] ss:$16 sps:$4 sm:$0xff]  }
 0xab0   :  { %16477 = vmatpush1.bf16.msra.mxu1 %v23121_v48  ;;  %v23199_v48 = vld [vmem:[#allocation6 + $0x428] ss:$16 sps:$4 sm:$0xff]  }
 0xab1   :  { %16478 = vmatprep.subr.bf16.mxu1 %v23126_v4  ;;  %v23204_v4 = vld [vmem:[#allocation6 + $0x44c] ss:$16 sps:$4 sm:$0xff]  }
 0xab4   :  { %16479 = vmatpush1.bf16.msra.mxu1 %v23124_v14  ;;  %v23202_v14 = vld [vmem:[#allocation6 + $0x448] ss:$16 sps:$4 sm:$0xff]  }
 0xab5   :  { %16480 = vmatprep.subr.bf16.mxu1 %v23129_v42  ;;  %v23207_v42 = vld [vmem:[#allocation6 + $0x46c] ss:$16 sps:$4 sm:$0xff]  }
 0xab8   :  { %16481 = vmatpush1.bf16.msra.mxu1 %v23127_v19  ;;  %v23205_v19 = vld [vmem:[#allocation6 + $0x468] ss:$16 sps:$4 sm:$0xff]  }
 0xab9   :  { %16482 = vmatprep.subr.bf16.mxu1 %v23132_v61  ;;  %v23210_v61 = vld [vmem:[#allocation6 + $0x48c] ss:$16 sps:$4 sm:$0xff]  }
 0xabc   :  { %16483 = vmatpush1.bf16.msra.mxu1 %v23130_v47  ;;  %v23208_v47 = vld [vmem:[#allocation6 + $0x488] ss:$16 sps:$4 sm:$0xff]  }
 0xabd   :  { %16484 = vmatprep.subr.bf16.mxu1 %v23135_v2  ;;  %v23213_v2 = vld [vmem:[#allocation6 + $0x4ac] ss:$16 sps:$4 sm:$0xff]  }
 0xac0   :  { %16485 = vmatpush1.bf16.msra.mxu1 %v23133_v15  ;;  %v23216_v15 = vld [vmem:[#allocation6 + $0x4cc] ss:$16 sps:$4 sm:$0xff]  }
 0xac1   :  { %16486 = vmatprep.subr.bf16.mxu1 %v23138_v30  ;;  %v23219_v30 = vld [vmem:[#allocation6 + $0x4ec] ss:$16 sps:$4 sm:$0xff]  }
 0xac4   :  { %16487 = vmatpush1.bf16.msra.mxu1 %v23136_v23  ;;  %v23217_v23 = vld [vmem:[#allocation6 + $0x4e8] ss:$16 sps:$4 sm:$0xff]  }
 0xac5   :  { %16488 = vmatprep.subr.bf16.mxu1 %v23141_v13  ;;  %v23222_v13 = vld [vmem:[#allocation6 + $0x50c] ss:$16 sps:$4 sm:$0xff]  }
 0xac8   :  { %16489 = vmatpush1.bf16.msra.mxu1 %v23139_v25  ;;  %v23220_v25 = vld [vmem:[#allocation6 + $0x508] ss:$16 sps:$4 sm:$0xff]  }
 0xac9   :  { %16490 = vmatprep.subr.bf16.mxu1 %v23144_v26  ;;  %v23225_v26 = vld [vmem:[#allocation6 + $0x52c] ss:$16 sps:$4 sm:$0xff]  }
 0xacc   :  { %16491 = vmatpush1.bf16.msra.mxu1 %v23142_v17  ;;  %v23223_v17 = vld [vmem:[#allocation6 + $0x528] ss:$16 sps:$4 sm:$0xff]  }
 0xacd   :  { %16492 = vmatprep.subr.bf16.mxu1 %v23147_v27  ;;  %v23228_v27 = vld [vmem:[#allocation6 + $0x54c] ss:$16 sps:$4 sm:$0xff]  }
 0xad0   :  { %16493 = vmatpush1.bf16.msra.mxu1 %v23145_v60  ;;  %v23226_v60 = vld [vmem:[#allocation6 + $0x548] ss:$16 sps:$4 sm:$0xff]  }
 0xad1   :  { %16503 = vmatprep.subr.bf16.mxu1 %v23150_v5  ;;  %v23231_v5 = vld [vmem:[#allocation6 + $0x56c] ss:$16 sps:$4 sm:$0xff]  }
 0xad3   :  { %16495 = vmatmul.mubr.bf16.vlgmr.msra.gmra.mrb[12].mxu1 %v24107_v50  ;;  %v23163_v50 = vld [vmem:[#allocation6 + $0x2a8] ss:$16 sps:$4 sm:$0xff]  }
 0xad4   :  { %16504 = vmatpush1.bf16.msra.mxu1 %v23148_v38  ;;  %16535 = vmatprep.mubr.bf16.mxu1 %v24109_v52  ;;  %v23166_v52 = vld [vmem:[#allocation6 + $0x2c8] ss:$16 sps:$4 sm:$0xff]  }
 0xad5   :  { %16505 = vmatprep.subr.bf16.mxu1 %v23153_v36  ;;  %v23229_v38 = vld [vmem:[#allocation6 + $0x568] ss:$16 sps:$4 sm:$0xff]   ;;  %v23234_v36 = vld [vmem:[#allocation6 + $0x58c] ss:$16 sps:$4 sm:$0xff]  }
 0xad8   :  { %16506 = vmatpush1.bf16.msra.mxu1 %v23151_v9  ;;  %v23232_v9 = vld [vmem:[#allocation6 + $0x588] ss:$16 sps:$4 sm:$0xff]  }
 0xad9   :  { %16507 = vmatprep.subr.bf16.mxu1 %v23156_v43  ;;  %v23237_v43 = vld [vmem:[#allocation6 + $0x5ac] ss:$16 sps:$4 sm:$0xff]  }
 0xadc   :  { %16508 = vmatpush1.bf16.msra.mxu1 %v23154_v44  ;;  %v23235_v44 = vld [vmem:[#allocation6 + $0x5a8] ss:$16 sps:$4 sm:$0xff]  }
 0xadd   :  { %16509 = vmatprep.subr.bf16.mxu1 %v23159_v46  ;;  %v23240_v46 = vld [vmem:[#allocation6 + $0x5cc] ss:$16 sps:$4 sm:$0xff]  }
 0xae0   :  { %16510 = vmatpush1.bf16.msra.mxu1 %v23157_v31  ;;  %v23238_v31 = vld [vmem:[#allocation6 + $0x5c8] ss:$16 sps:$4 sm:$0xff]  }
 0xae1   :  { %16511 = vmatprep.subr.bf16.mxu1 %v23162_v41  ;;  %v23243_v41 = vld [vmem:[#allocation6 + $0x5ec] ss:$16 sps:$4 sm:$0xff]  }
 0xae4   :  { %16512 = vmatpush1.bf16.msra.mxu1 %v23160_v21  ;;  %v23241_v21 = vld [vmem:[#allocation6 + $0x5e8] ss:$16 sps:$4 sm:$0xff]  }
 0xae5   :  { %16513 = vmatprep.subr.bf16.mxu1 %v23165_v0  ;;  %v23246_v0 = vld [vmem:[#allocation6 + $0x60c] ss:$16 sps:$4 sm:$0xff]  }
 0xae8   :  { %16514 = vmatpush1.bf16.msra.mxu1 %v23163_v50  ;;  %v23244_v50 = vld [vmem:[#allocation6 + $0x608] ss:$16 sps:$4 sm:$0xff]  }
 0xae9   :  { %16515 = vmatprep.subr.bf16.mxu1 %v23168_v1  ;;  %v23249_v1 = vld [vmem:[#allocation6 + $0x62c] ss:$16 sps:$4 sm:$0xff]  }
 0xaec   :  { %16516 = vmatpush1.bf16.msra.mxu1 %v23166_v52  ;;  %v23247_v52 = vld [vmem:[#allocation6 + $0x628] ss:$16 sps:$4 sm:$0xff]  }
 0xaed   :  { %16517 = vmatprep.subr.bf16.mxu1 %v23171_v3  ;;  %v23252_v3 = vld [vmem:[#allocation6 + $0x64c] ss:$16 sps:$4 sm:$0xff]  }
 0xaf0   :  { %16518 = vmatpush1.bf16.msra.mxu1 %v23169_v20  ;;  %v23250_v20 = vld [vmem:[#allocation6 + $0x648] ss:$16 sps:$4 sm:$0xff]  }
 0xaf1   :  { %16519 = vmatprep.subr.bf16.mxu1 %v23174_v11  ;;  %v23255_v11 = vld [vmem:[#allocation6 + $0x66c] ss:$16 sps:$4 sm:$0xff]  }
 0xaf4   :  { %16520 = vmatpush1.bf16.msra.mxu1 %v23172_v39  ;;  %v23253_v39 = vld [vmem:[#allocation6 + $0x668] ss:$16 sps:$4 sm:$0xff]  }
 0xaf5   :  { %16521 = vmatprep.subr.bf16.mxu1 %v23177_v53  ;;  %v23258_v53 = vld [vmem:[#allocation6 + $0x68c] ss:$16 sps:$4 sm:$0xff]  }
 0xaf8   :  { %16522 = vmatpush1.bf16.msra.mxu1 %v23175_v18  ;;  %v23256_v18 = vld [vmem:[#allocation6 + $0x688] ss:$16 sps:$4 sm:$0xff]  }
 0xaf9   :  { %16523 = vmatprep.subr.bf16.mxu1 %v23180_v24  ;;  %v23261_v24 = vld [vmem:[#allocation6 + $0x6ac] ss:$16 sps:$4 sm:$0xff]  }
 0xafc   :  { %16524 = vmatpush1.bf16.msra.mxu1 %v23178_v54  ;;  %v23264_v54 = vld [vmem:[#allocation6 + $0x6cc] ss:$16 sps:$4 sm:$0xff]  }
 0xafd   :  { %16525 = vmatprep.subr.bf16.mxu1 %v23183_v28 }
 0xb00   :  { %16526 = vmatpush1.bf16.msra.mxu1 %v23181_v58 }
 0xb01   :  { %16527 = vmatprep.subr.bf16.mxu1 %v23186_v59  ;;  %v23262_v59 = vld [vmem:[#allocation6 + $0x6c8] ss:$16 sps:$4 sm:$0xff]  }
 0xb04   :  { %16528 = vmatpush1.bf16.msra.mxu1 %v23184_v37 }
 0xb05   :  { %16529 = vmatprep.subr.bf16.mxu1 %v23189_v35  ;;  %v23267_v35 = vld [vmem:[#allocation6 + $0x6ec] ss:$16 sps:$4 sm:$0xff]  }
 0xb08   :  { %16530 = vmatpush1.bf16.msra.mxu1 %v23187_v57  ;;  %v23265_v57 = vld [vmem:[#allocation6 + $0x6e8] ss:$16 sps:$4 sm:$0xff]  }
 0xb09   :  { %16531 = vmatprep.subr.bf16.mxu1 %v23192_v32  ;;  %v23270_v32 = vld [vmem:[#allocation6 + $0x70c] ss:$16 sps:$4 sm:$0xff]  }
 0xb0c   :  { %16532 = vmatpush1.bf16.msra.mxu1 %v23190_v62  ;;  %v23268_v62 = vld [vmem:[#allocation6 + $0x708] ss:$16 sps:$4 sm:$0xff]  }
 0xb0d   :  { %16533 = vmatprep.subr.bf16.mxu1 %v23195_v7  ;;  %v23273_v7 = vld [vmem:[#allocation6 + $0x72c] ss:$16 sps:$4 sm:$0xff]  }
 0xb10   :  { %16534 = vmatpush1.bf16.msra.mxu1 %v23193_v10  ;;  %v23271_v10 = vld [vmem:[#allocation6 + $0x728] ss:$16 sps:$4 sm:$0xff]  }
 0xb11   :  { %16544 = vmatprep.subr.bf16.mxu1 %v23198_v8  ;;  %v23276_v8 = vld [vmem:[#allocation6 + $0x74c] ss:$16 sps:$4 sm:$0xff]  }
 0xb13   :  { %16536 = vmatmul.mubr.bf16.vlgmr.msra.gmra.mrb[12].mxu1 %v24120_v51  ;;  %v23211_v51 = vld [vmem:[#allocation6 + $0x4a8] ss:$16 sps:$4 sm:$0xff]  }
 0xb14   :  { %16545 = vmatpush1.bf16.msra.mxu1 %v23196_v49  ;;  %16576 = vmatprep.mubr.bf16.mxu1 %v24135_v34  ;;  %v23214_v34 = vld [vmem:[#allocation6 + $0x4c8] ss:$16 sps:$4 sm:$0xff]  }
 0xb15   :  { %16546 = vmatprep.subr.bf16.mxu1 %v23201_v63  ;;  %v23274_v49 = vld [vmem:[#allocation6 + $0x748] ss:$16 sps:$4 sm:$0xff]   ;;  %v23279_v63 = vld [vmem:[#allocation6 + $0x76c] ss:$16 sps:$4 sm:$0xff]  }
 0xb18   :  { %16547 = vmatpush1.bf16.msra.mxu1 %v23199_v48  ;;  %v23277_v48 = vld [vmem:[#allocation6 + $0x768] ss:$16 sps:$4 sm:$0xff]  }
 0xb19   :  { %16548 = vmatprep.subr.bf16.mxu1 %v23204_v4  ;;  %v23282_v4 = vld [vmem:[#allocation6 + $0x78c] ss:$16 sps:$4 sm:$0xff]  }
 0xb1c   :  { %16549 = vmatpush1.bf16.msra.mxu1 %v23202_v14  ;;  %v23280_v14 = vld [vmem:[#allocation6 + $0x788] ss:$16 sps:$4 sm:$0xff]  }
 0xb1d   :  { %16550 = vmatprep.subr.bf16.mxu1 %v23207_v42  ;;  %v23285_v42 = vld [vmem:[#allocation6 + $0x7ac] ss:$16 sps:$4 sm:$0xff]  }
 0xb20   :  { %16551 = vmatpush1.bf16.msra.mxu1 %v23205_v19  ;;  %v23283_v19 = vld [vmem:[#allocation6 + $0x7a8] ss:$16 sps:$4 sm:$0xff]  }
 0xb21   :  { %16552 = vmatprep.subr.bf16.mxu1 %v23210_v61  ;;  %v23288_v61 = vld [vmem:[#allocation6 + $0x7cc] ss:$16 sps:$4 sm:$0xff]  }
 0xb24   :  { %16553 = vmatpush1.bf16.msra.mxu1 %v23208_v47  ;;  %v23286_v47 = vld [vmem:[#allocation6 + $0x7c8] ss:$16 sps:$4 sm:$0xff]  }
 0xb25   :  { %16554 = vmatprep.subr.bf16.mxu1 %v23213_v2  ;;  %v23291_v2 = vld [vmem:[#allocation6 + $0x7ec] ss:$16 sps:$4 sm:$0xff]  }
 0xb28   :  { %16555 = vmatpush1.bf16.msra.mxu1 %v23211_v51  ;;  %v23289_v51 = vld [vmem:[#allocation6 + $0x7e8] ss:$16 sps:$4 sm:$0xff]  }
 0xb29   :  { %16556 = vmatprep.subr.bf16.mxu1 %v23216_v15  ;;  %v23294_v15 = vld [vmem:[#allocation6 + $0x80c] ss:$16 sps:$4 sm:$0xff]  }
 0xb2c   :  { %16557 = vmatpush1.bf16.msra.mxu1 %v23214_v34  ;;  %v23292_v34 = vld [vmem:[#allocation6 + $0x808] ss:$16 sps:$4 sm:$0xff]  }
 0xb2d   :  { %16558 = vmatprep.subr.bf16.mxu1 %v23219_v30  ;;  %v23297_v30 = vld [vmem:[#allocation6 + $0x82c] ss:$16 sps:$4 sm:$0xff]  }
 0xb30   :  { %16559 = vmatpush1.bf16.msra.mxu1 %v23217_v23  ;;  %v23295_v23 = vld [vmem:[#allocation6 + $0x828] ss:$16 sps:$4 sm:$0xff]  }
 0xb31   :  { %16560 = vmatprep.subr.bf16.mxu1 %v23222_v13  ;;  %v23300_v13 = vld [vmem:[#allocation6 + $0x84c] ss:$16 sps:$4 sm:$0xff]  }
 0xb34   :  { %16561 = vmatpush1.bf16.msra.mxu1 %v23220_v25  ;;  %v23298_v25 = vld [vmem:[#allocation6 + $0x848] ss:$16 sps:$4 sm:$0xff]  }
 0xb35   :  { %16562 = vmatprep.subr.bf16.mxu1 %v23225_v26  ;;  %v23303_v26 = vld [vmem:[#allocation6 + $0x86c] ss:$16 sps:$4 sm:$0xff]  }
 0xb38   :  { %16563 = vmatpush1.bf16.msra.mxu1 %v23223_v17  ;;  %v23301_v17 = vld [vmem:[#allocation6 + $0x868] ss:$16 sps:$4 sm:$0xff]  }
 0xb39   :  { %16564 = vmatprep.subr.bf16.mxu1 %v23228_v27  ;;  %v23306_v27 = vld [vmem:[#allocation6 + $0x88c] ss:$16 sps:$4 sm:$0xff]  }
 0xb3c   :  { %16565 = vmatpush1.bf16.msra.mxu1 %v23226_v60  ;;  %v23304_v60 = vld [vmem:[#allocation6 + $0x888] ss:$16 sps:$4 sm:$0xff]  }
 0xb3d   :  { %16566 = vmatprep.subr.bf16.mxu1 %v23231_v5  ;;  %v23309_v5 = vld [vmem:[#allocation6 + $0x8ac] ss:$16 sps:$4 sm:$0xff]  }
 0xb40   :  { %16567 = vmatpush1.bf16.msra.mxu1 %v23229_v38  ;;  %v23312_v38 = vld [vmem:[#allocation6 + $0x8cc] ss:$16 sps:$4 sm:$0xff]  }
 0xb41   :  { %16568 = vmatprep.subr.bf16.mxu1 %v23234_v36  ;;  %v23315_v36 = vld [vmem:[#allocation6 + $0x8ec] ss:$16 sps:$4 sm:$0xff]  }
 0xb44   :  { %16569 = vmatpush1.bf16.msra.mxu1 %v23232_v9  ;;  %v23313_v9 = vld [vmem:[#allocation6 + $0x8e8] ss:$16 sps:$4 sm:$0xff]  }
 0xb45   :  { %16570 = vmatprep.subr.bf16.mxu1 %v23237_v43  ;;  %v23318_v43 = vld [vmem:[#allocation6 + $0x90c] ss:$16 sps:$4 sm:$0xff]  }
 0xb48   :  { %16571 = vmatpush1.bf16.msra.mxu1 %v23235_v44  ;;  %v23316_v44 = vld [vmem:[#allocation6 + $0x908] ss:$16 sps:$4 sm:$0xff]  }
 0xb49   :  { %16572 = vmatprep.subr.bf16.mxu1 %v23240_v46  ;;  %v23321_v46 = vld [vmem:[#allocation6 + $0x92c] ss:$16 sps:$4 sm:$0xff]  }
 0xb4c   :  { %16573 = vmatpush1.bf16.msra.mxu1 %v23238_v31  ;;  %v23319_v31 = vld [vmem:[#allocation6 + $0x928] ss:$16 sps:$4 sm:$0xff]  }
 0xb4d   :  { %16574 = vmatprep.subr.bf16.mxu1 %v23243_v41  ;;  %v23324_v41 = vld [vmem:[#allocation6 + $0x94c] ss:$16 sps:$4 sm:$0xff]  }
 0xb50   :  { %16575 = vmatpush1.bf16.msra.mxu1 %v23241_v21  ;;  %v23322_v21 = vld [vmem:[#allocation6 + $0x948] ss:$16 sps:$4 sm:$0xff]  }
 0xb51   :  { %16585 = vmatprep.subr.bf16.mxu1 %v23246_v0  ;;  %v23327_v0 = vld [vmem:[#allocation6 + $0x96c] ss:$16 sps:$4 sm:$0xff]  }
 0xb53   :  { %16577 = vmatmul.mubr.bf16.vlgmr.msra.gmra.mrb[12].mxu1 %v24137_v40  ;;  %v23259_v40 = vld [vmem:[#allocation6 + $0x6a8] ss:$16 sps:$4 sm:$0xff]  }
 0xb54   :  { %16586 = vmatpush1.bf16.msra.mxu1 %v23244_v50  ;;  %16617 = vmatprep.mubr.bf16.mxu1 %v24140_v45  ;;  %v23325_v50 = vld [vmem:[#allocation6 + $0x968] ss:$16 sps:$4 sm:$0xff]  }
 0xb55   :  { %16587 = vmatprep.subr.bf16.mxu1 %v23249_v1  ;;  %v23330_v1 = vld [vmem:[#allocation6 + $0x98c] ss:$16 sps:$4 sm:$0xff]  }
 0xb58   :  { %16588 = vmatpush1.bf16.msra.mxu1 %v23247_v52  ;;  %v23328_v52 = vld [vmem:[#allocation6 + $0x988] ss:$16 sps:$4 sm:$0xff]  }
 0xb59   :  { %16589 = vmatprep.subr.bf16.mxu1 %v23252_v3  ;;  %v23333_v3 = vld [vmem:[#allocation6 + $0x9ac] ss:$16 sps:$4 sm:$0xff]  }
 0xb5c   :  { %16590 = vmatpush1.bf16.msra.mxu1 %v23250_v20  ;;  %v24187_v20 = vld [vmem:[#allocation7] sm:$0xf] }
 0xb5d   :  { %16591 = vmatprep.subr.bf16.mxu1 %v23255_v11  ;;  %v23331_v11 = vld [vmem:[#allocation6 + $0x9a8] ss:$16 sps:$4 sm:$0xff]  }
 0xb60   :  { %16592 = vmatpush1.bf16.msra.mxu1 %v23253_v39  ;;  %v23336_v39 = vld [vmem:[#allocation6 + $0x9cc] ss:$16 sps:$4 sm:$0xff]  }
 0xb61   :  { %16593 = vmatprep.subr.bf16.mxu1 %v23258_v53  ;;  %v14644_v53 = vrot.slane %v24187_v20, %v24083_v16  ;;  %v23343_v16 = vld [vmem:[#allocation9 + $0x8] sm:$0xff]  }
 0xb64   :  { %16594 = vmatpush1.bf16.msra.mxu1 %v23256_v18  ;;  %v23334_v18 = vld [vmem:[#allocation6 + $0x9c8] ss:$16 sps:$4 sm:$0xff]  }
 0xb65   :  { %16595 = vmatprep.subr.bf16.mxu1 %v23261_v24  ;;  %v23339_v24 = vld [vmem:[#allocation6 + $0x9ec] ss:$16 sps:$4 sm:$0xff]  }
 0xb66   :  { %v24181_v45 = vpop.f32.mrb[8].mxu1 }
 0xb67   :  { %v24183_v28 = vpop.f32.mrb[9].mxu1 }
 0xb68   :  { %16596 = vmatpush1.bf16.msra.mxu1 %v23259_v40  ;;  %v16459_v58 = vpop.f32.mrb[10].mxu1  ;;  %v19683_v40 = vadd.f32 %v24183_v28, %v14644_v53  ;;  %v23346_v28 = vld [vmem:[#allocation9 + $0x58] sm:$0xff]  }
 0xb69   :  { %v16460_v37 = vpop.f32.mrb[11].mxu1  ;;  %16597 = vmatprep.subr.bf16.mxu1 %v23264_v54  ;;  %v23337_v54 = vld [vmem:[#allocation6 + $0x9e8] ss:$16 sps:$4 sm:$0xff]  }
 0xb6a   :  { %v23340_v58 = vld [vmem:[#allocation9 + $0x40] sm:$0xff]  }
 0xb6b   :  { %v23341_v37 = vld [vmem:[#allocation9] sm:$0xff]  }
 0xb6c   :  { %16598 = vmatpush1.bf16.msra.mxu1 %v23262_v59  ;;  %v16668_v59 = vmax.f32 %v19683_v40, 0.0  ;;  %v23378_v40 = vld [vmem:[#allocation12 + $0x30] sm:$0xff]  }
 0xb6d   :  { %16599 = vmatprep.subr.bf16.mxu1 %v23267_v35  ;;  %v23342_v35 = vld [vmem:[#allocation9 + $0x48] sm:$0xff]  }
 0xb70   :  { %16600 = vmatpush1.bf16.msra.mxu1 %v23265_v57  ;;  %v16672_v57 = vpack.c.bf16 %v16668_v59, %v16668_v59 }
 0xb71   :  { %16601 = vmatprep.subr.bf16.mxu1 %v23270_v32  ;;  %v23344_v32 = vld [vmem:[#allocation9 + $0x50] sm:$0xff]  }
 0xb74   :  { %16602 = vmatpush1.bf16.msra.mxu1 %v23268_v62  ;;  %v23345_v62 = vld [vmem:[#allocation9 + $0x10] sm:$0xff]  }
 0xb75   :  { %16603 = vmatprep.subr.bf16.mxu1 %v23273_v7  ;;  %v23347_v7 = vld [vmem:[#allocation9 + $0x18] sm:$0xff]  }
 0xb78   :  { %16604 = vmatpush1.bf16.msra.mxu1 %v23271_v10  ;;  %v23348_v10 = vld [vmem:[#allocation9 + $0x60] sm:$0xff]  }
 0xb79   :  { %16605 = vmatprep.subr.bf16.mxu1 %v23276_v8  ;;  %v23349_v8 = vld [vmem:[#allocation9 + $0x20] sm:$0xff]  }
 0xb7c   :  { %16606 = vmatpush1.bf16.msra.mxu1 %v23274_v49  ;;  %v23350_v49 = vld [vmem:[#allocation9 + $0x68] sm:$0xff]  }
 0xb7d   :  { %16607 = vmatprep.subr.bf16.mxu1 %v23279_v63  ;;  %v23351_v63 = vld [vmem:[#allocation9 + $0x28] sm:$0xff]  }
 0xb80   :  { %16608 = vmatpush1.bf16.msra.mxu1 %v23277_v48  ;;  %v23352_v48 = vld [vmem:[#allocation9 + $0x70] sm:$0xff]  }
 0xb81   :  { %16609 = vmatprep.subr.bf16.mxu1 %v23282_v4  ;;  %v23353_v4 = vld [vmem:[#allocation9 + $0x30] sm:$0xff]  }
 0xb84   :  { %16610 = vmatpush1.bf16.msra.mxu1 %v23280_v14 }
 0xb85   :  { %16611 = vmatprep.subr.bf16.mxu1 %v23285_v42  ;;  %v23354_v42 = vld [vmem:[#allocation9 + $0x78] sm:$0xff]  }
 0xb88   :  { %16612 = vmatpush1.bf16.msra.mxu1 %v23283_v19  ;;  %v23355_v19 = vld [vmem:[#allocation9 + $0x38] sm:$0xff]  }
 0xb89   :  { %16613 = vmatprep.subr.bf16.mxu1 %v23288_v61 }
 0xb8c   :  { %16614 = vmatpush1.bf16.msra.mxu1 %v23286_v47  ;;  %v23356_v47 = vld [vmem:[#allocation9 + $0xc0] sm:$0xff]  }
 0xb8d   :  { %16615 = vmatprep.subr.bf16.mxu1 %v23291_v2  ;;  %v23357_v2 = vld [vmem:[#allocation9 + $0x80] sm:$0xff]  }
 0xb90   :  { %16616 = vmatpush1.bf16.msra.mxu1 %v23289_v51 }
 0xb91   :  { %16626 = vmatprep.subr.bf16.mxu1 %v23294_v15  ;;  %v23358_v15 = vld [vmem:[#allocation9 + $0xc8] sm:$0xff]  }
 0xb93   :  { %16618 = vmatmul.mubr.bf16.vlgmr.msra.gmra.mrb[12].mxu1 %v24148_v33  ;;  %v23307_v33 = vld [vmem:[#allocation6 + $0x8a8] ss:$16 sps:$4 sm:$0xff]  }
 0xb94   :  { %16627 = vmatpush1.bf16.msra.mxu1 %v23292_v34  ;;  %16658 = vmatprep.mubr.bf16.mxu1 %v24168_v29  ;;  %v23310_v29 = vld [vmem:[#allocation6 + $0x8c8] ss:$16 sps:$4 sm:$0xff]  }
 0xb95   :  { %16628 = vmatprep.subr.bf16.mxu1 %v23297_v30  ;;  %v23360_v34 = vld [vmem:[#allocation9 + $0xd0] sm:$0xff]  }
 0xb96   :  { %v23361_v30 = vld [vmem:[#allocation9 + $0x90] sm:$0xff]  }
 0xb98   :  { %16629 = vmatpush1.bf16.msra.mxu1 %v23295_v23  ;;  %v23363_v23 = vld [vmem:[#allocation9 + $0x98] sm:$0xff]  }
 0xb99   :  { %16630 = vmatprep.subr.bf16.mxu1 %v23300_v13  ;;  %v23364_v13 = vld [vmem:[#allocation9 + $0xe0] sm:$0xff]  }
 0xb9c   :  { %16631 = vmatpush1.bf16.msra.mxu1 %v23298_v25  ;;  %v23365_v25 = vld [vmem:[#allocation9 + $0xa0] sm:$0xff]  }
 0xb9d   :  { %16632 = vmatprep.subr.bf16.mxu1 %v23303_v26  ;;  %v23366_v26 = vld [vmem:[#allocation9 + $0xe8] sm:$0xff]  }
 0xba0   :  { %16633 = vmatpush1.bf16.msra.mxu1 %v23301_v17  ;;  %v23367_v17 = vld [vmem:[#allocation9 + $0xa8] sm:$0xff]  }
 0xba1   :  { %16634 = vmatprep.subr.bf16.mxu1 %v23306_v27  ;;  %v23368_v27 = vld [vmem:[#allocation9 + $0xf0] sm:$0xff]  }
 0xba4   :  { %16635 = vmatpush1.bf16.msra.mxu1 %v23304_v60  ;;  %v23369_v60 = vld [vmem:[#allocation9 + $0xb0] sm:$0xff]  }
 0xba5   :  { %16636 = vmatprep.subr.bf16.mxu1 %v23309_v5  ;;  %v23370_v5 = vld [vmem:[#allocation9 + $0xf8] sm:$0xff]  }
 0xba8   :  { %16637 = vmatpush1.bf16.msra.mxu1 %v23307_v33  ;;  %v23371_v33 = vld [vmem:[#allocation9 + $0xb8] sm:$0xff]  }
 0xba9   :  { %16638 = vmatprep.subr.bf16.mxu1 %v23312_v38  ;;  %v23637_v38 = vmov 0.0  }
 0xbac   :  { %16639 = vmatpush1.bf16.msra.mxu1 %v23310_v29  ;;  %v14648_v29 = vrot.slane %v24187_v20, %v2111_v22  ;;  %v23376_v22 = vld [vmem:[#allocation12 + $0x20] sm:$0xff]  }
 0xbad   :  { %16640 = vmatprep.subr.bf16.mxu1 %v23315_v36  ;;  %v14652_v36 = vrot.slane %v24187_v20, %v2115_v56  ;;  %v23375_v56 = vld [vmem:[#allocation12 + $0x18] sm:$0xff]  }
 0xbb0   :  { %16641 = vmatpush1.bf16.msra.mxu1 %v23313_v9 }
 0xbb1   :  { %16642 = vmatprep.subr.bf16.mxu1 %v23318_v43 }
 0xbb4   :  { %16643 = vmatpush1.bf16.msra.mxu1 %v23316_v44 }
 0xbb5   :  { %16644 = vmatprep.subr.bf16.mxu1 %v23321_v46 }
 0xbb8   :  { %16645 = vmatpush1.bf16.msra.mxu1 %v23319_v31 }
 0xbb9   :  { %16646 = vmatprep.subr.bf16.mxu1 %v23324_v41 }
 0xbbc   :  { %16647 = vmatpush1.bf16.msra.mxu1 %v23322_v21 }
 0xbbd   :  { %16648 = vmatprep.subr.bf16.mxu1 %v23327_v0 }
 0xbc0   :  { %16649 = vmatpush1.bf16.msra.mxu1 %v23325_v50 }
 0xbc1   :  { %16650 = vmatprep.subr.bf16.mxu1 %v23330_v1  ;;  %v23372_v1 = vld [vmem:[#allocation12] sm:$0xff]  }
 0xbc4   :  { %16651 = vmatpush1.bf16.msra.mxu1 %v23328_v52 }
 0xbc5   :  { %16652 = vmatprep.subr.bf16.mxu1 %v23333_v3  ;;  %v23373_v3 = vld [vmem:[#allocation12 + $0x8] sm:$0xff]  }
 0xbc8   :  { %16653 = vmatpush1.bf16.msra.mxu1 %v23331_v11 }
 0xbc9   :  { %16654 = vmatprep.subr.bf16.mxu1 %v23336_v39 }
 0xbcc   :  { %16655 = vmatpush1.bf16.msra.mxu1 %v23334_v18 }
 0xbcd   :  { %16656 = vmatprep.subr.bf16.mxu1 %v23339_v24 }
 0xbd0   :  { %16657 = vmatpush1.bf16.msra.mxu1 %v23337_v54  ;;  %v23379_v54 = vld [vmem:[#allocation12 + $0x38] sm:$0xff]  }
 0xbd1   :  { %19570 = vmatprep.subr.bf16.mxu1 %v23340_v58  ;;  %v19519_v58 = vld [vmem:[#allocation10] ss:$0 sm:$0xff] }
 0xbd3   :  { %16659 = vmatmul.mubr.bf16.vlgmr.msra.gmra.mrb[12].mxu1 %v24170_v55  ;;  %v14640_v55 = vrot.slane %v24187_v20, %v24097_v12  ;;  %v23359_v12 = vld [vmem:[#allocation9 + $0x88] sm:$0xff]  }
 0xbd4   :  { %19571 = vmatpush3.bf16.msra.mxu1 %v23341_v37  ;;  %16970 = vmatprep.mubr.bf16.mxu1 %v16672_v57  ;;  %v23377_v20 = vld [vmem:[#allocation12 + $0x28] sm:$0xff]  }
 0xbd5   :  { %19572 = vmatprep.subr.bf16.mxu1 %v23342_v35  ;;  %v19682_v14 = vadd.f32 %v24181_v45, %v14640_v55  ;;  %v23362_v45 = vld [vmem:[#allocation9 + $0xd8] sm:$0xff]   ;;  %v23384_v55 = vld [vmem:[#allocation15 + $0x20] sm:$0xff]  }
 0xbd7   :  { %v16667_v61 = vmax.f32 %v19682_v14, 0.0  ;;  %v23387_v14 = vld [vmem:[#allocation15 + $0x38] sm:$0xff]  }
 0xbd8   :  { %19573 = vmatpush3.bf16.msra.mxu1 %v23343_v16 }
 0xbd9   :  { %19574 = vmatprep.subr.bf16.mxu1 %v23344_v32  ;;  %v16671_v51 = vpack.c.bf16 %v16667_v61, %v16667_v61 }
 0xbdc   :  { %19575 = vmatpush3.bf16.msra.mxu1 %v23345_v62 }
 0xbdd   :  { %19576 = vmatprep.subr.bf16.mxu1 %v23346_v28 }
 0xbe0   :  { %19577 = vmatpush3.bf16.msra.mxu1 %v23347_v7  ;;  %v23380_v7 = vld [vmem:[#allocation15] sm:$0xff]  }
 0xbe1   :  { %19578 = vmatprep.subr.bf16.mxu1 %v23348_v10 }
 0xbe4   :  { %19579 = vmatpush3.bf16.msra.mxu1 %v23349_v8  ;;  %v23381_v8 = vld [vmem:[#allocation15 + $0x8] sm:$0xff]  }
 0xbe5   :  { %19580 = vmatprep.subr.bf16.mxu1 %v23350_v49  ;;  %v23382_v49 = vld [vmem:[#allocation15 + $0x10] sm:$0xff]  }
 0xbe8   :  { %19581 = vmatpush3.bf16.msra.mxu1 %v23351_v63  ;;  %v23383_v63 = vld [vmem:[#allocation15 + $0x18] sm:$0xff]  }
 0xbe9   :  { %19582 = vmatprep.subr.bf16.mxu1 %v23352_v48  ;;  %v23385_v48 = vld [vmem:[#allocation15 + $0x28] sm:$0xff]  }
 0xbec   :  { %19583 = vmatpush3.bf16.msra.mxu1 %v23353_v4  ;;  %v23386_v4 = vld [vmem:[#allocation15 + $0x30] sm:$0xff]  }
 0xbed   :  { %19584 = vmatprep.subr.bf16.mxu1 %v23354_v42  ;;  %v19552_v42 = vld [vmem:[#allocation13] ss:$0 sm:$0xff] }
 0xbf0   :  { %19585 = vmatpush3.bf16.msra.mxu1 %v23355_v19 }
 0xbf1   :  { %19592 = vmatprep.subr.bf16.mxu1 %v23356_v47 }
 0xbf3   :  { %16971 = vmatmul.mubr.bf16.vlgmr.msra.gmra.mrb[16].mxu1 %v16671_v51 }
 0xbf4   :  { %19593 = vmatpush3.bf16.msra.mxu1 %v23357_v2 }
 0xbf5   :  { %19594 = vmatprep.subr.bf16.mxu1 %v23358_v15 }
 0xbf8   :  { %19595 = vmatpush3.bf16.msra.mxu1 %v23359_v12 }
 0xbf9   :  { %19596 = vmatprep.subr.bf16.mxu1 %v23360_v34  ;;  %v19561_v34 = vld [vmem:[#allocation16] ss:$0 sm:$0xff] }
 0xbfc   :  { %19597 = vmatpush3.bf16.msra.mxu1 %v23361_v30 }
 0xbfd   :  { %19598 = vmatprep.subr.bf16.mxu1 %v23362_v45 }
 0xc00   :  { %19599 = vmatpush3.bf16.msra.mxu1 %v23363_v23 }
 0xc01   :  { %19600 = vmatprep.subr.bf16.mxu1 %v23364_v13 }
 0xc04   :  { %19601 = vmatpush3.bf16.msra.mxu1 %v23365_v25 }
 0xc05   :  { %19602 = vmatprep.subr.bf16.mxu1 %v23366_v26 }
 0xc08   :  { %19603 = vmatpush3.bf16.msra.mxu1 %v23367_v17 }
 0xc09   :  { %19604 = vmatprep.subr.bf16.mxu1 %v23368_v27 }
 0xc0c   :  { %19605 = vmatpush3.bf16.msra.mxu1 %v23369_v60 }
 0xc0d   :  { %19606 = vmatprep.subr.bf16.mxu1 %v23370_v5 }
 0xc10   :  { %19607 = vmatpush3.bf16.msra.mxu1 %v23371_v33 }
 0xc11   :  { %19632 = vmatprep.subr.bf16.mxu1 %v23637_v38 }
 0xca6   :  { %v16660_v9 = vpop.f32.mrb[12].mxu1 }
 0xca7   :  { %v19684_v43 = vadd.f32 %v16660_v9, %v14648_v29  ;;  %v16662_v44 = vpop.f32.mrb[13].mxu1 }
 0xca8   :  { %v19685_v46 = vadd.f32 %v16662_v44, %v14652_v36  ;;  %v16664_v31 = vpop.f32.mrb[14].mxu1 }
 0xca9   :  { %v16669_v41 = vmax.f32 %v19684_v43, 0.0  ;;  %v16665_v21 = vpop.f32.mrb[15].mxu1 }
 0xcaa   :  { %v16670_v0 = vmax.f32 %v19685_v46, 0.0 }
 0xcab   :  { %v16673_v52 = vpack.c.bf16 %v16669_v41, %v16669_v41 }
 0xcac   :  { %v16674_v50 = vpack.c.bf16 %v16670_v0, %v16670_v0 }
 0xcae   :  { %17010 = vmatprep.mubr.bf16.mxu1 %v16674_v50 }
 0xcaf   :  { %17011 = vmatmul.mubr.bf16.vlgmr.msra.gmra.mrb[20].mxu1 %v16673_v52 }
 0xcb0   :  { %19633 = vmatpush3.bf16.msra.mxu1 %v23372_v1  ;;  %19648 = vmatprep.mubr.msk.bf16.mxu1 %vm23638_vm0, %v23637_v38 }
 0xcb1   :  { %19634 = vmatprep.subr.bf16.mxu1 %v23637_v38 }
 0xcb4   :  { %19635 = vmatpush3.bf16.msra.mxu1 %v23373_v3 }
 0xcb5   :  { %19636 = vmatprep.subr.bf16.mxu1 %v23637_v38 }
 0xcb8   :  { %19637 = vmatpush3.bf16.msra.mxu1 %v23374_v6 }
 0xcb9   :  { %19638 = vmatprep.subr.bf16.mxu1 %v23637_v38 }
 0xcbc   :  { %19639 = vmatpush3.bf16.msra.mxu1 %v23375_v56 }
 0xcbd   :  { %19640 = vmatprep.subr.bf16.mxu1 %v23637_v38 }
 0xcc0   :  { %19641 = vmatpush3.bf16.msra.mxu1 %v23376_v22 }
 0xcc1   :  { %19642 = vmatprep.subr.bf16.mxu1 %v23637_v38 }
 0xcc4   :  { %19643 = vmatpush3.bf16.msra.mxu1 %v23377_v20 }
 0xcc5   :  { %19644 = vmatprep.subr.bf16.mxu1 %v23637_v38 }
 0xcc6   :  { %v19586_v11 = vpop.f32.mrb[16].mxu1 }
 0xcc7   :  { %v19587_v39 = vpop.f32.mrb[17].mxu1 }
 0xcc8   :  { %v19588_v53 = vadd.f32 %v19587_v39, %v19586_v11  ;;  %v19589_v18 = vpop.f32.mrb[18].mxu1  ;;  %19645 = vmatpush3.bf16.msra.mxu1 %v23378_v40 }
 0xcc9   :  { %v19590_v24 = vpop.f32.mrb[19].mxu1  ;;  %19646 = vmatprep.subr.bf16.mxu1 %v23637_v38 }
 0xcca   :  { %v16973_v35 = vadd.f32 %v19588_v53, %v19519_v58 }
 0xccc   :  { %19647 = vmatpush3.bf16.msra.mxu1 %v23379_v54 }
 0xccd   :  { %19652 = vmatprep.subr.bf16.mxu1 %v23637_v38 }
 0xd82   :  { %v19608_v59 = vpop.f32.mrb[20].mxu1 }
 0xd83   :  { %v19609_v37 = vpop.f32.mrb[21].mxu1 }
 0xd84   :  { %v19610_v57 = vadd.f32 %v19609_v37, %v19608_v59  ;;  %v19611_v16 = vpop.f32.mrb[22].mxu1 }
 0xd85   :  { %v19612_v32 = vpop.f32.mrb[23].mxu1 }
 0xd86   :  { %v17013_v62 = vadd.f32 %v19610_v57, %v16973_v35 }
 0xd88   :  { %v17018_v28 = vmax.f32 %v17013_v62, 0.0 }
 0xd8a   :  { %v17019_v10 = vpack.c.bf16 %v17018_v28, %v17018_v28 }
 0xd8c   :  { %19649 = vmatmul.mubr.bf16.vlgmr.msra.gmra.mrb[24].mxu1 %v17019_v10 }
 0xd8d   :  { %19653 = vmatpush3.bf16.msra.mxu1 %v23380_v7  ;;  %19668 = vmatprep.mubr.msk.bf16.mxu1 %vm23638_vm0, %v23637_v38 }
 0xd8e   :  { %19654 = vmatprep.subr.bf16.mxu1 %v23637_v38 }
 0xd91   :  { %19655 = vmatpush3.bf16.msra.mxu1 %v23381_v8 }
 0xd92   :  { %19656 = vmatprep.subr.bf16.mxu1 %v23637_v38 }
 0xd95   :  { %19657 = vmatpush3.bf16.msra.mxu1 %v23382_v49 }
 0xd96   :  { %19658 = vmatprep.subr.bf16.mxu1 %v23637_v38 }
 0xd99   :  { %19659 = vmatpush3.bf16.msra.mxu1 %v23383_v63 }
 0xd9a   :  { %19660 = vmatprep.subr.bf16.mxu1 %v23637_v38 }
 0xd9d   :  { %19661 = vmatpush3.bf16.msra.mxu1 %v23384_v55 }
 0xd9e   :  { %19662 = vmatprep.subr.bf16.mxu1 %v23637_v38 }
 0xda1   :  { %19663 = vmatpush3.bf16.msra.mxu1 %v23385_v48 }
 0xda2   :  { %19664 = vmatprep.subr.bf16.mxu1 %v23637_v38 }
 0xda5   :  { %19665 = vmatpush3.bf16.msra.mxu1 %v23386_v4 }
 0xda6   :  { %19666 = vmatprep.subr.bf16.mxu1 %v23637_v38 }
 0xda9   :  { %19667 = vmatpush3.bf16.msra.mxu1 %v23387_v14 }
 0xe5f   :  { %v17125_v19 = vpop.f32.mrb[24].mxu1 }
 0xe60   :  { %v17126_v61 = vadd.f32 %v19552_v42, %v17125_v19  ;;  %v19650_v47 = vpop.f32.mrb[25].mxu1 }
 0xe61   :  { %v17128_v2 = vpop.f32.mrb[26].mxu1 }
 0xe62   :  { %v17131_v51 = vmax.f32 %v17126_v61, 0.0  ;;  %v19651_v15 = vpop.f32.mrb[27].mxu1 }
 0xe64   :  { %v17132_v12 = vpack.c.bf16 %v17131_v51, %v17131_v51 }
 0xe66   :  { %19669 = vmatmul.mubr.bf16.vlgmr.msra.gmra.mrb[28].mxu1 %v17132_v12 }
 0xf39   :  { %v17238_v30 = vpop.f32.mrb[28].mxu1 }
 0xf3a   :  { %v17239_v45 = vadd.f32 %v19561_v34, %v17238_v30  ;;  %v19670_v23 = vpop.f32.mrb[29].mxu1 }
 0xf3b   :  { %v17241_v13 = vpop.f32.mrb[30].mxu1 }
 0xf3c   :  { %17244 = vst [vmem:[%s24236_s11] sm:$0xff] %v17239_v45  ;;  %v19671_v25 = vpop.f32.mrb[31].mxu1 }
 0xf3d   :  { %17249 = vsyncpa [#allocation3], 1 }
 0xf3e   :  { %17250 = vsyncpa [#allocation5], 1 }
 0xf3f   :  { %17251 = vsyncpa [#allocation8], 1 }
 0xf40   :  { %17252 = vsyncpa [#allocation11], 1 }
 0xf41   :  { %17253 = vsyncpa [#allocation14], 1 }
 0xf42   :  { %17254 = vsyncpa [#allocation17], 1 }

</bundles_post_ra>
